<compile_context>
chip_gen: v5e
topology: v5e:2x2
jax: 0.10.0
libtpu: 0.0.40
codegen_flags: <defaults>
</compile_context>

<pallas_src>
import functools

import jax
import jax.numpy as jnp
import numpy as np
from jax import lax
from jax.experimental import pallas as pl
from jax.experimental.pallas import tpu as pltpu

EPS = 1e-5  # nn.BatchNorm2d default


# ---------------------------------------------------------------------------
# Kernel 1: fused [optional BN+ReLU on the input] -> in-VMEM reflect pad ->
#           3x3 conv (+bias) -> per-(batch, h-tile) channel sum / sum-of-squares.
# ---------------------------------------------------------------------------
def _make_conv_kernel(*, H, W, Cin, Cout, Ht, nH, apply_input_act, mm_dtype,
                      use_im2col):
    HtW = Ht * W

    def kernel(xm_ref, xt_ref, xb_ref, insc_ref, insh_ref, w_ref, b_ref,
               y_ref, st_ref, *scratch):
        # xm_ref:  (Ht, W, Cin)   this h-tile's rows
        # xt_ref:  (8,  W, Cin)   8-row block containing the top halo row
        # xb_ref:  (8,  W, Cin)   8-row block containing the bottom halo row
        # insc/insh: (1, Cin)     fused BN scale/shift of the *previous* layer
        # w_ref:   (9*Cin, Cout) (im2col) or (9, Cin, Cout) (tap path), mm_dtype
        # b_ref:   (1, Cout) f32
        # y_ref:   (Ht*W, Cout)   pre-BN conv output tile
        # st_ref:  (2, Cout)      per-(batch, h-tile) [sum, sum_sq]
        xp_ref = scratch[0]                       # (Ht+2, W+2, Cin), mm_dtype
        cols_ref = scratch[1] if use_im2col else None
        h = pl.program_id(1)
        insc = insc_ref[...]                      # broadcasts as (1, 1, Cin)
        insh = insh_ref[...]

        def prep(rows):                           # rows: (r, W, Cin), input dtype
            r = rows.astype(jnp.float32)
            if apply_input_act:                   # previous layer's BN + ReLU
                r = jnp.maximum(r * insc + insh, 0.0)
            # reflect pad along W inside the value -> the scratch store below is
            # full-width and aligned (no 1-sublane-offset interior store).
            r = jnp.concatenate([r[:, 1:2, :], r, r[:, W - 2:W - 1, :]], axis=1)
            return r.astype(mm_dtype)             # cast ONCE into the MXU dtype

        # ---- assemble the reflect-padded (Ht+2, W+2, Cin) tile in VMEM ----
        xp_ref[1:Ht + 1] = prep(xm_ref[...])      # leading-dim offset: free
        top_local = jnp.where(h == 0, 1, 7)       # reflect row 1 at the image top
        bot_local = jnp.where(h == nH - 1, (H - 2) % 8, 0)   # reflect row H-2
        xp_ref[0:1] = prep(xt_ref[pl.ds(top_local, 1)])
        xp_ref[Ht + 1:Ht + 2] = prep(xb_ref[pl.ds(bot_local, 1)])

        # ---- 3x3 conv on the MXU ----
        if use_im2col:
            # small Cin: pack all 9 taps into the contraction dim -> ONE matmul
            for dy in range(3):
                for dx in range(3):
                    t = dy * 3 + dx
                    cols_ref[:, t * Cin:(t + 1) * Cin] = (
                        xp_ref[dy:dy + Ht, dx:dx + W, :].reshape(HtW, Cin))
            acc = jnp.dot(cols_ref[...], w_ref[...],
                          preferred_element_type=jnp.float32)
        else:
            # large Cin: shift-and-accumulate, 9 (HtW,Cin)x(Cin,Cout) matmuls
            acc = jnp.zeros((HtW, Cout), jnp.float32)
            for dy in range(3):
                for dx in range(3):
                    acc = acc + jnp.dot(
                        xp_ref[dy:dy + Ht, dx:dx + W, :].reshape(HtW, Cin),
                        w_ref[dy * 3 + dx],
                        preferred_element_type=jnp.float32)
        acc = acc + b_ref[...]                    # (HtW, Cout), f32

        # partial BatchNorm stats from the f32 accumulator (one store)
        st_ref[...] = jnp.concatenate(
            [jnp.sum(acc, axis=0, keepdims=True),
             jnp.sum(acc * acc, axis=0, keepdims=True)], axis=0)

        # single slab store of the pre-BN activation (bf16 on the default path)
        y_ref[...] = acc.astype(y_ref.dtype)

    return kernel


def _pick_ht(H, W, Cin, Cout, in_bytes, mm_bytes, out_bytes, use_im2col,
             budget_bytes):
    """Largest H tile (multiple of 8 dividing H) whose per-step footprint fits."""
    best = 8
    for ht in range(8, H + 1, 8):
        if H % ht:
            continue
        per = (2 * ht * W * Cin * in_bytes            # main input, double-buffered
               + 4 * 8 * W * Cin * in_bytes           # two 8-row halos, double-buf
               + (ht + 2) * (W + 2) * Cin * mm_bytes  # padded scratch
               + 2 * ht * W * Cout * out_bytes        # output, double-buffered
               + 9 * Cin * Cout * mm_bytes            # weights (Buffered(1))
               + 4 * Cout * 4)
        if use_im2col:
            per += ht * W * 9 * Cin * mm_bytes        # im2col scratch
        if per <= budget_bytes:
            best = ht
    return best


def conv3x3_reflect_bn(x_nhwc, w_arr, bias, insc, insh, *, apply_input_act,
                       mm_dtype, y_dtype, vmem_budget_bytes=16 * 1024 * 1024):
    """x_nhwc: (N,H,W,Cin) -> (y (N,H*W,Cout) pre-BN, stats (N,nH,2,Cout))."""
    N, H, W, Cin = x_nhwc.shape
    Cout = w_arr.shape[-1]
    use_im2col = (w_arr.ndim == 2)
    assert H % 8 == 0 and H >= 8 and W >= 2, "H-tiled halo path needs H % 8 == 0"

    Ht = _pick_ht(H, W, Cin, Cout, x_nhwc.dtype.itemsize,
                  np.dtype(mm_dtype).itemsize, np.dtype(y_dtype).itemsize,
                  use_im2col, vmem_budget_bytes)
    nH = H // Ht
    hB = Ht // 8

    kernel = _make_conv_kernel(H=H, W=W, Cin=Cin, Cout=Cout, Ht=Ht, nH=nH,
                               apply_input_act=apply_input_act,
                               mm_dtype=mm_dtype, use_im2col=use_im2col)

    scratch = [pltpu.VMEM((Ht + 2, W + 2, Cin), mm_dtype)]
    if use_im2col:
        scratch.append(pltpu.VMEM((Ht * W, 9 * Cin), mm_dtype))
        w_spec = pl.BlockSpec((9 * Cin, Cout), lambda n, h: (0, 0),
                              pipeline_mode=pl.Buffered(1))
    else:
        w_spec = pl.BlockSpec((9, Cin, Cout), lambda n, h: (0, 0, 0),
                              pipeline_mode=pl.Buffered(1))

    y, stats = pl.pallas_call(
        kernel,
        out_shape=(jax.ShapeDtypeStruct((N, H * W, Cout), y_dtype),
                   jax.ShapeDtypeStruct((N, nH, 2, Cout), jnp.float32)),
        grid=(N, nH),
        in_specs=[
            # this h-tile's rows
            pl.BlockSpec((None, Ht, W, Cin), lambda n, h: (n, h, 0, 0)),
            # 8-row block holding the top halo row (h*Ht-1, or reflect row 1)
            pl.BlockSpec((None, 8, W, Cin),
                         lambda n, h: (n, jnp.where(h == 0, 0, h * hB - 1), 0, 0)),
            # 8-row block holding the bottom halo row ((h+1)*Ht, or reflect H-2)
            pl.BlockSpec((None, 8, W, Cin),
                         lambda n, h: (n, jnp.where(h == nH - 1, H // 8 - 1,
                                                    (h + 1) * hB), 0, 0)),
            # grid-invariant operands: single-buffered
            pl.BlockSpec((1, Cin), lambda n, h: (0, 0),
                         pipeline_mode=pl.Buffered(1)),
            pl.BlockSpec((1, Cin), lambda n, h: (0, 0),
                         pipeline_mode=pl.Buffered(1)),
            w_spec,
            pl.BlockSpec((1, Cout), lambda n, h: (0, 0),
                         pipeline_mode=pl.Buffered(1)),
        ],
        out_specs=(
            pl.BlockSpec((None, Ht * W, Cout), lambda n, h: (n, h, 0)),
            pl.BlockSpec((None, None, 2, Cout), lambda n, h: (n, h, 0, 0)),
        ),
        scratch_shapes=scratch,
        compiler_params=pltpu.CompilerParams(
            dimension_semantics=("parallel", "parallel"),
            vmem_limit_bytes=48 * 1024 * 1024),
    )(x_nhwc, x_nhwc, x_nhwc, insc, insh, w_arr, bias)
    return y, stats


# ---------------------------------------------------------------------------
# Kernel 2: standalone BN-apply + ReLU for the final layer (lane-dense 2D view,
#           VMEM-budgeted row tile).
# ---------------------------------------------------------------------------
def _bn_relu_kernel(y_ref, sc_ref, sh_ref, o_ref):
    o_ref[...] = jnp.maximum(
        y_ref[...].astype(jnp.float32) * sc_ref[...] + sh_ref[...], 0.0)


def _pick_row_tile(rows, lanes, in_bytes, budget_bytes):
    best = None
    for tr in range(8, rows + 1, 8):
        if rows % tr:
            continue
        if tr * lanes * (2 * in_bytes + 2 * 4) + 2 * lanes * 4 <= budget_bytes:
            best = tr
    return best if best is not None else rows


def bn_relu(y_nhwc, scale, shift, *, vmem_budget_bytes=8 * 1024 * 1024):
    N, H, W, C = y_nhwc.shape
    rows, lanes = N * H, W * C
    y2 = y_nhwc.reshape(rows, lanes)              # lane-dense view, same HBM bytes
    sc = jnp.tile(scale, W)[None, :]
    sh = jnp.tile(shift, W)[None, :]
    tr = _pick_row_tile(rows, lanes, y2.dtype.itemsize, vmem_budget_bytes)
    out = pl.pallas_call(
        _bn_relu_kernel,
        out_shape=jax.ShapeDtypeStruct((rows, lanes), jnp.float32),
        grid=(rows // tr,),
        in_specs=[
            pl.BlockSpec((tr, lanes), lambda i: (i, 0)),
            pl.BlockSpec((1, lanes), lambda i: (0, 0),
                         pipeline_mode=pl.Buffered(1)),
            pl.BlockSpec((1, lanes), lambda i: (0, 0),
                         pipeline_mode=pl.Buffered(1)),
        ],
        out_specs=pl.BlockSpec((tr, lanes), lambda i: (i, 0)),
        compiler_params=pltpu.CompilerParams(
            dimension_semantics=("parallel",),
            vmem_limit_bytes=48 * 1024 * 1024),
    )(y2, sc, sh)
    return out.reshape(N, H, W, C)


# ---------------------------------------------------------------------------
# Wrappers
# ---------------------------------------------------------------------------
def _bn_scale_shift(stats, gamma, beta, count):
    tot = jnp.sum(stats, axis=(0, 1))                       # (2, Cout)
    mean = tot[0] / count
    var = jnp.maximum(tot[1] / count - mean * mean, 0.0)    # biased (PyTorch BN)
    scale = gamma * lax.rsqrt(var + EPS)
    shift = beta - mean * scale
    return scale, shift


def double_conv(x_nchw, params, *, matmul_dtype=jnp.bfloat16,
                conv_vmem_budget_bytes=16 * 1024 * 1024):
    """params: list of (conv_weight OIHW, conv_bias, bn_gamma, bn_beta)."""
    x = jnp.transpose(jnp.asarray(x_nchw, jnp.float32), (0, 2, 3, 1))   # -> NHWC
    N, H, W, cin = x.shape
    assert H % 8 == 0 and H >= 8 and W >= 2, "kernel assumes H % 8 == 0"
    count = float(N * H * W)
    act_dtype = jnp.bfloat16 if matmul_dtype == jnp.bfloat16 else jnp.float32

    cur = x
    scale = shift = None
    for li, (w, b, gamma, beta) in enumerate(params):
        w = jnp.asarray(w, jnp.float32)
        cout = int(w.shape[0])
        use_im2col = cin <= 64                     # fold taps into K when Cin small
        w_taps = jnp.transpose(w, (2, 3, 1, 0))    # (3,3,Cin,Cout), tap-major
        if use_im2col:
            w_arr = w_taps.reshape(9 * cin, cout).astype(matmul_dtype)
        else:
            w_arr = w_taps.reshape(9, cin, cout).astype(matmul_dtype)
        bias = jnp.asarray(b, jnp.float32)[None, :]
        if li == 0:
            insc = jnp.ones((1, cin), jnp.float32)
            insh = jnp.zeros((1, cin), jnp.float32)
        else:
            insc, insh = scale[None, :], shift[None, :]

        y_flat, stats = conv3x3_reflect_bn(
            cur, w_arr, bias, insc, insh, apply_input_act=(li > 0),
            mm_dtype=matmul_dtype, y_dtype=act_dtype,
            vmem_budget_bytes=conv_vmem_budget_bytes)
        scale, shift = _bn_scale_shift(stats, jnp.asarray(gamma, jnp.float32),
                                       jnp.asarray(beta, jnp.float32), count)
        cur = y_flat.reshape(N, H, W, cout)        # free view of the same bytes
        cin = cout

    out = bn_relu(cur, scale, shift)               # final BN + ReLU (f32 out)
    return jnp.transpose(out, (0, 3, 1, 2))        # NHWC -> NCHW


# ---------------------------------------------------------------------------
# Pure-JAX reference (for correctness check)
# ---------------------------------------------------------------------------
def ref_double_conv(x_nchw, params):
    x = x_nchw
    for (w, b, gamma, beta) in params:
        xp = jnp.pad(x, ((0, 0), (0, 0), (1, 1), (1, 1)), mode="reflect")
        y = lax.conv_general_dilated(
            xp, w, window_strides=(1, 1), padding="VALID",
            dimension_numbers=("NCHW", "OIHW", "NCHW"),
        ) + b[None, :, None, None]
        mean = y.mean(axis=(0, 2, 3), keepdims=True)
        var = y.var(axis=(0, 2, 3), keepdims=True)      # biased
        y = (y - mean) / jnp.sqrt(var + EPS)
        y = y * gamma[None, :, None, None] + beta[None, :, None, None]
        x = jnp.maximum(y, 0.0)
    return x


if __name__ == "__main__":
    key = jax.random.PRNGKey(0)
    N, Cin, H, W = 2, 4, 16, 16
    Cout = 8

    k1, k2, k3, k4, k5 = jax.random.split(key, 5)
    x = jax.random.normal(k1, (N, Cin, H, W), jnp.float32)
    w1 = jax.random.normal(k2, (Cout, Cin, 3, 3), jnp.float32) * 0.2
    b1 = jax.random.normal(k3, (Cout,), jnp.float32) * 0.1
    w2 = jax.random.normal(k4, (Cout, Cout, 3, 3), jnp.float32) * 0.2
    b2 = jax.random.normal(k5, (Cout,), jnp.float32) * 0.1
    g1 = jnp.ones((Cout,), jnp.float32)
    be1 = jnp.zeros((Cout,), jnp.float32)
    g2 = jnp.ones((Cout,), jnp.float32)
    be2 = jnp.zeros((Cout,), jnp.float32)
    params = [(w1, b1, g1, be1), (w2, b2, g2, be2)]

    ref = np.asarray(ref_double_conv(x, params))

    # 1) f32 MXU path, single h-tile per image: tight check of the kernel logic.
    out_f32 = jax.block_until_ready(
        jax.jit(functools.partial(double_conv, matmul_dtype=jnp.float32))(x, params))
    assert out_f32.shape == (N, Cout, H, W)
    np.testing.assert_allclose(np.asarray(out_f32), ref, rtol=2e-2, atol=2e-2)

    # 2) f32 path with the H-tiled halo grid forced (Ht=8 -> 2 h-tiles per image).
    out_tiled = jax.block_until_ready(
        jax.jit(functools.partial(double_conv, matmul_dtype=jnp.float32,
                                  conv_vmem_budget_bytes=1))(x, params))
    np.testing.assert_allclose(np.asarray(out_tiled), ref, rtol=2e-2, atol=2e-2)

    # 3) default path: bf16 MXU inputs + bf16 inter-layer activation (f32
    #    accumulation / f32 batch stats); loose tolerance for bf16 rounding.
    out_bf16 = jax.block_until_ready(jax.jit(double_conv)(x, params))
    assert out_bf16.shape == (N, Cout, H, W)
    np.testing.assert_allclose(np.asarray(out_bf16), ref, rtol=1e-1, atol=2.5e-1)

    print("KERNEL_OK")
</pallas_src>

<mosaic_0001>
module attributes {stable_mosaic.version = 11 : i64} {
  func.func @kernel(%arg0: i32, %arg1: i32, %arg2: memref<1x16x16x4xf32, #tpu.memory_space<vmem>>, %arg3: memref<1x8x16x4xf32, #tpu.memory_space<vmem>>, %arg4: memref<1x8x16x4xf32, #tpu.memory_space<vmem>>, %arg5: memref<1x4xf32, #tpu.memory_space<vmem>>, %arg6: memref<1x4xf32, #tpu.memory_space<vmem>>, %arg7: memref<36x8xf32, #tpu.memory_space<vmem>>, %arg8: memref<1x8xf32, #tpu.memory_space<vmem>>, %arg9: memref<1x256x8xf32, #tpu.memory_space<vmem>>, %arg10: memref<1x1x2x8xf32, #tpu.memory_space<vmem>>, %arg11: memref<18x18x4xf32, #tpu.memory_space<vmem>>, %arg12: memref<256x36xf32, #tpu.memory_space<vmem>>) attributes {dimension_semantics = [#tpu.dimension_semantics<parallel>, #tpu.dimension_semantics<parallel>], iteration_bounds = array<i64: 2, 1>, scalar_prefetch = 0 : i64, scratch_operands = 2 : i64, tpu.core_type = #tpu.core_type<tc>, window_params = [{transform_indices = @transform_0, window_bounds = array<i64: 1, 16, 16, 4>}, {transform_indices = @transform_1, window_bounds = array<i64: 1, 8, 16, 4>}, {transform_indices = @transform_2, window_bounds = array<i64: 1, 8, 16, 4>}, {pipeline_mode = #tpu.pipeline_mode<synchronous>, transform_indices = @transform_3, window_bounds = array<i64: 1, 4>}, {pipeline_mode = #tpu.pipeline_mode<synchronous>, transform_indices = @transform_4, window_bounds = array<i64: 1, 4>}, {pipeline_mode = #tpu.pipeline_mode<synchronous>, transform_indices = @transform_5, window_bounds = array<i64: 36, 8>}, {pipeline_mode = #tpu.pipeline_mode<synchronous>, transform_indices = @transform_6, window_bounds = array<i64: 1, 8>}, {transform_indices = @transform_7, window_bounds = array<i64: 1, 256, 8>}, {transform_indices = @transform_8, window_bounds = array<i64: 1, 1, 2, 8>}]} {
    %c0 = arith.constant 0 : index
    %c0_0 = arith.constant 0 : index
    %c0_1 = arith.constant 0 : index
    %c0_2 = arith.constant 0 : index
    %0 = vector.load %arg2[%c0, %c0_0, %c0_1, %c0_2] : memref<1x16x16x4xf32, #tpu.memory_space<vmem>>, vector<1x16x16x4xf32>
    %1 = vector.shape_cast %0 : vector<1x16x16x4xf32> to vector<16x16x4xf32>
    %2 = vector.extract_strided_slice %1 {offsets = [0, 1, 0], sizes = [16, 1, 4], strides = [1, 1, 1]} : vector<16x16x4xf32> to vector<16x1x4xf32>
    %3 = vector.extract_strided_slice %1 {offsets = [0, 14, 0], sizes = [16, 1, 4], strides = [1, 1, 1]} : vector<16x16x4xf32> to vector<16x1x4xf32>
    %4 = tpu.concatenate %2, %1, %3 in 1 : vector<16x1x4xf32>, vector<16x16x4xf32>, vector<16x1x4xf32> -> vector<16x18x4xf32>
    %c1 = arith.constant 1 : index
    %c0_3 = arith.constant 0 : index
    %c0_4 = arith.constant 0 : index
    %5 = vector.load %arg11[%c1, %c0_3, %c0_4] : memref<18x18x4xf32, #tpu.memory_space<vmem>>, vector<16x18x4xf32>
    tpu.vector_store %arg11[%c1, %c0_3, %c0_4], %4 {strides = array<i32>} : memref<18x18x4xf32, #tpu.memory_space<vmem>>, vector<16x18x4xf32>,
    %c0_i32 = arith.constant 0 : i32
    %6 = arith.cmpi eq, %arg1, %c0_i32 : i32
    %c1_i32 = arith.constant 1 : i32
    %c7_i32 = arith.constant 7 : i32
    %7 = arith.select %6, %c1_i32, %c7_i32 : i32
    %c0_i32_5 = arith.constant 0 : i32
    %8 = arith.cmpi eq, %arg1, %c0_i32_5 : i32
    %c6_i32 = arith.constant 6 : i32
    %c0_i32_6 = arith.constant 0 : i32
    %9 = arith.select %8, %c6_i32, %c0_i32_6 : i32
    %c0_7 = arith.constant 0 : index
    %10 = arith.index_cast %7 : i32 to index
    %c0_8 = arith.constant 0 : index
    %c0_9 = arith.constant 0 : index
    %11 = vector.load %arg3[%c0_7, %10, %c0_8, %c0_9] : memref<1x8x16x4xf32, #tpu.memory_space<vmem>>, vector<1x1x16x4xf32>
    %12 = vector.shape_cast %11 : vector<1x1x16x4xf32> to vector<1x16x4xf32>
    %13 = vector.extract_strided_slice %12 {offsets = [0, 1, 0], sizes = [1, 1, 4], strides = [1, 1, 1]} : vector<1x16x4xf32> to vector<1x1x4xf32>
    %14 = vector.extract_strided_slice %12 {offsets = [0, 14, 0], sizes = [1, 1, 4], strides = [1, 1, 1]} : vector<1x16x4xf32> to vector<1x1x4xf32>
    %15 = tpu.concatenate %13, %12, %14 in 1 : vector<1x1x4xf32>, vector<1x16x4xf32>, vector<1x1x4xf32> -> vector<1x18x4xf32>
    %c0_10 = arith.constant 0 : index
    %c0_11 = arith.constant 0 : index
    %c0_12 = arith.constant 0 : index
    %16 = vector.load %arg11[%c0_10, %c0_11, %c0_12] : memref<18x18x4xf32, #tpu.memory_space<vmem>>, vector<1x18x4xf32>
    tpu.vector_store %arg11[%c0_10, %c0_11, %c0_12], %15 {strides = array<i32>} : memref<18x18x4xf32, #tpu.memory_space<vmem>>, vector<1x18x4xf32>,
    %c0_13 = arith.constant 0 : index
    %17 = arith.index_cast %9 : i32 to index
    %c0_14 = arith.constant 0 : index
    %c0_15 = arith.constant 0 : index
    %18 = vector.load %arg4[%c0_13, %17, %c0_14, %c0_15] : memref<1x8x16x4xf32, #tpu.memory_space<vmem>>, vector<1x1x16x4xf32>
    %19 = vector.shape_cast %18 : vector<1x1x16x4xf32> to vector<1x16x4xf32>
    %20 = vector.extract_strided_slice %19 {offsets = [0, 1, 0], sizes = [1, 1, 4], strides = [1, 1, 1]} : vector<1x16x4xf32> to vector<1x1x4xf32>
    %21 = vector.extract_strided_slice %19 {offsets = [0, 14, 0], sizes = [1, 1, 4], strides = [1, 1, 1]} : vector<1x16x4xf32> to vector<1x1x4xf32>
    %22 = tpu.concatenate %20, %19, %21 in 1 : vector<1x1x4xf32>, vector<1x16x4xf32>, vector<1x1x4xf32> -> vector<1x18x4xf32>
    %c17 = arith.constant 17 : index
    %c0_16 = arith.constant 0 : index
    %c0_17 = arith.constant 0 : index
    %23 = vector.load %arg11[%c17, %c0_16, %c0_17] : memref<18x18x4xf32, #tpu.memory_space<vmem>>, vector<1x18x4xf32>
    tpu.vector_store %arg11[%c17, %c0_16, %c0_17], %22 {strides = array<i32>} : memref<18x18x4xf32, #tpu.memory_space<vmem>>, vector<1x18x4xf32>,
    %c0_18 = arith.constant 0 : index
    %c0_19 = arith.constant 0 : index
    %c0_20 = arith.constant 0 : index
    %24 = vector.load %arg11[%c0_18, %c0_19, %c0_20] : memref<18x18x4xf32, #tpu.memory_space<vmem>>, vector<16x16x4xf32>
    %25 = vector.shape_cast %24 : vector<16x16x4xf32> to vector<256x4xf32>
    %c0_21 = arith.constant 0 : index
    %c0_22 = arith.constant 0 : index
    %26 = vector.load %arg12[%c0_21, %c0_22] : memref<256x36xf32, #tpu.memory_space<vmem>>, vector<256x4xf32>
    tpu.vector_store %arg12[%c0_21, %c0_22], %25 {strides = array<i32>} : memref<256x36xf32, #tpu.memory_space<vmem>>, vector<256x4xf32>,
    %c0_23 = arith.constant 0 : index
    %c1_24 = arith.constant 1 : index
    %c0_25 = arith.constant 0 : index
    %27 = vector.load %arg11[%c0_23, %c1_24, %c0_25] : memref<18x18x4xf32, #tpu.memory_space<vmem>>, vector<16x16x4xf32>
    %28 = vector.shape_cast %27 : vector<16x16x4xf32> to vector<256x4xf32>
    %c0_26 = arith.constant 0 : index
    %c4 = arith.constant 4 : index
    %29 = vector.load %arg12[%c0_26, %c4] : memref<256x36xf32, #tpu.memory_space<vmem>>, vector<256x4xf32>
    tpu.vector_store %arg12[%c0_26, %c4], %28 {strides = array<i32>} : memref<256x36xf32, #tpu.memory_space<vmem>>, vector<256x4xf32>,
    %c0_27 = arith.constant 0 : index
    %c2 = arith.constant 2 : index
    %c0_28 = arith.constant 0 : index
    %30 = vector.load %arg11[%c0_27, %c2, %c0_28] : memref<18x18x4xf32, #tpu.memory_space<vmem>>, vector<16x16x4xf32>
    %31 = vector.shape_cast %30 : vector<16x16x4xf32> to vector<256x4xf32>
    %c0_29 = arith.constant 0 : index
    %c8 = arith.constant 8 : index
    %32 = vector.load %arg12[%c0_29, %c8] : memref<256x36xf32, #tpu.memory_space<vmem>>, vector<256x4xf32>
    tpu.vector_store %arg12[%c0_29, %c8], %31 {strides = array<i32>} : memref<256x36xf32, #tpu.memory_space<vmem>>, vector<256x4xf32>,
    %c1_30 = arith.constant 1 : index
    %c0_31 = arith.constant 0 : index
    %c0_32 = arith.constant 0 : index
    %33 = vector.load %arg11[%c1_30, %c0_31, %c0_32] : memref<18x18x4xf32, #tpu.memory_space<vmem>>, vector<16x16x4xf32>
    %34 = vector.shape_cast %33 : vector<16x16x4xf32> to vector<256x4xf32>
    %c0_33 = arith.constant 0 : index
    %c12 = arith.constant 12 : index
    %35 = vector.load %arg12[%c0_33, %c12] : memref<256x36xf32, #tpu.memory_space<vmem>>, vector<256x4xf32>
    tpu.vector_store %arg12[%c0_33, %c12], %34 {strides = array<i32>} : memref<256x36xf32, #tpu.memory_space<vmem>>, vector<256x4xf32>,
    %c1_34 = arith.constant 1 : index
    %c1_35 = arith.constant 1 : index
    %c0_36 = arith.constant 0 : index
    %36 = vector.load %arg11[%c1_34, %c1_35, %c0_36] : memref<18x18x4xf32, #tpu.memory_space<vmem>>, vector<16x16x4xf32>
    %37 = vector.shape_cast %36 : vector<16x16x4xf32> to vector<256x4xf32>
    %c0_37 = arith.constant 0 : index
    %c16 = arith.constant 16 : index
    %38 = vector.load %arg12[%c0_37, %c16] : memref<256x36xf32, #tpu.memory_space<vmem>>, vector<256x4xf32>
    tpu.vector_store %arg12[%c0_37, %c16], %37 {strides = array<i32>} : memref<256x36xf32, #tpu.memory_space<vmem>>, vector<256x4xf32>,
    %c1_38 = arith.constant 1 : index
    %c2_39 = arith.constant 2 : index
    %c0_40 = arith.constant 0 : index
    %39 = vector.load %arg11[%c1_38, %c2_39, %c0_40] : memref<18x18x4xf32, #tpu.memory_space<vmem>>, vector<16x16x4xf32>
    %40 = vector.shape_cast %39 : vector<16x16x4xf32> to vector<256x4xf32>
    %c0_41 = arith.constant 0 : index
    %c20 = arith.constant 20 : index
    %41 = vector.load %arg12[%c0_41, %c20] : memref<256x36xf32, #tpu.memory_space<vmem>>, vector<256x4xf32>
    tpu.vector_store %arg12[%c0_41, %c20], %40 {strides = array<i32>} : memref<256x36xf32, #tpu.memory_space<vmem>>, vector<256x4xf32>,
    %c2_42 = arith.constant 2 : index
    %c0_43 = arith.constant 0 : index
    %c0_44 = arith.constant 0 : index
    %42 = vector.load %arg11[%c2_42, %c0_43, %c0_44] : memref<18x18x4xf32, #tpu.memory_space<vmem>>, vector<16x16x4xf32>
    %43 = vector.shape_cast %42 : vector<16x16x4xf32> to vector<256x4xf32>
    %c0_45 = arith.constant 0 : index
    %c24 = arith.constant 24 : index
    %44 = vector.load %arg12[%c0_45, %c24] : memref<256x36xf32, #tpu.memory_space<vmem>>, vector<256x4xf32>
    tpu.vector_store %arg12[%c0_45, %c24], %43 {strides = array<i32>} : memref<256x36xf32, #tpu.memory_space<vmem>>, vector<256x4xf32>,
    %c2_46 = arith.constant 2 : index
    %c1_47 = arith.constant 1 : index
    %c0_48 = arith.constant 0 : index
    %45 = vector.load %arg11[%c2_46, %c1_47, %c0_48] : memref<18x18x4xf32, #tpu.memory_space<vmem>>, vector<16x16x4xf32>
    %46 = vector.shape_cast %45 : vector<16x16x4xf32> to vector<256x4xf32>
    %c0_49 = arith.constant 0 : index
    %c28 = arith.constant 28 : index
    %47 = vector.load %arg12[%c0_49, %c28] : memref<256x36xf32, #tpu.memory_space<vmem>>, vector<256x4xf32>
    tpu.vector_store %arg12[%c0_49, %c28], %46 {strides = array<i32>} : memref<256x36xf32, #tpu.memory_space<vmem>>, vector<256x4xf32>,
    %c2_50 = arith.constant 2 : index
    %c2_51 = arith.constant 2 : index
    %c0_52 = arith.constant 0 : index
    %48 = vector.load %arg11[%c2_50, %c2_51, %c0_52] : memref<18x18x4xf32, #tpu.memory_space<vmem>>, vector<16x16x4xf32>
    %49 = vector.shape_cast %48 : vector<16x16x4xf32> to vector<256x4xf32>
    %c0_53 = arith.constant 0 : index
    %c32 = arith.constant 32 : index
    %50 = vector.load %arg12[%c0_53, %c32] : memref<256x36xf32, #tpu.memory_space<vmem>>, vector<256x4xf32>
    tpu.vector_store %arg12[%c0_53, %c32], %49 {strides = array<i32>} : memref<256x36xf32, #tpu.memory_space<vmem>>, vector<256x4xf32>,
    %c0_54 = arith.constant 0 : index
    %c0_55 = arith.constant 0 : index
    %51 = vector.load %arg12[%c0_54, %c0_55] : memref<256x36xf32, #tpu.memory_space<vmem>>, vector<256x36xf32>
    %c0_56 = arith.constant 0 : index
    %c0_57 = arith.constant 0 : index
    %52 = vector.load %arg7[%c0_56, %c0_57] : memref<36x8xf32, #tpu.memory_space<vmem>>, vector<36x8xf32>
    %cst = arith.constant dense<0.000000e+00> : vector<256x8xf32>
    %53 = tpu.matmul %51, %52, %cst {dimension_numbers = #tpu.dot_dimension_numbers<[1], [0], [0], [1], [0, 0, 1, 1], [], []>} : vector<256x36xf32>, vector<36x8xf32>, vector<256x8xf32> -> vector<256x8xf32>
    %c0_58 = arith.constant 0 : index
    %c0_59 = arith.constant 0 : index
    %54 = vector.load %arg8[%c0_58, %c0_59] : memref<1x8xf32, #tpu.memory_space<vmem>>, vector<1x8xf32>
    %55 = vector.broadcast %54 : vector<1x8xf32> to vector<256x8xf32>
    %56 = arith.addf %53, %55 : vector<256x8xf32>
    %cst_60 = arith.constant dense<0.000000e+00> : vector<8xf32>
    %57 = vector.multi_reduction <add>, %56, %cst_60 [0] : vector<256x8xf32> to vector<8xf32>
    %58 = vector.shape_cast %57 : vector<8xf32> to vector<1x8xf32>
    %59 = arith.mulf %56, %56 : vector<256x8xf32>
    %cst_61 = arith.constant dense<0.000000e+00> : vector<8xf32>
    %60 = vector.multi_reduction <add>, %59, %cst_61 [0] : vector<256x8xf32> to vector<8xf32>
    %61 = vector.shape_cast %60 : vector<8xf32> to vector<1x8xf32>
    %62 = tpu.concatenate %58, %61 in 0 : vector<1x8xf32>, vector<1x8xf32> -> vector<2x8xf32>
    %c0_62 = arith.constant 0 : index
    %c0_63 = arith.constant 0 : index
    %c0_64 = arith.constant 0 : index
    %c0_65 = arith.constant 0 : index
    %63 = vector.load %arg10[%c0_62, %c0_63, %c0_64, %c0_65] : memref<1x1x2x8xf32, #tpu.memory_space<vmem>>, vector<1x1x2x8xf32>
    %64 = vector.shape_cast %63 : vector<1x1x2x8xf32> to vector<2x8xf32>
    %65 = vector.shape_cast %62 : vector<2x8xf32> to vector<1x1x2x8xf32>
    tpu.vector_store %arg10[%c0_62, %c0_63, %c0_64, %c0_65], %65 {strides = array<i32>} : memref<1x1x2x8xf32, #tpu.memory_space<vmem>>, vector<1x1x2x8xf32>,
    %c0_66 = arith.constant 0 : index
    %c0_67 = arith.constant 0 : index
    %c0_68 = arith.constant 0 : index
    %66 = vector.load %arg9[%c0_66, %c0_67, %c0_68] : memref<1x256x8xf32, #tpu.memory_space<vmem>>, vector<1x256x8xf32>
    %67 = vector.shape_cast %66 : vector<1x256x8xf32> to vector<256x8xf32>
    %68 = vector.shape_cast %56 : vector<256x8xf32> to vector<1x256x8xf32>
    tpu.vector_store %arg9[%c0_66, %c0_67, %c0_68], %68 {strides = array<i32>} : memref<1x256x8xf32, #tpu.memory_space<vmem>>, vector<1x256x8xf32>,
    return
  }
  func.func @transform_0(%arg0: i32, %arg1: i32) -> (i32, i32, i32, i32) {
    %c0_i32 = arith.constant 0 : i32
    %c0_i32_0 = arith.constant 0 : i32
    %c0_i32_1 = arith.constant 0 : i32
    return %arg0, %arg1, %c0_i32, %c0_i32_0 : i32, i32, i32, i32
  }
  func.func @transform_1(%arg0: i32, %arg1: i32) -> (i32, i32, i32, i32) {
    %c0_i32 = arith.constant 0 : i32
    %0 = arith.cmpi eq, %arg1, %c0_i32 : i32
    %c2_i32 = arith.constant 2 : i32
    %1 = arith.muli %arg1, %c2_i32 : i32
    %c1_i32 = arith.constant 1 : i32
    %2 = arith.subi %1, %c1_i32 : i32
    %c0_i32_0 = arith.constant 0 : i32
    %3 = arith.select %0, %c0_i32_0, %2 : i32
    %c0_i32_1 = arith.constant 0 : i32
    %c0_i32_2 = arith.constant 0 : i32
    %c0_i32_3 = arith.constant 0 : i32
    return %arg0, %3, %c0_i32_1, %c0_i32_2 : i32, i32, i32, i32
  }
  func.func @transform_2(%arg0: i32, %arg1: i32) -> (i32, i32, i32, i32) {
    %c0_i32 = arith.constant 0 : i32
    %0 = arith.cmpi eq, %arg1, %c0_i32 : i32
    %c1_i32 = arith.constant 1 : i32
    %1 = arith.addi %arg1, %c1_i32 : i32
    %c2_i32 = arith.constant 2 : i32
    %2 = arith.muli %1, %c2_i32 : i32
    %c1_i32_0 = arith.constant 1 : i32
    %3 = arith.select %0, %c1_i32_0, %2 : i32
    %c0_i32_1 = arith.constant 0 : i32
    %c0_i32_2 = arith.constant 0 : i32
    %c0_i32_3 = arith.constant 0 : i32
    return %arg0, %3, %c0_i32_1, %c0_i32_2 : i32, i32, i32, i32
  }
  func.func @transform_3(%arg0: i32, %arg1: i32) -> (i32, i32) {
    %c0_i32 = arith.constant 0 : i32
    %c0_i32_0 = arith.constant 0 : i32
    %c0_i32_1 = arith.constant 0 : i32
    return %c0_i32, %c0_i32_0 : i32, i32
  }
  func.func @transform_4(%arg0: i32, %arg1: i32) -> (i32, i32) {
    %c0_i32 = arith.constant 0 : i32
    %c0_i32_0 = arith.constant 0 : i32
    %c0_i32_1 = arith.constant 0 : i32
    return %c0_i32, %c0_i32_0 : i32, i32
  }
  func.func @transform_5(%arg0: i32, %arg1: i32) -> (i32, i32) {
    %c0_i32 = arith.constant 0 : i32
    %c0_i32_0 = arith.constant 0 : i32
    %c0_i32_1 = arith.constant 0 : i32
    return %c0_i32, %c0_i32_0 : i32, i32
  }
  func.func @transform_6(%arg0: i32, %arg1: i32) -> (i32, i32) {
    %c0_i32 = arith.constant 0 : i32
    %c0_i32_0 = arith.constant 0 : i32
    %c0_i32_1 = arith.constant 0 : i32
    return %c0_i32, %c0_i32_0 : i32, i32
  }
  func.func @transform_7(%arg0: i32, %arg1: i32) -> (i32, i32, i32) {
    %c0_i32 = arith.constant 0 : i32
    %c0_i32_0 = arith.constant 0 : i32
    return %arg0, %arg1, %c0_i32 : i32, i32, i32
  }
  func.func @transform_8(%arg0: i32, %arg1: i32) -> (i32, i32, i32, i32) {
    %c0_i32 = arith.constant 0 : i32
    %c0_i32_0 = arith.constant 0 : i32
    %c0_i32_1 = arith.constant 0 : i32
    return %arg0, %arg1, %c0_i32, %c0_i32_0 : i32, i32, i32, i32
  }
}

module attributes {stable_mosaic.version = 11 : i64} {
  func.func @_bn_relu_kernel(%arg0: i32, %arg1: memref<32x128xf32, #tpu.memory_space<vmem>>, %arg2: memref<1x128xf32, #tpu.memory_space<vmem>>, %arg3: memref<1x128xf32, #tpu.memory_space<vmem>>, %arg4: memref<32x128xf32, #tpu.memory_space<vmem>>) attributes {dimension_semantics = [#tpu.dimension_semantics<parallel>], iteration_bounds = array<i64: 1>, scalar_prefetch = 0 : i64, scratch_operands = 0 : i64, tpu.core_type = #tpu.core_type<tc>, window_params = [{transform_indices = @transform_0, window_bounds = array<i64: 32, 128>}, {pipeline_mode = #tpu.pipeline_mode<synchronous>, transform_indices = @transform_1, window_bounds = array<i64: 1, 128>}, {pipeline_mode = #tpu.pipeline_mode<synchronous>, transform_indices = @transform_2, window_bounds = array<i64: 1, 128>}, {transform_indices = @transform_3, window_bounds = array<i64: 32, 128>}]} {
    %c0 = arith.constant 0 : index
    %c0_0 = arith.constant 0 : index
    %0 = vector.load %arg1[%c0, %c0_0] : memref<32x128xf32, #tpu.memory_space<vmem>>, vector<32x128xf32>
    %c0_1 = arith.constant 0 : index
    %c0_2 = arith.constant 0 : index
    %1 = vector.load %arg2[%c0_1, %c0_2] : memref<1x128xf32, #tpu.memory_space<vmem>>, vector<1x128xf32>
    %2 = vector.broadcast %1 : vector<1x128xf32> to vector<32x128xf32>
    %3 = arith.mulf %0, %2 : vector<32x128xf32>
    %c0_3 = arith.constant 0 : index
    %c0_4 = arith.constant 0 : index
    %4 = vector.load %arg3[%c0_3, %c0_4] : memref<1x128xf32, #tpu.memory_space<vmem>>, vector<1x128xf32>
    %5 = vector.broadcast %4 : vector<1x128xf32> to vector<32x128xf32>
    %6 = arith.addf %3, %5 : vector<32x128xf32>
    %cst = arith.constant 0.000000e+00 : f32
    %7 = vector.broadcast %cst : f32 to vector<32x128xf32>
    %8 = arith.maximumf %6, %7 : vector<32x128xf32>
    %c0_5 = arith.constant 0 : index
    %c0_6 = arith.constant 0 : index
    %9 = vector.load %arg4[%c0_5, %c0_6] : memref<32x128xf32, #tpu.memory_space<vmem>>, vector<32x128xf32>
    tpu.vector_store %arg4[%c0_5, %c0_6], %8 {strides = array<i32>} : memref<32x128xf32, #tpu.memory_space<vmem>>, vector<32x128xf32>,
    return
  }
  func.func @transform_0(%arg0: i32) -> (i32, i32) {
    %c0_i32 = arith.constant 0 : i32
    %c0_i32_0 = arith.constant 0 : i32
    return %arg0, %c0_i32 : i32, i32
  }
  func.func @transform_1(%arg0: i32) -> (i32, i32) {
    %c0_i32 = arith.constant 0 : i32
    %c0_i32_0 = arith.constant 0 : i32
    %c0_i32_1 = arith.constant 0 : i32
    return %c0_i32, %c0_i32_0 : i32, i32
  }
  func.func @transform_2(%arg0: i32) -> (i32, i32) {
    %c0_i32 = arith.constant 0 : i32
    %c0_i32_0 = arith.constant 0 : i32
    %c0_i32_1 = arith.constant 0 : i32
    return %c0_i32, %c0_i32_0 : i32, i32
  }
  func.func @transform_3(%arg0: i32) -> (i32, i32) {
    %c0_i32 = arith.constant 0 : i32
    %c0_i32_0 = arith.constant 0 : i32
    return %arg0, %c0_i32 : i32, i32
  }
}

module attributes {stable_mosaic.version = 11 : i64} {
  func.func @kernel(%arg0: i32, %arg1: i32, %arg2: memref<1x16x16x8xf32, #tpu.memory_space<vmem>>, %arg3: memref<1x8x16x8xf32, #tpu.memory_space<vmem>>, %arg4: memref<1x8x16x8xf32, #tpu.memory_space<vmem>>, %arg5: memref<1x8xf32, #tpu.memory_space<vmem>>, %arg6: memref<1x8xf32, #tpu.memory_space<vmem>>, %arg7: memref<72x8xf32, #tpu.memory_space<vmem>>, %arg8: memref<1x8xf32, #tpu.memory_space<vmem>>, %arg9: memref<1x256x8xf32, #tpu.memory_space<vmem>>, %arg10: memref<1x1x2x8xf32, #tpu.memory_space<vmem>>, %arg11: memref<18x18x8xf32, #tpu.memory_space<vmem>>, %arg12: memref<256x72xf32, #tpu.memory_space<vmem>>) attributes {dimension_semantics = [#tpu.dimension_semantics<parallel>, #tpu.dimension_semantics<parallel>], iteration_bounds = array<i64: 2, 1>, scalar_prefetch = 0 : i64, scratch_operands = 2 : i64, tpu.core_type = #tpu.core_type<tc>, window_params = [{transform_indices = @transform_0, window_bounds = array<i64: 1, 16, 16, 8>}, {transform_indices = @transform_1, window_bounds = array<i64: 1, 8, 16, 8>}, {transform_indices = @transform_2, window_bounds = array<i64: 1, 8, 16, 8>}, {pipeline_mode = #tpu.pipeline_mode<synchronous>, transform_indices = @transform_3, window_bounds = array<i64: 1, 8>}, {pipeline_mode = #tpu.pipeline_mode<synchronous>, transform_indices = @transform_4, window_bounds = array<i64: 1, 8>}, {pipeline_mode = #tpu.pipeline_mode<synchronous>, transform_indices = @transform_5, window_bounds = array<i64: 72, 8>}, {pipeline_mode = #tpu.pipeline_mode<synchronous>, transform_indices = @transform_6, window_bounds = array<i64: 1, 8>}, {transform_indices = @transform_7, window_bounds = array<i64: 1, 256, 8>}, {transform_indices = @transform_8, window_bounds = array<i64: 1, 1, 2, 8>}]} {
    %c0 = arith.constant 0 : index
    %c0_0 = arith.constant 0 : index
    %0 = vector.load %arg5[%c0, %c0_0] : memref<1x8xf32, #tpu.memory_space<vmem>>, vector<1x8xf32>
    %c0_1 = arith.constant 0 : index
    %c0_2 = arith.constant 0 : index
    %1 = vector.load %arg6[%c0_1, %c0_2] : memref<1x8xf32, #tpu.memory_space<vmem>>, vector<1x8xf32>
    %c0_3 = arith.constant 0 : index
    %c0_4 = arith.constant 0 : index
    %c0_5 = arith.constant 0 : index
    %c0_6 = arith.constant 0 : index
    %2 = vector.load %arg2[%c0_3, %c0_4, %c0_5, %c0_6] : memref<1x16x16x8xf32, #tpu.memory_space<vmem>>, vector<1x16x16x8xf32>
    %3 = vector.shape_cast %2 : vector<1x16x16x8xf32> to vector<16x16x8xf32>
    %4 = vector.shape_cast %0 : vector<1x8xf32> to vector<1x1x8xf32>
    %5 = vector.broadcast %4 : vector<1x1x8xf32> to vector<16x16x8xf32>
    %6 = arith.mulf %3, %5 : vector<16x16x8xf32>
    %7 = vector.shape_cast %1 : vector<1x8xf32> to vector<1x1x8xf32>
    %8 = vector.broadcast %7 : vector<1x1x8xf32> to vector<16x16x8xf32>
    %9 = arith.addf %6, %8 : vector<16x16x8xf32>
    %cst = arith.constant 0.000000e+00 : f32
    %10 = vector.broadcast %cst : f32 to vector<16x16x8xf32>
    %11 = arith.maximumf %9, %10 : vector<16x16x8xf32>
    %12 = vector.extract_strided_slice %11 {offsets = [0, 1, 0], sizes = [16, 1, 8], strides = [1, 1, 1]} : vector<16x16x8xf32> to vector<16x1x8xf32>
    %13 = vector.extract_strided_slice %11 {offsets = [0, 14, 0], sizes = [16, 1, 8], strides = [1, 1, 1]} : vector<16x16x8xf32> to vector<16x1x8xf32>
    %14 = tpu.concatenate %12, %11, %13 in 1 : vector<16x1x8xf32>, vector<16x16x8xf32>, vector<16x1x8xf32> -> vector<16x18x8xf32>
    %c1 = arith.constant 1 : index
    %c0_7 = arith.constant 0 : index
    %c0_8 = arith.constant 0 : index
    %15 = vector.load %arg11[%c1, %c0_7, %c0_8] : memref<18x18x8xf32, #tpu.memory_space<vmem>>, vector<16x18x8xf32>
    tpu.vector_store %arg11[%c1, %c0_7, %c0_8], %14 {strides = array<i32>} : memref<18x18x8xf32, #tpu.memory_space<vmem>>, vector<16x18x8xf32>,
    %c0_i32 = arith.constant 0 : i32
    %16 = arith.cmpi eq, %arg1, %c0_i32 : i32
    %c1_i32 = arith.constant 1 : i32
    %c7_i32 = arith.constant 7 : i32
    %17 = arith.select %16, %c1_i32, %c7_i32 : i32
    %c0_i32_9 = arith.constant 0 : i32
    %18 = arith.cmpi eq, %arg1, %c0_i32_9 : i32
    %c6_i32 = arith.constant 6 : i32
    %c0_i32_10 = arith.constant 0 : i32
    %19 = arith.select %18, %c6_i32, %c0_i32_10 : i32
    %c0_11 = arith.constant 0 : index
    %20 = arith.index_cast %17 : i32 to index
    %c0_12 = arith.constant 0 : index
    %c0_13 = arith.constant 0 : index
    %21 = vector.load %arg3[%c0_11, %20, %c0_12, %c0_13] : memref<1x8x16x8xf32, #tpu.memory_space<vmem>>, vector<1x1x16x8xf32>
    %22 = vector.shape_cast %21 : vector<1x1x16x8xf32> to vector<1x16x8xf32>
    %23 = vector.shape_cast %0 : vector<1x8xf32> to vector<1x1x8xf32>
    %24 = vector.broadcast %23 : vector<1x1x8xf32> to vector<1x16x8xf32>
    %25 = arith.mulf %22, %24 : vector<1x16x8xf32>
    %26 = vector.shape_cast %1 : vector<1x8xf32> to vector<1x1x8xf32>
    %27 = vector.broadcast %26 : vector<1x1x8xf32> to vector<1x16x8xf32>
    %28 = arith.addf %25, %27 : vector<1x16x8xf32>
    %cst_14 = arith.constant 0.000000e+00 : f32
    %29 = vector.broadcast %cst_14 : f32 to vector<1x16x8xf32>
    %30 = arith.maximumf %28, %29 : vector<1x16x8xf32>
    %31 = vector.extract_strided_slice %30 {offsets = [0, 1, 0], sizes = [1, 1, 8], strides = [1, 1, 1]} : vector<1x16x8xf32> to vector<1x1x8xf32>
    %32 = vector.extract_strided_slice %30 {offsets = [0, 14, 0], sizes = [1, 1, 8], strides = [1, 1, 1]} : vector<1x16x8xf32> to vector<1x1x8xf32>
    %33 = tpu.concatenate %31, %30, %32 in 1 : vector<1x1x8xf32>, vector<1x16x8xf32>, vector<1x1x8xf32> -> vector<1x18x8xf32>
    %c0_15 = arith.constant 0 : index
    %c0_16 = arith.constant 0 : index
    %c0_17 = arith.constant 0 : index
    %34 = vector.load %arg11[%c0_15, %c0_16, %c0_17] : memref<18x18x8xf32, #tpu.memory_space<vmem>>, vector<1x18x8xf32>
    tpu.vector_store %arg11[%c0_15, %c0_16, %c0_17], %33 {strides = array<i32>} : memref<18x18x8xf32, #tpu.memory_space<vmem>>, vector<1x18x8xf32>,
    %c0_18 = arith.constant 0 : index
    %35 = arith.index_cast %19 : i32 to index
    %c0_19 = arith.constant 0 : index
    %c0_20 = arith.constant 0 : index
    %36 = vector.load %arg4[%c0_18, %35, %c0_19, %c0_20] : memref<1x8x16x8xf32, #tpu.memory_space<vmem>>, vector<1x1x16x8xf32>
    %37 = vector.shape_cast %36 : vector<1x1x16x8xf32> to vector<1x16x8xf32>
    %38 = vector.shape_cast %0 : vector<1x8xf32> to vector<1x1x8xf32>
    %39 = vector.broadcast %38 : vector<1x1x8xf32> to vector<1x16x8xf32>
    %40 = arith.mulf %37, %39 : vector<1x16x8xf32>
    %41 = vector.shape_cast %1 : vector<1x8xf32> to vector<1x1x8xf32>
    %42 = vector.broadcast %41 : vector<1x1x8xf32> to vector<1x16x8xf32>
    %43 = arith.addf %40, %42 : vector<1x16x8xf32>
    %cst_21 = arith.constant 0.000000e+00 : f32
    %44 = vector.broadcast %cst_21 : f32 to vector<1x16x8xf32>
    %45 = arith.maximumf %43, %44 : vector<1x16x8xf32>
    %46 = vector.extract_strided_slice %45 {offsets = [0, 1, 0], sizes = [1, 1, 8], strides = [1, 1, 1]} : vector<1x16x8xf32> to vector<1x1x8xf32>
    %47 = vector.extract_strided_slice %45 {offsets = [0, 14, 0], sizes = [1, 1, 8], strides = [1, 1, 1]} : vector<1x16x8xf32> to vector<1x1x8xf32>
    %48 = tpu.concatenate %46, %45, %47 in 1 : vector<1x1x8xf32>, vector<1x16x8xf32>, vector<1x1x8xf32> -> vector<1x18x8xf32>
    %c17 = arith.constant 17 : index
    %c0_22 = arith.constant 0 : index
    %c0_23 = arith.constant 0 : index
    %49 = vector.load %arg11[%c17, %c0_22, %c0_23] : memref<18x18x8xf32, #tpu.memory_space<vmem>>, vector<1x18x8xf32>
    tpu.vector_store %arg11[%c17, %c0_22, %c0_23], %48 {strides = array<i32>} : memref<18x18x8xf32, #tpu.memory_space<vmem>>, vector<1x18x8xf32>,
    %c0_24 = arith.constant 0 : index
    %c0_25 = arith.constant 0 : index
    %c0_26 = arith.constant 0 : index
    %50 = vector.load %arg11[%c0_24, %c0_25, %c0_26] : memref<18x18x8xf32, #tpu.memory_space<vmem>>, vector<16x16x8xf32>
    %51 = vector.shape_cast %50 : vector<16x16x8xf32> to vector<256x8xf32>
    %c0_27 = arith.constant 0 : index
    %c0_28 = arith.constant 0 : index
    %52 = vector.load %arg12[%c0_27, %c0_28] : memref<256x72xf32, #tpu.memory_space<vmem>>, vector<256x8xf32>
    tpu.vector_store %arg12[%c0_27, %c0_28], %51 {strides = array<i32>} : memref<256x72xf32, #tpu.memory_space<vmem>>, vector<256x8xf32>,
    %c0_29 = arith.constant 0 : index
    %c1_30 = arith.constant 1 : index
    %c0_31 = arith.constant 0 : index
    %53 = vector.load %arg11[%c0_29, %c1_30, %c0_31] : memref<18x18x8xf32, #tpu.memory_space<vmem>>, vector<16x16x8xf32>
    %54 = vector.shape_cast %53 : vector<16x16x8xf32> to vector<256x8xf32>
    %c0_32 = arith.constant 0 : index
    %c8 = arith.constant 8 : index
    %55 = vector.load %arg12[%c0_32, %c8] : memref<256x72xf32, #tpu.memory_space<vmem>>, vector<256x8xf32>
    tpu.vector_store %arg12[%c0_32, %c8], %54 {strides = array<i32>} : memref<256x72xf32, #tpu.memory_space<vmem>>, vector<256x8xf32>,
    %c0_33 = arith.constant 0 : index
    %c2 = arith.constant 2 : index
    %c0_34 = arith.constant 0 : index
    %56 = vector.load %arg11[%c0_33, %c2, %c0_34] : memref<18x18x8xf32, #tpu.memory_space<vmem>>, vector<16x16x8xf32>
    %57 = vector.shape_cast %56 : vector<16x16x8xf32> to vector<256x8xf32>
    %c0_35 = arith.constant 0 : index
    %c16 = arith.constant 16 : index
    %58 = vector.load %arg12[%c0_35, %c16] : memref<256x72xf32, #tpu.memory_space<vmem>>, vector<256x8xf32>
    tpu.vector_store %arg12[%c0_35, %c16], %57 {strides = array<i32>} : memref<256x72xf32, #tpu.memory_space<vmem>>, vector<256x8xf32>,
    %c1_36 = arith.constant 1 : index
    %c0_37 = arith.constant 0 : index
    %c0_38 = arith.constant 0 : index
    %59 = vector.load %arg11[%c1_36, %c0_37, %c0_38] : memref<18x18x8xf32, #tpu.memory_space<vmem>>, vector<16x16x8xf32>
    %60 = vector.shape_cast %59 : vector<16x16x8xf32> to vector<256x8xf32>
    %c0_39 = arith.constant 0 : index
    %c24 = arith.constant 24 : index
    %61 = vector.load %arg12[%c0_39, %c24] : memref<256x72xf32, #tpu.memory_space<vmem>>, vector<256x8xf32>
    tpu.vector_store %arg12[%c0_39, %c24], %60 {strides = array<i32>} : memref<256x72xf32, #tpu.memory_space<vmem>>, vector<256x8xf32>,
    %c1_40 = arith.constant 1 : index
    %c1_41 = arith.constant 1 : index
    %c0_42 = arith.constant 0 : index
    %62 = vector.load %arg11[%c1_40, %c1_41, %c0_42] : memref<18x18x8xf32, #tpu.memory_space<vmem>>, vector<16x16x8xf32>
    %63 = vector.shape_cast %62 : vector<16x16x8xf32> to vector<256x8xf32>
    %c0_43 = arith.constant 0 : index
    %c32 = arith.constant 32 : index
    %64 = vector.load %arg12[%c0_43, %c32] : memref<256x72xf32, #tpu.memory_space<vmem>>, vector<256x8xf32>
    tpu.vector_store %arg12[%c0_43, %c32], %63 {strides = array<i32>} : memref<256x72xf32, #tpu.memory_space<vmem>>, vector<256x8xf32>,
    %c1_44 = arith.constant 1 : index
    %c2_45 = arith.constant 2 : index
    %c0_46 = arith.constant 0 : index
    %65 = vector.load %arg11[%c1_44, %c2_45, %c0_46] : memref<18x18x8xf32, #tpu.memory_space<vmem>>, vector<16x16x8xf32>
    %66 = vector.shape_cast %65 : vector<16x16x8xf32> to vector<256x8xf32>
    %c0_47 = arith.constant 0 : index
    %c40 = arith.constant 40 : index
    %67 = vector.load %arg12[%c0_47, %c40] : memref<256x72xf32, #tpu.memory_space<vmem>>, vector<256x8xf32>
    tpu.vector_store %arg12[%c0_47, %c40], %66 {strides = array<i32>} : memref<256x72xf32, #tpu.memory_space<vmem>>, vector<256x8xf32>,
    %c2_48 = arith.constant 2 : index
    %c0_49 = arith.constant 0 : index
    %c0_50 = arith.constant 0 : index
    %68 = vector.load %arg11[%c2_48, %c0_49, %c0_50] : memref<18x18x8xf32, #tpu.memory_space<vmem>>, vector<16x16x8xf32>
    %69 = vector.shape_cast %68 : vector<16x16x8xf32> to vector<256x8xf32>
    %c0_51 = arith.constant 0 : index
    %c48 = arith.constant 48 : index
    %70 = vector.load %arg12[%c0_51, %c48] : memref<256x72xf32, #tpu.memory_space<vmem>>, vector<256x8xf32>
    tpu.vector_store %arg12[%c0_51, %c48], %69 {strides = array<i32>} : memref<256x72xf32, #tpu.memory_space<vmem>>, vector<256x8xf32>,
    %c2_52 = arith.constant 2 : index
    %c1_53 = arith.constant 1 : index
    %c0_54 = arith.constant 0 : index
    %71 = vector.load %arg11[%c2_52, %c1_53, %c0_54] : memref<18x18x8xf32, #tpu.memory_space<vmem>>, vector<16x16x8xf32>
    %72 = vector.shape_cast %71 : vector<16x16x8xf32> to vector<256x8xf32>
    %c0_55 = arith.constant 0 : index
    %c56 = arith.constant 56 : index
    %73 = vector.load %arg12[%c0_55, %c56] : memref<256x72xf32, #tpu.memory_space<vmem>>, vector<256x8xf32>
    tpu.vector_store %arg12[%c0_55, %c56], %72 {strides = array<i32>} : memref<256x72xf32, #tpu.memory_space<vmem>>, vector<256x8xf32>,
    %c2_56 = arith.constant 2 : index
    %c2_57 = arith.constant 2 : index
    %c0_58 = arith.constant 0 : index
    %74 = vector.load %arg11[%c2_56, %c2_57, %c0_58] : memref<18x18x8xf32, #tpu.memory_space<vmem>>, vector<16x16x8xf32>
    %75 = vector.shape_cast %74 : vector<16x16x8xf32> to vector<256x8xf32>
    %c0_59 = arith.constant 0 : index
    %c64 = arith.constant 64 : index
    %76 = vector.load %arg12[%c0_59, %c64] : memref<256x72xf32, #tpu.memory_space<vmem>>, vector<256x8xf32>
    tpu.vector_store %arg12[%c0_59, %c64], %75 {strides = array<i32>} : memref<256x72xf32, #tpu.memory_space<vmem>>, vector<256x8xf32>,
    %c0_60 = arith.constant 0 : index
    %c0_61 = arith.constant 0 : index
    %77 = vector.load %arg12[%c0_60, %c0_61] : memref<256x72xf32, #tpu.memory_space<vmem>>, vector<256x72xf32>
    %c0_62 = arith.constant 0 : index
    %c0_63 = arith.constant 0 : index
    %78 = vector.load %arg7[%c0_62, %c0_63] : memref<72x8xf32, #tpu.memory_space<vmem>>, vector<72x8xf32>
    %cst_64 = arith.constant dense<0.000000e+00> : vector<256x8xf32>
    %79 = tpu.matmul %77, %78, %cst_64 {dimension_numbers = #tpu.dot_dimension_numbers<[1], [0], [0], [1], [0, 0, 1, 1], [], []>} : vector<256x72xf32>, vector<72x8xf32>, vector<256x8xf32> -> vector<256x8xf32>
    %c0_65 = arith.constant 0 : index
    %c0_66 = arith.constant 0 : index
    %80 = vector.load %arg8[%c0_65, %c0_66] : memref<1x8xf32, #tpu.memory_space<vmem>>, vector<1x8xf32>
    %81 = vector.broadcast %80 : vector<1x8xf32> to vector<256x8xf32>
    %82 = arith.addf %79, %81 : vector<256x8xf32>
    %cst_67 = arith.constant dense<0.000000e+00> : vector<8xf32>
    %83 = vector.multi_reduction <add>, %82, %cst_67 [0] : vector<256x8xf32> to vector<8xf32>
    %84 = vector.shape_cast %83 : vector<8xf32> to vector<1x8xf32>
    %85 = arith.mulf %82, %82 : vector<256x8xf32>
    %cst_68 = arith.constant dense<0.000000e+00> : vector<8xf32>
    %86 = vector.multi_reduction <add>, %85, %cst_68 [0] : vector<256x8xf32> to vector<8xf32>
    %87 = vector.shape_cast %86 : vector<8xf32> to vector<1x8xf32>
    %88 = tpu.concatenate %84, %87 in 0 : vector<1x8xf32>, vector<1x8xf32> -> vector<2x8xf32>
    %c0_69 = arith.constant 0 : index
    %c0_70 = arith.constant 0 : index
    %c0_71 = arith.constant 0 : index
    %c0_72 = arith.constant 0 : index
    %89 = vector.load %arg10[%c0_69, %c0_70, %c0_71, %c0_72] : memref<1x1x2x8xf32, #tpu.memory_space<vmem>>, vector<1x1x2x8xf32>
    %90 = vector.shape_cast %89 : vector<1x1x2x8xf32> to vector<2x8xf32>
    %91 = vector.shape_cast %88 : vector<2x8xf32> to vector<1x1x2x8xf32>
    tpu.vector_store %arg10[%c0_69, %c0_70, %c0_71, %c0_72], %91 {strides = array<i32>} : memref<1x1x2x8xf32, #tpu.memory_space<vmem>>, vector<1x1x2x8xf32>,
    %c0_73 = arith.constant 0 : index
    %c0_74 = arith.constant 0 : index
    %c0_75 = arith.constant 0 : index
    %92 = vector.load %arg9[%c0_73, %c0_74, %c0_75] : memref<1x256x8xf32, #tpu.memory_space<vmem>>, vector<1x256x8xf32>
    %93 = vector.shape_cast %92 : vector<1x256x8xf32> to vector<256x8xf32>
    %94 = vector.shape_cast %82 : vector<256x8xf32> to vector<1x256x8xf32>
    tpu.vector_store %arg9[%c0_73, %c0_74, %c0_75], %94 {strides = array<i32>} : memref<1x256x8xf32, #tpu.memory_space<vmem>>, vector<1x256x8xf32>,
    return
  }
  func.func @transform_0(%arg0: i32, %arg1: i32) -> (i32, i32, i32, i32) {
    %c0_i32 = arith.constant 0 : i32
    %c0_i32_0 = arith.constant 0 : i32
    %c0_i32_1 = arith.constant 0 : i32
    return %arg0, %arg1, %c0_i32, %c0_i32_0 : i32, i32, i32, i32
  }
  func.func @transform_1(%arg0: i32, %arg1: i32) -> (i32, i32, i32, i32) {
    %c0_i32 = arith.constant 0 : i32
    %0 = arith.cmpi eq, %arg1, %c0_i32 : i32
    %c2_i32 = arith.constant 2 : i32
    %1 = arith.muli %arg1, %c2_i32 : i32
    %c1_i32 = arith.constant 1 : i32
    %2 = arith.subi %1, %c1_i32 : i32
    %c0_i32_0 = arith.constant 0 : i32
    %3 = arith.select %0, %c0_i32_0, %2 : i32
    %c0_i32_1 = arith.constant 0 : i32
    %c0_i32_2 = arith.constant 0 : i32
    %c0_i32_3 = arith.constant 0 : i32
    return %arg0, %3, %c0_i32_1, %c0_i32_2 : i32, i32, i32, i32
  }
  func.func @transform_2(%arg0: i32, %arg1: i32) -> (i32, i32, i32, i32) {
    %c0_i32 = arith.constant 0 : i32
    %0 = arith.cmpi eq, %arg1, %c0_i32 : i32
    %c1_i32 = arith.constant 1 : i32
    %1 = arith.addi %arg1, %c1_i32 : i32
    %c2_i32 = arith.constant 2 : i32
    %2 = arith.muli %1, %c2_i32 : i32
    %c1_i32_0 = arith.constant 1 : i32
    %3 = arith.select %0, %c1_i32_0, %2 : i32
    %c0_i32_1 = arith.constant 0 : i32
    %c0_i32_2 = arith.constant 0 : i32
    %c0_i32_3 = arith.constant 0 : i32
    return %arg0, %3, %c0_i32_1, %c0_i32_2 : i32, i32, i32, i32
  }
  func.func @transform_3(%arg0: i32, %arg1: i32) -> (i32, i32) {
    %c0_i32 = arith.constant 0 : i32
    %c0_i32_0 = arith.constant 0 : i32
    %c0_i32_1 = arith.constant 0 : i32
    return %c0_i32, %c0_i32_0 : i32, i32
  }
  func.func @transform_4(%arg0: i32, %arg1: i32) -> (i32, i32) {
    %c0_i32 = arith.constant 0 : i32
    %c0_i32_0 = arith.constant 0 : i32
    %c0_i32_1 = arith.constant 0 : i32
    return %c0_i32, %c0_i32_0 : i32, i32
  }
  func.func @transform_5(%arg0: i32, %arg1: i32) -> (i32, i32) {
    %c0_i32 = arith.constant 0 : i32
    %c0_i32_0 = arith.constant 0 : i32
    %c0_i32_1 = arith.constant 0 : i32
    return %c0_i32, %c0_i32_0 : i32, i32
  }
  func.func @transform_6(%arg0: i32, %arg1: i32) -> (i32, i32) {
    %c0_i32 = arith.constant 0 : i32
    %c0_i32_0 = arith.constant 0 : i32
    %c0_i32_1 = arith.constant 0 : i32
    return %c0_i32, %c0_i32_0 : i32, i32
  }
  func.func @transform_7(%arg0: i32, %arg1: i32) -> (i32, i32, i32) {
    %c0_i32 = arith.constant 0 : i32
    %c0_i32_0 = arith.constant 0 : i32
    return %arg0, %arg1, %c0_i32 : i32, i32, i32
  }
  func.func @transform_8(%arg0: i32, %arg1: i32) -> (i32, i32, i32, i32) {
    %c0_i32 = arith.constant 0 : i32
    %c0_i32_0 = arith.constant 0 : i32
    %c0_i32_1 = arith.constant 0 : i32
    return %arg0, %arg1, %c0_i32, %c0_i32_0 : i32, i32, i32, i32
  }
}

</mosaic_0001>

<bundles_post_ra>
// kernel: tile.13
= control target key start
LH: loop header
LB: loop body
LE: loop exit
PB: predicated region body
PF: predicated region fallthrough
CT: control target
= control target key end

     0   :  { %s28_s0 = inlined_call_operand.vmem [shape: f32[8], index: 0, kind: input, shape index: {}]   ;;  %s29_s1 = inlined_call_operand.vmem [shape: f32[16,8], index: 1, kind: output, shape index: {}]  }
   0x1   :  { %v4_v0 = vld [vmem:[%s28_s0] ss:$0 sm:$0xff] }
   0x2   :  { %5 = vst [vmem:[%s29_s1] sm:$0xff] %v4_v0 }
   0x3   :  { %8 = vst [vmem:[%s29_s1 + $0x8] sm:$0xff] %v4_v0 }

// kernel: tile.14
= control target key start
LH: loop header
LB: loop body
LE: loop exit
PB: predicated region body
PF: predicated region fallthrough
CT: control target
= control target key end

     0   :  { %s131_s10 = smov 120   ;;  %s132_s11 = smov 104   ;;  %vm3_vm0 = vcmask 64512   ;;  %vm9_vm1 = vcmask 1048512   ;;  %vm15_vm2 = vcmask 982912   ;;  %vm21_vm3 = vcmask 917312   ;;  %s207_s0 = inlined_call_operand.vmem [shape: f32[16,8], index: 0, kind: input, shape index: {}]   ;;  %s208_s1 = inlined_call_operand.vmem [shape: f32[1,128], index: 1, kind: output, shape index: {}]  }
   0x1   :  { %v101_v0 = vld [vmem:[%s207_s0 + $0xf] sm:$0x1]   ;;  %v103_v1 = vld [vmem:[%s207_s0 + $0xd] sm:$0x1]   ;;  %v105_v2 = vld [vmem:[%s207_s0 + $0xb] sm:$0x1]  }
   0x2   :  { %7 = vrot.lane.b32.xlu0 %v101_v0, %s131_s10  ;;  %19 = vrot.lane.b32.xlu1 %v103_v1, %s132_s11  ;;  %s133_s14 = smov 88   ;;  %v102_v3 = vld [vmem:[%s207_s0 + $0xe] sm:$0x1]   ;;  %v104_v4 = vld [vmem:[%s207_s0 + $0xc] sm:$0x1]   ;;  %s134_s19 = smov 112  }
   0x3   :  { %31 = vrot.lane.b32.xlu2 %v105_v2, %s133_s14  ;;  %s135_s20 = smov 96   ;;  %v106_v5 = vld [vmem:[%s207_s0 + $0xa] sm:$0x1]   ;;  %s136_s23 = smov 80   ;;  %v107_v6 = vld [vmem:[%s207_s0 + $0x9] sm:$0x1]  }
   0x4   :  { %v108_v7 = vld [vmem:[%s207_s0 + $0x8] sm:$0x1]   ;;  %s137_s28 = smov 72   ;;  %s138_s29 = smov 64   ;;  %v109_v8 = vld [vmem:[%s207_s0 + $0x7] sm:$0x1]  }
   0x5   :  { %s139_s3 = smov 56   ;;  %v110_v9 = vld [vmem:[%s207_s0 + $0x6] sm:$0x1]   ;;  %v111_v10 = vld [vmem:[%s207_s0 + $0x5] sm:$0x1]   ;;  %s140_s8 = smov 48  }
   0x6   :  { %s141_s9 = smov 40   ;;  %v112_v11 = vld [vmem:[%s207_s0 + $0x4] sm:$0x1]   ;;  %s142_s12 = smov 32   ;;  %v113_v12 = vld [vmem:[%s207_s0 + $0x3] sm:$0x1]  }
   0x7   :  { %v114_v13 = vld [vmem:[%s207_s0 + $0x2] sm:$0x1]   ;;  %s143_s17 = smov 24   ;;  %s144_s18 = smov 16   ;;  %v115_v14 = vld [vmem:[%s207_s0 + $0x1] sm:$0x1]  }
   0x8   :  { %s145_s21 = smov 8   ;;  %v2_v15 = vld [vmem:[%s207_s0] sm:$0x1]   ;;  %vm27_vm4 = vcmask 851712   ;;  %vm33_vm5 = vcmask 786112   ;;  %vm39_vm6 = vcmask 720512  }
   0x9   :  { %4 = vst.msk [vmem:[#allocation0] sm:$0x1] %vm3_vm0, %v2_v15   ;;  %vm45_vm7 = vcmask 654912   ;;  %vm51_vm8 = vcmask 589312   ;;  %vm57_vm9 = vcmask 523712   ;;  %vm63_vm10 = vcmask 458112  }
   0xa   :  { %13 = vrot.lane.b32.xlu0 %v102_v3, %s134_s19  ;;  %25 = vrot.lane.b32.xlu1 %v104_v4, %s135_s20  ;;  %vm69_vm11 = vcmask 392512   ;;  %vm75_vm12 = vcmask 326912   ;;  %vm81_vm13 = vcmask 261312   ;;  %vm87_vm14 = vcmask 195712  }
   0xb   :  { %37 = vrot.lane.b32.xlu2 %v106_v5, %s136_s23  ;;  %vm93_vm15 = vcmask 130112  }
  0x12   :  { %43 = vrot.lane.b32.xlu0 %v107_v6, %s137_s28  ;;  %49 = vrot.lane.b32.xlu1 %v108_v7, %s138_s29 }
  0x13   :  { %55 = vrot.lane.b32.xlu2 %v109_v8, %s139_s3 }
  0x1a   :  { %61 = vrot.lane.b32.xlu0 %v110_v9, %s140_s8  ;;  %67 = vrot.lane.b32.xlu1 %v111_v10, %s141_s9 }
  0x1b   :  { %73 = vrot.lane.b32.xlu2 %v112_v11, %s142_s12 }
  0x22   :  { %79 = vrot.lane.b32.xlu0 %v113_v12, %s143_s17  ;;  %85 = vrot.lane.b32.xlu1 %v114_v13, %s144_s18 }
  0x23   :  { %91 = vrot.lane.b32.xlu2 %v115_v14, %s145_s21 }
  0x5d   :  { %v32_v16 = vpop.permute.xlu2 %31  }
  0x65   :  { %v38_v17 = vpop.permute.xlu2 %37  }
  0x6d   :  { %v56_v18 = vpop.permute.xlu2 %55  }
  0x74   :  { %v8_v19 = vpop.permute.xlu0 %7   ;;  %v20_v20 = vpop.permute.xlu1 %19  }
  0x75   :  { %10 = vst.msk [vmem:[#allocation0] sm:$0x1] %vm9_vm1, %v8_v19   ;;  %v74_v21 = vpop.permute.xlu2 %73  }
  0x7c   :  { %v14_v22 = vpop.permute.xlu0 %13   ;;  %v26_v23 = vpop.permute.xlu1 %25  }
  0x7d   :  { %16 = vst.msk [vmem:[#allocation0] sm:$0x1] %vm15_vm2, %v14_v22   ;;  %v92_v24 = vpop.permute.xlu2 %91  }
  0x7e   :  { %22 = vst.msk [vmem:[#allocation0] sm:$0x1] %vm21_vm3, %v20_v20  }
  0x7f   :  { %28 = vst.msk [vmem:[#allocation0] sm:$0x1] %vm27_vm4, %v26_v23  }
  0x80   :  { %34 = vst.msk [vmem:[#allocation0] sm:$0x1] %vm33_vm5, %v32_v16  }
  0x81   :  { %40 = vst.msk [vmem:[#allocation0] sm:$0x1] %vm39_vm6, %v38_v17  }
  0x84   :  { %v44_v25 = vpop.permute.xlu0 %43   ;;  %v50_v26 = vpop.permute.xlu1 %49  }
  0x85   :  { %46 = vst.msk [vmem:[#allocation0] sm:$0x1] %vm45_vm7, %v44_v25  }
  0x86   :  { %52 = vst.msk [vmem:[#allocation0] sm:$0x1] %vm51_vm8, %v50_v26  }
  0x87   :  { %58 = vst.msk [vmem:[#allocation0] sm:$0x1] %vm57_vm9, %v56_v18  }
  0x8c   :  { %v62_v27 = vpop.permute.xlu0 %61   ;;  %v68_v28 = vpop.permute.xlu1 %67  }
  0x8d   :  { %64 = vst.msk [vmem:[#allocation0] sm:$0x1] %vm63_vm10, %v62_v27  }
  0x8e   :  { %70 = vst.msk [vmem:[#allocation0] sm:$0x1] %vm69_vm11, %v68_v28  }
  0x8f   :  { %76 = vst.msk [vmem:[#allocation0] sm:$0x1] %vm75_vm12, %v74_v21  }
  0x94   :  { %v80_v29 = vpop.permute.xlu0 %79   ;;  %v86_v30 = vpop.permute.xlu1 %85  }
  0x95   :  { %82 = vst.msk [vmem:[#allocation0] sm:$0x1] %vm81_vm13, %v80_v29  }
  0x96   :  { %88 = vst.msk [vmem:[#allocation0] sm:$0x1] %vm87_vm14, %v86_v30  }
  0x97   :  { %94 = vst.msk [vmem:[#allocation0] sm:$0x1] %vm93_vm15, %v92_v24  }
  0x9e   :  { %v97_v31 = vld [vmem:[#allocation0] sm:$0x1] }
  0x9f   :  { %100 = vst [vmem:[%s208_s1] sm:$0x1] %v97_v31 }

// kernel: double_conv.5
= control target key start
LH: loop header
LB: loop body
LE: loop exit
PB: predicated region body
PF: predicated region fallthrough
CT: control target
= control target key end

     0   :  { %s98_s0 = inlined_call_operand.vmem [shape: f32[32,128], index: 0, kind: input, shape index: {}]   ;;  %s99_s1 = inlined_call_operand.vmem [shape: f32[1,128], index: 1, kind: input, shape index: {}]   ;;  %s100_s2 = inlined_call_operand.vmem [shape: f32[1,128], index: 2, kind: input, shape index: {}]   ;;  %s101_s3 = inlined_call_operand.vmem [shape: f32[32,128], index: 3, kind: output, shape index: {}]  }
   0x1   :  { %v14_v0 = vld [vmem:[%s98_s0] sm:$0xff]  ;;  %v15_v3 = vld [vmem:[%s98_s0 + $0x8] sm:$0xff]  ;;  %v16_v6 = vld [vmem:[%s98_s0 + $0x10] sm:$0xff] }
   0x2   :  { %v46_v1 = vld [vmem:[%s99_s1] ss:$0 sm:$0xff]  ;;  %v17_v7 = vld [vmem:[%s98_s0 + $0x18] sm:$0xff] }
   0x3   :  { %v47_v2 = vld [vmem:[%s100_s2] ss:$0 sm:$0xff]  ;;  %v22_v4 = vmul.f32 %v46_v1, %v14_v0  ;;  %v23_v5 = vmul.f32 %v46_v1, %v15_v3  ;;  %v24_v8 = vmul.f32 %v46_v1, %v16_v6  ;;  %v25_v9 = vmul.f32 %v46_v1, %v17_v7 }
   0x5   :  { %v30_v10 = vadd.f32 %v47_v2, %v22_v4  ;;  %v31_v11 = vadd.f32 %v47_v2, %v23_v5  ;;  %v32_v12 = vadd.f32 %v47_v2, %v24_v8  ;;  %v33_v13 = vadd.f32 %v47_v2, %v25_v9 }
   0x7   :  { %v34_v14 = vmax.f32 %v30_v10, 0.0  ;;  %v35_v15 = vmax.f32 %v31_v11, 0.0  ;;  %v36_v16 = vmax.f32 %v32_v12, 0.0  ;;  %v37_v17 = vmax.f32 %v33_v13, 0.0 }
   0x9   :  { %38 = vst [vmem:[%s101_s3] sm:$0xff] %v34_v14 }
   0xa   :  { %39 = vst [vmem:[%s101_s3 + $0x8] sm:$0xff] %v35_v15 }
   0xb   :  { %40 = vst [vmem:[%s101_s3 + $0x10] sm:$0xff] %v36_v16 }
   0xc   :  { %41 = vst [vmem:[%s101_s3 + $0x18] sm:$0xff] %v37_v17 }

// kernel: double_conv.3
= control target key start
LH: loop header
LB: loop body
LE: loop exit
PB: predicated region body
PF: predicated region fallthrough
CT: control target
= control target key end

     0   :  { %s3286_s27 = smov 0   ;;  %s3288_s28 = smov 0   ;;  %s4696_s0 = inlined_call_operand.vmem [shape: f32[2,16,16,4], index: 0, kind: input, shape index: {}, may-alias: {0,1,2}]   ;;  %s4697_s1 = inlined_call_operand.vmem [shape: f32[2,16,16,4], index: 1, kind: input, shape index: {}, may-alias: {0,1,2}]   ;;  %s4698_s2 = inlined_call_operand.vmem [shape: f32[2,16,16,4], index: 2, kind: input, shape index: {}, may-alias: {0,1,2}]   ;;  %s4699_s3 = inlined_call_operand.vmem [shape: f32[1,4], index: 3, kind: input, shape index: {}]   ;;  %s4700_s4 = inlined_call_operand.vmem [shape: f32[1,4], index: 4, kind: input, shape index: {}]   ;;  %s4701_s5 = inlined_call_operand.vmem [shape: f32[36,8], index: 5, kind: input, shape index: {}]   ;;  %s4702_s6 = inlined_call_operand.vmem [shape: f32[1,8], index: 6, kind: input, shape index: {}]   ;;  %s4703_s7 = inlined_call_operand.vmem [shape: f32[2,256,8], index: 7, kind: output, shape index: {0}]   ;;  %s4704_s8 = inlined_call_operand.vmem [shape: f32[2,1,2,8], index: 8, kind: output, shape index: {1}]  }
   0x1   :  { %s3290_s3 = smov 0  }
   0x2 LB: > { %s31_s4 = sadd.s32 1, %s3227_s28  ;;  %p3106_p0 = scmp.ge.s32.totalorder %s3231_s3, 1  ;;  %s3231_s3 = sphi %s3290_s3, %s19_s3   ;;  %s3227_s28 = sphi %s3288_s28, %s4766_s28   ;;  %s3223_s27 = sphi %s3286_s27, %s4765_s27  }
   0x3   : > { %p33_p1 = scmp.ge.s32.totalorder %s31_s4, 2  ;;  %p357_p2 = scmp.lt.s32.totalorder %s3231_s3, 3 }
   0x5   : > { %s4768_s4 = smov (%p33_p1, %s31_s4), 0  ;;  %p358_p3 = pnand %p3106_p0, %p357_p2 }
   0x7   : > { %361 = sbr.rel (%p358_p3) target bundleno = 986 (0x3da), region = 48 }
   0xc   : > { %p436_p4 = scmp.lt.s32.totalorder %s3223_s27, 1  ;;  %vm597_vm0 = vcmask 1040384   ;;  %vm759_vm1 = vcmask 31744   ;;  %vm762_vm2 = vcmask 25600   ;;  %s3233_s14 = smov 4   ;;  %vm1079_vm3 = vcmask 64544  }
   0xd   : > { %s3234_s15 = smov 8   ;;  %s3235_s16 = smov 12   ;;  %vm1272_vm4 = vcmask 97344   ;;  %vm1465_vm5 = vcmask 130144   ;;  %vm1658_vm6 = vcmask 162944   ;;  %vm1851_vm7 = vcmask 195744  }
   0xe   : > { %s4770_s27 = smov (!%p436_p4, %s3223_s27), 1  ;;  %s3236_s17 = smov 16   ;;  %vm2602_vm8 = vcmask 1043456   ;;  %vm2045_vm9 = vcmask 228544   ;;  %vm2238_vm10 = vcmask 261344   ;;  %vm2431_vm11 = vcmask 294144  }
   0xf   : > { %s3307_s29 = sshll.u32 %s4770_s27, 8  ;;  %s3237_s18 = smov 20   ;;  %vm2505_vm12 = vcmask 293888   ;;  %vm2719_vm13 = vcmask 64512   ;;  %vm2891_vm14 = vcmask 58368  }
  0x10   : > { %s459_s10 = scalar_lea.vmem %s4697_s1, %s3307_s29  ;;  %s3317_s13 = scalar_lea.vmem %s4696_s0, %s3307_s29 }
  0x11   : > { %v3116_v0 = vld [vmem:[%s459_s10 + $0x10] sm:$0xff]  ;;  %v3117_v1 = vld [vmem:[%s459_s10 + $0x18] sm:$0xff]  ;;  %v501_v5 = vld [vmem:[%s3317_s13] sm:$0xff]  ;;  %s3238_s19 = smov 24   ;;  %s3239_s20 = smov 32  }
  0x12   : > { %v817_v2 = vrot.slane %v3116_v0, 1  ;;  %v820_v3 = vrot.slane %v3116_v0, 7  ;;  %v821_v4 = vrot.slane %v3117_v1, 7  ;;  %v502_v6 = vld [vmem:[%s3317_s13 + $0x8] sm:$0xff]  ;;  %v826_v7 = vrot.slane %v3117_v1, 5  ;;  %v505_v12 = vld [vmem:[%s3317_s13 + $0x20] sm:$0xff]  ;;  %s4383_s25 = scalar_lea.vmem %s4703_s7, %s3307_s29 }
  0x13   : > { %v549_v8 = vrot.slane %v501_v5, 1  ;;  %v598_v9 = vrot.slane %v501_v5, 7  ;;  %v599_v10 = vrot.slane %v502_v6, 7  ;;  %v694_v11 = vrot.slane %v502_v6, 5  ;;  %v506_v13 = vld [vmem:[%s3317_s13 + $0x28] sm:$0xff]  ;;  %v503_v17 = vld [vmem:[%s3317_s13 + $0x10] sm:$0xff] }
  0x14   : > { %v822_v14 = vsel %vm597_vm0, %v820_v3, %v821_v4  ;;  %v828_v15 = vsel %vm597_vm0, %v817_v2, %v820_v3  ;;  %v551_v16 = vrot.slane %v505_v12, 1  ;;  %v604_v20 = vrot.slane %v505_v12, 7  ;;  %v504_v21 = vld [vmem:[%s3317_s13 + $0x18] sm:$0xff]  ;;  %v3333_v25 = vld [vmem:[%s3317_s13 + $0x30] sm:$0xff]  ;;  %v509_v32 = vld [vmem:[%s3317_s13 + $0x40] sm:$0xff]  ;;  %s3240_s21 = smov 28  }
  0x15   : > { %830 = vst.msk [vmem:[#allocation2] sm:$0xff] %vm759_vm1, %v828_v15  ;;  %v600_v18 = vsel %vm597_vm0, %v598_v9, %v599_v10  ;;  %v726_v19 = vsel %vm597_vm0, %v549_v8, %v598_v9  ;;  %v829_v22 = vsel %vm597_vm0, %v821_v4, %v826_v7  ;;  %v605_v23 = vrot.slane %v506_v13, 7  ;;  %v508_v26 = vld [vmem:[%s3317_s13 + $0x38] sm:$0xff]  ;;  %v3345_v36 = vld [vmem:[%s3317_s13 + $0x48] sm:$0xff]  ;;  %v511_v42 = vld [vmem:[%s3317_s13 + $0x50] sm:$0xff] }
  0x16   : > { %831 = vst.msk [vmem:[#allocation2 + $0x8] sm:$0xff] %vm759_vm1, %v822_v14  ;;  %v696_v24 = vrot.slane %v506_v13, 5  ;;  %v742_v27 = vsel %vm597_vm0, %v599_v10, %v694_v11  ;;  %v550_v28 = vrot.slane %v503_v17, 1  ;;  %v601_v29 = vrot.slane %v503_v17, 7  ;;  %v512_v45 = vld [vmem:[%s3317_s13 + $0x58] sm:$0xff]  ;;  %v3364_v55 = vld [vmem:[%s3317_s13 + $0x60] sm:$0xff] }
  0x17   : > { %760 = vst.msk [vmem:[#allocation2 + $0x18] sm:$0xff] %vm759_vm1, %v726_v19  ;;  %v728_v30 = vsel %vm597_vm0, %v551_v16, %v604_v20  ;;  %v602_v31 = vrot.slane %v504_v21, 7  ;;  %v606_v33 = vsel %vm597_vm0, %v604_v20, %v605_v23  ;;  %v607_v34 = vrot.slane %v3333_v25, 7  ;;  %v514_v56 = vld [vmem:[%s3317_s13 + $0x68] sm:$0xff]  ;;  %v515_v61 = vld [vmem:[%s3317_s13 + $0x70] sm:$0xff]  ;;  %v3380_v1 = vld [vmem:[%s3317_s13 + $0x78] sm:$0xff] }
  0x18   : > { %761 = vst.msk [vmem:[#allocation2 + $0x20] sm:$0xff] %vm759_vm1, %v600_v18  ;;  %v608_v35 = vrot.slane %v508_v26, 7  ;;  %v744_v37 = vsel %vm597_vm0, %v605_v23, %v696_v24  ;;  %v697_v38 = vrot.slane %v508_v26, 5  ;;  %v727_v39 = vsel %vm597_vm0, %v550_v28, %v601_v29  ;;  %v517_v8 = vld [vmem:[%s3317_s13 + $0x80] sm:$0xff]  ;;  %v518_v12 = vld [vmem:[%s3317_s13 + $0x88] sm:$0xff] }
  0x19   : > { %832 = vst.msk [vmem:[#allocation2 + $0x10] sm:$0x3] %vm762_vm2, %v829_v22  ;;  %v553_v40 = vrot.slane %v509_v32, 1  ;;  %v610_v41 = vrot.slane %v509_v32, 7  ;;  %v603_v43 = vsel %vm597_vm0, %v601_v29, %v602_v31  ;;  %v611_v44 = vrot.slane %v3345_v36, 7  ;;  %v519_v29 = vld [vmem:[%s3317_s13 + $0x90] sm:$0xff] }
  0x1a   : > { %763 = vst.msk [vmem:[#allocation2 + $0x28] sm:$0x3] %vm762_vm2, %v742_v27  ;;  %v609_v47 = vsel %vm597_vm0, %v607_v34, %v608_v35  ;;  %v695_v48 = vrot.slane %v504_v21, 5  ;;  %v745_v49 = vsel %vm597_vm0, %v608_v35, %v697_v38  ;;  %v554_v50 = vrot.slane %v511_v42, 1  ;;  %v3423_v38 = vld [vmem:[%s3317_s13 + $0xa8] sm:$0xff] }
  0x1b   : > { %767 = vst.msk [vmem:[#allocation2 + $0x48] sm:$0xff] %vm759_vm1, %v728_v30  ;;  %v613_v51 = vrot.slane %v511_v42, 7  ;;  %v730_v53 = vsel %vm597_vm0, %v553_v40, %v610_v41  ;;  %v614_v54 = vrot.slane %v512_v45, 7  ;;  %v612_v57 = vsel %vm597_vm0, %v610_v41, %v611_v44  ;;  %v520_v30 = vld [vmem:[%s3317_s13 + $0x98] sm:$0xff] }
  0x1c   : > { %768 = vst.msk [vmem:[#allocation2 + $0x50] sm:$0xff] %vm759_vm1, %v606_v33  ;;  %v699_v58 = vrot.slane %v512_v45, 5  ;;  %v743_v59 = vsel %vm597_vm0, %v602_v31, %v695_v48  ;;  %v552_v60 = vrot.slane %v3333_v25, 1  ;;  %v616_v63 = vrot.slane %v3364_v55, 7  ;;  %v521_v31 = vld [vmem:[%s3317_s13 + $0xa0] sm:$0xff] }
  0x1d   : > { %v919_v46 = vld [vmem:[#allocation2 + $0x1] sm:$0xff]  ;;  %769 = vst.msk [vmem:[#allocation2 + $0x58] sm:$0x3] %vm762_vm2, %v744_v37  ;;  %v731_v62 = vsel %vm597_vm0, %v554_v50, %v613_v51  ;;  %v617_v0 = vrot.slane %v514_v56, 7  ;;  %v615_v3 = vsel %vm597_vm0, %v613_v51, %v614_v54  ;;  %v700_v4 = vrot.slane %v514_v56, 5  ;;  %v523_v50 = vld [vmem:[%s3317_s13 + $0xb0] sm:$0xff] }
  0x1e   : > { %983 = vrot.lane.b32.xlu0 %v919_v46, %s3233_s14  ;;  %764 = vst.msk [vmem:[#allocation2 + $0x30] sm:$0xff] %vm759_vm1, %v727_v39  ;;  %v747_v5 = vsel %vm597_vm0, %v614_v54, %v699_v58  ;;  %v556_v6 = vrot.slane %v515_v61, 1  ;;  %v619_v7 = vrot.slane %v515_v61, 7  ;;  %v729_v10 = vsel %vm597_vm0, %v552_v60, %v607_v34  ;;  %v524_v51 = vld [vmem:[%s3317_s13 + $0xb8] sm:$0xff] }
  0x1f   : > { %v921_v52 = vld [vmem:[#allocation2 + $0x19] sm:$0xff]  ;;  %765 = vst.msk [vmem:[#allocation2 + $0x38] sm:$0xff] %vm759_vm1, %v603_v43  ;;  %v620_v11 = vrot.slane %v3380_v1, 7  ;;  %v618_v14 = vsel %vm597_vm0, %v616_v63, %v617_v0  ;;  %v698_v15 = vrot.slane %v3345_v36, 5  ;;  %v748_v16 = vsel %vm597_vm0, %v617_v0, %v700_v4 }
  0x20   : > { %987 = vrot.lane.b32.xlu1 %v921_v52, %s3233_s14  ;;  %771 = vst.msk [vmem:[#allocation2 + $0x68] sm:$0xff] %vm759_vm1, %v609_v47  ;;  %v920_v2 = vld [vmem:[#allocation2 + $0x9] sm:$0xff]  ;;  %v557_v17 = vrot.slane %v517_v8, 1  ;;  %v622_v18 = vrot.slane %v517_v8, 7  ;;  %v733_v19 = vsel %vm597_vm0, %v556_v6, %v619_v7  ;;  %v623_v20 = vrot.slane %v518_v12, 7  ;;  %v525_v0 = vld [vmem:[%s3317_s13 + $0xc0] sm:$0xff] }
  0x21   : > { %772 = vst.msk [vmem:[#allocation2 + $0x70] sm:$0x3] %vm762_vm2, %v745_v49  ;;  %v922_v9 = vld [vmem:[#allocation2 + $0x21] sm:$0xff]  ;;  %v621_v21 = vsel %vm597_vm0, %v619_v7, %v620_v11  ;;  %v702_v22 = vrot.slane %v518_v12, 5  ;;  %v746_v23 = vsel %vm597_vm0, %v611_v44, %v698_v15  ;;  %v555_v24 = vrot.slane %v3364_v55, 1  ;;  %v527_v6 = vld [vmem:[%s3317_s13 + $0xd0] sm:$0xff] }
  0x22   : > { %773 = vst.msk [vmem:[#allocation2 + $0x78] sm:$0xff] %vm759_vm1, %v730_v53  ;;  %v734_v27 = vsel %vm597_vm0, %v557_v17, %v622_v18  ;;  %v624_v28 = vsel %vm597_vm0, %v622_v18, %v623_v20  ;;  %v625_v34 = vrot.slane %v519_v29, 7  ;;  %v626_v35 = vrot.slane %v520_v30, 7  ;;  %v528_v7 = vld [vmem:[%s3317_s13 + $0xd8] sm:$0xff] }
  0x23   : > { %774 = vst.msk [vmem:[#allocation2 + $0x80] sm:$0xff] %vm759_vm1, %v612_v57  ;;  %v925_v25 = vld [vmem:[#allocation2 + $0x49] sm:$0xff]  ;;  %v750_v33 = vsel %vm597_vm0, %v623_v20, %v702_v22  ;;  %v703_v36 = vrot.slane %v520_v30, 5  ;;  %v732_v37 = vsel %vm597_vm0, %v555_v24, %v616_v63  ;;  %v559_v39 = vrot.slane %v521_v31, 1 }
  0x24   : > { %766 = vst.msk [vmem:[#allocation2 + $0x40] sm:$0x3] %vm762_vm2, %v743_v59  ;;  %v926_v32 = vld [vmem:[#allocation2 + $0x51] sm:$0xff]  ;;  %v628_v40 = vrot.slane %v521_v31, 7  ;;  %v627_v41 = vsel %vm597_vm0, %v625_v34, %v626_v35  ;;  %v629_v42 = vrot.slane %v3423_v38, 7  ;;  %v701_v43 = vrot.slane %v3380_v1, 5 }
  0x25   : > { %776 = vst.msk [vmem:[#allocation2 + $0x90] sm:$0xff] %vm759_vm1, %v731_v62  ;;  %v751_v44 = vsel %vm597_vm0, %v626_v35, %v703_v36  ;;  %v560_v53 = vrot.slane %v523_v50, 1  ;;  %v631_v54 = vrot.slane %v523_v50, 7  ;;  %v632_v55 = vrot.slane %v524_v51, 7  ;;  %v526_v1 = vld [vmem:[%s3317_s13 + $0xc8] sm:$0xff] }
  0x26   : > { %985 = vrot.lane.b32.xlu0 %v920_v2, %s3233_s14  ;;  %v923_v13 = vld [vmem:[#allocation2 + $0x31] sm:$0xff]  ;;  %777 = vst.msk [vmem:[#allocation2 + $0x98] sm:$0xff] %vm759_vm1, %v615_v3  ;;  %v736_v45 = vsel %vm597_vm0, %v559_v39, %v628_v40  ;;  %v630_v46 = vsel %vm597_vm0, %v628_v40, %v629_v42  ;;  %v749_v48 = vsel %vm597_vm0, %v620_v11, %v701_v43  ;;  %v705_v56 = vrot.slane %v524_v51, 5  ;;  %v530_v20 = vld [vmem:[%s3317_s13 + $0xe8] sm:$0xff]  ;;  %v855_v51 = vld [vmem:[#allocation2] sm:$0xff] }
  0x27   : > { %991 = vrot.lane.b32.xlu2 %v923_v13, %s3233_s14  ;;  %778 = vst.msk [vmem:[#allocation2 + $0xa0] sm:$0x3] %vm762_vm2, %v747_v5  ;;  %v633_v57 = vsel %vm597_vm0, %v631_v54, %v632_v55  ;;  %v737_v58 = vsel %vm597_vm0, %v560_v53, %v631_v54  ;;  %v558_v60 = vrot.slane %v519_v29, 1  ;;  %v634_v3 = vrot.slane %v525_v0, 7  ;;  %v1113_v53 = vld [vmem:[#allocation2 + $0xa] sm:$0xff]  ;;  %v3573_v54 = vld [vmem:[#allocation2 + $0x38] sm:$0xff] }
  0x28   : > { %989 = vrot.lane.b32.xlu1 %v922_v9, %s3233_s14  ;;  %770 = vst.msk [vmem:[#allocation2 + $0x60] sm:$0xff] %vm759_vm1, %v729_v10  ;;  %v928_v47 = vld [vmem:[#allocation2 + $0x69] sm:$0xff]  ;;  %v753_v59 = vsel %vm597_vm0, %v632_v55, %v705_v56  ;;  %v635_v4 = vrot.slane %v526_v1, 7  ;;  %v706_v5 = vrot.slane %v526_v1, 5  ;;  %v562_v8 = vrot.slane %v527_v6, 1  ;;  %v3577_v56 = vld [vmem:[#allocation2 + $0x1a] sm:$0xff] }
  0x29   : > { %780 = vst.msk [vmem:[#allocation2 + $0xb0] sm:$0xff] %vm759_vm1, %v618_v14  ;;  %v735_v61 = vsel %vm597_vm0, %v558_v60, %v625_v34  ;;  %v637_v9 = vrot.slane %v527_v6, 7  ;;  %v638_v10 = vrot.slane %v528_v7, 7  ;;  %v704_v13 = vrot.slane %v3423_v38, 5  ;;  %v1112_v55 = vld [vmem:[#allocation2 + $0x2] sm:$0xff]  ;;  %v3617_v6 = vld [vmem:[#allocation2 + $0x4a] sm:$0xff] }
  0x2a   : > { %781 = vst.msk [vmem:[#allocation2 + $0xb8] sm:$0x3] %vm762_vm2, %v748_v16  ;;  %v929_v52 = vld [vmem:[#allocation2 + $0x79] sm:$0xff]  ;;  %v636_v11 = vsel %vm597_vm0, %v634_v3, %v635_v4  ;;  %v754_v12 = vsel %vm597_vm0, %v635_v4, %v706_v5  ;;  %v641_v24 = vrot.slane %v530_v20, 7  ;;  %v561_v30 = vrot.slane %v525_v0, 1  ;;  %v3604_v1 = vld [vmem:[#allocation2 + $0x48] sm:$0xff] }
  0x2b   : > { %v3408_v26 = vld [vmem:[#allocation2 + $0x39] sm:$0xff]  ;;  %782 = vst.msk [vmem:[#allocation2 + $0xc0] sm:$0xff] %vm759_vm1, %v733_v19  ;;  %v639_v14 = vsel %vm597_vm0, %v637_v9, %v638_v10  ;;  %v739_v15 = vsel %vm597_vm0, %v562_v8, %v637_v9  ;;  %v752_v16 = vsel %vm597_vm0, %v629_v42, %v704_v13  ;;  %v707_v35 = vrot.slane %v528_v7, 5  ;;  %v3629_v8 = vld [vmem:[#allocation2 + $0x68] sm:$0xff] }
  0x2c   : > { %783 = vst.msk [vmem:[#allocation2 + $0xc8] sm:$0xff] %vm759_vm1, %v621_v21  ;;  %v529_v19 = vld [vmem:[%s3317_s13 + $0xe0] sm:$0xff]  ;;  %v738_v31 = vsel %vm597_vm0, %v561_v30, %v634_v3  ;;  %v3608_v3 = vld [vmem:[#allocation2 + $0x50] sm:$0xff] }
  0x2d   : > { %775 = vst.msk [vmem:[#allocation2 + $0x88] sm:$0x3] %vm762_vm2, %v746_v23  ;;  %v3458_v62 = vld [vmem:[#allocation2 + $0x91] sm:$0xff]  ;;  %v563_v22 = vrot.slane %v529_v19, 1  ;;  %v640_v23 = vrot.slane %v529_v19, 7  ;;  %v755_v36 = vsel %vm597_vm0, %v638_v10, %v707_v35  ;;  %v3596_v0 = vld [vmem:[#allocation2 + $0x3a] sm:$0xff] }
  0x2e   : > { %995 = vrot.lane.b32.xlu0 %v925_v25, %s3233_s14  ;;  %785 = vst.msk [vmem:[#allocation2 + $0xd8] sm:$0xff] %vm759_vm1, %v734_v27  ;;  %v932_v2 = vld [vmem:[#allocation2 + $0x99] sm:$0xff]  ;;  %v708_v25 = vrot.slane %v530_v20, 5  ;;  %v3642_v13 = vld [vmem:[#allocation2 + $0x6a] sm:$0xff] }
  0x2f   : > { %993 = vrot.lane.b32.xlu2 %v3408_v26, %s3233_s14  ;;  %786 = vst.msk [vmem:[#allocation2 + $0xe0] sm:$0xff] %vm759_vm1, %v624_v28  ;;  %v3440_v49 = vld [vmem:[#allocation2 + $0x61] sm:$0xff]  ;;  %v642_v27 = vsel %vm597_vm0, %v640_v23, %v641_v24  ;;  %v740_v28 = vsel %vm597_vm0, %v563_v22, %v640_v23  ;;  %v3611_v4 = vld [vmem:[#allocation2 + $0x52] sm:$0xff] }
  0x30   : > { %997 = vrot.lane.b32.xlu1 %v926_v32, %s3233_s14  ;;  %787 = vst.msk [vmem:[#allocation2 + $0xe8] sm:$0x3] %vm762_vm2, %v750_v33  ;;  %v756_v29 = vsel %vm597_vm0, %v641_v24, %v708_v25  ;;  %v3590_v60 = vld [vmem:[#allocation2 + $0x60] sm:$0xff]  ;;  %v3633_v10 = vld [vmem:[#allocation2 + $0x78] sm:$0xff]  ;;  %v3655_v19 = vld [vmem:[#allocation2 + $0x90] sm:$0xff] }
  0x31   : > { %779 = vst.msk [vmem:[#allocation2 + $0xa8] sm:$0xff] %vm759_vm1, %v732_v37  ;;  %v3481_v17 = vld [vmem:[#allocation2 + $0xb1] sm:$0xff]  ;;  %v3615_v5 = vld [vmem:[#allocation2 + $0x80] sm:$0xff] }
  0x32   : > { %789 = vst.msk [vmem:[#allocation2 + $0xf8] sm:$0xff] %vm759_vm1, %v627_v41  ;;  %v3621_v7 = vld [vmem:[#allocation2 + $0x62] sm:$0xff]  ;;  %v3661_v22 = vld [vmem:[#allocation2 + $0x9a] sm:$0xff]  ;;  %v3665_v24 = vld [vmem:[#allocation2 + $0x92] sm:$0xff] }
  0x33   : > { %790 = vst.msk [vmem:[#allocation2 + $0x100] sm:$0x3] %vm762_vm2, %v751_v44  ;;  %v935_v21 = vld [vmem:[#allocation2 + $0xc1] sm:$0xff] }
  0x34   : > { %791 = vst.msk [vmem:[#allocation2 + $0x108] sm:$0xff] %vm759_vm1, %v736_v45  ;;  %v3461_v63 = vld [vmem:[#allocation2 + $0x81] sm:$0xff] }
  0x35   : > { %792 = vst.msk [vmem:[#allocation2 + $0x110] sm:$0xff] %vm759_vm1, %v630_v46  ;;  %v3552_v46 = vld [vmem:[#allocation2 + $0x30] sm:$0xff]  ;;  %v3663_v23 = vld [vmem:[#allocation2 + $0xc8] sm:$0xff] }
  0x36   : > { %1001 = vrot.lane.b32.xlu0 %v928_v47, %s3233_s14  ;;  %784 = vst.msk [vmem:[#allocation2 + $0xd0] sm:$0x3] %vm762_vm2, %v749_v48  ;;  %v3501_v32 = vld [vmem:[#allocation2 + $0xd9] sm:$0xff]  ;;  %v3688_v35 = vld [vmem:[#allocation2 + $0xc2] sm:$0xff] }
  0x37   : > { %999 = vrot.lane.b32.xlu2 %v3440_v49, %s3233_s14  ;;  %794 = vst.msk [vmem:[#allocation2 + $0x120] sm:$0xff] %vm759_vm1, %v737_v58  ;;  %v3506_v34 = vld [vmem:[#allocation2 + $0xe1] sm:$0xff] }
  0x38   : > { %1003 = vrot.lane.b32.xlu1 %v929_v52, %s3233_s14  ;;  %795 = vst.msk [vmem:[#allocation2 + $0x128] sm:$0xff] %vm759_vm1, %v633_v57  ;;  %v3484_v18 = vld [vmem:[#allocation2 + $0xa9] sm:$0xff]  ;;  %v3569_v52 = vld [vmem:[#allocation2 + $0x18] sm:$0xff]  ;;  %v3584_v58 = vld [vmem:[#allocation2 + $0x20] sm:$0xff] }
  0x39   : > { %796 = vst.msk [vmem:[#allocation2 + $0x130] sm:$0x3] %vm762_vm2, %v753_v59  ;;  %v856_v57 = vld [vmem:[#allocation2 + $0x8] sm:$0xff]  ;;  %v3588_v59 = vld [vmem:[#allocation2 + $0x32] sm:$0xff] }
  0x3a   : > { %788 = vst.msk [vmem:[#allocation2 + $0xf0] sm:$0xff] %vm759_vm1, %v735_v61  ;;  %v3516_v37 = vld [vmem:[#allocation2 + $0xf9] sm:$0xff]  ;;  %v3592_v61 = vld [vmem:[#allocation2 + $0x22] sm:$0xff]  ;;  %v3669_v25 = vld [vmem:[#allocation2 + $0xaa] sm:$0xff] }
  0x3b   : > { %798 = vst.msk [vmem:[#allocation2 + $0x140] sm:$0xff] %vm759_vm1, %v636_v11  ;;  %v3636_v11 = vld [vmem:[#allocation2 + $0x7a] sm:$0xff] }
  0x3c   : > { %799 = vst.msk [vmem:[#allocation2 + $0x148] sm:$0x3] %vm762_vm2, %v754_v12  ;;  %v3520_v39 = vld [vmem:[#allocation2 + $0x109] sm:$0xff] }
  0x3d   : > { %800 = vst.msk [vmem:[#allocation2 + $0x150] sm:$0xff] %vm759_vm1, %v739_v15  ;;  %v3504_v33 = vld [vmem:[#allocation2 + $0xc9] sm:$0xff] }
  0x3e   : > { %1007 = vrot.lane.b32.xlu0 %v3458_v62, %s3233_s14  ;;  %801 = vst.msk [vmem:[#allocation2 + $0x158] sm:$0xff] %vm759_vm1, %v639_v14  ;;  %v3640_v12 = vld [vmem:[#allocation2 + $0xa8] sm:$0xff] }
  0x3f   : > { %1005 = vrot.lane.b32.xlu2 %v3461_v63, %s3233_s14  ;;  %793 = vst.msk [vmem:[#allocation2 + $0x118] sm:$0x3] %vm762_vm2, %v752_v16  ;;  %v3528_v40 = vld [vmem:[#allocation2 + $0x121] sm:$0xff] }
  0x40   : > { %1009 = vrot.lane.b32.xlu1 %v932_v2, %s3233_s14  ;;  %803 = vst.msk [vmem:[#allocation2 + $0x168] sm:$0xff] %vm759_vm1, %v740_v28  ;;  %v3532_v42 = vld [vmem:[#allocation2 + $0x129] sm:$0xff] }
  0x41   : > { %804 = vst.msk [vmem:[#allocation2 + $0x170] sm:$0xff] %vm759_vm1, %v642_v27  ;;  %v3518_v38 = vld [vmem:[#allocation2 + $0xf1] sm:$0xff]  ;;  %v3646_v14 = vld [vmem:[#allocation2 + $0x82] sm:$0xff] }
  0x42   : > { %805 = vst.msk [vmem:[#allocation2 + $0x178] sm:$0x3] %vm762_vm2, %v756_v29  ;;  %v3682_v29 = vld [vmem:[#allocation2 + $0xb0] sm:$0xff] }
  0x43   : > { %797 = vst.msk [vmem:[#allocation2 + $0x138] sm:$0xff] %vm759_vm1, %v738_v31  ;;  %v3540_v43 = vld [vmem:[#allocation2 + $0x141] sm:$0xff] }
  0x44   : > { %802 = vst.msk [vmem:[#allocation2 + $0x160] sm:$0x3] %vm762_vm2, %v755_v36  ;;  %v3685_v31 = vld [vmem:[#allocation2 + $0xc0] sm:$0xff]  ;;  %v3690_v36 = vld [vmem:[#allocation2 + $0xf0] sm:$0xff] }
  0x45   : > { %v3544_v45 = vld [vmem:[#allocation2 + $0x151] sm:$0xff]  ;;  %891 = vst.msk [vmem:[#allocation3 + $0x20] sm:$0xff] %vm759_vm1, %v3552_v46 }
  0x46   : > { %1013 = vrot.lane.b32.xlu0 %v3481_v17, %s3233_s14  ;;  %v3530_v41 = vld [vmem:[#allocation2 + $0x111] sm:$0xff]  ;;  %887 = vst.msk [vmem:[#allocation3] sm:$0xff] %vm759_vm1, %v855_v51 }
  0x47   : > { %1011 = vrot.lane.b32.xlu2 %v3484_v18, %s3233_s14  ;;  %889 = vst.msk [vmem:[#allocation3 + $0x10] sm:$0xff] %vm759_vm1, %v3569_v52  ;;  %v3692_v51 = vld [vmem:[#allocation2 + $0xb2] sm:$0xff] }
  0x48   : > { %1015 = vrot.lane.b32.xlu1 %v935_v21, %s3233_s14  ;;  %v3556_v47 = vld [vmem:[#allocation2 + $0x169] sm:$0xff]  ;;  %892 = vst.msk [vmem:[#allocation3 + $0x28] sm:$0xff] %vm759_vm1, %v3573_v54  ;;  %v3658_v21 = vld [vmem:[#allocation2 + $0x98] sm:$0xff] }
  0x49   : > { %v3560_v50 = vld [vmem:[#allocation2 + $0x171] sm:$0xff]  ;;  %888 = vst.msk [vmem:[#allocation3 + $0x8] sm:$0xff] %vm759_vm1, %v856_v57 }
  0x4a   : > { %v3542_v44 = vld [vmem:[#allocation2 + $0x139] sm:$0xff]  ;;  %890 = vst.msk [vmem:[#allocation3 + $0x18] sm:$0xff] %vm759_vm1, %v3584_v58 }
  0x4b   : > { %v3558_v48 = vld [vmem:[#allocation2 + $0x159] sm:$0xff]  ;;  %895 = vst.msk [vmem:[#allocation3 + $0x40] sm:$0xff] %vm759_vm1, %v3590_v60 }
  0x4c   : > { %893 = vst.msk [vmem:[#allocation3 + $0x30] sm:$0xff] %vm759_vm1, %v3604_v1 }
  0x4d   : > { %894 = vst.msk [vmem:[#allocation3 + $0x38] sm:$0xff] %vm759_vm1, %v3608_v3 }
  0x4e   : > { %1019 = vrot.lane.b32.xlu0 %v3501_v32, %s3233_s14  ;;  %898 = vst.msk [vmem:[#allocation3 + $0x58] sm:$0xff] %vm759_vm1, %v3615_v5 }
  0x4f   : > { %1017 = vrot.lane.b32.xlu2 %v3504_v33, %s3233_s14  ;;  %4725 = vst [vmem:[#allocation4_spill] sm:$0xff] %v3621_v7 }
  0x50   : > { %1021 = vrot.lane.b32.xlu1 %v3506_v34, %s3233_s14  ;;  %896 = vst.msk [vmem:[#allocation3 + $0x48] sm:$0xff] %vm759_vm1, %v3629_v8 }
  0x51   : > { %4726 = vst [vmem:[#allocation5_spill] sm:$0xff] %v3636_v11 }
  0x52   : > { %897 = vst.msk [vmem:[#allocation3 + $0x50] sm:$0xff] %vm759_vm1, %v3633_v10 }
  0x53   : > { %4727 = vst [vmem:[#allocation6_spill] sm:$0xff] %v3642_v13 }
  0x54   : > { %901 = vst.msk [vmem:[#allocation3 + $0x70] sm:$0xff] %vm759_vm1, %v3640_v12 }
  0x55   : > { %4728 = vst [vmem:[#allocation7_spill] sm:$0xff] %v3646_v14 }
  0x56   : > { %1025 = vrot.lane.b32.xlu0 %v3516_v37, %s3233_s14  ;;  %4729 = vst [vmem:[#allocation8_spill] sm:$0xff] %v3661_v22 }
  0x57   : > { %1023 = vrot.lane.b32.xlu2 %v3518_v38, %s3233_s14  ;;  %4730 = vst [vmem:[#allocation9_spill] sm:$0xff] %v3665_v24 }
  0x58   : > { %1027 = vrot.lane.b32.xlu1 %v3520_v39, %s3233_s14  ;;  %899 = vst.msk [vmem:[#allocation3 + $0x60] sm:$0xff] %vm759_vm1, %v3655_v19 }
  0x59   : > { %4731 = vst [vmem:[#allocation10_spill] sm:$0xff] %v3669_v25 }
  0x5a   : > { %900 = vst.msk [vmem:[#allocation3 + $0x68] sm:$0xff] %vm759_vm1, %v3658_v21 }
  0x5b   : > { %904 = vst.msk [vmem:[#allocation3 + $0x88] sm:$0xff] %vm759_vm1, %v3663_v23 }
  0x5c   : > { %4732 = vst [vmem:[#allocation11_spill] sm:$0xff] %v3688_v35 }
  0x5d   : > { %4733 = vst [vmem:[#allocation12_spill] sm:$0xff] %v3692_v51 }
  0x5e   : > { %1031 = vrot.lane.b32.xlu0 %v3528_v40, %s3233_s14  ;;  %902 = vst.msk [vmem:[#allocation3 + $0x78] sm:$0xff] %vm759_vm1, %v3682_v29 }
  0x5f   : > { %1029 = vrot.lane.b32.xlu2 %v3530_v41, %s3233_s14  ;;  %903 = vst.msk [vmem:[#allocation3 + $0x80] sm:$0xff] %vm759_vm1, %v3685_v31 }
  0x60   : > { %1033 = vrot.lane.b32.xlu1 %v3532_v42, %s3233_s14  ;;  %907 = vst.msk [vmem:[#allocation3 + $0xa0] sm:$0xff] %vm759_vm1, %v3690_v36 }
  0x66   : > { %1037 = vrot.lane.b32.xlu0 %v3540_v43, %s3233_s14 }
  0x67   : > { %1035 = vrot.lane.b32.xlu2 %v3542_v44, %s3233_s14 }
  0x68   : > { %1039 = vrot.lane.b32.xlu1 %v3544_v45, %s3233_s14 }
  0x6e   : > { %1043 = vrot.lane.b32.xlu0 %v3556_v47, %s3233_s14 }
  0x6f   : > { %1041 = vrot.lane.b32.xlu2 %v3558_v48, %s3233_s14 }
  0x70   : > { %1045 = vrot.lane.b32.xlu1 %v3560_v50, %s3233_s14 }
  0x76   : > { %1178 = vrot.lane.b32.xlu0 %v1113_v53, %s3234_s15  ;;  %v3696_v53 = vld [vmem:[#allocation2 + $0xca] sm:$0xff] }
  0x77   : > { %1176 = vrot.lane.b32.xlu2 %v1112_v55, %s3234_s15  ;;  %4734 = vst [vmem:[#allocation13_spill] sm:$0xff] %v3696_v53 }
  0x78   : > { %1180 = vrot.lane.b32.xlu1 %v3577_v56, %s3234_s15 }
  0x7e   : > { %1184 = vrot.lane.b32.xlu0 %v3588_v59, %s3234_s15 }
  0x7f   : > { %1182 = vrot.lane.b32.xlu2 %v3592_v61, %s3234_s15 }
  0x80   : > { %1186 = vrot.lane.b32.xlu1 %v3596_v0, %s3234_s15 }
  0x81   : > { %v992_v2 = vpop.permute.xlu2 %991 }
  0x82   : > { %1084 = vst.msk [vmem:[#allocation3 + $0x20] sm:$0xff] %vm1079_vm3, %v992_v2  ;;  %v3709_v2 = vld [vmem:[#allocation2 + $0xd8] sm:$0xff] }
  0x83   : > { %905 = vst.msk [vmem:[#allocation3 + $0x90] sm:$0xff] %vm759_vm1, %v3709_v2 }
  0x86   : > { %1190 = vrot.lane.b32.xlu0 %v3611_v4, %s3234_s15 }
  0x87   : > { %1188 = vrot.lane.b32.xlu2 %v3617_v6, %s3234_s15 }
  0x88   : > { %1192 = vrot.lane.b32.xlu1 %v3621_v7, %s3234_s15  ;;  %v3816_v7 = vld [vmem:[#allocation2 + $0x170] sm:$0xff] }
  0x89   : > { %v994_v9 = vpop.permute.xlu2 %993  ;;  %918 = vst.msk [vmem:[#allocation3 + $0xf8] sm:$0xff] %vm759_vm1, %v3816_v7 }
  0x8a   : > { %1085 = vst.msk [vmem:[#allocation3 + $0x28] sm:$0xff] %vm1079_vm3, %v994_v9 }
  0x8e   : > { %1196 = vrot.lane.b32.xlu0 %v3636_v11, %s3234_s15  ;;  %v3798_v11 = vld [vmem:[#allocation2 + $0x142] sm:$0xff] }
  0x8f   : > { %1194 = vrot.lane.b32.xlu2 %v3642_v13, %s3234_s15  ;;  %v3819_v13 = vld [vmem:[#allocation2 + $0x16a] sm:$0xff] }
  0x90   : > { %1198 = vrot.lane.b32.xlu1 %v3646_v14, %s3234_s15  ;;  %v984_v15 = vpop.permute.xlu0 %983 }
  0x91   : > { %1080 = vst.msk [vmem:[#allocation3] sm:$0xff] %vm1079_vm3, %v984_v15  ;;  %v1000_v16 = vpop.permute.xlu2 %999  ;;  %v3712_v15 = vld [vmem:[#allocation2 + $0xe0] sm:$0xff] }
  0x92   : > { %v988_v20 = vpop.permute.xlu1 %987  ;;  %1088 = vst.msk [vmem:[#allocation3 + $0x40] sm:$0xff] %vm1079_vm3, %v1000_v16  ;;  %v3715_v16 = vld [vmem:[#allocation2 + $0xe2] sm:$0xff] }
  0x93   : > { %1082 = vst.msk [vmem:[#allocation3 + $0x10] sm:$0xff] %vm1079_vm3, %v988_v20  ;;  %v3717_v20 = vld [vmem:[#allocation2 + $0x110] sm:$0xff] }
  0x94   : > { %4735 = vst [vmem:[#allocation14_spill] sm:$0xff] %v3715_v16 }
  0x95   : > { %906 = vst.msk [vmem:[#allocation3 + $0x98] sm:$0xff] %vm759_vm1, %v3712_v15 }
  0x96   : > { %1202 = vrot.lane.b32.xlu0 %v3661_v22, %s3234_s15  ;;  %910 = vst.msk [vmem:[#allocation3 + $0xb8] sm:$0xff] %vm759_vm1, %v3717_v20  ;;  %v3771_v22 = vld [vmem:[#allocation2 + $0x158] sm:$0xff] }
  0x97   : > { %1200 = vrot.lane.b32.xlu2 %v3665_v24, %s3234_s15  ;;  %916 = vst.msk [vmem:[#allocation3 + $0xe8] sm:$0xff] %vm759_vm1, %v3771_v22  ;;  %v3793_v24 = vld [vmem:[#allocation2 + $0x150] sm:$0xff] }
  0x98   : > { %1204 = vrot.lane.b32.xlu1 %v3669_v25, %s3234_s15  ;;  %v986_v27 = vpop.permute.xlu0 %985  ;;  %915 = vst.msk [vmem:[#allocation3 + $0xe0] sm:$0xff] %vm759_vm1, %v3793_v24 }
  0x99   : > { %1081 = vst.msk [vmem:[#allocation3 + $0x8] sm:$0xff] %vm1079_vm3, %v986_v27  ;;  %v1006_v28 = vpop.permute.xlu2 %1005  ;;  %v3719_v27 = vld [vmem:[#allocation2 + $0xda] sm:$0xff] }
  0x9a   : > { %v990_v30 = vpop.permute.xlu1 %989  ;;  %1091 = vst.msk [vmem:[#allocation3 + $0x58] sm:$0xff] %vm1079_vm3, %v1006_v28  ;;  %v3723_v28 = vld [vmem:[#allocation2 + $0xf2] sm:$0xff] }
  0x9b   : > { %1083 = vst.msk [vmem:[#allocation3 + $0x18] sm:$0xff] %vm1079_vm3, %v990_v30 }
  0x9c   : > { %4736 = vst [vmem:[#allocation15_spill] sm:$0xff] %v3719_v27 }
  0x9d   : > { %4737 = vst [vmem:[#allocation16_spill] sm:$0xff] %v3723_v28 }
  0x9e   : > { %1208 = vrot.lane.b32.xlu0 %v3688_v35, %s3234_s15  ;;  %v3744_v35 = vld [vmem:[#allocation2 + $0x138] sm:$0xff] }
  0x9f   : > { %1206 = vrot.lane.b32.xlu2 %v3692_v51, %s3234_s15  ;;  %913 = vst.msk [vmem:[#allocation3 + $0xd0] sm:$0xff] %vm759_vm1, %v3744_v35  ;;  %v3766_v51 = vld [vmem:[#allocation2 + $0x128] sm:$0xff] }
  0xa0   : > { %1210 = vrot.lane.b32.xlu1 %v3696_v53, %s3234_s15  ;;  %v996_v55 = vpop.permute.xlu0 %995  ;;  %v3739_v53 = vld [vmem:[#allocation2 + $0x108] sm:$0xff]  ;;  %912 = vst.msk [vmem:[#allocation3 + $0xc8] sm:$0xff] %vm759_vm1, %v3766_v51 }
  0xa1   : > { %1086 = vst.msk [vmem:[#allocation3 + $0x30] sm:$0xff] %vm1079_vm3, %v996_v55  ;;  %v1012_v57 = vpop.permute.xlu2 %1011 }
  0xa2   : > { %v998_v9 = vpop.permute.xlu1 %997  ;;  %1094 = vst.msk [vmem:[#allocation3 + $0x70] sm:$0xff] %vm1079_vm3, %v1012_v57  ;;  %v3736_v57 = vld [vmem:[#allocation2 + $0xf8] sm:$0xff] }
  0xa3   : > { %1087 = vst.msk [vmem:[#allocation3 + $0x38] sm:$0xff] %vm1079_vm3, %v998_v9 }
  0xa4   : > { %908 = vst.msk [vmem:[#allocation3 + $0xa8] sm:$0xff] %vm759_vm1, %v3736_v57 }
  0xa5   : > { %909 = vst.msk [vmem:[#allocation3 + $0xb0] sm:$0xff] %vm759_vm1, %v3739_v53 }
  0xa6   : > { %1214 = vrot.lane.b32.xlu0 %v3715_v16, %s3234_s15  ;;  %v3742_v16 = vld [vmem:[#allocation2 + $0x10a] sm:$0xff] }
  0xa7   : > { %1212 = vrot.lane.b32.xlu2 %v3719_v27, %s3234_s15  ;;  %4738 = vst [vmem:[#allocation17_spill] sm:$0xff] %v3742_v16  ;;  %v3746_v27 = vld [vmem:[#allocation2 + $0xfa] sm:$0xff] }
  0xa8   : > { %1216 = vrot.lane.b32.xlu1 %v3723_v28, %s3234_s15  ;;  %v1002_v30 = vpop.permute.xlu0 %1001  ;;  %4739 = vst [vmem:[#allocation18_spill] sm:$0xff] %v3746_v27  ;;  %v3763_v28 = vld [vmem:[#allocation2 + $0x120] sm:$0xff] }
  0xa9   : > { %1089 = vst.msk [vmem:[#allocation3 + $0x48] sm:$0xff] %vm1079_vm3, %v1002_v30  ;;  %v1018_v55 = vpop.permute.xlu2 %1017  ;;  %v3750_v30 = vld [vmem:[#allocation2 + $0x112] sm:$0xff] }
  0xaa   : > { %v1004_v9 = vpop.permute.xlu1 %1003  ;;  %1097 = vst.msk [vmem:[#allocation3 + $0x88] sm:$0xff] %vm1079_vm3, %v1018_v55 }
  0xab   : > { %1090 = vst.msk [vmem:[#allocation3 + $0x50] sm:$0xff] %vm1079_vm3, %v1004_v9 }
  0xac   : > { %4740 = vst [vmem:[#allocation19_spill] sm:$0xff] %v3750_v30 }
  0xad   : > { %911 = vst.msk [vmem:[#allocation3 + $0xc0] sm:$0xff] %vm759_vm1, %v3763_v28 }
  0xae   : > { %1220 = vrot.lane.b32.xlu0 %v3742_v16, %s3234_s15  ;;  %v3769_v16 = vld [vmem:[#allocation2 + $0x12a] sm:$0xff] }
  0xaf   : > { %1218 = vrot.lane.b32.xlu2 %v3746_v27, %s3234_s15  ;;  %4741 = vst [vmem:[#allocation20_spill] sm:$0xff] %v3769_v16  ;;  %v3773_v27 = vld [vmem:[#allocation2 + $0x122] sm:$0xff] }
  0xb0   : > { %1222 = vrot.lane.b32.xlu1 %v3750_v30, %s3234_s15  ;;  %v1008_v55 = vpop.permute.xlu0 %1007  ;;  %4742 = vst [vmem:[#allocation21_spill] sm:$0xff] %v3773_v27  ;;  %v3790_v30 = vld [vmem:[#allocation2 + $0x140] sm:$0xff] }
  0xb1   : > { %1092 = vst.msk [vmem:[#allocation3 + $0x60] sm:$0xff] %vm1079_vm3, %v1008_v55  ;;  %v1024_v9 = vpop.permute.xlu2 %1023  ;;  %v3777_v55 = vld [vmem:[#allocation2 + $0x13a] sm:$0xff] }
  0xb2   : > { %v1010_v25 = vpop.permute.xlu1 %1009  ;;  %1100 = vst.msk [vmem:[#allocation3 + $0xa0] sm:$0xff] %vm1079_vm3, %v1024_v9 }
  0xb3   : > { %1093 = vst.msk [vmem:[#allocation3 + $0x68] sm:$0xff] %vm1079_vm3, %v1010_v25 }
  0xb4   : > { %4743 = vst [vmem:[#allocation22_spill] sm:$0xff] %v3777_v55 }
  0xb5   : > { %914 = vst.msk [vmem:[#allocation3 + $0xd8] sm:$0xff] %vm759_vm1, %v3790_v30 }
  0xb6   : > { %1226 = vrot.lane.b32.xlu0 %v3769_v16, %s3234_s15  ;;  %v3796_v16 = vld [vmem:[#allocation2 + $0x152] sm:$0xff] }
  0xb7   : > { %1224 = vrot.lane.b32.xlu2 %v3773_v27, %s3234_s15  ;;  %4744 = vst [vmem:[#allocation23_spill] sm:$0xff] %v3796_v16 }
  0xb8   : > { %1228 = vrot.lane.b32.xlu1 %v3777_v55, %s3234_s15  ;;  %v1014_v25 = vpop.permute.xlu0 %1013  ;;  %v3802_v55 = vld [vmem:[#allocation2 + $0x15a] sm:$0xff] }
  0xb9   : > { %1095 = vst.msk [vmem:[#allocation3 + $0x78] sm:$0xff] %vm1079_vm3, %v1014_v25  ;;  %v1030_v9 = vpop.permute.xlu2 %1029 }
  0xba   : > { %v1016_v14 = vpop.permute.xlu1 %1015  ;;  %1103 = vst.msk [vmem:[#allocation3 + $0xb8] sm:$0xff] %vm1079_vm3, %v1030_v9  ;;  %v3813_v9 = vld [vmem:[#allocation2 + $0x168] sm:$0xff] }
  0xbb   : > { %1096 = vst.msk [vmem:[#allocation3 + $0x80] sm:$0xff] %vm1079_vm3, %v1016_v14 }
  0xbc   : > { %917 = vst.msk [vmem:[#allocation3 + $0xf0] sm:$0xff] %vm759_vm1, %v3813_v9 }
  0xbe   : > { %1232 = vrot.lane.b32.xlu0 %v3796_v16, %s3234_s15  ;;  %v1143_v16 = vld [vmem:[#allocation2 + $0x172] sm:$0xff] }
  0xbf   : > { %1230 = vrot.lane.b32.xlu2 %v3798_v11, %s3234_s15 }
  0xc0   : > { %1234 = vrot.lane.b32.xlu1 %v3802_v55, %s3234_s15  ;;  %v1020_v14 = vpop.permute.xlu0 %1019 }
  0xc1   : > { %1098 = vst.msk [vmem:[#allocation3 + $0x90] sm:$0xff] %vm1079_vm3, %v1020_v14  ;;  %v1036_v25 = vpop.permute.xlu2 %1035 }
  0xc2   : > { %v1022_v27 = vpop.permute.xlu1 %1021  ;;  %1106 = vst.msk [vmem:[#allocation3 + $0xd0] sm:$0xff] %vm1079_vm3, %v1036_v25 }
  0xc3   : > { %1099 = vst.msk [vmem:[#allocation3 + $0x98] sm:$0xff] %vm1079_vm3, %v1022_v27 }
  0xc6   : > { %1238 = vrot.lane.b32.xlu0 %v1143_v16, %s3234_s15 }
  0xc7   : > { %1236 = vrot.lane.b32.xlu2 %v3819_v13, %s3234_s15 }
  0xc8   : > { %1369 = vrot.lane.b32.xlu1 %v3569_v52, %s3235_s16  ;;  %v1026_v14 = vpop.permute.xlu0 %1025 }
  0xc9   : > { %1101 = vst.msk [vmem:[#allocation3 + $0xa8] sm:$0xff] %vm1079_vm3, %v1026_v14  ;;  %v1042_v27 = vpop.permute.xlu2 %1041 }
  0xca   : > { %v1028_v25 = vpop.permute.xlu1 %1027  ;;  %1109 = vst.msk [vmem:[#allocation3 + $0xe8] sm:$0xff] %vm1079_vm3, %v1042_v27  ;;  %v531_v27 = vld [vmem:[%s3317_s13 + $0xf0] sm:$0xff] }
  0xcb   : > { %1102 = vst.msk [vmem:[#allocation3 + $0xb0] sm:$0xff] %vm1079_vm3, %v1028_v25  ;;  %v564_v25 = vrot.slane %v531_v27, 1 }
  0xce   : > { %1373 = vrot.lane.b32.xlu0 %v3552_v46, %s3235_s16 }
  0xcf   : > { %1371 = vrot.lane.b32.xlu2 %v3584_v58, %s3235_s16 }
  0xd0   : > { %1375 = vrot.lane.b32.xlu1 %v3573_v54, %s3235_s16  ;;  %v1032_v52 = vpop.permute.xlu0 %1031 }
  0xd1   : > { %1104 = vst.msk [vmem:[#allocation3 + $0xc0] sm:$0xff] %vm1079_vm3, %v1032_v52  ;;  %v1177_v16 = vpop.permute.xlu2 %1176  ;;  %v643_v52 = vrot.slane %v531_v27, 7  ;;  %v3941_v27 = vld [vmem:[#allocation2 + $0x49] sm:$0xff] }
  0xd2   : > { %v1034_v14 = vpop.permute.xlu1 %1033  ;;  %1273 = vst.msk [vmem:[#allocation3] sm:$0xff] %vm1272_vm4, %v1177_v16 }
  0xd3   : > { %1105 = vst.msk [vmem:[#allocation3 + $0xc8] sm:$0xff] %vm1079_vm3, %v1034_v14  ;;  %v3893_v14 = vld [vmem:[%s3317_s13 + $0xf8] sm:$0xff]  ;;  %s3158_s13 = sadd.s32 128, %s3307_s29  ;;  %s3115_s29 = sshll.u32 %s4770_s27, 1 }
  0xd6   : > { %1379 = vrot.lane.b32.xlu0 %v3608_v3, %s3235_s16 }
  0xd7   : > { %1377 = vrot.lane.b32.xlu2 %v3604_v1, %s3235_s16 }
  0xd8   : > { %1381 = vrot.lane.b32.xlu1 %v3590_v60, %s3235_s16  ;;  %v1038_v46 = vpop.permute.xlu0 %1037 }
  0xd9   : > { %1107 = vst.msk [vmem:[#allocation3 + $0xd8] sm:$0xff] %vm1079_vm3, %v1038_v46  ;;  %v1183_v54 = vpop.permute.xlu2 %1182 }
  0xda   : > { %v1040_v58 = vpop.permute.xlu1 %1039  ;;  %1276 = vst.msk [vmem:[#allocation3 + $0x18] sm:$0xff] %vm1272_vm4, %v1183_v54 }
  0xdb   : > { %1108 = vst.msk [vmem:[#allocation3 + $0xe0] sm:$0xff] %vm1079_vm3, %v1040_v58 }
  0xde   : > { %1385 = vrot.lane.b32.xlu0 %v3633_v10, %s3235_s16 }
  0xdf   : > { %1383 = vrot.lane.b32.xlu2 %v3629_v8, %s3235_s16 }
  0xe0   : > { %1387 = vrot.lane.b32.xlu1 %v3615_v5, %s3235_s16  ;;  %v1044_v60 = vpop.permute.xlu0 %1043 }
  0xe1   : > { %1110 = vst.msk [vmem:[#allocation3 + $0xf0] sm:$0xff] %vm1079_vm3, %v1044_v60  ;;  %v1189_v1 = vpop.permute.xlu2 %1188 }
  0xe2   : > { %v1046_v3 = vpop.permute.xlu1 %1045  ;;  %1279 = vst.msk [vmem:[#allocation3 + $0x30] sm:$0xff] %vm1272_vm4, %v1189_v1  ;;  %v1498_v1 = vld [vmem:[#allocation2 + $0x19] sm:$0xff] }
  0xe3   : > { %1111 = vst.msk [vmem:[#allocation3 + $0xf8] sm:$0xff] %vm1079_vm3, %v1046_v3 }
  0xe6   : > { %1391 = vrot.lane.b32.xlu0 %v3658_v21, %s3235_s16 }
  0xe7   : > { %1389 = vrot.lane.b32.xlu2 %v3655_v19, %s3235_s16 }
  0xe8   : > { %1393 = vrot.lane.b32.xlu1 %v3640_v12, %s3235_s16  ;;  %v1179_v5 = vpop.permute.xlu0 %1178  ;;  %v741_v12 = vsel %vm597_vm0, %v564_v25, %v643_v52 }
  0xe9   : > { %1274 = vst.msk [vmem:[#allocation3 + $0x8] sm:$0xff] %vm1272_vm4, %v1179_v5  ;;  %v1195_v8 = vpop.permute.xlu2 %1194  ;;  %v1499_v5 = vld [vmem:[#allocation2 + $0x21] sm:$0xff] }
  0xea   : > { %v1181_v10 = vpop.permute.xlu1 %1180  ;;  %1282 = vst.msk [vmem:[#allocation3 + $0x48] sm:$0xff] %vm1272_vm4, %v1195_v8 }
  0xeb   : > { %1275 = vst.msk [vmem:[#allocation3 + $0x10] sm:$0xff] %vm1272_vm4, %v1181_v10  ;;  %v3939_v10 = vld [vmem:[#allocation2 + $0x31] sm:$0xff] }
  0xec   : > { %806 = vst.msk [vmem:[#allocation2 + $0x180] sm:$0xff] %vm759_vm1, %v741_v12 }
  0xee   : > { %1397 = vrot.lane.b32.xlu0 %v3685_v31, %s3235_s16 }
  0xef   : > { %1395 = vrot.lane.b32.xlu2 %v3682_v29, %s3235_s16 }
  0xf0   : > { %1399 = vrot.lane.b32.xlu1 %v3663_v23, %s3235_s16  ;;  %v1185_v19 = vpop.permute.xlu0 %1184 }
  0xf1   : > { %1277 = vst.msk [vmem:[#allocation3 + $0x20] sm:$0xff] %vm1272_vm4, %v1185_v19  ;;  %v1201_v21 = vpop.permute.xlu2 %1200  ;;  %v3952_v19 = vld [vmem:[#allocation2 + $0x51] sm:$0xff] }
  0xf2   : > { %v1187_v16 = vpop.permute.xlu1 %1186  ;;  %1285 = vst.msk [vmem:[#allocation3 + $0x60] sm:$0xff] %vm1272_vm4, %v1201_v21  ;;  %v3954_v21 = vld [vmem:[#allocation2 + $0x69] sm:$0xff] }
  0xf3   : > { %1278 = vst.msk [vmem:[#allocation3 + $0x28] sm:$0xff] %vm1272_vm4, %v1187_v16  ;;  %v1335_v58 = vld [vmem:[#allocation2 + $0x180] sm:$0xff] }
  0xf6   : > { %1403 = vrot.lane.b32.xlu0 %v3712_v15, %s3235_s16 }
  0xf7   : > { %1401 = vrot.lane.b32.xlu2 %v3709_v2, %s3235_s16  ;;  %v644_v2 = vrot.slane %v3893_v14, 7 }
  0xf8   : > { %1405 = vrot.lane.b32.xlu1 %v3690_v36, %s3235_s16  ;;  %v1191_v23 = vpop.permute.xlu0 %1190 }
  0xf9   : > { %1280 = vst.msk [vmem:[#allocation3 + $0x38] sm:$0xff] %vm1272_vm4, %v1191_v23  ;;  %v1207_v29 = vpop.permute.xlu2 %1206  ;;  %v645_v46 = vsel %vm597_vm0, %v643_v52, %v644_v2 }
  0xfa   : > { %v1193_v31 = vpop.permute.xlu1 %1192  ;;  %1288 = vst.msk [vmem:[#allocation3 + $0x78] sm:$0xff] %vm1272_vm4, %v1207_v29  ;;  %v3965_v29 = vld [vmem:[#allocation2 + $0x79] sm:$0xff] }
  0xfb   : > { %1281 = vst.msk [vmem:[#allocation3 + $0x40] sm:$0xff] %vm1272_vm4, %v1193_v31 }
  0xfc   : > { %807 = vst.msk [vmem:[#allocation2 + $0x188] sm:$0xff] %vm759_vm1, %v645_v46 }
  0xfe   : > { %1409 = vrot.lane.b32.xlu0 %v3739_v53, %s3235_s16 }
  0xff   : > { %1407 = vrot.lane.b32.xlu2 %v3736_v57, %s3235_s16 }
 0x100   : > { %1411 = vrot.lane.b32.xlu1 %v3717_v20, %s3235_s16  ;;  %v1197_v36 = vpop.permute.xlu0 %1196 }
 0x101   : > { %1283 = vst.msk [vmem:[#allocation3 + $0x50] sm:$0xff] %vm1272_vm4, %v1197_v36  ;;  %v1213_v15 = vpop.permute.xlu2 %1212 }
 0x102   : > { %v1199_v54 = vpop.permute.xlu1 %1198  ;;  %1291 = vst.msk [vmem:[#allocation3 + $0x90] sm:$0xff] %vm1272_vm4, %v1213_v15  ;;  %v3976_v15 = vld [vmem:[#allocation2 + $0x99] sm:$0xff] }
 0x103   : > { %1284 = vst.msk [vmem:[#allocation3 + $0x58] sm:$0xff] %vm1272_vm4, %v1199_v54  ;;  %v1336_v3 = vld [vmem:[#allocation2 + $0x188] sm:$0xff] }
 0x104   : > { %v3987_v54 = vld [vmem:[#allocation2 + $0xc1] sm:$0xff] }
 0x106   : > { %1415 = vrot.lane.b32.xlu0 %v3766_v51, %s3235_s16 }
 0x107   : > { %1413 = vrot.lane.b32.xlu2 %v3763_v28, %s3235_s16 }
 0x108   : > { %1417 = vrot.lane.b32.xlu1 %v3744_v35, %s3235_s16  ;;  %v1203_v53 = vpop.permute.xlu0 %1202 }
 0x109   : > { %1286 = vst.msk [vmem:[#allocation3 + $0x68] sm:$0xff] %vm1272_vm4, %v1203_v53  ;;  %v1219_v20 = vpop.permute.xlu2 %1218  ;;  %v709_v53 = vrot.slane %v3893_v14, 5 }
 0x10a   : > { %v1205_v57 = vpop.permute.xlu1 %1204  ;;  %1294 = vst.msk [vmem:[#allocation3 + $0xa8] sm:$0xff] %vm1272_vm4, %v1219_v20 }
 0x10b   : > { %1287 = vst.msk [vmem:[#allocation3 + $0x70] sm:$0xff] %vm1272_vm4, %v1205_v57 }
 0x10e   : > { %1421 = vrot.lane.b32.xlu0 %v3793_v24, %s3235_s16 }
 0x10f   : > { %1419 = vrot.lane.b32.xlu2 %v3790_v30, %s3235_s16 }
 0x110   : > { %1423 = vrot.lane.b32.xlu1 %v3771_v22, %s3235_s16  ;;  %v1209_v51 = vpop.permute.xlu0 %1208 }
 0x111   : > { %1289 = vst.msk [vmem:[#allocation3 + $0x80] sm:$0xff] %vm1272_vm4, %v1209_v51  ;;  %v1225_v35 = vpop.permute.xlu2 %1224 }
 0x112   : > { %v1211_v28 = vpop.permute.xlu1 %1210  ;;  %1297 = vst.msk [vmem:[#allocation3 + $0xc0] sm:$0xff] %vm1272_vm4, %v1225_v35 }
 0x113   : > { %1290 = vst.msk [vmem:[#allocation3 + $0x88] sm:$0xff] %vm1272_vm4, %v1211_v28 }
 0x116   : > { %1427 = vrot.lane.b32.xlu0 %v3816_v7, %s3235_s16 }
 0x117   : > { %1425 = vrot.lane.b32.xlu2 %v3813_v9, %s3235_s16 }
 0x118   : > { %1429 = vrot.lane.b32.xlu1 %v1335_v58, %s3235_s16  ;;  %v1215_v30 = vpop.permute.xlu0 %1214  ;;  %v4745_v58 = vld [vmem:[#allocation6_spill] sm:$0xff] }
 0x119   : > { %1292 = vst.msk [vmem:[#allocation3 + $0x98] sm:$0xff] %vm1272_vm4, %v1215_v30  ;;  %v1231_v22 = vpop.permute.xlu2 %1230 }
 0x11a   : > { %v1217_v60 = vpop.permute.xlu1 %1216  ;;  %1300 = vst.msk [vmem:[#allocation3 + $0xd8] sm:$0xff] %vm1272_vm4, %v1231_v22 }
 0x11b   : > { %1293 = vst.msk [vmem:[#allocation3 + $0xa0] sm:$0xff] %vm1272_vm4, %v1217_v60  ;;  %v4748_v60 = vld [vmem:[#allocation9_spill] sm:$0xff] }
 0x11e   : > { %1562 = vrot.lane.b32.xlu0 %v1498_v1, %s3236_s17  ;;  %v4749_v1 = vld [vmem:[#allocation7_spill] sm:$0xff] }
 0x11f   : > { %1431 = vrot.lane.b32.xlu2 %v1336_v3, %s3235_s16  ;;  %v4750_v3 = vld [vmem:[#allocation8_spill] sm:$0xff]  ;;  %s478_s16 = scalar_lea.vmem %s4698_s2, %s3158_s13 }
 0x120   : > { %1564 = vrot.lane.b32.xlu1 %v1499_v5, %s3236_s17  ;;  %v1221_v7 = vpop.permute.xlu0 %1220 }
 0x121   : > { %1295 = vst.msk [vmem:[#allocation3 + $0xb0] sm:$0xff] %vm1272_vm4, %v1221_v7  ;;  %v1237_v9 = vpop.permute.xlu2 %1236 }
 0x122   : > { %v1223_v8 = vpop.permute.xlu1 %1222  ;;  %1303 = vst.msk [vmem:[#allocation3 + $0xf0] sm:$0xff] %vm1272_vm4, %v1237_v9 }
 0x123   : > { %1296 = vst.msk [vmem:[#allocation3 + $0xb8] sm:$0xff] %vm1272_vm4, %v1223_v8  ;;  %v4751_v8 = vld [vmem:[#allocation12_spill] sm:$0xff] }
 0x126   : > { %1568 = vrot.lane.b32.xlu0 %v3408_v26, %s3236_s17 }
 0x127   : > { %1566 = vrot.lane.b32.xlu2 %v3939_v10, %s3236_s17 }
 0x128   : > { %1570 = vrot.lane.b32.xlu1 %v3941_v27, %s3236_s17  ;;  %v1227_v25 = vpop.permute.xlu0 %1226 }
 0x129   : > { %1298 = vst.msk [vmem:[#allocation3 + $0xc8] sm:$0xff] %vm1272_vm4, %v1227_v25  ;;  %v1372_v52 = vpop.permute.xlu2 %1371  ;;  %v4752_v25 = vld [vmem:[#allocation10_spill] sm:$0xff] }
 0x12a   : > { %v1229_v12 = vpop.permute.xlu1 %1228  ;;  %1467 = vst.msk [vmem:[#allocation3 + $0x8] sm:$0xff] %vm1465_vm5, %v1372_v52  ;;  %v4753_v52 = vld [vmem:[#allocation11_spill] sm:$0xff] }
 0x12b   : > { %1299 = vst.msk [vmem:[#allocation3 + $0xd0] sm:$0xff] %vm1272_vm4, %v1229_v12 }
 0x12e   : > { %1574 = vrot.lane.b32.xlu0 %v3440_v49, %s3236_s17 }
 0x12f   : > { %1572 = vrot.lane.b32.xlu2 %v3952_v19, %s3236_s17 }
 0x130   : > { %1576 = vrot.lane.b32.xlu1 %v3954_v21, %s3236_s17  ;;  %v1233_v26 = vpop.permute.xlu0 %1232 }
 0x131   : > { %1301 = vst.msk [vmem:[#allocation3 + $0xe0] sm:$0xff] %vm1272_vm4, %v1233_v26  ;;  %v1378_v16 = vpop.permute.xlu2 %1377 }
 0x132   : > { %v1235_v23 = vpop.permute.xlu1 %1234  ;;  %1470 = vst.msk [vmem:[#allocation3 + $0x20] sm:$0xff] %vm1465_vm5, %v1378_v16 }
 0x133   : > { %1302 = vst.msk [vmem:[#allocation3 + $0xe8] sm:$0xff] %vm1272_vm4, %v1235_v23  ;;  %v4754_v23 = vld [vmem:[#allocation15_spill] sm:$0xff] }
 0x136   : > { %1580 = vrot.lane.b32.xlu0 %v3461_v63, %s3236_s17 }
 0x137   : > { %1578 = vrot.lane.b32.xlu2 %v3965_v29, %s3236_s17 }
 0x138   : > { %1582 = vrot.lane.b32.xlu1 %v3458_v62, %s3236_s17  ;;  %v1239_v49 = vpop.permute.xlu0 %1238 }
 0x139   : > { %1304 = vst.msk [vmem:[#allocation3 + $0xf8] sm:$0xff] %vm1272_vm4, %v1239_v49  ;;  %v1384_v31 = vpop.permute.xlu2 %1383  ;;  %v4755_v49 = vld [vmem:[#allocation13_spill] sm:$0xff] }
 0x13a   : > { %v1370_v36 = vpop.permute.xlu1 %1369  ;;  %1473 = vst.msk [vmem:[#allocation3 + $0x38] sm:$0xff] %vm1465_vm5, %v1384_v31  ;;  %v4756_v31 = vld [vmem:[#allocation14_spill] sm:$0xff] }
 0x13b   : > { %1466 = vst.msk [vmem:[#allocation3] sm:$0xff] %vm1465_vm5, %v1370_v36 }
 0x13e   : > { %1586 = vrot.lane.b32.xlu0 %v3484_v18, %s3236_s17 }
 0x13f   : > { %1584 = vrot.lane.b32.xlu2 %v3976_v15, %s3236_s17 }
 0x140   : > { %1588 = vrot.lane.b32.xlu1 %v3481_v17, %s3236_s17  ;;  %v1374_v62 = vpop.permute.xlu0 %1373  ;;  %v757_v17 = vsel %vm597_vm0, %v644_v2, %v709_v53  ;;  %v4039_v2 = vld [vmem:[#allocation2 + $0x181] sm:$0xff]  ;;  %v4758_v53 = vld [vmem:[#allocation16_spill] sm:$0xff] }
 0x141   : > { %1468 = vst.msk [vmem:[#allocation3 + $0x10] sm:$0xff] %vm1465_vm5, %v1374_v62  ;;  %v1390_v63 = vpop.permute.xlu2 %1389 }
 0x142   : > { %v1376_v46 = vpop.permute.xlu1 %1375  ;;  %1476 = vst.msk [vmem:[#allocation3 + $0x50] sm:$0xff] %vm1465_vm5, %v1390_v63 }
 0x143   : > { %1469 = vst.msk [vmem:[#allocation3 + $0x18] sm:$0xff] %vm1465_vm5, %v1376_v46  ;;  %v4757_v46 = vld [vmem:[#allocation18_spill] sm:$0xff] }
 0x144   : > { %808 = vst.msk [vmem:[#allocation2 + $0x190] sm:$0x3] %vm762_vm2, %v757_v17  ;;  %v4759_v17 = vld [vmem:[#allocation17_spill] sm:$0xff] }
 0x146   : > { %1592 = vrot.lane.b32.xlu0 %v3504_v33, %s3236_s17 }
 0x147   : > { %1590 = vrot.lane.b32.xlu2 %v3987_v54, %s3236_s17 }
 0x148   : > { %1594 = vrot.lane.b32.xlu1 %v3501_v32, %s3236_s17  ;;  %v1380_v18 = vpop.permute.xlu0 %1379 }
 0x149   : > { %1471 = vst.msk [vmem:[#allocation3 + $0x28] sm:$0xff] %vm1465_vm5, %v1380_v18  ;;  %v1396_v20 = vpop.permute.xlu2 %1395 }
 0x14a   : > { %v1382_v57 = vpop.permute.xlu1 %1381  ;;  %1479 = vst.msk [vmem:[#allocation3 + $0x68] sm:$0xff] %vm1465_vm5, %v1396_v20 }
 0x14b   : > { %1472 = vst.msk [vmem:[#allocation3 + $0x30] sm:$0xff] %vm1465_vm5, %v1382_v57  ;;  %v1529_v51 = vld [vmem:[#allocation2 + $0x189] sm:$0xff] }
 0x14e   : > { %1598 = vrot.lane.b32.xlu0 %v3518_v38, %s3236_s17 }
 0x14f   : > { %1596 = vrot.lane.b32.xlu2 %v3506_v34, %s3236_s17 }
 0x150   : > { %1600 = vrot.lane.b32.xlu1 %v3516_v37, %s3236_s17  ;;  %v1386_v32 = vpop.permute.xlu0 %1385 }
 0x151   : > { %1474 = vst.msk [vmem:[#allocation3 + $0x40] sm:$0xff] %vm1465_vm5, %v1386_v32  ;;  %v1402_v33 = vpop.permute.xlu2 %1401  ;;  %v4760_v32 = vld [vmem:[#allocation21_spill] sm:$0xff] }
 0x152   : > { %v1388_v14 = vpop.permute.xlu1 %1387  ;;  %1482 = vst.msk [vmem:[#allocation3 + $0x80] sm:$0xff] %vm1465_vm5, %v1402_v33  ;;  %v4761_v33 = vld [vmem:[#allocation19_spill] sm:$0xff] }
 0x153   : > { %1475 = vst.msk [vmem:[#allocation3 + $0x48] sm:$0xff] %vm1465_vm5, %v1388_v14  ;;  %v4762_v14 = vld [vmem:[#allocation20_spill] sm:$0xff] }
 0x156   : > { %1604 = vrot.lane.b32.xlu0 %v3530_v41, %s3236_s17 }
 0x157   : > { %1602 = vrot.lane.b32.xlu2 %v3520_v39, %s3236_s17 }
 0x158   : > { %1606 = vrot.lane.b32.xlu1 %v3528_v40, %s3236_s17  ;;  %v1392_v34 = vpop.permute.xlu0 %1391 }
 0x159   : > { %1477 = vst.msk [vmem:[#allocation3 + $0x58] sm:$0xff] %vm1465_vm5, %v1392_v34  ;;  %v1408_v37 = vpop.permute.xlu2 %1407 }
 0x15a   : > { %v1394_v38 = vpop.permute.xlu1 %1393  ;;  %1485 = vst.msk [vmem:[#allocation3 + $0x98] sm:$0xff] %vm1465_vm5, %v1408_v37 }
 0x15b   : > { %1478 = vst.msk [vmem:[#allocation3 + $0x60] sm:$0xff] %vm1465_vm5, %v1394_v38 }
 0x15e   : > { %1610 = vrot.lane.b32.xlu0 %v3542_v44, %s3236_s17 }
 0x15f   : > { %1608 = vrot.lane.b32.xlu2 %v3532_v42, %s3236_s17 }
 0x160   : > { %1612 = vrot.lane.b32.xlu1 %v3540_v43, %s3236_s17  ;;  %v1398_v39 = vpop.permute.xlu0 %1397 }
 0x161   : > { %1480 = vst.msk [vmem:[#allocation3 + $0x70] sm:$0xff] %vm1465_vm5, %v1398_v39  ;;  %v1414_v40 = vpop.permute.xlu2 %1413  ;;  %v4763_v39 = vld [vmem:[#allocation22_spill] sm:$0xff] }
 0x162   : > { %v1400_v41 = vpop.permute.xlu1 %1399  ;;  %1488 = vst.msk [vmem:[#allocation3 + $0xb0] sm:$0xff] %vm1465_vm5, %v1414_v40  ;;  %v4764_v40 = vld [vmem:[#allocation23_spill] sm:$0xff] }
 0x163   : > { %1481 = vst.msk [vmem:[#allocation3 + $0x78] sm:$0xff] %vm1465_vm5, %v1400_v41 }
 0x166   : > { %1616 = vrot.lane.b32.xlu0 %v3558_v48, %s3236_s17 }
 0x167   : > { %1614 = vrot.lane.b32.xlu2 %v3544_v45, %s3236_s17 }
 0x168   : > { %1618 = vrot.lane.b32.xlu1 %v3556_v47, %s3236_s17  ;;  %v1404_v42 = vpop.permute.xlu0 %1403 }
 0x169   : > { %1483 = vst.msk [vmem:[#allocation3 + $0x88] sm:$0xff] %vm1465_vm5, %v1404_v42  ;;  %v1420_v43 = vpop.permute.xlu2 %1419 }
 0x16a   : > { %v1406_v44 = vpop.permute.xlu1 %1405  ;;  %1491 = vst.msk [vmem:[#allocation3 + $0xc8] sm:$0xff] %vm1465_vm5, %v1420_v43 }
 0x16b   : > { %1484 = vst.msk [vmem:[#allocation3 + $0x90] sm:$0xff] %vm1465_vm5, %v1406_v44  ;;  %v1885_v44 = vld [vmem:[#allocation2 + $0x30] sm:$0xff] }
 0x16e   : > { %1622 = vrot.lane.b32.xlu0 %v4039_v2, %s3236_s17 }
 0x16f   : > { %1620 = vrot.lane.b32.xlu2 %v3560_v50, %s3236_s17 }
 0x170   : > { %1624 = vrot.lane.b32.xlu1 %v1529_v51, %s3236_s17  ;;  %v1410_v45 = vpop.permute.xlu0 %1409 }
 0x171   : > { %1486 = vst.msk [vmem:[#allocation3 + $0xa0] sm:$0xff] %vm1465_vm5, %v1410_v45  ;;  %v1426_v47 = vpop.permute.xlu2 %1425 }
 0x172   : > { %v1412_v48 = vpop.permute.xlu1 %1411  ;;  %1494 = vst.msk [vmem:[#allocation3 + $0xe0] sm:$0xff] %vm1465_vm5, %v1426_v47  ;;  %v2271_v47 = vld [vmem:[#allocation2 + $0x32] sm:$0xff] }
 0x173   : > { %1487 = vst.msk [vmem:[#allocation3 + $0xa8] sm:$0xff] %vm1465_vm5, %v1412_v48  ;;  %v1886_v48 = vld [vmem:[#allocation2 + $0x38] sm:$0xff] }
 0x176   : > { %1757 = vrot.lane.b32.xlu0 %v3592_v61, %s3237_s18 }
 0x177   : > { %1755 = vrot.lane.b32.xlu2 %v3577_v56, %s3237_s18 }
 0x178   : > { %1759 = vrot.lane.b32.xlu1 %v3588_v59, %s3237_s18  ;;  %v1416_v50 = vpop.permute.xlu0 %1415 }
 0x179   : > { %1489 = vst.msk [vmem:[#allocation3 + $0xb8] sm:$0xff] %vm1465_vm5, %v1416_v50  ;;  %v1432_v35 = vpop.permute.xlu2 %1431 }
 0x17a   : > { %v1418_v28 = vpop.permute.xlu1 %1417  ;;  %1497 = vst.msk [vmem:[#allocation3 + $0xf8] sm:$0xff] %vm1465_vm5, %v1432_v35  ;;  %v2272_v35 = vld [vmem:[#allocation2 + $0x3a] sm:$0xff] }
 0x17b   : > { %1490 = vst.msk [vmem:[#allocation3 + $0xc0] sm:$0xff] %vm1465_vm5, %v1418_v28  ;;  %v2079_v28 = vld [vmem:[#allocation2 + $0x39] sm:$0xff] }
 0x17e   : > { %1763 = vrot.lane.b32.xlu0 %v3617_v6, %s3237_s18  ;;  %v4746_v6 = vld [vmem:[#allocation4_spill] sm:$0xff] }
 0x17f   : > { %1761 = vrot.lane.b32.xlu2 %v3596_v0, %s3237_s18  ;;  %v4747_v0 = vld [vmem:[#allocation5_spill] sm:$0xff] }
 0x180   : > { %1765 = vrot.lane.b32.xlu1 %v3611_v4, %s3237_s18  ;;  %v1422_v56 = vpop.permute.xlu0 %1421 }
 0x181   : > { %1492 = vst.msk [vmem:[#allocation3 + $0xd0] sm:$0xff] %vm1465_vm5, %v1422_v56  ;;  %v1567_v59 = vpop.permute.xlu2 %1566  ;;  %v1887_v56 = vld [vmem:[#allocation2 + $0x48] sm:$0xff] }
 0x182   : > { %v1424_v61 = vpop.permute.xlu1 %1423  ;;  %1661 = vst.msk [vmem:[#allocation3 + $0x10] sm:$0xff] %vm1658_vm6, %v1567_v59 }
 0x183   : > { %1493 = vst.msk [vmem:[#allocation3 + $0xd8] sm:$0xff] %vm1465_vm5, %v1424_v61 }
 0x186   : > { %1769 = vrot.lane.b32.xlu0 %v4745_v58, %s3237_s18  ;;  %v1893_v58 = vld [vmem:[#allocation2 + $0x90] sm:$0xff] }
 0x187   : > { %1767 = vrot.lane.b32.xlu2 %v4746_v6, %s3237_s18  ;;  %v2086_v6 = vld [vmem:[#allocation2 + $0x91] sm:$0xff] }
 0x188   : > { %1771 = vrot.lane.b32.xlu1 %v4747_v0, %s3237_s18  ;;  %v1428_v4 = vpop.permute.xlu0 %1427 }
 0x189   : > { %1495 = vst.msk [vmem:[#allocation3 + $0xe8] sm:$0xff] %vm1465_vm5, %v1428_v4  ;;  %v1573_v30 = vpop.permute.xlu2 %1572 }
 0x18a   : > { %v1430_v22 = vpop.permute.xlu1 %1429  ;;  %1664 = vst.msk [vmem:[#allocation3 + $0x28] sm:$0xff] %vm1658_vm6, %v1573_v30 }
 0x18b   : > { %1496 = vst.msk [vmem:[#allocation3 + $0xf0] sm:$0xff] %vm1465_vm5, %v1430_v22  ;;  %v2279_v22 = vld [vmem:[#allocation2 + $0x92] sm:$0xff] }
 0x18e   : > { %1775 = vrot.lane.b32.xlu0 %v4748_v60, %s3237_s18  ;;  %v2273_v60 = vld [vmem:[#allocation2 + $0x4a] sm:$0xff] }
 0x18f   : > { %1773 = vrot.lane.b32.xlu2 %v4749_v1, %s3237_s18  ;;  %v1888_v1 = vld [vmem:[#allocation2 + $0x50] sm:$0xff] }
 0x190   : > { %1777 = vrot.lane.b32.xlu1 %v4750_v3, %s3237_s18  ;;  %v1563_v5 = vpop.permute.xlu0 %1562 }
 0x191   : > { %1659 = vst.msk [vmem:[#allocation3] sm:$0xff] %vm1658_vm6, %v1563_v5  ;;  %v1579_v7 = vpop.permute.xlu2 %1578 }
 0x192   : > { %v1565_v9 = vpop.permute.xlu1 %1564  ;;  %1667 = vst.msk [vmem:[#allocation3 + $0x40] sm:$0xff] %vm1658_vm6, %v1579_v7  ;;  %v1894_v7 = vld [vmem:[#allocation2 + $0x98] sm:$0xff] }
 0x193   : > { %1660 = vst.msk [vmem:[#allocation3 + $0x8] sm:$0xff] %vm1658_vm6, %v1565_v9 }
 0x196   : > { %1781 = vrot.lane.b32.xlu0 %v4751_v8, %s3237_s18 }
 0x197   : > { %1779 = vrot.lane.b32.xlu2 %v4752_v25, %s3237_s18 }
 0x198   : > { %1783 = vrot.lane.b32.xlu1 %v4753_v52, %s3237_s18  ;;  %v1569_v12 = vpop.permute.xlu0 %1568  ;;  %v2274_v52 = vld [vmem:[#allocation2 + $0x52] sm:$0xff] }
 0x199   : > { %1662 = vst.msk [vmem:[#allocation3 + $0x18] sm:$0xff] %vm1658_vm6, %v1569_v12  ;;  %v1585_v26 = vpop.permute.xlu2 %1584  ;;  %v1901_v12 = vld [vmem:[#allocation2 + $0xf0] sm:$0xff] }
 0x19a   : > { %v1571_v16 = vpop.permute.xlu1 %1570  ;;  %1670 = vst.msk [vmem:[#allocation3 + $0x58] sm:$0xff] %vm1658_vm6, %v1585_v26  ;;  %v2280_v26 = vld [vmem:[#allocation2 + $0x9a] sm:$0xff] }
 0x19b   : > { %1663 = vst.msk [vmem:[#allocation3 + $0x20] sm:$0xff] %vm1658_vm6, %v1571_v16 }
 0x19e   : > { %1787 = vrot.lane.b32.xlu0 %v4754_v23, %s3237_s18  ;;  %v2287_v23 = vld [vmem:[#allocation2 + $0xf2] sm:$0xff] }
 0x19f   : > { %1785 = vrot.lane.b32.xlu2 %v4755_v49, %s3237_s18  ;;  %v2094_v49 = vld [vmem:[#allocation2 + $0xf1] sm:$0xff] }
 0x1a0   : > { %1789 = vrot.lane.b32.xlu1 %v4756_v31, %s3237_s18  ;;  %v1575_v36 = vpop.permute.xlu0 %1574  ;;  %v1889_v31 = vld [vmem:[#allocation2 + $0x60] sm:$0xff] }
 0x1a1   : > { %1665 = vst.msk [vmem:[#allocation3 + $0x30] sm:$0xff] %vm1658_vm6, %v1575_v36  ;;  %v1591_v62 = vpop.permute.xlu2 %1590 }
 0x1a2   : > { %v1577_v63 = vpop.permute.xlu1 %1576  ;;  %1673 = vst.msk [vmem:[#allocation3 + $0x70] sm:$0xff] %vm1658_vm6, %v1591_v62 }
 0x1a3   : > { %1666 = vst.msk [vmem:[#allocation3 + $0x38] sm:$0xff] %vm1658_vm6, %v1577_v63 }
 0x1a6   : > { %1793 = vrot.lane.b32.xlu0 %v4757_v46, %s3237_s18  ;;  %v2082_v46 = vld [vmem:[#allocation2 + $0x61] sm:$0xff] }
 0x1a7   : > { %1791 = vrot.lane.b32.xlu2 %v4758_v53, %s3237_s18  ;;  %v1895_v53 = vld [vmem:[#allocation2 + $0xa8] sm:$0xff] }
 0x1a8   : > { %1795 = vrot.lane.b32.xlu1 %v4759_v17, %s3237_s18  ;;  %v1581_v18 = vpop.permute.xlu0 %1580  ;;  %v2088_v17 = vld [vmem:[#allocation2 + $0xa9] sm:$0xff] }
 0x1a9   : > { %1668 = vst.msk [vmem:[#allocation3 + $0x48] sm:$0xff] %vm1658_vm6, %v1581_v18  ;;  %v1597_v20 = vpop.permute.xlu2 %1596 }
 0x1aa   : > { %v1583_v57 = vpop.permute.xlu1 %1582  ;;  %1676 = vst.msk [vmem:[#allocation3 + $0x88] sm:$0xff] %vm1658_vm6, %v1597_v20 }
 0x1ab   : > { %1669 = vst.msk [vmem:[#allocation3 + $0x50] sm:$0xff] %vm1658_vm6, %v1583_v57 }
 0x1ae   : > { %1799 = vrot.lane.b32.xlu0 %v4760_v32, %s3237_s18  ;;  %v2275_v32 = vld [vmem:[#allocation2 + $0x62] sm:$0xff] }
 0x1af   : > { %1797 = vrot.lane.b32.xlu2 %v4761_v33, %s3237_s18  ;;  %v1902_v33 = vld [vmem:[#allocation2 + $0xf8] sm:$0xff] }
 0x1b0   : > { %1801 = vrot.lane.b32.xlu1 %v4762_v14, %s3237_s18  ;;  %v1587_v34 = vpop.permute.xlu0 %1586  ;;  %v2281_v14 = vld [vmem:[#allocation2 + $0xaa] sm:$0xff] }
 0x1b1   : > { %1671 = vst.msk [vmem:[#allocation3 + $0x60] sm:$0xff] %vm1658_vm6, %v1587_v34  ;;  %v1603_v37 = vpop.permute.xlu2 %1602 }
 0x1b2   : > { %v1589_v38 = vpop.permute.xlu1 %1588  ;;  %1679 = vst.msk [vmem:[#allocation3 + $0xa0] sm:$0xff] %vm1658_vm6, %v1603_v37 }
 0x1b3   : > { %1672 = vst.msk [vmem:[#allocation3 + $0x68] sm:$0xff] %vm1658_vm6, %v1589_v38 }
 0x1b6   : > { %1805 = vrot.lane.b32.xlu0 %v3798_v11, %s3237_s18 }
 0x1b7   : > { %1803 = vrot.lane.b32.xlu2 %v4763_v39, %s3237_s18  ;;  %v2288_v39 = vld [vmem:[#allocation2 + $0xfa] sm:$0xff] }
 0x1b8   : > { %1807 = vrot.lane.b32.xlu1 %v4764_v40, %s3237_s18  ;;  %v1593_v41 = vpop.permute.xlu0 %1592  ;;  %v2095_v40 = vld [vmem:[#allocation2 + $0xf9] sm:$0xff] }
 0x1b9   : > { %1674 = vst.msk [vmem:[#allocation3 + $0x78] sm:$0xff] %vm1658_vm6, %v1593_v41  ;;  %v1609_v42 = vpop.permute.xlu2 %1608  ;;  %v1890_v41 = vld [vmem:[#allocation2 + $0x68] sm:$0xff] }
 0x1ba   : > { %v1595_v43 = vpop.permute.xlu1 %1594  ;;  %1682 = vst.msk [vmem:[#allocation3 + $0xb8] sm:$0xff] %vm1658_vm6, %v1609_v42 }
 0x1bb   : > { %1675 = vst.msk [vmem:[#allocation3 + $0x80] sm:$0xff] %vm1658_vm6, %v1595_v43 }
 0x1be   : > { %1811 = vrot.lane.b32.xlu0 %v3819_v13, %s3237_s18 }
 0x1bf   : > { %1809 = vrot.lane.b32.xlu2 %v3802_v55, %s3237_s18 }
 0x1c0   : > { %1949 = vrot.lane.b32.xlu1 %v1885_v44, %s3238_s19  ;;  %v1599_v11 = vpop.permute.xlu0 %1598 }
 0x1c1   : > { %1677 = vst.msk [vmem:[#allocation3 + $0x90] sm:$0xff] %vm1658_vm6, %v1599_v11  ;;  %v1615_v51 = vpop.permute.xlu2 %1614  ;;  %v1896_v11 = vld [vmem:[#allocation2 + $0xb0] sm:$0xff] }
 0x1c2   : > { %v1601_v45 = vpop.permute.xlu1 %1600  ;;  %1685 = vst.msk [vmem:[#allocation3 + $0xd0] sm:$0xff] %vm1658_vm6, %v1615_v51  ;;  %v2089_v51 = vld [vmem:[#allocation2 + $0xb1] sm:$0xff] }
 0x1c3   : > { %1678 = vst.msk [vmem:[#allocation3 + $0x98] sm:$0xff] %vm1658_vm6, %v1601_v45 }
 0x1c6   : > { %2335 = vrot.lane.b32.xlu0 %v2271_v47, %s3239_s20  ;;  %v2500_v47 = vld [vmem:[%s4701_s5 + $0x20] sm:$0xf] }
 0x1c7   : > { %2142 = vrot.lane.b32.xlu2 %v3939_v10, %s3240_s21  ;;  %3120 = vmatpush.msk.msra.mxu0 %vm2602_vm8, %v2500_v47 }
 0x1c8   : > { %1951 = vrot.lane.b32.xlu1 %v1886_v48, %s3238_s19  ;;  %v1605_v13 = vpop.permute.xlu0 %1604  ;;  %3161 = vmatpush.msk.msra.mxu1 %vm2602_vm8, %v2500_v47 }
 0x1c9   : > { %1680 = vst.msk [vmem:[#allocation3 + $0xa8] sm:$0xff] %vm1658_vm6, %v1605_v13  ;;  %v1621_v55 = vpop.permute.xlu2 %1620  ;;  %3162 = vmatpush.msk.msra.mxu2 %vm2602_vm8, %v2500_v47  ;;  %3163 = vmatpush.msk.msra.mxu3 %vm2602_vm8, %v2500_v47  ;;  %v2284_v47 = vld [vmem:[#allocation2 + $0xca] sm:$0xff] }
 0x1ca   : > { %v1607_v50 = vpop.permute.xlu1 %1606  ;;  %1688 = vst.msk [vmem:[#allocation3 + $0xe8] sm:$0xff] %vm1658_vm6, %v1621_v55  ;;  %v1903_v55 = vld [vmem:[#allocation2 + $0x108] sm:$0xff] }
 0x1cb   : > { %1681 = vst.msk [vmem:[#allocation3 + $0xb0] sm:$0xff] %vm1658_vm6, %v1607_v50  ;;  %v2498_v50 = vld [vmem:[%s4701_s5 + $0x10] sm:$0xff] }
 0x1ce   : > { %2337 = vrot.lane.b32.xlu0 %v2272_v35, %s3239_s20  ;;  %v2276_v35 = vld [vmem:[#allocation2 + $0x6a] sm:$0xff] }
 0x1cf   : > { %2144 = vrot.lane.b32.xlu2 %v2079_v28, %s3240_s21  ;;  %v2497_v28 = vld [vmem:[%s4701_s5 + $0x8] sm:$0xff] }
 0x1d0   : > { %1953 = vrot.lane.b32.xlu1 %v1887_v56, %s3238_s19  ;;  %v1611_v10 = vpop.permute.xlu0 %1610 }
 0x1d1   : > { %1683 = vst.msk [vmem:[#allocation3 + $0xc0] sm:$0xff] %vm1658_vm6, %v1611_v10  ;;  %v1756_v59 = vpop.permute.xlu2 %1755  ;;  %v2496_v10 = vld [vmem:[%s4701_s5] sm:$0xff] }
 0x1d2   : > { %v1613_v61 = vpop.permute.xlu1 %1612  ;;  %1852 = vst.msk [vmem:[#allocation3] sm:$0xff] %vm1851_vm7, %v1756_v59 }
 0x1d3   : > { %1684 = vst.msk [vmem:[#allocation3 + $0xc8] sm:$0xff] %vm1658_vm6, %v1613_v61 }
 0x1d6   : > { %2146 = vrot.lane.b32.xlu0 %v3941_v27, %s3240_s21 }
 0x1d7   : > { %1965 = vrot.lane.b32.xlu2 %v1893_v58, %s3238_s19  ;;  %v2282_v58 = vld [vmem:[#allocation2 + $0xb2] sm:$0xff] }
 0x1d8   : > { %2158 = vrot.lane.b32.xlu1 %v2086_v6, %s3240_s21  ;;  %v1617_v0 = vpop.permute.xlu0 %1616  ;;  %v2102_v6 = vld [vmem:[#allocation2 + $0x151] sm:$0xff] }
 0x1d9   : > { %1686 = vst.msk [vmem:[#allocation3 + $0xd8] sm:$0xff] %vm1658_vm6, %v1617_v0  ;;  %v1762_v4 = vpop.permute.xlu2 %1761 }
 0x1da   : > { %v1619_v30 = vpop.permute.xlu1 %1618  ;;  %1855 = vst.msk [vmem:[#allocation3 + $0x18] sm:$0xff] %vm1851_vm7, %v1762_v4 }
 0x1db   : > { %1687 = vst.msk [vmem:[#allocation3 + $0xe0] sm:$0xff] %vm1658_vm6, %v1619_v30 }
 0x1de   : > { %2351 = vrot.lane.b32.xlu0 %v2279_v22, %s3239_s20  ;;  %v2295_v22 = vld [vmem:[#allocation2 + $0x152] sm:$0xff] }
 0x1df   : > { %2339 = vrot.lane.b32.xlu2 %v2273_v60, %s3239_s20  ;;  %v2289_v60 = vld [vmem:[#allocation2 + $0x10a] sm:$0xff] }
 0x1e0   : > { %1955 = vrot.lane.b32.xlu1 %v1888_v1, %s3238_s19  ;;  %v1623_v27 = vpop.permute.xlu0 %1622  ;;  %v1891_v1 = vld [vmem:[#allocation2 + $0x78] sm:$0xff] }
 0x1e1   : > { %1689 = vst.msk [vmem:[#allocation3 + $0xf0] sm:$0xff] %vm1658_vm6, %v1623_v27  ;;  %v1768_v3 = vpop.permute.xlu2 %1767 }
 0x1e2   : > { %v1625_v5 = vpop.permute.xlu1 %1624  ;;  %1858 = vst.msk [vmem:[#allocation3 + $0x30] sm:$0xff] %vm1851_vm7, %v1768_v3 }
 0x1e3   : > { %1690 = vst.msk [vmem:[#allocation3 + $0xf8] sm:$0xff] %vm1658_vm6, %v1625_v5 }
 0x1e6   : > { %2148 = vrot.lane.b32.xlu0 %v3952_v19, %s3240_s21 }
 0x1e7   : > { %1967 = vrot.lane.b32.xlu2 %v1894_v7, %s3238_s19  ;;  %v1897_v7 = vld [vmem:[#allocation2 + $0xc0] sm:$0xff] }
 0x1e8   : > { %2160 = vrot.lane.b32.xlu1 %v3976_v15, %s3240_s21  ;;  %v1758_v9 = vpop.permute.xlu0 %1757 }
 0x1e9   : > { %1853 = vst.msk [vmem:[#allocation3 + $0x8] sm:$0xff] %vm1851_vm7, %v1758_v9  ;;  %v1774_v8 = vpop.permute.xlu2 %1773 }
 0x1ea   : > { %v1760_v25 = vpop.permute.xlu1 %1759  ;;  %1861 = vst.msk [vmem:[#allocation3 + $0x48] sm:$0xff] %vm1851_vm7, %v1774_v8 }
 0x1eb   : > { %1854 = vst.msk [vmem:[#allocation3 + $0x10] sm:$0xff] %vm1851_vm7, %v1760_v25 }
 0x1ee   : > { %2341 = vrot.lane.b32.xlu0 %v2274_v52, %s3239_s20  ;;  %v1910_v52 = vld [vmem:[#allocation2 + $0x158] sm:$0xff] }
 0x1ef   : > { %1981 = vrot.lane.b32.xlu2 %v1901_v12, %s3238_s19  ;;  %v1904_v12 = vld [vmem:[#allocation2 + $0x110] sm:$0xff] }
 0x1f0   : > { %2353 = vrot.lane.b32.xlu1 %v2280_v26, %s3239_s20  ;;  %v1764_v19 = vpop.permute.xlu0 %1763  ;;  %v2277_v26 = vld [vmem:[#allocation2 + $0x7a] sm:$0xff] }
 0x1f1   : > { %1856 = vst.msk [vmem:[#allocation3 + $0x20] sm:$0xff] %vm1851_vm7, %v1764_v19  ;;  %v1780_v15 = vpop.permute.xlu2 %1779 }
 0x1f2   : > { %v1766_v16 = vpop.permute.xlu1 %1765  ;;  %1864 = vst.msk [vmem:[#allocation3 + $0x60] sm:$0xff] %vm1851_vm7, %v1780_v15 }
 0x1f3   : > { %1857 = vst.msk [vmem:[#allocation3 + $0x28] sm:$0xff] %vm1851_vm7, %v1766_v16  ;;  %v2097_v16 = vld [vmem:[#allocation2 + $0x111] sm:$0xff] }
 0x1f6   : > { %2367 = vrot.lane.b32.xlu0 %v2287_v23, %s3239_s20  ;;  %v2283_v23 = vld [vmem:[#allocation2 + $0xc2] sm:$0xff] }
 0x1f7   : > { %2174 = vrot.lane.b32.xlu2 %v2094_v49, %s3240_s21  ;;  %v2103_v49 = vld [vmem:[#allocation2 + $0x159] sm:$0xff] }
 0x1f8   : > { %1957 = vrot.lane.b32.xlu1 %v1889_v31, %s3238_s19  ;;  %v1770_v36 = vpop.permute.xlu0 %1769 }
 0x1f9   : > { %1859 = vst.msk [vmem:[#allocation3 + $0x38] sm:$0xff] %vm1851_vm7, %v1770_v36  ;;  %v1786_v62 = vpop.permute.xlu2 %1785 }
 0x1fa   : > { %v1772_v63 = vpop.permute.xlu1 %1771  ;;  %1867 = vst.msk [vmem:[#allocation3 + $0x78] sm:$0xff] %vm1851_vm7, %v1786_v62 }
 0x1fb   : > { %1860 = vst.msk [vmem:[#allocation3 + $0x40] sm:$0xff] %vm1851_vm7, %v1772_v63 }
 0x1fe   : > { %2150 = vrot.lane.b32.xlu0 %v2082_v46, %s3240_s21  ;;  %v2296_v46 = vld [vmem:[#allocation2 + $0x15a] sm:$0xff] }
 0x1ff   : > { %1969 = vrot.lane.b32.xlu2 %v1895_v53, %s3238_s19  ;;  %v2290_v53 = vld [vmem:[#allocation2 + $0x112] sm:$0xff] }
 0x200   : > { %2162 = vrot.lane.b32.xlu1 %v2088_v17, %s3240_s21  ;;  %v1776_v18 = vpop.permute.xlu0 %1775  ;;  %v1892_v17 = vld [vmem:[#allocation2 + $0x80] sm:$0xff] }
 0x201   : > { %1862 = vst.msk [vmem:[#allocation3 + $0x50] sm:$0xff] %vm1851_vm7, %v1776_v18  ;;  %v1792_v20 = vpop.permute.xlu2 %1791 }
 0x202   : > { %v1778_v57 = vpop.permute.xlu1 %1777  ;;  %1870 = vst.msk [vmem:[#allocation3 + $0x90] sm:$0xff] %vm1851_vm7, %v1792_v20 }
 0x203   : > { %1863 = vst.msk [vmem:[#allocation3 + $0x58] sm:$0xff] %vm1851_vm7, %v1778_v57 }
 0x206   : > { %2343 = vrot.lane.b32.xlu0 %v2275_v32, %s3239_s20 }
 0x207   : > { %1983 = vrot.lane.b32.xlu2 %v1902_v33, %s3238_s19  ;;  %v2085_v33 = vld [vmem:[#allocation2 + $0x81] sm:$0xff] }
 0x208   : > { %2355 = vrot.lane.b32.xlu1 %v2281_v14, %s3239_s20  ;;  %v1782_v34 = vpop.permute.xlu0 %1781  ;;  %v1898_v14 = vld [vmem:[#allocation2 + $0xc8] sm:$0xff] }
 0x209   : > { %1865 = vst.msk [vmem:[#allocation3 + $0x68] sm:$0xff] %vm1851_vm7, %v1782_v34  ;;  %v1798_v37 = vpop.permute.xlu2 %1797  ;;  %v2091_v34 = vld [vmem:[#allocation2 + $0xc9] sm:$0xff] }
 0x20a   : > { %v1784_v38 = vpop.permute.xlu1 %1783  ;;  %1873 = vst.msk [vmem:[#allocation3 + $0xa8] sm:$0xff] %vm1851_vm7, %v1798_v37 }
 0x20b   : > { %1866 = vst.msk [vmem:[#allocation3 + $0x70] sm:$0xff] %vm1851_vm7, %v1784_v38 }
 0x20e   : > { %2369 = vrot.lane.b32.xlu0 %v2288_v39, %s3239_s20 }
 0x20f   : > { %2176 = vrot.lane.b32.xlu2 %v2095_v40, %s3240_s21 }
 0x210   : > { %1959 = vrot.lane.b32.xlu1 %v1890_v41, %s3238_s19  ;;  %v1788_v42 = vpop.permute.xlu0 %1787  ;;  %v1911_v41 = vld [vmem:[#allocation2 + $0x168] sm:$0xff] }
 0x211   : > { %1868 = vst.msk [vmem:[#allocation3 + $0x80] sm:$0xff] %vm1851_vm7, %v1788_v42  ;;  %v1804_v43 = vpop.permute.xlu2 %1803  ;;  %v1905_v42 = vld [vmem:[#allocation2 + $0x120] sm:$0xff] }
 0x212   : > { %v1790_v44 = vpop.permute.xlu1 %1789  ;;  %1876 = vst.msk [vmem:[#allocation3 + $0xc0] sm:$0xff] %vm1851_vm7, %v1804_v43  ;;  %v2278_v43 = vld [vmem:[#allocation2 + $0x82] sm:$0xff] }
 0x213   : > { %1869 = vst.msk [vmem:[#allocation3 + $0x88] sm:$0xff] %vm1851_vm7, %v1790_v44 }
 0x216   : > { %2152 = vrot.lane.b32.xlu0 %v3954_v21, %s3240_s21  ;;  %v2499_v21 = vld [vmem:[%s4701_s5 + $0x18] sm:$0xff] }
 0x217   : > { %1971 = vrot.lane.b32.xlu2 %v1896_v11, %s3238_s19  ;;  %2618 = vmatpush.msra.mxu0 %v2499_v21 }
 0x218   : > { %2164 = vrot.lane.b32.xlu1 %v2089_v51, %s3240_s21  ;;  %v1794_v45 = vpop.permute.xlu0 %1793  ;;  %3164 = vmatpush.msra.mxu1 %v2499_v21 }
 0x219   : > { %1871 = vst.msk [vmem:[#allocation3 + $0x98] sm:$0xff] %vm1851_vm7, %v1794_v45  ;;  %v1810_v48 = vpop.permute.xlu2 %1809  ;;  %3165 = vmatpush.msra.mxu2 %v2499_v21  ;;  %3166 = vmatpush.msra.mxu3 %v2499_v21  ;;  %v2098_v45 = vld [vmem:[#allocation2 + $0x121] sm:$0xff] }
 0x21a   : > { %v1796_v13 = vpop.permute.xlu1 %1795  ;;  %1879 = vst.msk [vmem:[#allocation3 + $0xd8] sm:$0xff] %vm1851_vm7, %v1810_v48  ;;  %2619 = vmatpush.msra.mxu0 %v2498_v50  ;;  %3167 = vmatpush.msra.mxu1 %v2498_v50  ;;  %v2104_v48 = vld [vmem:[#allocation2 + $0x169] sm:$0xff] }
 0x21b   : > { %1872 = vst.msk [vmem:[#allocation3 + $0xa0] sm:$0xff] %vm1851_vm7, %v1796_v13  ;;  %3168 = vmatpush.msra.mxu2 %v2498_v50  ;;  %3169 = vmatpush.msra.mxu3 %v2498_v50 }
 0x21c   : > { %2620 = vmatpush.msra.mxu0 %v2497_v28  ;;  %3170 = vmatpush.msra.mxu1 %v2497_v28 }
 0x21d   : > { %3171 = vmatpush.msra.mxu2 %v2497_v28  ;;  %3172 = vmatpush.msra.mxu3 %v2497_v28  ;;  %v2297_v28 = vld [vmem:[#allocation2 + $0x16a] sm:$0xff] }
 0x21e   : > { %1997 = vrot.lane.b32.xlu0 %v3793_v24, %s3238_s19  ;;  %2621 = vmatpush.msra.mxu0 %v2496_v10  ;;  %v2096_v24 = vld [vmem:[#allocation2 + $0x109] sm:$0xff] }
 0x21f   : > { %1985 = vrot.lane.b32.xlu2 %v1903_v55, %s3238_s19  ;;  %3173 = vmatpush.msra.mxu1 %v2496_v10 }
 0x220   : > { %2345 = vrot.lane.b32.xlu1 %v2276_v35, %s3239_s20  ;;  %v1800_v56 = vpop.permute.xlu0 %1799  ;;  %3174 = vmatpush.msra.mxu2 %v2496_v10 }
 0x221   : > { %1874 = vst.msk [vmem:[#allocation3 + $0xb0] sm:$0xff] %vm1851_vm7, %v1800_v56  ;;  %v2143_v59 = vpop.permute.xlu2 %2142  ;;  %3175 = vmatpush.msra.mxu3 %v2496_v10  ;;  %v2291_v56 = vld [vmem:[#allocation2 + $0x122] sm:$0xff]  ;;  %v1899_v10 = vld [vmem:[#allocation2 + $0xd8] sm:$0xff] }
 0x222   : > { %v1802_v61 = vpop.permute.xlu1 %1801 }
 0x223   : > { %1875 = vst.msk [vmem:[#allocation3 + $0xb8] sm:$0xff] %vm1851_vm7, %v1802_v61 }
 0x226   : > { %2178 = vrot.lane.b32.xlu0 %v2096_v24, %s3240_s21 }
 0x227   : > { %2357 = vrot.lane.b32.xlu2 %v2282_v58, %s3239_s20 }
 0x228   : > { %2190 = vrot.lane.b32.xlu1 %v2102_v6, %s3240_s21  ;;  %v1806_v0 = vpop.permute.xlu0 %1805  ;;  %v1906_v6 = vld [vmem:[#allocation2 + $0x128] sm:$0xff] }
 0x229   : > { %1877 = vst.msk [vmem:[#allocation3 + $0xc8] sm:$0xff] %vm1851_vm7, %v1806_v0  ;;  %v2145_v4 = vpop.permute.xlu2 %2144  ;;  %v2092_v0 = vld [vmem:[#allocation2 + $0xd9] sm:$0xff] }
 0x22a   : > { %v1808_v30 = vpop.permute.xlu1 %1807 }
 0x22b   : > { %1878 = vst.msk [vmem:[#allocation3 + $0xd0] sm:$0xff] %vm1851_vm7, %v1808_v30 }
 0x22e   : > { %2383 = vrot.lane.b32.xlu0 %v2295_v22, %s3239_s20 }
 0x22f   : > { %2371 = vrot.lane.b32.xlu2 %v2289_v60, %s3239_s20 }
 0x230   : > { %1961 = vrot.lane.b32.xlu1 %v1891_v1, %s3238_s19  ;;  %v1812_v27 = vpop.permute.xlu0 %1811  ;;  %v2099_v1 = vld [vmem:[#allocation2 + $0x129] sm:$0xff] }
 0x231   : > { %1880 = vst.msk [vmem:[#allocation3 + $0xe0] sm:$0xff] %vm1851_vm7, %v1812_v27  ;;  %v1966_v3 = vpop.permute.xlu2 %1965  ;;  %v2285_v27 = vld [vmem:[#allocation2 + $0xda] sm:$0xff] }
 0x232   : > { %v1950_v5 = vpop.permute.xlu1 %1949  ;;  %2054 = vst.msk [vmem:[#allocation3 + $0x40] sm:$0xff] %vm2045_vm9, %v1966_v3  ;;  %v2105_v3 = vld [vmem:[#allocation2 + $0x171] sm:$0xff] }
 0x233   : > { %2046 = vst.msk [vmem:[#allocation3] sm:$0xff] %vm2045_vm9, %v1950_v5 }
 0x234   : > { %2239 = vst.msk [vmem:[#allocation3] sm:$0xff] %vm2238_vm10, %v2143_v59 }
 0x236   : > { %2154 = vrot.lane.b32.xlu0 %v3965_v29, %s3240_s21 }
 0x237   : > { %1973 = vrot.lane.b32.xlu2 %v1897_v7, %s3238_s19 }
 0x238   : > { %2166 = vrot.lane.b32.xlu1 %v3987_v54, %s3240_s21  ;;  %v2336_v9 = vpop.permute.xlu0 %2335 }
 0x239   : > { %2432 = vst.msk [vmem:[#allocation3] sm:$0xff] %vm2431_vm11, %v2336_v9  ;;  %v2340_v8 = vpop.permute.xlu2 %2339 }
 0x23a   : > { %v1952_v25 = vpop.permute.xlu1 %1951 }
 0x23b   : > { %2047 = vst.msk [vmem:[#allocation3 + $0x8] sm:$0xff] %vm2045_vm9, %v1952_v25 }
 0x23c   : > { %2240 = vst.msk [vmem:[#allocation3 + $0x8] sm:$0xff] %vm2238_vm10, %v2145_v4  ;;  %v1912_v4 = vld [vmem:[#allocation2 + $0x170] sm:$0xff] }
 0x23e   : > { %1999 = vrot.lane.b32.xlu0 %v1910_v52, %s3238_s19  ;;  %v2298_v52 = vld [vmem:[#allocation2 + $0x172] sm:$0xff] }
 0x23f   : > { %1987 = vrot.lane.b32.xlu2 %v1904_v12, %s3238_s19  ;;  %v2292_v12 = vld [vmem:[#allocation2 + $0x12a] sm:$0xff] }
 0x240   : > { %2347 = vrot.lane.b32.xlu1 %v2277_v26, %s3239_s20  ;;  %v2338_v29 = vpop.permute.xlu0 %2337  ;;  %v2464_v54 = vld [vmem:[#allocation3] sm:$0xff]  ;;  %v1900_v26 = vld [vmem:[#allocation2 + $0xe0] sm:$0xff] }
 0x241   : > { %2433 = vst.msk [vmem:[#allocation3 + $0x8] sm:$0xff] %vm2431_vm11, %v2338_v29  ;;  %3121 = vmatmul.msk.f32.vlgmr.msra.gmra.mxu0 %vm2505_vm12, %v2464_v54  ;;  %v1968_v19 = vpop.permute.xlu2 %1967 }
 0x242   : > { %v1954_v15 = vpop.permute.xlu1 %1953  ;;  %2055 = vst.msk [vmem:[#allocation3 + $0x48] sm:$0xff] %vm2045_vm9, %v1968_v19 }
 0x243   : > { %2048 = vst.msk [vmem:[#allocation3 + $0x10] sm:$0xff] %vm2045_vm9, %v1954_v15 }
 0x246   : > { %2180 = vrot.lane.b32.xlu0 %v2097_v16, %s3240_s21  ;;  %v1907_v16 = vld [vmem:[#allocation2 + $0x138] sm:$0xff] }
 0x247   : > { %2359 = vrot.lane.b32.xlu2 %v2283_v23, %s3239_s20  ;;  %v2093_v23 = vld [vmem:[#allocation2 + $0xe1] sm:$0xff] }
 0x248   : > { %2192 = vrot.lane.b32.xlu1 %v2103_v49, %s3240_s21  ;;  %v2147_v31 = vpop.permute.xlu0 %2146  ;;  %v2465_v36 = vld [vmem:[#allocation3 + $0x8] sm:$0xff]  ;;  %v3118_v49 = vld [vmem:[%s478_s16 + $0x60] sm:$0xff] }
 0x249   : > { %2241 = vst.msk [vmem:[#allocation3 + $0x10] sm:$0xff] %vm2238_vm10, %v2147_v31  ;;  %3122 = vmatmul.msk.f32.gmra.mxu0 %vm2505_vm12, %v2465_v36  ;;  %v1982_v62 = vpop.permute.xlu2 %1981  ;;  %v1913_v31 = vld [vmem:[#allocation2 + $0x180] sm:$0xff]  ;;  %v838_v36 = vrot.slane %v3118_v49, 1 }
 0x24a   : > { %2434 = vst.msk [vmem:[#allocation3 + $0x10] sm:$0xff] %vm2431_vm11, %v2340_v8  ;;  %v2159_v63 = vpop.permute.xlu1 %2158 }
 0x24b   : > { %2247 = vst.msk [vmem:[#allocation3 + $0x40] sm:$0xff] %vm2238_vm10, %v2159_v63 }
 0x24c   : > { %2062 = vst.msk [vmem:[#allocation3 + $0x80] sm:$0xff] %vm2045_vm9, %v1982_v62  ;;  %v841_v62 = vrot.slane %v3118_v49, 7 }
 0x24e   : > { %2385 = vrot.lane.b32.xlu0 %v2296_v46, %s3239_s20  ;;  %v849_v63 = vsel %vm597_vm0, %v838_v36, %v841_v62 }
 0x24f   : > { %2373 = vrot.lane.b32.xlu2 %v2290_v53, %s3239_s20  ;;  %852 = vst.msk [vmem:[#allocation2 + $0x198] sm:$0xff] %vm759_vm1, %v849_v63 }
 0x250   : > { %1963 = vrot.lane.b32.xlu1 %v1892_v17, %s3238_s19  ;;  %v2352_v18 = vpop.permute.xlu0 %2351  ;;  %v3119_v17 = vld [vmem:[%s478_s16 + $0x68] sm:$0xff] }
 0x251   : > { %2440 = vst.msk [vmem:[#allocation3 + $0x40] sm:$0xff] %vm2431_vm11, %v2352_v18  ;;  %v2466_v20 = vld [vmem:[#allocation3 + $0x10] sm:$0xff]  ;;  %v2175_v57 = vpop.permute.xlu2 %2174 }
 0x252   : > { %v1956_v32 = vpop.permute.xlu1 %1955  ;;  %3123 = vmatmul.msk.f32.gmra.mxu0 %vm2505_vm12, %v2466_v20  ;;  %2255 = vst.msk [vmem:[#allocation3 + $0x80] sm:$0xff] %vm2238_vm10, %v2175_v57  ;;  %v842_v20 = vrot.slane %v3119_v17, 7  ;;  %v2100_v57 = vld [vmem:[#allocation2 + $0x139] sm:$0xff] }
 0x253   : > { %2049 = vst.msk [vmem:[#allocation3 + $0x18] sm:$0xff] %vm2045_vm9, %v1956_v32 }
 0x256   : > { %2156 = vrot.lane.b32.xlu0 %v2085_v33, %s3240_s21  ;;  %v2286_v33 = vld [vmem:[#allocation2 + $0xe2] sm:$0xff] }
 0x257   : > { %1975 = vrot.lane.b32.xlu2 %v1898_v14, %s3238_s19  ;;  %v843_v14 = vsel %vm597_vm0, %v841_v62, %v842_v20 }
 0x258   : > { %2168 = vrot.lane.b32.xlu1 %v2091_v34, %s3240_s21  ;;  %v2149_v37 = vpop.permute.xlu0 %2148  ;;  %v2472_v38 = vld [vmem:[#allocation3 + $0x40] sm:$0xff]  ;;  %853 = vst.msk [vmem:[#allocation2 + $0x1a0] sm:$0xff] %vm759_vm1, %v843_v14 }
 0x259   : > { %2242 = vst.msk [vmem:[#allocation3 + $0x18] sm:$0xff] %vm2238_vm10, %v2149_v37  ;;  %3129 = vmatmul.msk.f32.vlgmr.msra.gmra.mxu1 %vm2505_vm12, %v2472_v38  ;;  %v1970_v39 = vpop.permute.xlu2 %1969 }
 0x25a   : > { %v2161_v40 = vpop.permute.xlu1 %2160  ;;  %2056 = vst.msk [vmem:[#allocation3 + $0x50] sm:$0xff] %vm2045_vm9, %v1970_v39 }
 0x25b   : > { %2248 = vst.msk [vmem:[#allocation3 + $0x48] sm:$0xff] %vm2238_vm10, %v2161_v40  ;;  %v2299_v40 = vld [vmem:[#allocation2 + $0x182] sm:$0xff] }
 0x25e   : > { %2001 = vrot.lane.b32.xlu0 %v1911_v41, %s3238_s19  ;;  %v2293_v41 = vld [vmem:[#allocation2 + $0x13a] sm:$0xff] }
 0x25f   : > { %1989 = vrot.lane.b32.xlu2 %v1905_v42, %s3238_s19  ;;  %v847_v42 = vrot.slane %v3119_v17, 5 }
 0x260   : > { %2349 = vrot.lane.b32.xlu1 %v2278_v43, %s3239_s20  ;;  %v2342_v44 = vpop.permute.xlu0 %2341 }
 0x261   : > { %2435 = vst.msk [vmem:[#allocation3 + $0x18] sm:$0xff] %vm2431_vm11, %v2342_v44  ;;  %v1984_v11 = vpop.permute.xlu2 %1983 }
 0x262   : > { %v2354_v51 = vpop.permute.xlu1 %2353  ;;  %2063 = vst.msk [vmem:[#allocation3 + $0x88] sm:$0xff] %vm2045_vm9, %v1984_v11 }
 0x263   : > { %2441 = vst.msk [vmem:[#allocation3 + $0x48] sm:$0xff] %vm2431_vm11, %v2354_v51 }
 0x266   : > { %2182 = vrot.lane.b32.xlu0 %v2098_v45, %s3240_s21  ;;  %v1914_v45 = vld [vmem:[#allocation2 + $0x188] sm:$0xff] }
 0x267   : > { %2361 = vrot.lane.b32.xlu2 %v2284_v47, %s3239_s20  ;;  %v1908_v47 = vld [vmem:[#allocation2 + $0x140] sm:$0xff] }
 0x268   : > { %2194 = vrot.lane.b32.xlu1 %v2104_v48, %s3240_s21  ;;  %v2368_v13 = vpop.permute.xlu0 %2367  ;;  %v2467_v21 = vld [vmem:[#allocation3 + $0x18] sm:$0xff] }
 0x269   : > { %2448 = vst.msk [vmem:[#allocation3 + $0x80] sm:$0xff] %vm2431_vm11, %v2368_v13  ;;  %3124 = vmatmul.msk.f32.gmra.mxu0 %vm2505_vm12, %v2467_v21  ;;  %v2177_v55 = vpop.permute.xlu2 %2176  ;;  %v2101_v48 = vld [vmem:[#allocation2 + $0x141] sm:$0xff] }
 0x26a   : > { %v1958_v50 = vpop.permute.xlu1 %1957  ;;  %v2473_v35 = vld [vmem:[#allocation3 + $0x48] sm:$0xff]  ;;  %2256 = vst.msk [vmem:[#allocation3 + $0x88] sm:$0xff] %vm2238_vm10, %v2177_v55 }
 0x26b   : > { %2050 = vst.msk [vmem:[#allocation3 + $0x20] sm:$0xff] %vm2045_vm9, %v1958_v50  ;;  %3130 = vmatmul.msk.f32.gmra.mxu1 %vm2505_vm12, %v2473_v35  ;;  %v2294_v35 = vld [vmem:[#allocation2 + $0x142] sm:$0xff] }
 0x26e   : > { %2387 = vrot.lane.b32.xlu0 %v2297_v28, %s3239_s20  ;;  %v2107_v28 = vld [vmem:[#allocation2 + $0x189] sm:$0xff] }
 0x26f   : > { %2375 = vrot.lane.b32.xlu2 %v2291_v56, %s3239_s20  ;;  %v2300_v56 = vld [vmem:[#allocation2 + $0x18a] sm:$0xff] }
 0x270   : > { %1977 = vrot.lane.b32.xlu1 %v1899_v10, %s3238_s19  ;;  %v2151_v59 = vpop.permute.xlu0 %2150  ;;  %v2480_v61 = vld [vmem:[#allocation3 + $0x80] sm:$0xff] }
 0x271   : > { %2243 = vst.msk [vmem:[#allocation3 + $0x20] sm:$0xff] %vm2238_vm10, %v2151_v59  ;;  %3137 = vmatmul.msk.f32.vlgmr.msra.gmra.mxu2 %vm2505_vm12, %v2480_v61  ;;  %v1972_v24 = vpop.permute.xlu2 %1971 }
 0x272   : > { %v2163_v58 = vpop.permute.xlu1 %2162  ;;  %2057 = vst.msk [vmem:[#allocation3 + $0x58] sm:$0xff] %vm2045_vm9, %v1972_v24  ;;  %v1915_v24 = vld [vmem:[#allocation2 + $0x198] sm:$0xff] }
 0x273   : > { %2249 = vst.msk [vmem:[#allocation3 + $0x50] sm:$0xff] %vm2238_vm10, %v2163_v58 }
 0x276   : > { %1991 = vrot.lane.b32.xlu0 %v1906_v6, %s3238_s19  ;;  %v2108_v6 = vld [vmem:[#allocation2 + $0x199] sm:$0xff] }
 0x277   : > { %2170 = vrot.lane.b32.xlu2 %v2092_v0, %s3240_s21 }
 0x278   : > { %2003 = vrot.lane.b32.xlu1 %v1912_v4, %s3238_s19  ;;  %v2344_v30 = vpop.permute.xlu0 %2343 }
 0x279   : > { %2436 = vst.msk [vmem:[#allocation3 + $0x20] sm:$0xff] %vm2431_vm11, %v2344_v30  ;;  %v1986_v22 = vpop.permute.xlu2 %1985 }
 0x27a   : > { %v2356_v60 = vpop.permute.xlu1 %2355  ;;  %2064 = vst.msk [vmem:[#allocation3 + $0x90] sm:$0xff] %vm2045_vm9, %v1986_v22 }
 0x27b   : > { %2442 = vst.msk [vmem:[#allocation3 + $0x50] sm:$0xff] %vm2431_vm11, %v2356_v60  ;;  %v4376_v60 = vld [vmem:[%s4702_s6] ss:$0 sm:$0xff] }
 0x27e   : > { %2184 = vrot.lane.b32.xlu0 %v2099_v1, %s3240_s21  ;;  %v2301_v1 = vld [vmem:[#allocation2 + $0x19a] sm:$0xff] }
 0x27f   : > { %2363 = vrot.lane.b32.xlu2 %v2285_v27, %s3239_s20  ;;  %v1916_v27 = vld [vmem:[#allocation2 + $0x1a0] sm:$0xff] }
 0x280   : > { %2196 = vrot.lane.b32.xlu1 %v2105_v3, %s3240_s21  ;;  %v2370_v5 = vpop.permute.xlu0 %2369  ;;  %v2468_v7 = vld [vmem:[#allocation3 + $0x20] sm:$0xff] }
 0x281   : > { %2449 = vst.msk [vmem:[#allocation3 + $0x88] sm:$0xff] %vm2431_vm11, %v2370_v5  ;;  %3125 = vmatmul.msk.f32.gmra.mxu0 %vm2505_vm12, %v2468_v7  ;;  %v2358_v9 = vpop.permute.xlu2 %2357 }
 0x282   : > { %v1960_v8 = vpop.permute.xlu1 %1959  ;;  %v2474_v25 = vld [vmem:[#allocation3 + $0x50] sm:$0xff] }
 0x283   : > { %2051 = vst.msk [vmem:[#allocation3 + $0x28] sm:$0xff] %vm2045_vm9, %v1960_v8  ;;  %3131 = vmatmul.msk.f32.gmra.mxu1 %vm2505_vm12, %v2474_v25 }
 0x286   : > { %2389 = vrot.lane.b32.xlu0 %v2298_v52, %s3239_s20 }
 0x287   : > { %2377 = vrot.lane.b32.xlu2 %v2292_v12, %s3239_s20 }
 0x288   : > { %1979 = vrot.lane.b32.xlu1 %v1900_v26, %s3238_s19  ;;  %v2153_v29 = vpop.permute.xlu0 %2152  ;;  %v2481_v54 = vld [vmem:[#allocation3 + $0x88] sm:$0xff] }
 0x289   : > { %2244 = vst.msk [vmem:[#allocation3 + $0x28] sm:$0xff] %vm2238_vm10, %v2153_v29  ;;  %3138 = vmatmul.msk.f32.gmra.mxu2 %vm2505_vm12, %v2481_v54  ;;  %v2372_v19 = vpop.permute.xlu2 %2371 }
 0x28a   : > { %v2165_v15 = vpop.permute.xlu1 %2164 }
 0x28b   : > { %2250 = vst.msk [vmem:[#allocation3 + $0x58] sm:$0xff] %vm2238_vm10, %v2165_v15 }
 0x28c   : > { %2443 = vst.msk [vmem:[#allocation3 + $0x58] sm:$0xff] %vm2431_vm11, %v2358_v9 }
 0x28e   : > { %1993 = vrot.lane.b32.xlu0 %v1907_v16, %s3238_s19 }
 0x28f   : > { %2172 = vrot.lane.b32.xlu2 %v2093_v23, %s3240_s21 }
 0x290   : > { %v1998_v46 = vpop.permute.xlu0 %1997  ;;  %2005 = vrot.lane.b32.xlu1 %v1913_v31, %s3238_s19 }
 0x291   : > { %2070 = vst.msk [vmem:[#allocation3 + $0xc0] sm:$0xff] %vm2045_vm9, %v1998_v46  ;;  %v1974_v53 = vpop.permute.xlu2 %1973 }
 0x292   : > { %v2346_v18 = vpop.permute.xlu1 %2345  ;;  %2058 = vst.msk [vmem:[#allocation3 + $0x60] sm:$0xff] %vm2045_vm9, %v1974_v53 }
 0x293   : > { %2437 = vst.msk [vmem:[#allocation3 + $0x28] sm:$0xff] %vm2431_vm11, %v2346_v18  ;;  %v2475_v32 = vld [vmem:[#allocation3 + $0x58] sm:$0xff] }
 0x294   : > { %3132 = vmatmul.msk.f32.gmra.mxu1 %vm2505_vm12, %v2475_v32 }
 0x296   : > { %2186 = vrot.lane.b32.xlu0 %v2100_v57, %s3240_s21 }
 0x297   : > { %2365 = vrot.lane.b32.xlu2 %v2286_v33, %s3239_s20 }
 0x298   : > { %v2179_v34 = vpop.permute.xlu0 %2178  ;;  %2198 = vrot.lane.b32.xlu1 %v4039_v2, %s3240_s21  ;;  %v850_v2 = vsel %vm597_vm0, %v842_v20, %v847_v42 }
 0x299   : > { %2257 = vst.msk [vmem:[#allocation3 + $0x90] sm:$0xff] %vm2238_vm10, %v2179_v34  ;;  %v1988_v37 = vpop.permute.xlu2 %1987 }
 0x29a   : > { %2450 = vst.msk [vmem:[#allocation3 + $0x90] sm:$0xff] %vm2431_vm11, %v2372_v19  ;;  %v2191_v38 = vpop.permute.xlu1 %2190  ;;  %v2469_v39 = vld [vmem:[#allocation3 + $0x28] sm:$0xff] }
 0x29b   : > { %2263 = vst.msk [vmem:[#allocation3 + $0xc0] sm:$0xff] %vm2238_vm10, %v2191_v38  ;;  %3126 = vmatmul.msk.f32.gmra.mxu0 %vm2505_vm12, %v2469_v39 }
 0x29c   : > { %2065 = vst.msk [vmem:[#allocation3 + $0x98] sm:$0xff] %vm2045_vm9, %v1988_v37 }
 0x29d   : > { %854 = vst.msk [vmem:[#allocation2 + $0x1a8] sm:$0x3] %vm762_vm2, %v850_v2 }
 0x29e   : > { %2391 = vrot.lane.b32.xlu0 %v2299_v40, %s3239_s20 }
 0x29f   : > { %2379 = vrot.lane.b32.xlu2 %v2293_v41, %s3239_s20 }
 0x2a0   : > { %v2384_v43 = vpop.permute.xlu0 %2383  ;;  %1813 = vrot.lane.b32.xlu1 %v2298_v52, %s3237_s18 }
 0x2a1   : > { %2456 = vst.msk [vmem:[#allocation3 + $0xc0] sm:$0xff] %vm2431_vm11, %v2384_v43  ;;  %v2482_v44 = vld [vmem:[#allocation3 + $0x90] sm:$0xff]  ;;  %v2360_v11 = vpop.permute.xlu2 %2359 }
 0x2a2   : > { %v1962_v51 = vpop.permute.xlu1 %1961  ;;  %3139 = vmatmul.msk.f32.gmra.mxu2 %vm2505_vm12, %v2482_v44 }
 0x2a3   : > { %2052 = vst.msk [vmem:[#allocation3 + $0x30] sm:$0xff] %vm2045_vm9, %v1962_v51 }
 0x2a4   : > { %v2302_v52 = vld [vmem:[#allocation2 + $0x1a2] sm:$0xff] }
 0x2a5   : > { %v2109_v12 = vld [vmem:[#allocation2 + $0x1a1] sm:$0xff] }
 0x2a6   : > { %2007 = vrot.lane.b32.xlu0 %v1914_v45, %s3238_s19 }
 0x2a7   : > { %1995 = vrot.lane.b32.xlu2 %v1908_v47, %s3238_s19 }
 0x2a8   : > { %v2155_v13 = vpop.permute.xlu0 %2154  ;;  %v2488_v21 = vld [vmem:[#allocation3 + $0xc0] sm:$0xff]  ;;  %2188 = vrot.lane.b32.xlu1 %v2101_v48, %s3240_s21 }
 0x2a9   : > { %2245 = vst.msk [vmem:[#allocation3 + $0x30] sm:$0xff] %vm2238_vm10, %v2155_v13  ;;  %3145 = vmatmul.msk.f32.vlgmr.msra.gmra.mxu3 %vm2505_vm12, %v2488_v21  ;;  %v2374_v55 = vpop.permute.xlu2 %2373 }
 0x2aa   : > { %v2167_v50 = vpop.permute.xlu1 %2166 }
 0x2ab   : > { %2251 = vst.msk [vmem:[#allocation3 + $0x60] sm:$0xff] %vm2238_vm10, %v2167_v50 }
 0x2ac   : > { %2444 = vst.msk [vmem:[#allocation3 + $0x60] sm:$0xff] %vm2431_vm11, %v2360_v11 }
 0x2ae   : > { %2381 = vrot.lane.b32.xlu0 %v2294_v35, %s3239_s20 }
 0x2af   : > { %2200 = vrot.lane.b32.xlu2 %v2107_v28, %s3240_s21 }
 0x2b0   : > { %v2000_v10 = vpop.permute.xlu0 %1999  ;;  %2393 = vrot.lane.b32.xlu1 %v2300_v56, %s3239_s20 }
 0x2b1   : > { %2071 = vst.msk [vmem:[#allocation3 + $0xc8] sm:$0xff] %vm2045_vm9, %v2000_v10  ;;  %v1976_v59 = vpop.permute.xlu2 %1975 }
 0x2b2   : > { %v2348_v61 = vpop.permute.xlu1 %2347  ;;  %2059 = vst.msk [vmem:[#allocation3 + $0x68] sm:$0xff] %vm2045_vm9, %v1976_v59 }
 0x2b3   : > { %2438 = vst.msk [vmem:[#allocation3 + $0x30] sm:$0xff] %vm2431_vm11, %v2348_v61  ;;  %v2476_v58 = vld [vmem:[#allocation3 + $0x60] sm:$0xff] }
 0x2b4   : > { %3133 = vmatmul.msk.f32.gmra.mxu1 %vm2505_vm12, %v2476_v58 }
 0x2b6   : > { %2009 = vrot.lane.b32.xlu0 %v1915_v24, %s3238_s19 }
 0x2b7   : > { %1815 = vrot.lane.b32.xlu2 %v2299_v40, %s3237_s18 }
 0x2b8   : > { %v2181_v0 = vpop.permute.xlu0 %2180  ;;  %2202 = vrot.lane.b32.xlu1 %v2108_v6, %s3240_s21 }
 0x2b9   : > { %2258 = vst.msk [vmem:[#allocation3 + $0x98] sm:$0xff] %vm2238_vm10, %v2181_v0  ;;  %v1990_v4 = vpop.permute.xlu2 %1989 }
 0x2ba   : > { %2451 = vst.msk [vmem:[#allocation3 + $0x98] sm:$0xff] %vm2431_vm11, %v2374_v55  ;;  %v2193_v30 = vpop.permute.xlu1 %2192  ;;  %v2470_v22 = vld [vmem:[#allocation3 + $0x30] sm:$0xff] }
 0x2bb   : > { %2264 = vst.msk [vmem:[#allocation3 + $0xc8] sm:$0xff] %vm2238_vm10, %v2193_v30  ;;  %3127 = vmatmul.msk.f32.gmra.mxu0 %vm2505_vm12, %v2470_v22 }
 0x2bc   : > { %2066 = vst.msk [vmem:[#allocation3 + $0xa0] sm:$0xff] %vm2045_vm9, %v1990_v4 }
 0x2be   : > { %1817 = vrot.lane.b32.xlu0 %v2300_v56, %s3237_s18  ;;  %v2623_v3 = vpop.f32.mrf.mxu0 }
 0x2bf   : > { %v2624_v5 = vadd.f32 %v4376_v60, %v2623_v3  ;;  %2395 = vrot.lane.b32.xlu2 %v2301_v1, %s3239_s20 }
 0x2c0   : > { %v2386_v7 = vpop.permute.xlu0 %2385  ;;  %2011 = vrot.lane.b32.xlu1 %v1916_v27, %s3238_s19 }
 0x2c1   : > { %2893 = vst.msk [vmem:[%s4383_s25] sm:$0xff] %vm2719_vm13, %v2624_v5  ;;  %v2483_v9 = vld [vmem:[#allocation3 + $0x98] sm:$0xff]  ;;  %v2362_v8 = vpop.permute.xlu2 %2361  ;;  %v2789_v29 = vmul.f32 %v2624_v5, %v2624_v5  ;;  %v2720_v15 = vsel %vm2719_vm13, %v2624_v5, 0.0 }
 0x2c2   : > { %2457 = vst.msk [vmem:[#allocation3 + $0xc8] sm:$0xff] %vm2431_vm11, %v2386_v7  ;;  %v1964_v25 = vpop.permute.xlu1 %1963  ;;  %3140 = vmatmul.msk.f32.gmra.mxu2 %vm2505_vm12, %v2483_v9 }
 0x2c3   : > { %2053 = vst.msk [vmem:[#allocation3 + $0x38] sm:$0xff] %vm2045_vm9, %v1964_v25  ;;  %v2821_v63 = vsel %vm2719_vm13, %v2789_v29, 0.0 }
 0x2c6   : > { %2397 = vrot.lane.b32.xlu0 %v2302_v52, %s3239_s20  ;;  %v2626_v26 = vpop.f32.mrf.mxu0  ;;  %s500_s20 = scalar_lea.vmem %s4704_s8, %s3115_s29 }
 0x2c7   : > { %v2627_v54 = vadd.f32 %v4376_v60, %v2626_v26  ;;  %2204 = vrot.lane.b32.xlu2 %v2109_v12, %s3240_s21 }
 0x2c8   : > { %v2157_v19 = vpop.permute.xlu0 %2156 }
 0x2c9   : > { %v2721_v16 = vsel %vm2719_vm13, %v2627_v54, 0.0  ;;  %v2790_v23 = vmul.f32 %v2627_v54, %v2627_v54  ;;  %2894 = vst.msk [vmem:[%s4383_s25 + $0x8] sm:$0xff] %vm2719_vm13, %v2627_v54  ;;  %v2489_v49 = vld [vmem:[#allocation3 + $0xc8] sm:$0xff]  ;;  %v2376_v31 = vpop.permute.xlu2 %2375 }
 0x2ca   : > { %v2722_v36 = vadd.f32 %v2721_v16, %v2720_v15  ;;  %2246 = vst.msk [vmem:[#allocation3 + $0x38] sm:$0xff] %vm2238_vm10, %v2157_v19  ;;  %v2169_v62 = vpop.permute.xlu1 %2168  ;;  %3146 = vmatmul.msk.f32.gmra.mxu3 %vm2505_vm12, %v2489_v49 }
 0x2cb   : > { %v2822_v46 = vsel %vm2719_vm13, %v2790_v23, 0.0  ;;  %2252 = vst.msk [vmem:[#allocation3 + $0x68] sm:$0xff] %vm2238_vm10, %v2169_v62 }
 0x2cc   : > { %v2823_v53 = vadd.f32 %v2822_v46, %v2821_v63  ;;  %2445 = vst.msk [vmem:[#allocation3 + $0x68] sm:$0xff] %vm2431_vm11, %v2362_v8 }
 0x2cf   : > { %v2629_v17 = vpop.f32.mrf.mxu0 }
 0x2d0   : > { %v2630_v18 = vadd.f32 %v4376_v60, %v2629_v17  ;;  %v2002_v20 = vpop.permute.xlu0 %2001 }
 0x2d1   : > { %2072 = vst.msk [vmem:[#allocation3 + $0xd0] sm:$0xff] %vm2045_vm9, %v2002_v20  ;;  %v2171_v57 = vpop.permute.xlu2 %2170 }
 0x2d2   : > { %v2723_v32 = vsel %vm2719_vm13, %v2630_v18, 0.0  ;;  %v2791_v33 = vmul.f32 %v2630_v18, %v2630_v18  ;;  %2895 = vst.msk [vmem:[%s4383_s25 + $0x10] sm:$0xff] %vm2719_vm13, %v2630_v18  ;;  %v2350_v14 = vpop.permute.xlu1 %2349 }
 0x2d3   : > { %v2724_v34 = vadd.f32 %v2723_v32, %v2722_v36  ;;  %2439 = vst.msk [vmem:[#allocation3 + $0x38] sm:$0xff] %vm2431_vm11, %v2350_v14  ;;  %v2477_v37 = vld [vmem:[#allocation3 + $0x68] sm:$0xff] }
 0x2d4   : > { %v2824_v38 = vsel %vm2719_vm13, %v2791_v33, 0.0  ;;  %3134 = vmatmul.msk.f32.gmra.mxu1 %vm2505_vm12, %v2477_v37 }
 0x2d5   : > { %v2825_v39 = vadd.f32 %v2824_v38, %v2823_v53 }
 0x2d6   : > { %v2647_v40 = vpop.f32.mrf.mxu1 }
 0x2d7   : > { %v4416_v41 = vadd.f32 %v4376_v60, %v2647_v40 }
 0x2d8   : > { %v2183_v42 = vpop.permute.xlu0 %2182 }
 0x2d9   : > { %2901 = vst.msk [vmem:[%s4383_s25 + $0x40] sm:$0xff] %vm2719_vm13, %v4416_v41  ;;  %v2364_v2 = vpop.permute.xlu2 %2363 }
 0x2da   : > { %2259 = vst.msk [vmem:[#allocation3 + $0xa0] sm:$0xff] %vm2238_vm10, %v2183_v42  ;;  %v2195_v43 = vpop.permute.xlu1 %2194  ;;  %v2471_v44 = vld [vmem:[#allocation3 + $0x38] sm:$0xff] }
 0x2db   : > { %2452 = vst.msk [vmem:[#allocation3 + $0xa0] sm:$0xff] %vm2431_vm11, %v2376_v31  ;;  %3128 = vmatmul.msk.f32.gmra.mxu0 %vm2505_vm12, %v2471_v44 }
 0x2dc   : > { %2265 = vst.msk [vmem:[#allocation3 + $0xd0] sm:$0xff] %vm2238_vm10, %v2195_v43 }
 0x2e0   : > { %v2388_v11 = vpop.permute.xlu0 %2387 }
 0x2e1   : > { %2458 = vst.msk [vmem:[#allocation3 + $0xd0] sm:$0xff] %vm2431_vm11, %v2388_v11  ;;  %v2378_v51 = vpop.permute.xlu2 %2377 }
 0x2e2   : > { %v1978_v45 = vpop.permute.xlu1 %1977  ;;  %v2484_v47 = vld [vmem:[#allocation3 + $0xa0] sm:$0xff] }
 0x2e3   : > { %2060 = vst.msk [vmem:[#allocation3 + $0x70] sm:$0xff] %vm2045_vm9, %v1978_v45  ;;  %3141 = vmatmul.msk.f32.gmra.mxu2 %vm2505_vm12, %v2484_v47 }
 0x2e4   : > { %2253 = vst.msk [vmem:[#allocation3 + $0x70] sm:$0xff] %vm2238_vm10, %v2171_v57 }
 0x2e5   : > { %2446 = vst.msk [vmem:[#allocation3 + $0x70] sm:$0xff] %vm2431_vm11, %v2364_v2 }
 0x2e6   : > { %v2632_v48 = vpop.f32.mrf.mxu0 }
 0x2e7   : > { %v2633_v13 = vadd.f32 %v4376_v60, %v2632_v48 }
 0x2e8   : > { %v1992_v21 = vpop.permute.xlu0 %1991  ;;  %v2490_v55 = vld [vmem:[#allocation3 + $0xd0] sm:$0xff]  ;;  %v2650_v50 = vpop.f32.mrf.mxu1 }
 0x2e9   : > { %v2725_v35 = vsel %vm2719_vm13, %v2633_v13, 0.0  ;;  %v2792_v28 = vmul.f32 %v2633_v13, %v2633_v13  ;;  %2896 = vst.msk [vmem:[%s4383_s25 + $0x18] sm:$0xff] %vm2719_vm13, %v2633_v13  ;;  %3147 = vmatmul.msk.f32.gmra.mxu3 %vm2505_vm12, %v2490_v55  ;;  %v4436_v56 = vadd.f32 %v4376_v60, %v2650_v50  ;;  %v2173_v10 = vpop.permute.xlu2 %2172 }
 0x2ea   : > { %v2726_v59 = vadd.f32 %v2725_v35, %v2724_v34  ;;  %2067 = vst.msk [vmem:[#allocation3 + $0xa8] sm:$0xff] %vm2045_vm9, %v1992_v21  ;;  %v2004_v61 = vpop.permute.xlu1 %2003 }
 0x2eb   : > { %v2826_v24 = vsel %vm2719_vm13, %v2792_v28, 0.0  ;;  %2073 = vst.msk [vmem:[#allocation3 + $0xd8] sm:$0xff] %vm2045_vm9, %v2004_v61 }
 0x2ec   : > { %v2827_v58 = vadd.f32 %v2826_v24, %v2825_v39  ;;  %v2478_v6 = vld [vmem:[#allocation3 + $0x70] sm:$0xff]  ;;  %2902 = vst.msk [vmem:[%s4383_s25 + $0x48] sm:$0xff] %vm2719_vm13, %v4436_v56 }
 0x2ed   : > { %3135 = vmatmul.msk.f32.gmra.mxu1 %vm2505_vm12, %v2478_v6 }
 0x2f0   : > { %v2185_v0 = vpop.permute.xlu0 %2184 }
 0x2f1   : > { %2260 = vst.msk [vmem:[#allocation3 + $0xa8] sm:$0xff] %vm2238_vm10, %v2185_v0  ;;  %v2366_v4 = vpop.permute.xlu2 %2365 }
 0x2f2   : > { %2453 = vst.msk [vmem:[#allocation3 + $0xa8] sm:$0xff] %vm2431_vm11, %v2378_v51  ;;  %v2197_v30 = vpop.permute.xlu1 %2196 }
 0x2f3   : > { %2266 = vst.msk [vmem:[#allocation3 + $0xd8] sm:$0xff] %vm2238_vm10, %v2197_v30 }
 0x2f4   : > { %v2671_v22 = vpop.f32.mrf.mxu2 }
 0x2f5   : > { %v4449_v1 = vadd.f32 %v4376_v60, %v2671_v22 }
 0x2f7   : > { %2909 = vst.msk [vmem:[%s4383_s25 + $0x80] sm:$0xff] %vm2719_vm13, %v4449_v1 }
 0x2f8   : > { %v2390_v27 = vpop.permute.xlu0 %2389 }
 0x2f9   : > { %2459 = vst.msk [vmem:[#allocation3 + $0xd8] sm:$0xff] %vm2431_vm11, %v2390_v27  ;;  %v2485_v3 = vld [vmem:[#allocation3 + $0xa8] sm:$0xff]  ;;  %v2380_v5 = vpop.permute.xlu2 %2379 }
 0x2fa   : > { %v1980_v7 = vpop.permute.xlu1 %1979  ;;  %3142 = vmatmul.msk.f32.gmra.mxu2 %vm2505_vm12, %v2485_v3 }
 0x2fb   : > { %2061 = vst.msk [vmem:[#allocation3 + $0x78] sm:$0xff] %vm2045_vm9, %v1980_v7 }
 0x2fc   : > { %2254 = vst.msk [vmem:[#allocation3 + $0x78] sm:$0xff] %vm2238_vm10, %v2173_v10 }
 0x2fd   : > { %2447 = vst.msk [vmem:[#allocation3 + $0x78] sm:$0xff] %vm2431_vm11, %v2366_v4 }
 0x2fe   : > { %v2635_v9 = vpop.f32.mrf.mxu0 }
 0x2ff   : > { %v2636_v8 = vadd.f32 %v4376_v60, %v2635_v9 }
 0x300   : > { %v1994_v25 = vpop.permute.xlu0 %1993  ;;  %v2491_v52 = vld [vmem:[#allocation3 + $0xd8] sm:$0xff]  ;;  %v2653_v12 = vpop.f32.mrf.mxu1 }
 0x301   : > { %v2727_v26 = vsel %vm2719_vm13, %v2636_v8, 0.0  ;;  %v2793_v29 = vmul.f32 %v2636_v8, %v2636_v8  ;;  %2897 = vst.msk [vmem:[%s4383_s25 + $0x20] sm:$0xff] %vm2719_vm13, %v2636_v8  ;;  %3148 = vmatmul.msk.f32.gmra.mxu3 %vm2505_vm12, %v2491_v52  ;;  %v4465_v54 = vadd.f32 %v4376_v60, %v2653_v12  ;;  %v1996_v19 = vpop.permute.xlu2 %1995 }
 0x302   : > { %v2728_v15 = vadd.f32 %v2727_v26, %v2726_v59  ;;  %2068 = vst.msk [vmem:[#allocation3 + $0xb0] sm:$0xff] %vm2045_vm9, %v1994_v25  ;;  %v2006_v16 = vpop.permute.xlu1 %2005 }
 0x303   : > { %v2828_v23 = vsel %vm2719_vm13, %v2793_v29, 0.0  ;;  %2903 = vst.msk [vmem:[%s4383_s25 + $0x50] sm:$0xff] %vm2719_vm13, %v4465_v54 }
 0x304   : > { %v2829_v49 = vadd.f32 %v2828_v23, %v2827_v58  ;;  %v2479_v31 = vld [vmem:[#allocation3 + $0x78] sm:$0xff]  ;;  %2074 = vst.msk [vmem:[#allocation3 + $0xe0] sm:$0xff] %vm2045_vm9, %v2006_v16  ;;  %v2797_v16 = vmul.f32 %v4416_v41, %v4416_v41 }
 0x305   : > { %3136 = vmatmul.msk.f32.gmra.mxu1 %vm2505_vm12, %v2479_v31  ;;  %2069 = vst.msk [vmem:[#allocation3 + $0xb8] sm:$0xff] %vm2045_vm9, %v1996_v19 }
 0x308   : > { %v2187_v36 = vpop.permute.xlu0 %2186 }
 0x309   : > { %2261 = vst.msk [vmem:[#allocation3 + $0xb0] sm:$0xff] %vm2238_vm10, %v2187_v36  ;;  %v2201_v62 = vpop.permute.xlu2 %2200  ;;  %v2735_v36 = vsel %vm2719_vm13, %v4416_v41, 0.0  ;;  %v2739_v41 = vsel %vm2719_vm13, %v4465_v54, 0.0 }
 0x30a   : > { %2454 = vst.msk [vmem:[#allocation3 + $0xb0] sm:$0xff] %vm2431_vm11, %v2380_v5  ;;  %v2199_v63 = vpop.permute.xlu1 %2198 }
 0x30b   : > { %2267 = vst.msk [vmem:[#allocation3 + $0xe0] sm:$0xff] %vm2238_vm10, %v2199_v63 }
 0x30c   : > { %v2674_v46 = vpop.f32.mrf.mxu2 }
 0x30d   : > { %v4479_v53 = vadd.f32 %v4376_v60, %v2674_v46 }
 0x30f   : > { %2910 = vst.msk [vmem:[%s4383_s25 + $0x88] sm:$0xff] %vm2719_vm13, %v4479_v53 }
 0x310   : > { %v2392_v17 = vpop.permute.xlu0 %2391 }
 0x311   : > { %2460 = vst.msk [vmem:[#allocation3 + $0xe0] sm:$0xff] %vm2431_vm11, %v2392_v17  ;;  %v2486_v18 = vld [vmem:[#allocation3 + $0xb0] sm:$0xff]  ;;  %v2656_v20 = vpop.f32.mrf.mxu1  ;;  %v1816_v57 = vpop.permute.xlu2 %1815 }
 0x312   : > { %3143 = vmatmul.msk.f32.gmra.mxu2 %vm2505_vm12, %v2486_v18  ;;  %v1814_v32 = vpop.permute.xlu1 %1813  ;;  %v4487_v33 = vadd.f32 %v4376_v60, %v2656_v20  ;;  %1882 = vst.msk [vmem:[#allocation3 + $0xf0] sm:$0xff] %vm1851_vm7, %v1816_v57  ;;  %v2836_v18 = vsel %vm2719_vm13, %v2797_v16, 0.0  ;;  %v2737_v20 = vsel %vm2719_vm13, %v4436_v56, 0.0  ;;  %v2799_v57 = vmul.f32 %v4465_v54, %v4465_v54 }
 0x313   : > { %1881 = vst.msk [vmem:[#allocation3 + $0xe8] sm:$0xff] %vm1851_vm7, %v1814_v32  ;;  %v2806_v16 = vmul.f32 %v4479_v53, %v4479_v53 }
 0x314   : > { %2904 = vst.msk [vmem:[%s4383_s25 + $0x58] sm:$0xff] %vm2719_vm13, %v4487_v33 }
 0x318   : > { %v2638_v14 = vpop.f32.mrf.mxu0  ;;  %v2008_v34 = vpop.permute.xlu0 %2007  ;;  %v2492_v37 = vld [vmem:[#allocation3 + $0xe0] sm:$0xff] }
 0x319   : > { %v2639_v38 = vadd.f32 %v4376_v60, %v2638_v14  ;;  %2075 = vst.msk [vmem:[#allocation3 + $0xe8] sm:$0xff] %vm2045_vm9, %v2008_v34  ;;  %3149 = vmatmul.msk.f32.gmra.mxu3 %vm2505_vm12, %v2492_v37  ;;  %v2396_v48 = vpop.permute.xlu2 %2395  ;;  %v2800_v37 = vmul.f32 %v4487_v33, %v4487_v33 }
 0x31a   : > { %v2189_v39 = vpop.permute.xlu1 %2188  ;;  %2268 = vst.msk [vmem:[#allocation3 + $0xe8] sm:$0xff] %vm2238_vm10, %v2201_v62  ;;  %v2798_v62 = vmul.f32 %v4436_v56, %v4436_v56  ;;  %v2741_v56 = vsel %vm2719_vm13, %v4487_v33, 0.0 }
 0x31b   : > { %v2729_v40 = vsel %vm2719_vm13, %v2639_v38, 0.0  ;;  %v2794_v42 = vmul.f32 %v2639_v38, %v2639_v38  ;;  %2898 = vst.msk [vmem:[%s4383_s25 + $0x28] sm:$0xff] %vm2719_vm13, %v2639_v38 }
 0x31c   : > { %v2730_v2 = vadd.f32 %v2729_v40, %v2728_v15  ;;  %2262 = vst.msk [vmem:[#allocation3 + $0xb8] sm:$0xff] %vm2238_vm10, %v2189_v39  ;;  %v2838_v34 = vsel %vm2719_vm13, %v2798_v62, 0.0  ;;  %v2840_v40 = vsel %vm2719_vm13, %v2799_v57, 0.0  ;;  %v2753_v62 = vsel %vm2719_vm13, %v4479_v53, 0.0 }
 0x31d   : > { %v2830_v43 = vsel %vm2719_vm13, %v2794_v42, 0.0 }
 0x31e   : > { %v2831_v44 = vadd.f32 %v2830_v43, %v2829_v49 }
 0x320   : > { %v2382_v11 = vpop.permute.xlu0 %2381 }
 0x321   : > { %2455 = vst.msk [vmem:[#allocation3 + $0xb8] sm:$0xff] %vm2431_vm11, %v2382_v11  ;;  %v2205_v59 = vpop.permute.xlu2 %2204 }
 0x322   : > { %v2394_v51 = vpop.permute.xlu1 %2393 }
 0x323   : > { %2461 = vst.msk [vmem:[#allocation3 + $0xe8] sm:$0xff] %vm2431_vm11, %v2394_v51 }
 0x325   : > { %v2677_v45 = vpop.f32.mrf.mxu2 }
 0x326   : > { %v4506_v47 = vadd.f32 %v4376_v60, %v2677_v45 }
 0x328   : > { %v2010_v13 = vpop.permute.xlu0 %2009  ;;  %v2487_v21 = vld [vmem:[#allocation3 + $0xb8] sm:$0xff]  ;;  %2911 = vst.msk [vmem:[%s4383_s25 + $0x90] sm:$0xff] %vm2719_vm13, %v4506_v47 }
 0x329   : > { %2076 = vst.msk [vmem:[#allocation3 + $0xf0] sm:$0xff] %vm2045_vm9, %v2010_v13  ;;  %3144 = vmatmul.msk.f32.gmra.mxu2 %vm2505_vm12, %v2487_v21 }
 0x32a   : > { %v2203_v55 = vpop.permute.xlu1 %2202  ;;  %v2493_v50 = vld [vmem:[#allocation3 + $0xe8] sm:$0xff] }
 0x32b   : > { %2269 = vst.msk [vmem:[#allocation3 + $0xf0] sm:$0xff] %vm2238_vm10, %v2203_v55  ;;  %3150 = vmatmul.msk.f32.gmra.mxu3 %vm2505_vm12, %v2493_v50 }
 0x32c   : > { %v2695_v35 = vpop.f32.mrf.mxu3  ;;  %2462 = vst.msk [vmem:[#allocation3 + $0xf0] sm:$0xff] %vm2431_vm11, %v2396_v48 }
 0x32d   : > { %v4517_v28 = vadd.f32 %v4376_v60, %v2695_v35 }
 0x32f   : > { %2917 = vst.msk [vmem:[%s4383_s25 + $0xc0] sm:$0xff] %vm2719_vm13, %v4517_v28 }
 0x330   : > { %v1818_v10 = vpop.permute.xlu0 %1817 }
 0x331   : > { %1883 = vst.msk [vmem:[#allocation3 + $0xf8] sm:$0xff] %vm1851_vm7, %v1818_v10  ;;  %v2659_v61 = vpop.f32.mrf.mxu1 }
 0x332   : > { %v2012_v24 = vpop.permute.xlu1 %2011  ;;  %v2660_v58 = vadd.f32 %v4376_v60, %v2659_v61 }
 0x333   : > { %2077 = vst.msk [vmem:[#allocation3 + $0xf8] sm:$0xff] %vm2045_vm9, %v2012_v24  ;;  %v2494_v6 = vld [vmem:[#allocation3 + $0xf0] sm:$0xff] }
 0x334   : > { %2270 = vst.msk [vmem:[#allocation3 + $0xf8] sm:$0xff] %vm2238_vm10, %v2205_v59  ;;  %3151 = vmatmul.msk.f32.gmra.mxu3 %vm2505_vm12, %v2494_v6  ;;  %v2801_v42 = vmul.f32 %v2660_v58, %v2660_v58  ;;  %v2743_v11 = vsel %vm2719_vm13, %v2660_v58, 0.0 }
 0x335   : > { %2905 = vst.msk [vmem:[%s4383_s25 + $0x60] sm:$0xff] %vm2719_vm13, %v2660_v58 }
 0x336   : > { %v2844_v13 = vsel %vm2719_vm13, %v2801_v42, 0.0 }
 0x338   : > { %v2641_v0 = vpop.f32.mrf.mxu0  ;;  %v2398_v4 = vpop.permute.xlu0 %2397 }
 0x339   : > { %v2642_v30 = vadd.f32 %v4376_v60, %v2641_v0  ;;  %2463 = vst.msk [vmem:[#allocation3 + $0xf8] sm:$0xff] %vm2431_vm11, %v2398_v4 }
 0x33b   : > { %v2731_v22 = vsel %vm2719_vm13, %v2642_v30, 0.0  ;;  %v2795_v27 = vmul.f32 %v2642_v30, %v2642_v30  ;;  %2899 = vst.msk [vmem:[%s4383_s25 + $0x30] sm:$0xff] %vm2719_vm13, %v2642_v30 }
 0x33c   : > { %v2732_v3 = vadd.f32 %v2731_v22, %v2730_v2 }
 0x33d   : > { %v2832_v5 = vsel %vm2719_vm13, %v2795_v27, 0.0 }
 0x33e   : > { %v2833_v7 = vadd.f32 %v2832_v5, %v2831_v44  ;;  %v2842_v44 = vsel %vm2719_vm13, %v2800_v37, 0.0 }
 0x340   : > { %v2495_v9 = vld [vmem:[#allocation3 + $0xf8] sm:$0xff] }
 0x341   : > { %3152 = vmatmul.msk.f32.gmra.mxu3 %vm2505_vm12, %v2495_v9  ;;  %v2805_v9 = vmul.f32 %v4449_v1, %v4449_v1 }
 0x345   : > { %v2680_v8 = vpop.f32.mrf.mxu2 }
 0x346   : > { %v4537_v25 = vadd.f32 %v4376_v60, %v2680_v8 }
 0x348   : > { %2912 = vst.msk [vmem:[%s4383_s25 + $0x98] sm:$0xff] %vm2719_vm13, %v4537_v25  ;;  %v2757_v53 = vsel %vm2719_vm13, %v4537_v25, 0.0 }
 0x34d   : > { %v2698_v52 = vpop.f32.mrf.mxu3 }
 0x34e   : > { %v4543_v12 = vadd.f32 %v4376_v60, %v2698_v52 }
 0x350   : > { %2918 = vst.msk [vmem:[%s4383_s25 + $0xc8] sm:$0xff] %vm2719_vm13, %v4543_v12 }
 0x351   : > { %v2662_v26 = vpop.f32.mrf.mxu1 }
 0x352   : > { %v2663_v29 = vadd.f32 %v4376_v60, %v2662_v26 }
 0x354   : > { %2906 = vst.msk [vmem:[%s4383_s25 + $0x68] sm:$0xff] %vm2719_vm13, %v2663_v29  ;;  %v2802_v54 = vmul.f32 %v2663_v29, %v2663_v29  ;;  %v2745_v21 = vsel %vm2719_vm13, %v2663_v29, 0.0 }
 0x356   : > { %v2846_v35 = vsel %vm2719_vm13, %v2802_v54, 0.0 }
 0x358   : > { %v2644_v19 = vpop.f32.mrf.mxu0 }
 0x359   : > { %v2645_v15 = vadd.f32 %v4376_v60, %v2644_v19 }
 0x35b   : > { %v2733_v23 = vsel %vm2719_vm13, %v2645_v15, 0.0  ;;  %v2796_v49 = vmul.f32 %v2645_v15, %v2645_v15  ;;  %2900 = vst.msk [vmem:[%s4383_s25 + $0x38] sm:$0xff] %vm2719_vm13, %v2645_v15  ;;  %v2751_v15 = vsel %vm2719_vm13, %v4449_v1, 0.0 }
 0x35c   : > { %v2734_v31 = vadd.f32 %v2733_v23, %v2732_v3 }
 0x35d   : > { %v2834_v63 = vsel %vm2719_vm13, %v2796_v49, 0.0 }
 0x35e   : > { %v2736_v46 = vadd.f32 %v2735_v36, %v2734_v31  ;;  %v2835_v17 = vadd.f32 %v2834_v63, %v2833_v7  ;;  %v2852_v36 = vsel %vm2719_vm13, %v2805_v9, 0.0  ;;  %v2807_v63 = vmul.f32 %v4506_v47, %v4506_v47 }
 0x35f   : > { %v2769_v9 = vsel %vm2719_vm13, %v4543_v12, 0.0 }
 0x360   : > { %v2738_v32 = vadd.f32 %v2737_v20, %v2736_v46  ;;  %v2837_v14 = vadd.f32 %v2836_v18, %v2835_v17  ;;  %v2854_v17 = vsel %vm2719_vm13, %v2806_v16, 0.0  ;;  %v2755_v18 = vsel %vm2719_vm13, %v4506_v47, 0.0 }
 0x361   : > { %v2808_v20 = vmul.f32 %v4537_v25, %v4537_v25 }
 0x362   : > { %v2839_v38 = vadd.f32 %v2838_v34, %v2837_v14  ;;  %v2740_v39 = vadd.f32 %v2739_v41, %v2738_v32  ;;  %v2856_v14 = vsel %vm2719_vm13, %v2807_v63, 0.0 }
 0x364   : > { %v2742_v2 = vadd.f32 %v2741_v56, %v2740_v39  ;;  %v2841_v43 = vadd.f32 %v2840_v40, %v2839_v38  ;;  %v2858_v38 = vsel %vm2719_vm13, %v2808_v20, 0.0 }
 0x366   : > { %v2744_v51 = vadd.f32 %v2743_v11, %v2742_v2  ;;  %v2843_v45 = vadd.f32 %v2842_v44, %v2841_v43  ;;  %v2683_v48 = vpop.f32.mrf.mxu2 }
 0x367   : > { %v2684_v33 = vadd.f32 %v4376_v60, %v2683_v48 }
 0x368   : > { %v2746_v55 = vadd.f32 %v2745_v21, %v2744_v51  ;;  %v2845_v50 = vadd.f32 %v2844_v13, %v2843_v45 }
 0x369   : > { %2913 = vst.msk [vmem:[%s4383_s25 + $0xa0] sm:$0xff] %vm2719_vm13, %v2684_v33  ;;  %v2809_v34 = vmul.f32 %v2684_v33, %v2684_v33  ;;  %v2759_v39 = vsel %vm2719_vm13, %v2684_v33, 0.0 }
 0x36a   : > { %v2847_v10 = vadd.f32 %v2846_v35, %v2845_v50  ;;  %v2665_v59 = vpop.f32.mrf.mxu1 }
 0x36b   : > { %v2666_v61 = vadd.f32 %v4376_v60, %v2665_v59  ;;  %v2860_v56 = vsel %vm2719_vm13, %v2809_v34, 0.0  ;;  %v2813_v59 = vmul.f32 %v4517_v28, %v4517_v28 }
 0x36c   : > { %v2701_v24 = vpop.f32.mrf.mxu3 }
 0x36d   : > { %2907 = vst.msk [vmem:[%s4383_s25 + $0x70] sm:$0xff] %vm2719_vm13, %v2666_v61  ;;  %v4587_v58 = vadd.f32 %v4376_v60, %v2701_v24  ;;  %v2803_v4 = vmul.f32 %v2666_v61, %v2666_v61  ;;  %v2747_v30 = vsel %vm2719_vm13, %v2666_v61, 0.0 }
 0x36e   : > { %v2748_v5 = vadd.f32 %v2747_v30, %v2746_v55  ;;  %v2767_v30 = vsel %vm2719_vm13, %v4517_v28, 0.0 }
 0x36f   : > { %2919 = vst.msk [vmem:[%s4383_s25 + $0xd0] sm:$0xff] %vm2719_vm13, %v4587_v58  ;;  %v2848_v27 = vsel %vm2719_vm13, %v2803_v4, 0.0 }
 0x370   : > { %v2849_v29 = vadd.f32 %v2848_v27, %v2847_v10 }
 0x37d   : > { %v2686_v6 = vpop.f32.mrf.mxu2 }
 0x37e   : > { %v2687_v0 = vadd.f32 %v4376_v60, %v2686_v6 }
 0x380   : > { %2914 = vst.msk [vmem:[%s4383_s25 + $0xa8] sm:$0xff] %vm2719_vm13, %v2687_v0  ;;  %v2810_v11 = vmul.f32 %v2687_v0, %v2687_v0  ;;  %v2761_v51 = vsel %vm2719_vm13, %v2687_v0, 0.0 }
 0x382   : > { %v2668_v22 = vpop.f32.mrf.mxu1  ;;  %v2862_v21 = vsel %vm2719_vm13, %v2810_v11, 0.0 }
 0x383   : > { %v2669_v3 = vadd.f32 %v4376_v60, %v2668_v22  ;;  %v2814_v22 = vmul.f32 %v4543_v12, %v4543_v12 }
 0x384   : > { %v2704_v7 = vpop.f32.mrf.mxu3 }
 0x385   : > { %v2749_v8 = vsel %vm2719_vm13, %v2669_v3, 0.0  ;;  %v2804_v52 = vmul.f32 %v2669_v3, %v2669_v3  ;;  %2908 = vst.msk [vmem:[%s4383_s25 + $0x78] sm:$0xff] %vm2719_vm13, %v2669_v3  ;;  %v4604_v26 = vadd.f32 %v4376_v60, %v2704_v7  ;;  %v2868_v7 = vsel %vm2719_vm13, %v2813_v59, 0.0 }
 0x386   : > { %v2750_v19 = vadd.f32 %v2749_v8, %v2748_v5  ;;  %v2815_v8 = vmul.f32 %v4587_v58, %v4587_v58 }
 0x387   : > { %v2850_v23 = vsel %vm2719_vm13, %v2804_v52, 0.0  ;;  %2920 = vst.msk [vmem:[%s4383_s25 + $0xd8] sm:$0xff] %vm2719_vm13, %v4604_v26 }
 0x388   : > { %v2752_v49 = vadd.f32 %v2751_v15, %v2750_v19  ;;  %v2851_v31 = vadd.f32 %v2850_v23, %v2849_v29  ;;  %v2870_v29 = vsel %vm2719_vm13, %v2814_v22, 0.0  ;;  %v2771_v19 = vsel %vm2719_vm13, %v4587_v58, 0.0 }
 0x389   : > { %v2872_v23 = vsel %vm2719_vm13, %v2815_v8, 0.0 }
 0x38a   : > { %v2754_v46 = vadd.f32 %v2753_v62, %v2752_v49  ;;  %v2853_v1 = vadd.f32 %v2852_v36, %v2851_v31  ;;  %v2816_v49 = vmul.f32 %v4604_v26, %v4604_v26  ;;  %v2773_v62 = vsel %vm2719_vm13, %v4604_v26, 0.0 }
 0x38c   : > { %v2855_v57 = vadd.f32 %v2854_v17, %v2853_v1  ;;  %v2756_v32 = vadd.f32 %v2755_v18, %v2754_v46  ;;  %v2874_v46 = vsel %vm2719_vm13, %v2816_v49, 0.0 }
 0x38e   : > { %v2758_v41 = vadd.f32 %v2757_v53, %v2756_v32  ;;  %v2857_v37 = vadd.f32 %v2856_v14, %v2855_v57 }
 0x390   : > { %v2760_v47 = vadd.f32 %v2759_v39, %v2758_v41  ;;  %v2859_v40 = vadd.f32 %v2858_v38, %v2857_v37 }
 0x392   : > { %v2861_v42 = vadd.f32 %v2860_v56, %v2859_v40  ;;  %v2762_v48 = vadd.f32 %v2761_v51, %v2760_v47 }
 0x394   : > { %v2863_v50 = vadd.f32 %v2862_v21, %v2861_v42 }
 0x395   : > { %v2689_v2 = vpop.f32.mrf.mxu2 }
 0x396   : > { %v2690_v43 = vadd.f32 %v4376_v60, %v2689_v2 }
 0x398   : > { %2915 = vst.msk [vmem:[%s4383_s25 + $0xb0] sm:$0xff] %vm2719_vm13, %v2690_v43  ;;  %v2811_v54 = vmul.f32 %v2690_v43, %v2690_v43  ;;  %v2763_v45 = vsel %vm2719_vm13, %v2690_v43, 0.0 }
 0x399   : > { %v2764_v35 = vadd.f32 %v2763_v45, %v2762_v48 }
 0x39a   : > { %v2864_v33 = vsel %vm2719_vm13, %v2811_v54, 0.0 }
 0x39b   : > { %v2865_v0 = vadd.f32 %v2864_v33, %v2863_v50 }
 0x39c   : > { %v2707_v44 = vpop.f32.mrf.mxu3 }
 0x39d   : > { %v2708_v25 = vadd.f32 %v4376_v60, %v2707_v44 }
 0x39f   : > { %2921 = vst.msk [vmem:[%s4383_s25 + $0xe0] sm:$0xff] %vm2719_vm13, %v2708_v25  ;;  %v2817_v58 = vmul.f32 %v2708_v25, %v2708_v25  ;;  %v2775_v17 = vsel %vm2719_vm13, %v2708_v25, 0.0 }
 0x3a1   : > { %v2876_v20 = vsel %vm2719_vm13, %v2817_v58, 0.0 }
 0x3ac   : > { %v2692_v13 = vpop.f32.mrf.mxu2 }
 0x3ad   : > { %v2693_v55 = vadd.f32 %v4376_v60, %v2692_v13 }
 0x3ae   : > { %v2710_v10 = vpop.f32.mrf.mxu3 }
 0x3af   : > { %v2765_v61 = vsel %vm2719_vm13, %v2693_v55, 0.0  ;;  %v2812_v24 = vmul.f32 %v2693_v55, %v2693_v55  ;;  %2916 = vst.msk [vmem:[%s4383_s25 + $0xb8] sm:$0xff] %vm2719_vm13, %v2693_v55  ;;  %v2711_v6 = vadd.f32 %v4376_v60, %v2710_v10 }
 0x3b0   : > { %v2766_v4 = vadd.f32 %v2765_v61, %v2764_v35 }
 0x3b1   : > { %v2866_v27 = vsel %vm2719_vm13, %v2812_v24, 0.0  ;;  %2922 = vst.msk [vmem:[%s4383_s25 + $0xe8] sm:$0xff] %vm2719_vm13, %v2711_v6  ;;  %v2818_v57 = vmul.f32 %v2711_v6, %v2711_v6  ;;  %v2777_v14 = vsel %vm2719_vm13, %v2711_v6, 0.0 }
 0x3b2   : > { %v2768_v3 = vadd.f32 %v2767_v30, %v2766_v4  ;;  %v2867_v5 = vadd.f32 %v2866_v27, %v2865_v0 }
 0x3b3   : > { %v2878_v26 = vsel %vm2719_vm13, %v2818_v57, 0.0 }
 0x3b4   : > { %v2770_v52 = vadd.f32 %v2769_v9, %v2768_v3  ;;  %v2869_v28 = vadd.f32 %v2868_v7, %v2867_v5 }
 0x3b6   : > { %v2871_v15 = vadd.f32 %v2870_v29, %v2869_v28  ;;  %v2772_v16 = vadd.f32 %v2771_v19, %v2770_v52 }
 0x3b7   : > { %v2713_v31 = vpop.f32.mrf.mxu3 }
 0x3b8   : > { %v2873_v36 = vadd.f32 %v2872_v23, %v2871_v15  ;;  %v2714_v12 = vadd.f32 %v4376_v60, %v2713_v31  ;;  %v2774_v63 = vadd.f32 %v2773_v62, %v2772_v16 }
 0x3ba   : > { %2923 = vst.msk [vmem:[%s4383_s25 + $0xf0] sm:$0xff] %vm2719_vm13, %v2714_v12  ;;  %v2875_v1 = vadd.f32 %v2874_v46, %v2873_v36  ;;  %v2776_v18 = vadd.f32 %v2775_v17, %v2774_v63  ;;  %v2819_v53 = vmul.f32 %v2714_v12, %v2714_v12  ;;  %v2779_v41 = vsel %vm2719_vm13, %v2714_v12, 0.0 }
 0x3bc   : > { %v2877_v32 = vadd.f32 %v2876_v20, %v2875_v1  ;;  %v2778_v34 = vadd.f32 %v2777_v14, %v2776_v18  ;;  %v2880_v39 = vsel %vm2719_vm13, %v2819_v53, 0.0 }
 0x3be   : > { %v2879_v37 = vadd.f32 %v2878_v26, %v2877_v32  ;;  %v2780_v40 = vadd.f32 %v2779_v41, %v2778_v34 }
 0x3c0   : > { %v2881_v2 = vadd.f32 %v2880_v39, %v2879_v37 }
 0x3c4   : > { %v2716_v38 = vpop.f32.mrf.mxu3 }
 0x3c5   : > { %v2717_v47 = vadd.f32 %v4376_v60, %v2716_v38 }
 0x3c7   : > { %v2781_v56 = vsel %vm2719_vm13, %v2717_v47, 0.0  ;;  %v2820_v42 = vmul.f32 %v2717_v47, %v2717_v47  ;;  %2924 = vst.msk [vmem:[%s4383_s25 + $0xf8] sm:$0xff] %vm2719_vm13, %v2717_v47 }
 0x3c8   : > { %v2782_v43 = vadd.f32 %v2781_v56, %v2780_v40 }
 0x3c9   : > { %v2882_v44 = vsel %vm2719_vm13, %v2820_v42, 0.0 }
 0x3ca   : > { %v2783_v25 = vrot.slane %v2782_v43, 4  ;;  %v2883_v11 = vadd.f32 %v2882_v44, %v2881_v2 }
 0x3cc   : > { %v2784_v54 = vadd.f32 %v2783_v25, %v2782_v43  ;;  %v2884_v51 = vrot.slane %v2883_v11, 4 }
 0x3ce   : > { %v2785_v45 = vrot.slane %v2784_v54, 2  ;;  %v2885_v48 = vadd.f32 %v2884_v51, %v2883_v11 }
 0x3d0   : > { %v2786_v13 = vadd.f32 %v2785_v45, %v2784_v54  ;;  %v2886_v21 = vrot.slane %v2885_v48, 2 }
 0x3d2   : > { %v2787_v60 = vrot.slane %v2786_v13, 1  ;;  %v2887_v33 = vadd.f32 %v2886_v21, %v2885_v48 }
 0x3d4   : > { %v2888_v55 = vrot.slane %v2887_v33, 1  ;;  %v2788_v50 = vadd.f32 %v2787_v60, %v2786_v13 }
 0x3d6   : > { %v2889_v35 = vadd.f32 %v2888_v55, %v2887_v33 }
 0x3d8   : > { %v2890_v10 = vsel %vm597_vm0, %v2788_v50, %v2889_v35 }
 0x3d9   : > { %2892 = vst.msk [vmem:[%s500_s20] sm:$0x3] %vm2891_vm14, %v2890_v10 }
 0x3da PF: > { %s19_s3 = sadd.s32 1, %s3231_s3   ;;  %s4765_s27 = smov %s3227_s28 }
 0x3db   : > { %p16_p5 = scmp.ge.s32.totalorder %s19_s3, 4   ;;  %s4766_s28 = smov %s4768_s4 }
 0x3dd   :  { %18 = sbr.rel (!%p16_p5) target bundleno = 2 (0x2), region = 101 }

// kernel: double_conv.4
= control target key start
LH: loop header
LB: loop body
LE: loop exit
PB: predicated region body
PF: predicated region fallthrough
CT: control target
= control target key end

     0   :  { %s3417_s27 = smov 0   ;;  %s3419_s28 = smov 0   ;;  %s4913_s0 = inlined_call_operand.vmem [shape: f32[2,16,16,8], index: 0, kind: input, shape index: {}, may-alias: {0,1,2}]   ;;  %s4914_s1 = inlined_call_operand.vmem [shape: f32[2,16,16,8], index: 1, kind: input, shape index: {}, may-alias: {0,1,2}]   ;;  %s4915_s2 = inlined_call_operand.vmem [shape: f32[2,16,16,8], index: 2, kind: input, shape index: {}, may-alias: {0,1,2}]   ;;  %s4916_s3 = inlined_call_operand.vmem [shape: f32[1,8], index: 3, kind: input, shape index: {}]   ;;  %s4917_s4 = inlined_call_operand.vmem [shape: f32[1,8], index: 4, kind: input, shape index: {}]   ;;  %s4918_s5 = inlined_call_operand.vmem [shape: f32[72,8], index: 5, kind: input, shape index: {}]   ;;  %s4919_s6 = inlined_call_operand.vmem [shape: f32[1,8], index: 6, kind: input, shape index: {}]   ;;  %s4920_s7 = inlined_call_operand.vmem [shape: f32[2,256,8], index: 7, kind: output, shape index: {0}]   ;;  %s4921_s8 = inlined_call_operand.vmem [shape: f32[2,1,2,8], index: 8, kind: output, shape index: {1}]  }
   0x1   :  { %s3421_s29 = smov 0  }
   0x2 LB: > { %s31_s30 = sadd.s32 1, %s3358_s28  ;;  %p3220_p0 = scmp.ge.s32.totalorder %s3362_s29, 1  ;;  %s3362_s29 = sphi %s3421_s29, %s19_s29   ;;  %s3358_s28 = sphi %s3419_s28, %s4956_s28   ;;  %s3354_s27 = sphi %s3417_s27, %s4955_s27  }
   0x3   : > { %p33_p1 = scmp.ge.s32.totalorder %s31_s30, 2  ;;  %p357_p2 = scmp.lt.s32.totalorder %s3362_s29, 3 }
   0x5   : > { %s4958_s30 = smov (%p33_p1, %s31_s30), 0  ;;  %p358_p3 = pnand %p3220_p0, %p357_p2 }
   0x7   : > { %361 = sbr.rel (%p358_p3) target bundleno = 992 (0x3e0), region = 48 }
   0xc   : > { %p436_p4 = scmp.lt.s32.totalorder %s3354_s27, 1  ;;  %v3440_v0 = vld [vmem:[%s4916_s3] ss:$0 sm:$0xff]  ;;  %vm701_vm0 = vcmask 1040384   ;;  %vm863_vm1 = vcmask 64512   ;;  %vm866_vm2 = vcmask 58368  }
   0xd   : > { %v3452_v1 = vld [vmem:[%s4917_s4] ss:$0 sm:$0xff]  ;;  %s3364_s20 = smov 8   ;;  %s3365_s21 = smov 16   ;;  %vm1195_vm3 = vcmask 130112   ;;  %vm1388_vm4 = vcmask 195712  }
   0xe   : > { %s4960_s27 = smov (!%p436_p4, %s3354_s27), 1  ;;  %s3366_s22 = smov 24   ;;  %vm1581_vm5 = vcmask 261312   ;;  %vm1774_vm6 = vcmask 326912   ;;  %vm1967_vm7 = vcmask 392512   ;;  %vm2161_vm8 = vcmask 458112  }
   0xf   : > { %s3443_s11 = sshll.u32 %s4960_s27, 8  ;;  %s3367_s9 = smov 32   ;;  %vm2354_vm9 = vcmask 523712   ;;  %vm2547_vm10 = vcmask 589312   ;;  %vm2625_vm11 = vcmask 588800  }
  0x10   : > { %s459_s14 = scalar_lea.vmem %s4914_s1, %s3443_s11  ;;  %s3458_s19 = scalar_lea.vmem %s4913_s0, %s3443_s11 }
  0x11   : > { %v3230_v2 = vld [vmem:[%s459_s14 + $0x10] sm:$0xff]  ;;  %v3231_v3 = vld [vmem:[%s459_s14 + $0x18] sm:$0xff]  ;;  %v503_v6 = vld [vmem:[%s3458_s19] sm:$0xff]  ;;  %s3368_s10 = smov 40   ;;  %s3369_s12 = smov 48  }
  0x12   : > { %v920_v4 = vmul.f32 %v3440_v0, %v3230_v2  ;;  %v921_v5 = vmul.f32 %v3440_v0, %v3231_v3  ;;  %v504_v7 = vld [vmem:[%s3458_s19 + $0x8] sm:$0xff]  ;;  %v507_v8 = vld [vmem:[%s3458_s19 + $0x20] sm:$0xff]  ;;  %v538_v9 = vmul.f32 %v3440_v0, %v503_v6  ;;  %v505_v13 = vld [vmem:[%s3458_s19 + $0x10] sm:$0xff]  ;;  %s3370_s13 = smov 64   ;;  %s3371_s14 = smov 56  }
  0x13   : > { %v539_v10 = vmul.f32 %v3440_v0, %v504_v7  ;;  %v508_v11 = vld [vmem:[%s3458_s19 + $0x28] sm:$0xff]  ;;  %v542_v12 = vmul.f32 %v3440_v0, %v507_v8  ;;  %v506_v14 = vld [vmem:[%s3458_s19 + $0x18] sm:$0xff]  ;;  %v540_v18 = vmul.f32 %v3440_v0, %v505_v13  ;;  %v509_v43 = vld [vmem:[%s3458_s19 + $0x30] sm:$0xff] }
  0x14   : > { %v922_v15 = vadd.f32 %v3452_v1, %v920_v4  ;;  %v923_v16 = vadd.f32 %v3452_v1, %v921_v5  ;;  %v543_v17 = vmul.f32 %v3440_v0, %v508_v11  ;;  %v573_v19 = vadd.f32 %v3452_v1, %v538_v9  ;;  %v510_v44 = vld [vmem:[%s3458_s19 + $0x38] sm:$0xff]  ;;  %v511_v45 = vld [vmem:[%s3458_s19 + $0x40] sm:$0xff]  ;;  %v512_v57 = vld [vmem:[%s3458_s19 + $0x48] sm:$0xff] }
  0x15   : > { %v574_v20 = vadd.f32 %v3452_v1, %v539_v10  ;;  %v577_v21 = vadd.f32 %v3452_v1, %v542_v12  ;;  %v541_v22 = vmul.f32 %v3440_v0, %v506_v14  ;;  %v575_v26 = vadd.f32 %v3452_v1, %v540_v18  ;;  %v513_v59 = vld [vmem:[%s3458_s19 + $0x50] sm:$0xff]  ;;  %v514_v6 = vld [vmem:[%s3458_s19 + $0x58] sm:$0xff] }
  0x16   : > { %v924_v23 = vmax.f32 %v922_v15, 0.0  ;;  %v925_v24 = vmax.f32 %v923_v16, 0.0  ;;  %v578_v25 = vadd.f32 %v3452_v1, %v543_v17  ;;  %v605_v27 = vmax.f32 %v573_v19, 0.0  ;;  %v515_v19 = vld [vmem:[%s3458_s19 + $0x60] sm:$0xff] }
  0x17   : > { %v606_v28 = vmax.f32 %v574_v20, 0.0  ;;  %v609_v29 = vmax.f32 %v577_v21, 0.0  ;;  %v576_v30 = vadd.f32 %v3452_v1, %v541_v22  ;;  %v607_v53 = vmax.f32 %v575_v26, 0.0 }
  0x18   : > { %v927_v31 = vrot.slane %v924_v23, 1  ;;  %v930_v32 = vrot.slane %v924_v23, 7  ;;  %v931_v33 = vrot.slane %v925_v24, 7  ;;  %v936_v34 = vrot.slane %v925_v24, 5 }
  0x19   : > { %v653_v35 = vrot.slane %v605_v27, 1  ;;  %v702_v36 = vrot.slane %v605_v27, 7  ;;  %v703_v37 = vrot.slane %v606_v28, 7  ;;  %v798_v38 = vrot.slane %v606_v28, 5 }
  0x1a   : > { %v932_v39 = vsel %vm701_vm0, %v930_v32, %v931_v33  ;;  %v938_v40 = vsel %vm701_vm0, %v927_v31, %v930_v32  ;;  %v939_v41 = vsel %vm701_vm0, %v931_v33, %v936_v34  ;;  %v610_v42 = vmax.f32 %v578_v25, 0.0 }
  0x1b   : > { %940 = vst.msk [vmem:[#allocation2] sm:$0xff] %vm863_vm1, %v938_v40  ;;  %v704_v46 = vsel %vm701_vm0, %v702_v36, %v703_v37  ;;  %v830_v47 = vsel %vm701_vm0, %v653_v35, %v702_v36  ;;  %v846_v48 = vsel %vm701_vm0, %v703_v37, %v798_v38  ;;  %v655_v49 = vrot.slane %v609_v29, 1  ;;  %v518_v40 = vld [vmem:[%s3458_s19 + $0x78] sm:$0xff] }
  0x1c   : > { %941 = vst.msk [vmem:[#allocation2 + $0x8] sm:$0xff] %vm863_vm1, %v932_v39  ;;  %v708_v50 = vrot.slane %v609_v29, 7  ;;  %v709_v51 = vrot.slane %v610_v42, 7  ;;  %v800_v52 = vrot.slane %v610_v42, 5  ;;  %v608_v54 = vmax.f32 %v576_v30, 0.0  ;;  %v516_v29 = vld [vmem:[%s3458_s19 + $0x68] sm:$0xff] }
  0x1d   : > { %864 = vst.msk [vmem:[#allocation2 + $0x18] sm:$0xff] %vm863_vm1, %v830_v47  ;;  %v544_v55 = vmul.f32 %v3440_v0, %v509_v43  ;;  %v545_v56 = vmul.f32 %v3440_v0, %v510_v44  ;;  %v546_v58 = vmul.f32 %v3440_v0, %v511_v45  ;;  %v654_v63 = vrot.slane %v607_v53, 1  ;;  %v517_v39 = vld [vmem:[%s3458_s19 + $0x70] sm:$0xff] }
  0x1e   : > { %865 = vst.msk [vmem:[#allocation2 + $0x20] sm:$0xff] %vm863_vm1, %v704_v46  ;;  %v710_v60 = vsel %vm701_vm0, %v708_v50, %v709_v51  ;;  %v832_v61 = vsel %vm701_vm0, %v655_v49, %v708_v50  ;;  %v848_v62 = vsel %vm701_vm0, %v709_v51, %v800_v52  ;;  %v705_v2 = vrot.slane %v607_v53, 7  ;;  %v519_v49 = vld [vmem:[%s3458_s19 + $0x80] sm:$0xff] }
  0x1f   : > { %942 = vst.msk [vmem:[#allocation2 + $0x10] sm:$0x3] %vm866_vm2, %v939_v41  ;;  %v706_v3 = vrot.slane %v608_v54, 7  ;;  %v579_v4 = vadd.f32 %v3452_v1, %v544_v55  ;;  %v580_v5 = vadd.f32 %v3452_v1, %v545_v56  ;;  %v547_v7 = vmul.f32 %v3440_v0, %v512_v57  ;;  %v520_v55 = vld [vmem:[%s3458_s19 + $0x88] sm:$0xff] }
  0x20   : > { %867 = vst.msk [vmem:[#allocation2 + $0x28] sm:$0x3] %vm866_vm2, %v846_v48  ;;  %v581_v8 = vadd.f32 %v3452_v1, %v546_v58  ;;  %v799_v9 = vrot.slane %v608_v54, 5  ;;  %v548_v10 = vmul.f32 %v3440_v0, %v513_v59  ;;  %v831_v12 = vsel %vm701_vm0, %v654_v63, %v705_v2 }
  0x21   : > { %871 = vst.msk [vmem:[#allocation2 + $0x48] sm:$0xff] %vm863_vm1, %v832_v61  ;;  %v707_v11 = vsel %vm701_vm0, %v705_v2, %v706_v3  ;;  %v611_v13 = vmax.f32 %v579_v4, 0.0  ;;  %v612_v14 = vmax.f32 %v580_v5, 0.0  ;;  %v582_v15 = vadd.f32 %v3452_v1, %v547_v7  ;;  %v521_v7 = vld [vmem:[%s3458_s19 + $0x90] sm:$0xff] }
  0x22   : > { %872 = vst.msk [vmem:[#allocation2 + $0x50] sm:$0xff] %vm863_vm1, %v710_v60  ;;  %v613_v16 = vmax.f32 %v581_v8, 0.0  ;;  %v847_v17 = vsel %vm701_vm0, %v706_v3, %v799_v9  ;;  %v549_v18 = vmul.f32 %v3440_v0, %v514_v6  ;;  %v583_v24 = vadd.f32 %v3452_v1, %v548_v10 }
  0x23   : > { %v1035_v20 = vld [vmem:[#allocation2 + $0x1] sm:$0xff]  ;;  %873 = vst.msk [vmem:[#allocation2 + $0x58] sm:$0x3] %vm866_vm2, %v848_v62  ;;  %v711_v21 = vrot.slane %v611_v13, 7  ;;  %v712_v22 = vrot.slane %v612_v14, 7  ;;  %v801_v23 = vrot.slane %v612_v14, 5  ;;  %v550_v38 = vmul.f32 %v3440_v0, %v515_v19 }
  0x24   : > { %1099 = vrot.lane.b32.xlu0 %v1035_v20, %s3364_s20  ;;  %868 = vst.msk [vmem:[#allocation2 + $0x30] sm:$0xff] %vm863_vm1, %v831_v12  ;;  %v614_v25 = vmax.f32 %v582_v15, 0.0  ;;  %v657_v26 = vrot.slane %v613_v16, 1  ;;  %v714_v27 = vrot.slane %v613_v16, 7  ;;  %v584_v28 = vadd.f32 %v3452_v1, %v549_v18  ;;  %v522_v15 = vld [vmem:[%s3458_s19 + $0x98] sm:$0xff] }
  0x25   : > { %v1037_v30 = vld [vmem:[#allocation2 + $0x19] sm:$0xff]  ;;  %869 = vst.msk [vmem:[#allocation2 + $0x38] sm:$0xff] %vm863_vm1, %v707_v11  ;;  %v713_v31 = vsel %vm701_vm0, %v711_v21, %v712_v22  ;;  %v849_v32 = vsel %vm701_vm0, %v712_v22, %v801_v23  ;;  %v615_v33 = vmax.f32 %v583_v24, 0.0  ;;  %v656_v34 = vrot.slane %v611_v13, 1 }
  0x26   : > { %1103 = vrot.lane.b32.xlu1 %v1037_v30, %s3364_s20  ;;  %875 = vst.msk [vmem:[#allocation2 + $0x68] sm:$0xff] %vm863_vm1, %v713_v31  ;;  %v715_v35 = vrot.slane %v614_v25, 7  ;;  %v834_v36 = vsel %vm701_vm0, %v657_v26, %v714_v27  ;;  %v616_v37 = vmax.f32 %v584_v28, 0.0  ;;  %v551_v44 = vmul.f32 %v3440_v0, %v516_v29  ;;  %v1036_v50 = vld [vmem:[#allocation2 + $0x9] sm:$0xff] }
  0x27   : > { %876 = vst.msk [vmem:[#allocation2 + $0x70] sm:$0x3] %vm866_vm2, %v849_v32  ;;  %v658_v41 = vrot.slane %v615_v33, 1  ;;  %v717_v42 = vrot.slane %v615_v33, 7  ;;  %v833_v43 = vsel %vm701_vm0, %v656_v34, %v711_v21  ;;  %v585_v48 = vadd.f32 %v3452_v1, %v550_v38  ;;  %v1038_v60 = vld [vmem:[#allocation2 + $0x21] sm:$0xff] }
  0x28   : > { %v716_v45 = vsel %vm701_vm0, %v714_v27, %v715_v35  ;;  %877 = vst.msk [vmem:[#allocation2 + $0x78] sm:$0xff] %vm863_vm1, %v834_v36  ;;  %v718_v46 = vrot.slane %v616_v37, 7  ;;  %v803_v47 = vrot.slane %v616_v37, 5  ;;  %v586_v52 = vadd.f32 %v3452_v1, %v551_v44  ;;  %v524_v26 = vld [vmem:[%s3458_s19 + $0xa8] sm:$0xff] }
  0x29   : > { %878 = vst.msk [vmem:[#allocation2 + $0x80] sm:$0xff] %vm863_vm1, %v716_v45  ;;  %v835_v51 = vsel %vm701_vm0, %v658_v41, %v717_v42  ;;  %v552_v53 = vmul.f32 %v3440_v0, %v517_v39  ;;  %v553_v54 = vmul.f32 %v3440_v0, %v518_v40  ;;  %v617_v58 = vmax.f32 %v585_v48, 0.0  ;;  %v1041_v27 = vld [vmem:[#allocation2 + $0x49] sm:$0xff] }
  0x2a   : > { %870 = vst.msk [vmem:[#allocation2 + $0x40] sm:$0x3] %vm866_vm2, %v847_v17  ;;  %v719_v56 = vsel %vm701_vm0, %v717_v42, %v718_v46  ;;  %v851_v57 = vsel %vm701_vm0, %v718_v46, %v803_v47  ;;  %v802_v59 = vrot.slane %v614_v25, 5  ;;  %v618_v61 = vmax.f32 %v586_v52, 0.0  ;;  %v523_v17 = vld [vmem:[%s3458_s19 + $0xa0] sm:$0xff]  ;;  %v1042_v37 = vld [vmem:[#allocation2 + $0x51] sm:$0xff] }
  0x2b   : > { %880 = vst.msk [vmem:[#allocation2 + $0x90] sm:$0xff] %vm863_vm1, %v835_v51  ;;  %v587_v62 = vadd.f32 %v3452_v1, %v552_v53  ;;  %v3553_v63 = vadd.f32 %v3452_v1, %v553_v54  ;;  %v554_v2 = vmul.f32 %v3440_v0, %v519_v49  ;;  %v720_v4 = vrot.slane %v617_v58, 7  ;;  %v525_v45 = vld [vmem:[%s3458_s19 + $0xb0] sm:$0xff]  ;;  %v526_v46 = vld [vmem:[%s3458_s19 + $0xb8] sm:$0xff] }
  0x2c   : > { %1101 = vrot.lane.b32.xlu0 %v1036_v50, %s3364_s20  ;;  %v1039_v3 = vld [vmem:[#allocation2 + $0x31] sm:$0xff]  ;;  %881 = vst.msk [vmem:[#allocation2 + $0x98] sm:$0xff] %vm863_vm1, %v719_v56  ;;  %v850_v5 = vsel %vm701_vm0, %v715_v35, %v802_v59  ;;  %v555_v6 = vmul.f32 %v3440_v0, %v520_v55  ;;  %v721_v8 = vrot.slane %v618_v61, 7  ;;  %v804_v9 = vrot.slane %v618_v61, 5 }
  0x2d   : > { %1107 = vrot.lane.b32.xlu2 %v1039_v3, %s3364_s20  ;;  %882 = vst.msk [vmem:[#allocation2 + $0xa0] sm:$0x3] %vm866_vm2, %v851_v57  ;;  %v619_v10 = vmax.f32 %v587_v62, 0.0  ;;  %v620_v11 = vmax.f32 %v3553_v63, 0.0  ;;  %v589_v12 = vadd.f32 %v3452_v1, %v554_v2  ;;  %v659_v14 = vrot.slane %v617_v58, 1 }
  0x2e   : > { %1105 = vrot.lane.b32.xlu1 %v1038_v60, %s3364_s20  ;;  %874 = vst.msk [vmem:[#allocation2 + $0x60] sm:$0xff] %vm863_vm1, %v833_v43  ;;  %v590_v13 = vadd.f32 %v3452_v1, %v555_v6  ;;  %v556_v16 = vmul.f32 %v3440_v0, %v521_v7  ;;  %v722_v18 = vsel %vm701_vm0, %v720_v4, %v721_v8  ;;  %v1044_v62 = vld [vmem:[#allocation2 + $0x69] sm:$0xff] }
  0x2f   : > { %v852_v19 = vsel %vm701_vm0, %v721_v8, %v804_v9  ;;  %v660_v20 = vrot.slane %v619_v10, 1  ;;  %v723_v21 = vrot.slane %v619_v10, 7  ;;  %879 = vst.msk [vmem:[#allocation2 + $0x88] sm:$0x3] %vm866_vm2, %v850_v5  ;;  %v724_v22 = vrot.slane %v620_v11, 7 }
  0x30   : > { %884 = vst.msk [vmem:[#allocation2 + $0xb0] sm:$0xff] %vm863_vm1, %v722_v18  ;;  %v621_v23 = vmax.f32 %v589_v12, 0.0  ;;  %v622_v24 = vmax.f32 %v590_v13, 0.0  ;;  %v836_v25 = vsel %vm701_vm0, %v659_v14, %v720_v4  ;;  %v557_v29 = vmul.f32 %v3440_v0, %v522_v15  ;;  %v1045_v8 = vld [vmem:[#allocation2 + $0x79] sm:$0xff]  ;;  %v528_v14 = vld [vmem:[%s3458_s19 + $0xc8] sm:$0xff]  ;;  %v529_v15 = vld [vmem:[%s3458_s19 + $0xd0] sm:$0xff] }
  0x31   : > { %885 = vst.msk [vmem:[#allocation2 + $0xb8] sm:$0x3] %vm866_vm2, %v852_v19  ;;  %v837_v28 = vsel %vm701_vm0, %v660_v20, %v723_v21  ;;  %v3581_v30 = vadd.f32 %v3452_v1, %v556_v16  ;;  %v558_v31 = vmul.f32 %v3440_v0, %v523_v17  ;;  %v1040_v32 = vld [vmem:[#allocation2 + $0x39] sm:$0xff]  ;;  %v725_v33 = vsel %vm701_vm0, %v723_v21, %v724_v22 }
  0x32   : > { %886 = vst.msk [vmem:[#allocation2 + $0xc0] sm:$0xff] %vm863_vm1, %v837_v28  ;;  %v661_v34 = vrot.slane %v621_v23, 1  ;;  %v726_v35 = vrot.slane %v621_v23, 7  ;;  %v727_v36 = vrot.slane %v622_v24, 7  ;;  %v806_v38 = vrot.slane %v622_v24, 5  ;;  %v527_v13 = vld [vmem:[%s3458_s19 + $0xc0] sm:$0xff] }
  0x33   : > { %887 = vst.msk [vmem:[#allocation2 + $0xc8] sm:$0xff] %vm863_vm1, %v725_v33  ;;  %v592_v39 = vadd.f32 %v3452_v1, %v557_v29  ;;  %v623_v40 = vmax.f32 %v3581_v30, 0.0  ;;  %v559_v41 = vmul.f32 %v3440_v0, %v524_v26  ;;  %v593_v44 = vadd.f32 %v3452_v1, %v558_v31  ;;  %v530_v20 = vld [vmem:[%s3458_s19 + $0xd8] sm:$0xff] }
  0x34   : > { %1111 = vrot.lane.b32.xlu0 %v1041_v27, %s3364_s20  ;;  %v728_v42 = vsel %vm701_vm0, %v726_v35, %v727_v36  ;;  %v838_v43 = vsel %vm701_vm0, %v661_v34, %v726_v35  ;;  %883 = vst.msk [vmem:[#allocation2 + $0xa8] sm:$0xff] %vm863_vm1, %v836_v25  ;;  %v854_v47 = vsel %vm701_vm0, %v727_v36, %v806_v38  ;;  %v805_v52 = vrot.slane %v620_v11, 5  ;;  %v1048_v38 = vld [vmem:[#allocation2 + $0x99] sm:$0xff] }
  0x35   : > { %1109 = vrot.lane.b32.xlu2 %v1040_v32, %s3364_s20  ;;  %889 = vst.msk [vmem:[#allocation2 + $0xd8] sm:$0xff] %vm863_vm1, %v838_v43  ;;  %v624_v48 = vmax.f32 %v592_v39, 0.0  ;;  %v729_v49 = vrot.slane %v623_v40, 7  ;;  %v3601_v50 = vadd.f32 %v3452_v1, %v559_v41  ;;  %v625_v51 = vmax.f32 %v593_v44, 0.0  ;;  %v1043_v5 = vld [vmem:[#allocation2 + $0x61] sm:$0xff]  ;;  %v1047_v32 = vld [vmem:[#allocation2 + $0x91] sm:$0xff] }
  0x36   : > { %1113 = vrot.lane.b32.xlu1 %v1042_v37, %s3364_s20  ;;  %890 = vst.msk [vmem:[#allocation2 + $0xe0] sm:$0xff] %vm863_vm1, %v728_v42  ;;  %v560_v53 = vmul.f32 %v3440_v0, %v525_v45  ;;  %v561_v54 = vmul.f32 %v3440_v0, %v526_v46  ;;  %v853_v60 = vsel %vm701_vm0, %v724_v22, %v805_v52  ;;  %v662_v18 = vrot.slane %v623_v40, 1  ;;  %v1046_v34 = vld [vmem:[#allocation2 + $0x81] sm:$0xff] }
  0x37   : > { %891 = vst.msk [vmem:[#allocation2 + $0xe8] sm:$0x3] %vm866_vm2, %v854_v47  ;;  %v730_v55 = vrot.slane %v624_v48, 7  ;;  %v807_v56 = vrot.slane %v624_v48, 5  ;;  %v626_v57 = vmax.f32 %v3601_v50, 0.0  ;;  %v663_v58 = vrot.slane %v625_v51, 1 }
  0x38   : > { %v732_v59 = vrot.slane %v625_v51, 7  ;;  %v595_v61 = vadd.f32 %v3452_v1, %v560_v53  ;;  %888 = vst.msk [vmem:[#allocation2 + $0xd0] sm:$0x3] %vm866_vm2, %v853_v60  ;;  %v596_v4 = vadd.f32 %v3452_v1, %v561_v54  ;;  %v562_v19 = vmul.f32 %v3440_v0, %v527_v13  ;;  %v531_v44 = vld [vmem:[%s3458_s19 + $0xe0] sm:$0xff]  ;;  %v532_v47 = vld [vmem:[%s3458_s19 + $0xe8] sm:$0xff] }
  0x39   : > { %v731_v63 = vsel %vm701_vm0, %v729_v49, %v730_v55  ;;  %v855_v2 = vsel %vm701_vm0, %v730_v55, %v807_v56  ;;  %v3615_v3 = vrot.slane %v626_v57, 7  ;;  %v563_v22 = vmul.f32 %v3440_v0, %v528_v14 }
  0x3a   : > { %893 = vst.msk [vmem:[#allocation2 + $0xf8] sm:$0xff] %vm863_vm1, %v731_v63  ;;  %v840_v6 = vsel %vm701_vm0, %v663_v58, %v732_v59  ;;  %v627_v7 = vmax.f32 %v595_v61, 0.0  ;;  %v628_v10 = vmax.f32 %v596_v4, 0.0  ;;  %v564_v23 = vmul.f32 %v3440_v0, %v529_v15  ;;  %v1051_v60 = vld [vmem:[#allocation2 + $0xc1] sm:$0xff] }
  0x3b   : > { %894 = vst.msk [vmem:[#allocation2 + $0x100] sm:$0x3] %vm866_vm2, %v855_v2  ;;  %v734_v9 = vsel %vm701_vm0, %v732_v59, %v3615_v3  ;;  %v565_v24 = vmul.f32 %v3440_v0, %v530_v20  ;;  %v839_v27 = vsel %vm701_vm0, %v662_v18, %v729_v49  ;;  %v597_v28 = vadd.f32 %v3452_v1, %v562_v19  ;;  %v3669_v59 = vld [vmem:[#allocation2 + $0xa9] sm:$0xff] }
  0x3c   : > { %1117 = vrot.lane.b32.xlu0 %v1044_v62, %s3364_s20  ;;  %895 = vst.msk [vmem:[#allocation2 + $0x108] sm:$0xff] %vm863_vm1, %v840_v6  ;;  %v664_v11 = vrot.slane %v627_v7, 1  ;;  %v735_v12 = vrot.slane %v627_v7, 7  ;;  %v736_v16 = vrot.slane %v628_v10, 7  ;;  %v809_v17 = vrot.slane %v628_v10, 5 }
  0x3d   : > { %1115 = vrot.lane.b32.xlu2 %v1043_v5, %s3364_s20  ;;  %896 = vst.msk [vmem:[#allocation2 + $0x110] sm:$0xff] %vm863_vm1, %v734_v9  ;;  %v598_v29 = vadd.f32 %v3452_v1, %v563_v22  ;;  %v599_v30 = vadd.f32 %v3452_v1, %v564_v23  ;;  %v600_v31 = vadd.f32 %v3452_v1, %v565_v24  ;;  %v629_v33 = vmax.f32 %v597_v28, 0.0  ;;  %v1053_v7 = vld [vmem:[#allocation2 + $0xd9] sm:$0xff] }
  0x3e   : > { %1119 = vrot.lane.b32.xlu1 %v1045_v8, %s3364_s20  ;;  %v841_v21 = vsel %vm701_vm0, %v664_v11, %v735_v12  ;;  %v737_v25 = vsel %vm701_vm0, %v735_v12, %v736_v16  ;;  %v857_v26 = vsel %vm701_vm0, %v736_v16, %v809_v17  ;;  %892 = vst.msk [vmem:[#allocation2 + $0xf0] sm:$0xff] %vm863_vm1, %v839_v27  ;;  %v808_v46 = vrot.slane %v626_v57, 5  ;;  %v1050_v57 = vld [vmem:[#allocation2 + $0xb1] sm:$0xff]  ;;  %v1054_v9 = vld [vmem:[#allocation2 + $0xe1] sm:$0xff] }
  0x3f   : > { %898 = vst.msk [vmem:[#allocation2 + $0x120] sm:$0xff] %vm863_vm1, %v841_v21  ;;  %v630_v35 = vmax.f32 %v598_v29, 0.0  ;;  %v631_v36 = vmax.f32 %v599_v30, 0.0  ;;  %v632_v37 = vmax.f32 %v600_v31, 0.0  ;;  %v738_v39 = vrot.slane %v629_v33, 7  ;;  %v3685_v8 = vld [vmem:[#allocation2 + $0xc9] sm:$0xff] }
  0x40   : > { %899 = vst.msk [vmem:[#allocation2 + $0x128] sm:$0xff] %vm863_vm1, %v737_v25  ;;  %v566_v48 = vmul.f32 %v3440_v0, %v531_v44  ;;  %v567_v53 = vmul.f32 %v3440_v0, %v532_v47  ;;  %v856_v55 = vsel %vm701_vm0, %v3615_v3, %v808_v46  ;;  %v665_v3 = vrot.slane %v629_v33, 1  ;;  %v3723_v21 = vld [vmem:[#allocation2 + $0x30] sm:$0xff]  ;;  %v971_v25 = vld [vmem:[#allocation2] sm:$0xff]  ;;  %v3744_v28 = vld [vmem:[#allocation2 + $0x38] sm:$0xff] }
  0x41   : > { %900 = vst.msk [vmem:[#allocation2 + $0x130] sm:$0x3] %vm866_vm2, %v857_v26  ;;  %v739_v40 = vrot.slane %v630_v35, 7  ;;  %v810_v41 = vrot.slane %v630_v35, 5  ;;  %v666_v42 = vrot.slane %v631_v36, 1  ;;  %v741_v43 = vrot.slane %v631_v36, 7 }
  0x42   : > { %v742_v45 = vrot.slane %v632_v37, 7  ;;  %v601_v50 = vadd.f32 %v3452_v1, %v566_v48  ;;  %v602_v56 = vadd.f32 %v3452_v1, %v567_v53  ;;  %897 = vst.msk [vmem:[#allocation2 + $0x118] sm:$0x3] %vm866_vm2, %v856_v55  ;;  %v842_v6 = vsel %vm701_vm0, %v665_v3, %v738_v39  ;;  %v1056_v12 = vld [vmem:[#allocation2 + $0xf9] sm:$0xff]  ;;  %v1229_v27 = vld [vmem:[#allocation2 + $0xa] sm:$0xff]  ;;  %v1228_v29 = vld [vmem:[#allocation2 + $0x2] sm:$0xff] }
  0x43   : > { %v740_v49 = vsel %vm701_vm0, %v738_v39, %v739_v40  ;;  %v858_v51 = vsel %vm701_vm0, %v739_v40, %v810_v41  ;;  %v843_v52 = vsel %vm701_vm0, %v666_v42, %v741_v43  ;;  %901 = vst.msk [vmem:[#allocation2 + $0x138] sm:$0xff] %vm863_vm1, %v842_v6  ;;  %v811_v10 = vrot.slane %v632_v37, 5  ;;  %v3740_v26 = vld [vmem:[#allocation2 + $0x18] sm:$0xff]  ;;  %v972_v31 = vld [vmem:[#allocation2 + $0x8] sm:$0xff]  ;;  %v3779_v39 = vld [vmem:[#allocation2 + $0x50] sm:$0xff] }
  0x44   : > { %1123 = vrot.lane.b32.xlu0 %v1047_v32, %s3364_s20  ;;  %902 = vst.msk [vmem:[#allocation2 + $0x140] sm:$0xff] %vm863_vm1, %v740_v49  ;;  %v743_v54 = vsel %vm701_vm0, %v741_v43, %v742_v45  ;;  %v633_v58 = vmax.f32 %v601_v50, 0.0  ;;  %v634_v0 = vmax.f32 %v602_v56, 0.0  ;;  %v1057_v14 = vld [vmem:[#allocation2 + $0x109] sm:$0xff]  ;;  %v3748_v30 = vld [vmem:[#allocation2 + $0x1a] sm:$0xff]  ;;  %v3759_v33 = vld [vmem:[#allocation2 + $0x32] sm:$0xff] }
  0x45   : > { %1121 = vrot.lane.b32.xlu2 %v1046_v34, %s3364_s20  ;;  %903 = vst.msk [vmem:[#allocation2 + $0x148] sm:$0x3] %vm866_vm2, %v858_v51  ;;  %v859_v11 = vsel %vm701_vm0, %v742_v45, %v811_v10  ;;  %v3693_v13 = vld [vmem:[#allocation2 + $0xf1] sm:$0xff]  ;;  %v3755_v32 = vld [vmem:[#allocation2 + $0x20] sm:$0xff]  ;;  %v3775_v37 = vld [vmem:[#allocation2 + $0x48] sm:$0xff] }
  0x46   : > { %1125 = vrot.lane.b32.xlu1 %v1048_v38, %s3364_s20  ;;  %904 = vst.msk [vmem:[#allocation2 + $0x150] sm:$0xff] %vm863_vm1, %v843_v52  ;;  %v667_v61 = vrot.slane %v633_v58, 1  ;;  %v744_v62 = vrot.slane %v633_v58, 7  ;;  %v745_v63 = vrot.slane %v634_v0, 7  ;;  %v812_v2 = vrot.slane %v634_v0, 5  ;;  %v3761_v34 = vld [vmem:[#allocation2 + $0x60] sm:$0xff] }
  0x47   : > { %905 = vst.msk [vmem:[#allocation2 + $0x158] sm:$0xff] %vm863_vm1, %v743_v54  ;;  %v3699_v15 = vld [vmem:[#allocation2 + $0x121] sm:$0xff]  ;;  %v3782_v40 = vld [vmem:[#allocation2 + $0x52] sm:$0xff]  ;;  %v3788_v42 = vld [vmem:[#allocation2 + $0x4a] sm:$0xff] }
  0x48   : > { %v844_v1 = vsel %vm701_vm0, %v667_v61, %v744_v62  ;;  %v746_v4 = vsel %vm701_vm0, %v744_v62, %v745_v63  ;;  %v860_v5 = vsel %vm701_vm0, %v745_v63, %v812_v2  ;;  %906 = vst.msk [vmem:[#allocation2 + $0x160] sm:$0x3] %vm866_vm2, %v859_v11  ;;  %v3703_v17 = vld [vmem:[#allocation2 + $0x129] sm:$0xff]  ;;  %v3767_v36 = vld [vmem:[#allocation2 + $0x3a] sm:$0xff]  ;;  %v3836_v58 = vld [vmem:[#allocation2 + $0x92] sm:$0xff] }
  0x49   : > { %907 = vst.msk [vmem:[#allocation2 + $0x168] sm:$0xff] %vm863_vm1, %v844_v1  ;;  %v3701_v16 = vld [vmem:[#allocation2 + $0x111] sm:$0xff]  ;;  %v3763_v35 = vld [vmem:[#allocation2 + $0x22] sm:$0xff]  ;;  %v3807_v47 = vld [vmem:[#allocation2 + $0x7a] sm:$0xff] }
  0x4a   : > { %908 = vst.msk [vmem:[#allocation2 + $0x170] sm:$0xff] %vm863_vm1, %v746_v4  ;;  %v3786_v41 = vld [vmem:[#allocation2 + $0x80] sm:$0xff]  ;;  %v3800_v44 = vld [vmem:[#allocation2 + $0x68] sm:$0xff]  ;;  %v3804_v46 = vld [vmem:[#allocation2 + $0x78] sm:$0xff] }
  0x4b   : > { %909 = vst.msk [vmem:[#allocation2 + $0x178] sm:$0x3] %vm866_vm2, %v860_v5  ;;  %v3713_v19 = vld [vmem:[#allocation2 + $0x139] sm:$0xff]  ;;  %v3792_v43 = vld [vmem:[#allocation2 + $0x62] sm:$0xff]  ;;  %v3813_v49 = vld [vmem:[#allocation2 + $0x6a] sm:$0xff] }
  0x4c   : > { %1129 = vrot.lane.b32.xlu0 %v1050_v57, %s3364_s20  ;;  %v3711_v18 = vld [vmem:[#allocation2 + $0x141] sm:$0xff]  ;;  %1007 = vst.msk [vmem:[#allocation3 + $0x20] sm:$0xff] %vm863_vm1, %v3723_v21  ;;  %v3826_v54 = vld [vmem:[#allocation2 + $0x90] sm:$0xff]  ;;  %v3829_v55 = vld [vmem:[#allocation2 + $0x98] sm:$0xff] }
  0x4d   : > { %1127 = vrot.lane.b32.xlu2 %v3669_v59, %s3364_s20  ;;  %1003 = vst.msk [vmem:[#allocation3] sm:$0xff] %vm863_vm1, %v971_v25  ;;  %v3811_v48 = vld [vmem:[#allocation2 + $0xa8] sm:$0xff]  ;;  %v3832_v56 = vld [vmem:[#allocation2 + $0x9a] sm:$0xff]  ;;  %v3853_v62 = vld [vmem:[#allocation2 + $0xb0] sm:$0xff] }
  0x4e   : > { %1131 = vrot.lane.b32.xlu1 %v1051_v60, %s3364_s20  ;;  %v3715_v20 = vld [vmem:[#allocation2 + $0x151] sm:$0xff]  ;;  %1005 = vst.msk [vmem:[#allocation3 + $0x10] sm:$0xff] %vm863_vm1, %v3740_v26  ;;  %v3817_v51 = vld [vmem:[#allocation2 + $0x82] sm:$0xff]  ;;  %v3890_v25 = vld [vmem:[#allocation2 + $0xda] sm:$0xff] }
  0x4f   : > { %v3729_v23 = vld [vmem:[#allocation2 + $0x159] sm:$0xff]  ;;  %1008 = vst.msk [vmem:[#allocation3 + $0x28] sm:$0xff] %vm863_vm1, %v3744_v28  ;;  %v3834_v57 = vld [vmem:[#allocation2 + $0xc8] sm:$0xff]  ;;  %v3861_v3 = vld [vmem:[#allocation2 + $0xf0] sm:$0xff] }
  0x50   : > { %1004 = vst.msk [vmem:[#allocation3 + $0x8] sm:$0xff] %vm863_vm1, %v972_v31  ;;  %v3840_v0 = vld [vmem:[#allocation2 + $0xaa] sm:$0xff]  ;;  %v3856_v2 = vld [vmem:[#allocation2 + $0xc0] sm:$0xff]  ;;  %v3863_v4 = vld [vmem:[#allocation2 + $0xb2] sm:$0xff] }
  0x51   : > { %v3727_v22 = vld [vmem:[#allocation2 + $0x169] sm:$0xff]  ;;  %1006 = vst.msk [vmem:[#allocation3 + $0x18] sm:$0xff] %vm863_vm1, %v3755_v32  ;;  %v3883_v11 = vld [vmem:[#allocation2 + $0xe0] sm:$0xff] }
  0x52   : > { %v3731_v24 = vld [vmem:[#allocation2 + $0x171] sm:$0xff]  ;;  %1011 = vst.msk [vmem:[#allocation3 + $0x40] sm:$0xff] %vm863_vm1, %v3761_v34  ;;  %v3859_v1 = vld [vmem:[#allocation2 + $0xc2] sm:$0xff] }
  0x53   : > { %1009 = vst.msk [vmem:[#allocation3 + $0x30] sm:$0xff] %vm863_vm1, %v3775_v37  ;;  %v3867_v5 = vld [vmem:[#allocation2 + $0xca] sm:$0xff] }
  0x54   : > { %1135 = vrot.lane.b32.xlu0 %v1053_v7, %s3364_s20  ;;  %1010 = vst.msk [vmem:[#allocation3 + $0x38] sm:$0xff] %vm863_vm1, %v3779_v39 }
  0x55   : > { %1133 = vrot.lane.b32.xlu2 %v3685_v8, %s3364_s20  ;;  %1014 = vst.msk [vmem:[#allocation3 + $0x58] sm:$0xff] %vm863_vm1, %v3786_v41 }
  0x56   : > { %1137 = vrot.lane.b32.xlu1 %v1054_v9, %s3364_s20  ;;  %1012 = vst.msk [vmem:[#allocation3 + $0x48] sm:$0xff] %vm863_vm1, %v3800_v44  ;;  %v3880_v9 = vld [vmem:[#allocation2 + $0xd8] sm:$0xff] }
  0x57   : > { %1013 = vst.msk [vmem:[#allocation3 + $0x50] sm:$0xff] %vm863_vm1, %v3804_v46 }
  0x58   : > { %1017 = vst.msk [vmem:[#allocation3 + $0x70] sm:$0xff] %vm863_vm1, %v3811_v48 }
  0x59   : > { %1015 = vst.msk [vmem:[#allocation3 + $0x60] sm:$0xff] %vm863_vm1, %v3826_v54 }
  0x5a   : > { %1016 = vst.msk [vmem:[#allocation3 + $0x68] sm:$0xff] %vm863_vm1, %v3829_v55 }
  0x5b   : > { %1020 = vst.msk [vmem:[#allocation3 + $0x88] sm:$0xff] %vm863_vm1, %v3834_v57 }
  0x5c   : > { %1141 = vrot.lane.b32.xlu0 %v1056_v12, %s3364_s20  ;;  %1018 = vst.msk [vmem:[#allocation3 + $0x78] sm:$0xff] %vm863_vm1, %v3853_v62  ;;  %v3886_v12 = vld [vmem:[#allocation2 + $0xe2] sm:$0xff] }
  0x5d   : > { %1139 = vrot.lane.b32.xlu2 %v3693_v13, %s3364_s20  ;;  %4933 = vst [vmem:[#allocation4_spill] sm:$0xff] %v3867_v5 }
  0x5e   : > { %1143 = vrot.lane.b32.xlu1 %v1057_v14, %s3364_s20  ;;  %1019 = vst.msk [vmem:[#allocation3 + $0x80] sm:$0xff] %vm863_vm1, %v3856_v2  ;;  %v3888_v14 = vld [vmem:[#allocation2 + $0x110] sm:$0xff] }
  0x5f   : > { %1023 = vst.msk [vmem:[#allocation3 + $0xa0] sm:$0xff] %vm863_vm1, %v3861_v3 }
  0x60   : > { %4934 = vst [vmem:[#allocation5_spill] sm:$0xff] %v3886_v12 }
  0x61   : > { %4935 = vst [vmem:[#allocation6_spill] sm:$0xff] %v3890_v25 }
  0x62   : > { %1021 = vst.msk [vmem:[#allocation3 + $0x90] sm:$0xff] %vm863_vm1, %v3880_v9 }
  0x63   : > { %1022 = vst.msk [vmem:[#allocation3 + $0x98] sm:$0xff] %vm863_vm1, %v3883_v11 }
  0x64   : > { %1147 = vrot.lane.b32.xlu0 %v3699_v15, %s3364_s20  ;;  %1026 = vst.msk [vmem:[#allocation3 + $0xb8] sm:$0xff] %vm863_vm1, %v3888_v14 }
  0x65   : > { %1145 = vrot.lane.b32.xlu2 %v3701_v16, %s3364_s20 }
  0x66   : > { %1149 = vrot.lane.b32.xlu1 %v3703_v17, %s3364_s20 }
  0x6c   : > { %1153 = vrot.lane.b32.xlu0 %v3711_v18, %s3364_s20 }
  0x6d   : > { %1151 = vrot.lane.b32.xlu2 %v3713_v19, %s3364_s20 }
  0x6e   : > { %1155 = vrot.lane.b32.xlu1 %v3715_v20, %s3364_s20 }
  0x74   : > { %1159 = vrot.lane.b32.xlu0 %v3727_v22, %s3364_s20 }
  0x75   : > { %1157 = vrot.lane.b32.xlu2 %v3729_v23, %s3364_s20 }
  0x76   : > { %1161 = vrot.lane.b32.xlu1 %v3731_v24, %s3364_s20  ;;  %s3271_s20 = sadd.s32 128, %s3443_s11 }
  0x77   : > { %s478_s23 = scalar_lea.vmem %s4915_s2, %s3271_s20 }
  0x7c   : > { %1294 = vrot.lane.b32.xlu0 %v1229_v27, %s3365_s21  ;;  %v3894_v27 = vld [vmem:[#allocation2 + $0xf2] sm:$0xff] }
  0x7d   : > { %1292 = vrot.lane.b32.xlu2 %v1228_v29, %s3365_s21  ;;  %4936 = vst [vmem:[#allocation7_spill] sm:$0xff] %v3894_v27 }
  0x7e   : > { %1296 = vrot.lane.b32.xlu1 %v3748_v30, %s3365_s21 }
  0x84   : > { %1300 = vrot.lane.b32.xlu0 %v3759_v33, %s3365_s21 }
  0x85   : > { %1298 = vrot.lane.b32.xlu2 %v3763_v35, %s3365_s21 }
  0x86   : > { %1302 = vrot.lane.b32.xlu1 %v3767_v36, %s3365_s21 }
  0x87   : > { %v1108_v38 = vpop.permute.xlu2 %1107 }
  0x88   : > { %1200 = vst.msk [vmem:[#allocation3 + $0x20] sm:$0xff] %vm1195_vm3, %v1108_v38  ;;  %v3907_v38 = vld [vmem:[#allocation2 + $0xf8] sm:$0xff] }
  0x89   : > { %1024 = vst.msk [vmem:[#allocation3 + $0xa8] sm:$0xff] %vm863_vm1, %v3907_v38 }
  0x8c   : > { %1306 = vrot.lane.b32.xlu0 %v3782_v40, %s3365_s21 }
  0x8d   : > { %1304 = vrot.lane.b32.xlu2 %v3788_v42, %s3365_s21 }
  0x8e   : > { %1308 = vrot.lane.b32.xlu1 %v3792_v43, %s3365_s21 }
  0x8f   : > { %v1110_v45 = vpop.permute.xlu2 %1109 }
  0x90   : > { %1201 = vst.msk [vmem:[#allocation3 + $0x28] sm:$0xff] %vm1195_vm3, %v1110_v45 }
  0x94   : > { %1312 = vrot.lane.b32.xlu0 %v3807_v47, %s3365_s21 }
  0x95   : > { %1310 = vrot.lane.b32.xlu2 %v3813_v49, %s3365_s21 }
  0x96   : > { %1314 = vrot.lane.b32.xlu1 %v3817_v51, %s3365_s21  ;;  %v1100_v52 = vpop.permute.xlu0 %1099 }
  0x97   : > { %1196 = vst.msk [vmem:[#allocation3] sm:$0xff] %vm1195_vm3, %v1100_v52  ;;  %v1116_v53 = vpop.permute.xlu2 %1115  ;;  %v3910_v52 = vld [vmem:[#allocation2 + $0x108] sm:$0xff] }
  0x98   : > { %v1104_v50 = vpop.permute.xlu1 %1103  ;;  %1204 = vst.msk [vmem:[#allocation3 + $0x40] sm:$0xff] %vm1195_vm3, %v1116_v53  ;;  %v3913_v53 = vld [vmem:[#allocation2 + $0x10a] sm:$0xff] }
  0x99   : > { %1198 = vst.msk [vmem:[#allocation3 + $0x10] sm:$0xff] %vm1195_vm3, %v1104_v50  ;;  %v3915_v50 = vld [vmem:[#allocation2 + $0x138] sm:$0xff] }
  0x9a   : > { %4937 = vst [vmem:[#allocation8_spill] sm:$0xff] %v3913_v53 }
  0x9b   : > { %1025 = vst.msk [vmem:[#allocation3 + $0xb0] sm:$0xff] %vm863_vm1, %v3910_v52 }
  0x9c   : > { %1318 = vrot.lane.b32.xlu0 %v3832_v56, %s3365_s21  ;;  %1029 = vst.msk [vmem:[#allocation3 + $0xd0] sm:$0xff] %vm863_vm1, %v3915_v50 }
  0x9d   : > { %1316 = vrot.lane.b32.xlu2 %v3836_v58, %s3365_s21 }
  0x9e   : > { %1320 = vrot.lane.b32.xlu1 %v3840_v0, %s3365_s21  ;;  %v1102_v60 = vpop.permute.xlu0 %1101 }
  0x9f   : > { %1197 = vst.msk [vmem:[#allocation3 + $0x8] sm:$0xff] %vm1195_vm3, %v1102_v60  ;;  %v1122_v61 = vpop.permute.xlu2 %1121  ;;  %v3917_v60 = vld [vmem:[#allocation2 + $0xfa] sm:$0xff] }
  0xa0   : > { %v1106_v63 = vpop.permute.xlu1 %1105  ;;  %1207 = vst.msk [vmem:[#allocation3 + $0x58] sm:$0xff] %vm1195_vm3, %v1122_v61  ;;  %v3921_v61 = vld [vmem:[#allocation2 + $0x112] sm:$0xff] }
  0xa1   : > { %1199 = vst.msk [vmem:[#allocation3 + $0x18] sm:$0xff] %vm1195_vm3, %v1106_v63 }
  0xa2   : > { %4938 = vst [vmem:[#allocation9_spill] sm:$0xff] %v3917_v60 }
  0xa3   : > { %4939 = vst [vmem:[#allocation10_spill] sm:$0xff] %v3921_v61 }
  0xa4   : > { %1324 = vrot.lane.b32.xlu0 %v3859_v1, %s3365_s21 }
  0xa5   : > { %1322 = vrot.lane.b32.xlu2 %v3863_v4, %s3365_s21 }
  0xa6   : > { %1326 = vrot.lane.b32.xlu1 %v3867_v5, %s3365_s21  ;;  %v1112_v6 = vpop.permute.xlu0 %1111  ;;  %v3987_v5 = vld [vmem:[#allocation2 + $0x170] sm:$0xff] }
  0xa7   : > { %1202 = vst.msk [vmem:[#allocation3 + $0x30] sm:$0xff] %vm1195_vm3, %v1112_v6  ;;  %v1128_v7 = vpop.permute.xlu2 %1127 }
  0xa8   : > { %v1114_v10 = vpop.permute.xlu1 %1113  ;;  %1210 = vst.msk [vmem:[#allocation3 + $0x70] sm:$0xff] %vm1195_vm3, %v1128_v7  ;;  %v3934_v7 = vld [vmem:[#allocation2 + $0x120] sm:$0xff] }
  0xa9   : > { %1203 = vst.msk [vmem:[#allocation3 + $0x38] sm:$0xff] %vm1195_vm3, %v1114_v10 }
  0xaa   : > { %1027 = vst.msk [vmem:[#allocation3 + $0xc0] sm:$0xff] %vm863_vm1, %v3934_v7 }
  0xab   : > { %1034 = vst.msk [vmem:[#allocation3 + $0xf8] sm:$0xff] %vm863_vm1, %v3987_v5 }
  0xac   : > { %1330 = vrot.lane.b32.xlu0 %v3886_v12, %s3365_s21  ;;  %v3969_v12 = vld [vmem:[#allocation2 + $0x142] sm:$0xff] }
  0xad   : > { %1328 = vrot.lane.b32.xlu2 %v3890_v25, %s3365_s21  ;;  %v3990_v25 = vld [vmem:[#allocation2 + $0x16a] sm:$0xff] }
  0xae   : > { %1332 = vrot.lane.b32.xlu1 %v3894_v27, %s3365_s21  ;;  %v1118_v29 = vpop.permute.xlu0 %1117 }
  0xaf   : > { %1205 = vst.msk [vmem:[#allocation3 + $0x48] sm:$0xff] %vm1195_vm3, %v1118_v29  ;;  %v1134_v31 = vpop.permute.xlu2 %1133  ;;  %v3937_v29 = vld [vmem:[#allocation2 + $0x128] sm:$0xff] }
  0xb0   : > { %v1120_v45 = vpop.permute.xlu1 %1119  ;;  %1213 = vst.msk [vmem:[#allocation3 + $0x88] sm:$0xff] %vm1195_vm3, %v1134_v31  ;;  %v3940_v31 = vld [vmem:[#allocation2 + $0x12a] sm:$0xff] }
  0xb1   : > { %1206 = vst.msk [vmem:[#allocation3 + $0x50] sm:$0xff] %vm1195_vm3, %v1120_v45  ;;  %v3942_v45 = vld [vmem:[#allocation2 + $0x158] sm:$0xff] }
  0xb2   : > { %4940 = vst [vmem:[#allocation11_spill] sm:$0xff] %v3940_v31 }
  0xb3   : > { %1028 = vst.msk [vmem:[#allocation3 + $0xc8] sm:$0xff] %vm863_vm1, %v3937_v29 }
  0xb4   : > { %1336 = vrot.lane.b32.xlu0 %v3913_v53, %s3365_s21  ;;  %v3944_v53 = vld [vmem:[#allocation2 + $0x122] sm:$0xff]  ;;  %1032 = vst.msk [vmem:[#allocation3 + $0xe8] sm:$0xff] %vm863_vm1, %v3942_v45 }
  0xb5   : > { %1334 = vrot.lane.b32.xlu2 %v3917_v60, %s3365_s21  ;;  %4941 = vst [vmem:[#allocation12_spill] sm:$0xff] %v3944_v53  ;;  %v3964_v60 = vld [vmem:[#allocation2 + $0x150] sm:$0xff] }
  0xb6   : > { %1338 = vrot.lane.b32.xlu1 %v3921_v61, %s3365_s21  ;;  %v1124_v63 = vpop.permute.xlu0 %1123  ;;  %v3961_v61 = vld [vmem:[#allocation2 + $0x140] sm:$0xff]  ;;  %1031 = vst.msk [vmem:[#allocation3 + $0xe0] sm:$0xff] %vm863_vm1, %v3964_v60 }
  0xb7   : > { %1208 = vst.msk [vmem:[#allocation3 + $0x60] sm:$0xff] %vm1195_vm3, %v1124_v63  ;;  %v1140_v6 = vpop.permute.xlu2 %1139  ;;  %v3948_v63 = vld [vmem:[#allocation2 + $0x13a] sm:$0xff] }
  0xb8   : > { %v1126_v10 = vpop.permute.xlu1 %1125  ;;  %1216 = vst.msk [vmem:[#allocation3 + $0xa0] sm:$0xff] %vm1195_vm3, %v1140_v6 }
  0xb9   : > { %1209 = vst.msk [vmem:[#allocation3 + $0x68] sm:$0xff] %vm1195_vm3, %v1126_v10 }
  0xba   : > { %4942 = vst [vmem:[#allocation13_spill] sm:$0xff] %v3948_v63 }
  0xbb   : > { %1030 = vst.msk [vmem:[#allocation3 + $0xd8] sm:$0xff] %vm863_vm1, %v3961_v61 }
  0xbc   : > { %1342 = vrot.lane.b32.xlu0 %v3940_v31, %s3365_s21  ;;  %v3967_v31 = vld [vmem:[#allocation2 + $0x152] sm:$0xff] }
  0xbd   : > { %1340 = vrot.lane.b32.xlu2 %v3944_v53, %s3365_s21  ;;  %4943 = vst [vmem:[#allocation14_spill] sm:$0xff] %v3967_v31 }
  0xbe   : > { %1344 = vrot.lane.b32.xlu1 %v3948_v63, %s3365_s21  ;;  %v1130_v6 = vpop.permute.xlu0 %1129  ;;  %v3973_v63 = vld [vmem:[#allocation2 + $0x15a] sm:$0xff] }
  0xbf   : > { %1211 = vst.msk [vmem:[#allocation3 + $0x78] sm:$0xff] %vm1195_vm3, %v1130_v6  ;;  %v1146_v10 = vpop.permute.xlu2 %1145 }
  0xc0   : > { %v1132_v27 = vpop.permute.xlu1 %1131  ;;  %1219 = vst.msk [vmem:[#allocation3 + $0xb8] sm:$0xff] %vm1195_vm3, %v1146_v10  ;;  %v3984_v10 = vld [vmem:[#allocation2 + $0x168] sm:$0xff] }
  0xc1   : > { %1212 = vst.msk [vmem:[#allocation3 + $0x80] sm:$0xff] %vm1195_vm3, %v1132_v27 }
  0xc2   : > { %1033 = vst.msk [vmem:[#allocation3 + $0xf0] sm:$0xff] %vm863_vm1, %v3984_v10 }
  0xc4   : > { %1348 = vrot.lane.b32.xlu0 %v3967_v31, %s3365_s21  ;;  %v1259_v31 = vld [vmem:[#allocation2 + $0x172] sm:$0xff] }
  0xc5   : > { %1346 = vrot.lane.b32.xlu2 %v3969_v12, %s3365_s21 }
  0xc6   : > { %1350 = vrot.lane.b32.xlu1 %v3973_v63, %s3365_s21  ;;  %v1136_v27 = vpop.permute.xlu0 %1135 }
  0xc7   : > { %1214 = vst.msk [vmem:[#allocation3 + $0x90] sm:$0xff] %vm1195_vm3, %v1136_v27  ;;  %v1152_v6 = vpop.permute.xlu2 %1151 }
  0xc8   : > { %v1138_v53 = vpop.permute.xlu1 %1137  ;;  %1222 = vst.msk [vmem:[#allocation3 + $0xd0] sm:$0xff] %vm1195_vm3, %v1152_v6 }
  0xc9   : > { %1215 = vst.msk [vmem:[#allocation3 + $0x98] sm:$0xff] %vm1195_vm3, %v1138_v53 }
  0xcc   : > { %1354 = vrot.lane.b32.xlu0 %v1259_v31, %s3365_s21 }
  0xcd   : > { %1352 = vrot.lane.b32.xlu2 %v3990_v25, %s3365_s21 }
  0xce   : > { %1485 = vrot.lane.b32.xlu1 %v3740_v26, %s3366_s22  ;;  %v1142_v27 = vpop.permute.xlu0 %1141 }
  0xcf   : > { %1217 = vst.msk [vmem:[#allocation3 + $0xa8] sm:$0xff] %vm1195_vm3, %v1142_v27  ;;  %v1158_v53 = vpop.permute.xlu2 %1157 }
  0xd0   : > { %v1144_v6 = vpop.permute.xlu1 %1143  ;;  %1225 = vst.msk [vmem:[#allocation3 + $0xe8] sm:$0xff] %vm1195_vm3, %v1158_v53  ;;  %v533_v53 = vld [vmem:[%s3458_s19 + $0xf0] sm:$0xff] }
  0xd1   : > { %1218 = vst.msk [vmem:[#allocation3 + $0xb0] sm:$0xff] %vm1195_vm3, %v1144_v6 }
  0xd4   : > { %1489 = vrot.lane.b32.xlu0 %v3723_v21, %s3366_s22 }
  0xd5   : > { %1487 = vrot.lane.b32.xlu2 %v3755_v32, %s3366_s22 }
  0xd6   : > { %1491 = vrot.lane.b32.xlu1 %v3744_v28, %s3366_s22  ;;  %v1148_v26 = vpop.permute.xlu0 %1147 }
  0xd7   : > { %1220 = vst.msk [vmem:[#allocation3 + $0xc0] sm:$0xff] %vm1195_vm3, %v1148_v26  ;;  %v1293_v31 = vpop.permute.xlu2 %1292 }
  0xd8   : > { %v1150_v27 = vpop.permute.xlu1 %1149  ;;  %1389 = vst.msk [vmem:[#allocation3] sm:$0xff] %vm1388_vm4, %v1293_v31 }
  0xd9   : > { %1221 = vst.msk [vmem:[#allocation3 + $0xc8] sm:$0xff] %vm1195_vm3, %v1150_v27 }
  0xdc   : > { %1495 = vrot.lane.b32.xlu0 %v3779_v39, %s3366_s22 }
  0xdd   : > { %1493 = vrot.lane.b32.xlu2 %v3775_v37, %s3366_s22 }
  0xde   : > { %1497 = vrot.lane.b32.xlu1 %v3761_v34, %s3366_s22  ;;  %v1154_v21 = vpop.permute.xlu0 %1153 }
  0xdf   : > { %1223 = vst.msk [vmem:[#allocation3 + $0xd8] sm:$0xff] %vm1195_vm3, %v1154_v21  ;;  %v1299_v28 = vpop.permute.xlu2 %1298 }
  0xe0   : > { %v1156_v32 = vpop.permute.xlu1 %1155  ;;  %1392 = vst.msk [vmem:[#allocation3 + $0x18] sm:$0xff] %vm1388_vm4, %v1299_v28 }
  0xe1   : > { %1224 = vst.msk [vmem:[#allocation3 + $0xe0] sm:$0xff] %vm1195_vm3, %v1156_v32 }
  0xe4   : > { %1501 = vrot.lane.b32.xlu0 %v3804_v46, %s3366_s22 }
  0xe5   : > { %1499 = vrot.lane.b32.xlu2 %v3800_v44, %s3366_s22 }
  0xe6   : > { %1503 = vrot.lane.b32.xlu1 %v3786_v41, %s3366_s22  ;;  %v1160_v34 = vpop.permute.xlu0 %1159  ;;  %v3336_v41 = vld [vmem:[%s4916_s3] ss:$0 sm:$0xff] }
  0xe7   : > { %1226 = vst.msk [vmem:[#allocation3 + $0xf0] sm:$0xff] %vm1195_vm3, %v1160_v34  ;;  %v1305_v37 = vpop.permute.xlu2 %1304  ;;  %v568_v44 = vmul.f32 %v3336_v41, %v533_v53 }
  0xe8   : > { %v1162_v39 = vpop.permute.xlu1 %1161  ;;  %1395 = vst.msk [vmem:[#allocation3 + $0x30] sm:$0xff] %vm1388_vm4, %v1305_v37 }
  0xe9   : > { %1227 = vst.msk [vmem:[#allocation3 + $0xf8] sm:$0xff] %vm1195_vm3, %v1162_v39 }
  0xec   : > { %1507 = vrot.lane.b32.xlu0 %v3829_v55, %s3366_s22  ;;  %v3337_v55 = vld [vmem:[%s4917_s4] ss:$0 sm:$0xff] }
  0xed   : > { %1505 = vrot.lane.b32.xlu2 %v3826_v54, %s3366_s22  ;;  %v603_v26 = vadd.f32 %v3337_v55, %v568_v44 }
  0xee   : > { %1509 = vrot.lane.b32.xlu1 %v3811_v48, %s3366_s22  ;;  %v1295_v46 = vpop.permute.xlu0 %1294 }
  0xef   : > { %1390 = vst.msk [vmem:[#allocation3 + $0x8] sm:$0xff] %vm1388_vm4, %v1295_v46  ;;  %v1311_v6 = vpop.permute.xlu2 %1310  ;;  %v635_v54 = vmax.f32 %v603_v26, 0.0 }
  0xf0   : > { %v1297_v31 = vpop.permute.xlu1 %1296  ;;  %1398 = vst.msk [vmem:[#allocation3 + $0x48] sm:$0xff] %vm1388_vm4, %v1311_v6 }
  0xf1   : > { %1391 = vst.msk [vmem:[#allocation3 + $0x10] sm:$0xff] %vm1388_vm4, %v1297_v31  ;;  %v668_v27 = vrot.slane %v635_v54, 1  ;;  %v747_v21 = vrot.slane %v635_v54, 7  ;;  %v1615_v31 = vld [vmem:[#allocation2 + $0x21] sm:$0xff] }
  0xf3   : > { %v845_v48 = vsel %vm701_vm0, %v668_v27, %v747_v21  ;;  %v4119_v27 = vld [vmem:[#allocation2 + $0x39] sm:$0xff] }
  0xf4   : > { %1513 = vrot.lane.b32.xlu0 %v3856_v2, %s3366_s22  ;;  %910 = vst.msk [vmem:[#allocation2 + $0x180] sm:$0xff] %vm863_vm1, %v845_v48  ;;  %v4123_v48 = vld [vmem:[#allocation2 + $0x49] sm:$0xff] }
  0xf5   : > { %1511 = vrot.lane.b32.xlu2 %v3853_v62, %s3366_s22  ;;  %v534_v62 = vld [vmem:[%s3458_s19 + $0xf8] sm:$0xff]  ;;  %s4599_s19 = scalar_lea.vmem %s4920_s7, %s3443_s11  ;;  %s3229_s11 = sshll.u32 %s4960_s27, 1 }
  0xf6   : > { %1515 = vrot.lane.b32.xlu1 %v3834_v57, %s3366_s22  ;;  %v1301_v28 = vpop.permute.xlu0 %1300  ;;  %v569_v37 = vmul.f32 %v3336_v41, %v534_v62  ;;  %v4136_v62 = vld [vmem:[#allocation2 + $0x51] sm:$0xff] }
  0xf7   : > { %1393 = vst.msk [vmem:[#allocation3 + $0x20] sm:$0xff] %vm1388_vm4, %v1301_v28  ;;  %v1317_v32 = vpop.permute.xlu2 %1316 }
  0xf8   : > { %v1303_v34 = vpop.permute.xlu1 %1302  ;;  %1401 = vst.msk [vmem:[#allocation3 + $0x60] sm:$0xff] %vm1388_vm4, %v1317_v32  ;;  %v4068_v53 = vadd.f32 %v3337_v55, %v569_v37  ;;  %v1614_v55 = vld [vmem:[#allocation2 + $0x19] sm:$0xff] }
  0xf9   : > { %1394 = vst.msk [vmem:[#allocation3 + $0x28] sm:$0xff] %vm1388_vm4, %v1303_v34 }
  0xfb   : > { %v1451_v6 = vld [vmem:[#allocation2 + $0x180] sm:$0xff] }
  0xfc   : > { %1519 = vrot.lane.b32.xlu0 %v3883_v11, %s3366_s22  ;;  %v636_v11 = vmax.f32 %v4068_v53, 0.0  ;;  %v4192_v53 = vld [vmem:[#allocation2 + $0xf9] sm:$0xff] }
  0xfd   : > { %1517 = vrot.lane.b32.xlu2 %v3880_v9, %s3366_s22 }
  0xfe   : > { %1521 = vrot.lane.b32.xlu1 %v3861_v3, %s3366_s22  ;;  %v1307_v57 = vpop.permute.xlu0 %1306  ;;  %v4077_v3 = vrot.slane %v636_v11, 7 }
  0xff   : > { %1396 = vst.msk [vmem:[#allocation3 + $0x38] sm:$0xff] %vm1388_vm4, %v1307_v57  ;;  %v1323_v2 = vpop.permute.xlu2 %1322  ;;  %v4134_v57 = vld [vmem:[#allocation2 + $0x61] sm:$0xff] }
 0x100   : > { %v1309_v39 = vpop.permute.xlu1 %1308  ;;  %1404 = vst.msk [vmem:[#allocation3 + $0x78] sm:$0xff] %vm1388_vm4, %v1323_v2  ;;  %v749_v44 = vsel %vm701_vm0, %v747_v21, %v4077_v3  ;;  %v4121_v21 = vld [vmem:[#allocation2 + $0x31] sm:$0xff]  ;;  %v4138_v2 = vld [vmem:[#allocation2 + $0x69] sm:$0xff] }
 0x101   : > { %1397 = vst.msk [vmem:[#allocation3 + $0x40] sm:$0xff] %vm1388_vm4, %v1309_v39 }
 0x102   : > { %911 = vst.msk [vmem:[#allocation2 + $0x188] sm:$0xff] %vm863_vm1, %v749_v44  ;;  %v4151_v44 = vld [vmem:[#allocation2 + $0x79] sm:$0xff] }
 0x104   : > { %1525 = vrot.lane.b32.xlu0 %v3910_v52, %s3366_s22 }
 0x105   : > { %1523 = vrot.lane.b32.xlu2 %v3907_v38, %s3366_s22 }
 0x106   : > { %1527 = vrot.lane.b32.xlu1 %v3888_v14, %s3366_s22  ;;  %v1313_v9 = vpop.permute.xlu0 %1312 }
 0x107   : > { %1399 = vst.msk [vmem:[#allocation3 + $0x50] sm:$0xff] %vm1388_vm4, %v1313_v9  ;;  %v1329_v41 = vpop.permute.xlu2 %1328 }
 0x108   : > { %v1315_v46 = vpop.permute.xlu1 %1314  ;;  %1407 = vst.msk [vmem:[#allocation3 + $0x90] sm:$0xff] %vm1388_vm4, %v1329_v41  ;;  %v4149_v41 = vld [vmem:[#allocation2 + $0x81] sm:$0xff] }
 0x109   : > { %1400 = vst.msk [vmem:[#allocation3 + $0x58] sm:$0xff] %vm1388_vm4, %v1315_v46  ;;  %v1452_v26 = vld [vmem:[#allocation2 + $0x188] sm:$0xff]  ;;  %v4153_v46 = vld [vmem:[#allocation2 + $0x91] sm:$0xff] }
 0x10c   : > { %1531 = vrot.lane.b32.xlu0 %v3937_v29, %s3366_s22 }
 0x10d   : > { %1529 = vrot.lane.b32.xlu2 %v3934_v7, %s3366_s22 }
 0x10e   : > { %1533 = vrot.lane.b32.xlu1 %v3915_v50, %s3366_s22  ;;  %v1319_v14 = vpop.permute.xlu0 %1318 }
 0x10f   : > { %1402 = vst.msk [vmem:[#allocation3 + $0x68] sm:$0xff] %vm1388_vm4, %v1319_v14  ;;  %v1335_v38 = vpop.permute.xlu2 %1334 }
 0x110   : > { %v1321_v52 = vpop.permute.xlu1 %1320  ;;  %1410 = vst.msk [vmem:[#allocation3 + $0xa8] sm:$0xff] %vm1388_vm4, %v1335_v38 }
 0x111   : > { %1403 = vst.msk [vmem:[#allocation3 + $0x70] sm:$0xff] %vm1388_vm4, %v1321_v52 }
 0x114   : > { %1537 = vrot.lane.b32.xlu0 %v3964_v60, %s3366_s22 }
 0x115   : > { %1535 = vrot.lane.b32.xlu2 %v3961_v61, %s3366_s22 }
 0x116   : > { %1539 = vrot.lane.b32.xlu1 %v3942_v45, %s3366_s22  ;;  %v1325_v7 = vpop.permute.xlu0 %1324 }
 0x117   : > { %1405 = vst.msk [vmem:[#allocation3 + $0x80] sm:$0xff] %vm1388_vm4, %v1325_v7  ;;  %v1341_v50 = vpop.permute.xlu2 %1340  ;;  %v4164_v7 = vld [vmem:[#allocation2 + $0x99] sm:$0xff] }
 0x118   : > { %v1327_v29 = vpop.permute.xlu1 %1326  ;;  %1413 = vst.msk [vmem:[#allocation3 + $0xc0] sm:$0xff] %vm1388_vm4, %v1341_v50  ;;  %v4166_v50 = vld [vmem:[#allocation2 + $0xb1] sm:$0xff] }
 0x119   : > { %1406 = vst.msk [vmem:[#allocation3 + $0x88] sm:$0xff] %vm1388_vm4, %v1327_v29 }
 0x11c   : > { %1543 = vrot.lane.b32.xlu0 %v3987_v5, %s3366_s22 }
 0x11d   : > { %1541 = vrot.lane.b32.xlu2 %v3984_v10, %s3366_s22 }
 0x11e   : > { %1545 = vrot.lane.b32.xlu1 %v1451_v6, %s3366_s22  ;;  %v1331_v60 = vpop.permute.xlu0 %1330 }
 0x11f   : > { %1408 = vst.msk [vmem:[#allocation3 + $0x98] sm:$0xff] %vm1388_vm4, %v1331_v60  ;;  %v1347_v61 = vpop.permute.xlu2 %1346 }
 0x120   : > { %v1333_v45 = vpop.permute.xlu1 %1332  ;;  %1416 = vst.msk [vmem:[#allocation3 + $0xd8] sm:$0xff] %vm1388_vm4, %v1347_v61  ;;  %v4177_v61 = vld [vmem:[#allocation2 + $0xc1] sm:$0xff] }
 0x121   : > { %1409 = vst.msk [vmem:[#allocation3 + $0xa0] sm:$0xff] %vm1388_vm4, %v1333_v45  ;;  %v1630_v45 = vld [vmem:[#allocation2 + $0xd9] sm:$0xff] }
 0x124   : > { %1678 = vrot.lane.b32.xlu0 %v1614_v55, %s3367_s9 }
 0x125   : > { %1547 = vrot.lane.b32.xlu2 %v1452_v26, %s3366_s22 }
 0x126   : > { %1680 = vrot.lane.b32.xlu1 %v1615_v31, %s3367_s9  ;;  %v1337_v5 = vpop.permute.xlu0 %1336 }
 0x127   : > { %1411 = vst.msk [vmem:[#allocation3 + $0xb0] sm:$0xff] %vm1388_vm4, %v1337_v5  ;;  %v1353_v10 = vpop.permute.xlu2 %1352 }
 0x128   : > { %v1339_v54 = vpop.permute.xlu1 %1338  ;;  %1419 = vst.msk [vmem:[#allocation3 + $0xf0] sm:$0xff] %vm1388_vm4, %v1353_v10 }
 0x129   : > { %1412 = vst.msk [vmem:[#allocation3 + $0xb8] sm:$0xff] %vm1388_vm4, %v1339_v54  ;;  %v4202_v54 = vld [vmem:[#allocation2 + $0x109] sm:$0xff] }
 0x12c   : > { %1684 = vrot.lane.b32.xlu0 %v4119_v27, %s3367_s9 }
 0x12d   : > { %1682 = vrot.lane.b32.xlu2 %v4121_v21, %s3367_s9 }
 0x12e   : > { %1686 = vrot.lane.b32.xlu1 %v4123_v48, %s3367_s9  ;;  %v1343_v28 = vpop.permute.xlu0 %1342 }
 0x12f   : > { %1414 = vst.msk [vmem:[#allocation3 + $0xc8] sm:$0xff] %vm1388_vm4, %v1343_v28  ;;  %v1488_v32 = vpop.permute.xlu2 %1487 }
 0x130   : > { %v1345_v34 = vpop.permute.xlu1 %1344  ;;  %1583 = vst.msk [vmem:[#allocation3 + $0x8] sm:$0xff] %vm1581_vm5, %v1488_v32 }
 0x131   : > { %1415 = vst.msk [vmem:[#allocation3 + $0xd0] sm:$0xff] %vm1388_vm4, %v1345_v34 }
 0x134   : > { %1690 = vrot.lane.b32.xlu0 %v4134_v57, %s3367_s9 }
 0x135   : > { %1688 = vrot.lane.b32.xlu2 %v4136_v62, %s3367_s9 }
 0x136   : > { %1692 = vrot.lane.b32.xlu1 %v4138_v2, %s3367_s9  ;;  %v1349_v37 = vpop.permute.xlu0 %1348 }
 0x137   : > { %1417 = vst.msk [vmem:[#allocation3 + $0xe0] sm:$0xff] %vm1388_vm4, %v1349_v37  ;;  %v1494_v39 = vpop.permute.xlu2 %1493  ;;  %v1644_v37 = vld [vmem:[#allocation2 + $0x181] sm:$0xff] }
 0x138   : > { %v1351_v9 = vpop.permute.xlu1 %1350  ;;  %1586 = vst.msk [vmem:[#allocation3 + $0x20] sm:$0xff] %vm1581_vm5, %v1494_v39 }
 0x139   : > { %1418 = vst.msk [vmem:[#allocation3 + $0xe8] sm:$0xff] %vm1388_vm4, %v1351_v9 }
 0x13c   : > { %1696 = vrot.lane.b32.xlu0 %v4149_v41, %s3367_s9 }
 0x13d   : > { %1694 = vrot.lane.b32.xlu2 %v4151_v44, %s3367_s9 }
 0x13e   : > { %1698 = vrot.lane.b32.xlu1 %v4153_v46, %s3367_s9  ;;  %v1355_v14 = vpop.permute.xlu0 %1354 }
 0x13f   : > { %1420 = vst.msk [vmem:[#allocation3 + $0xf8] sm:$0xff] %vm1388_vm4, %v1355_v14  ;;  %v1500_v38 = vpop.permute.xlu2 %1499 }
 0x140   : > { %v1486_v52 = vpop.permute.xlu1 %1485  ;;  %1589 = vst.msk [vmem:[#allocation3 + $0x38] sm:$0xff] %vm1581_vm5, %v1500_v38  ;;  %v4944_v38 = vld [vmem:[#allocation6_spill] sm:$0xff] }
 0x141   : > { %1582 = vst.msk [vmem:[#allocation3] sm:$0xff] %vm1581_vm5, %v1486_v52 }
 0x144   : > { %1702 = vrot.lane.b32.xlu0 %v3669_v59, %s3367_s9  ;;  %v813_v59 = vrot.slane %v636_v11, 5 }
 0x145   : > { %1700 = vrot.lane.b32.xlu2 %v4164_v7, %s3367_s9 }
 0x146   : > { %1704 = vrot.lane.b32.xlu1 %v4166_v50, %s3367_s9  ;;  %v1490_v29 = vpop.permute.xlu0 %1489  ;;  %v861_v55 = vsel %vm701_vm0, %v4077_v3, %v813_v59 }
 0x147   : > { %1584 = vst.msk [vmem:[#allocation3 + $0x10] sm:$0xff] %vm1581_vm5, %v1490_v29  ;;  %v1506_v6 = vpop.permute.xlu2 %1505 }
 0x148   : > { %v1492_v60 = vpop.permute.xlu1 %1491  ;;  %1592 = vst.msk [vmem:[#allocation3 + $0x50] sm:$0xff] %vm1581_vm5, %v1506_v6  ;;  %v4947_v6 = vld [vmem:[#allocation9_spill] sm:$0xff] }
 0x149   : > { %1585 = vst.msk [vmem:[#allocation3 + $0x18] sm:$0xff] %vm1581_vm5, %v1492_v60  ;;  %v4948_v60 = vld [vmem:[#allocation7_spill] sm:$0xff] }
 0x14a   : > { %912 = vst.msk [vmem:[#allocation2 + $0x190] sm:$0x3] %vm866_vm2, %v861_v55 }
 0x14c   : > { %1708 = vrot.lane.b32.xlu0 %v3685_v8, %s3367_s9  ;;  %v1631_v8 = vld [vmem:[#allocation2 + $0xe1] sm:$0xff] }
 0x14d   : > { %1706 = vrot.lane.b32.xlu2 %v4177_v61, %s3367_s9 }
 0x14e   : > { %1710 = vrot.lane.b32.xlu1 %v1630_v45, %s3367_s9  ;;  %v1496_v26 = vpop.permute.xlu0 %1495  ;;  %v4949_v45 = vld [vmem:[#allocation8_spill] sm:$0xff] }
 0x14f   : > { %1587 = vst.msk [vmem:[#allocation3 + $0x28] sm:$0xff] %vm1581_vm5, %v1496_v26  ;;  %v1512_v31 = vpop.permute.xlu2 %1511 }
 0x150   : > { %v1498_v5 = vpop.permute.xlu1 %1497  ;;  %1595 = vst.msk [vmem:[#allocation3 + $0x68] sm:$0xff] %vm1581_vm5, %v1512_v31  ;;  %v4950_v31 = vld [vmem:[#allocation12_spill] sm:$0xff] }
 0x151   : > { %1588 = vst.msk [vmem:[#allocation3 + $0x30] sm:$0xff] %vm1581_vm5, %v1498_v5  ;;  %v1645_v39 = vld [vmem:[#allocation2 + $0x189] sm:$0xff]  ;;  %v4951_v5 = vld [vmem:[#allocation10_spill] sm:$0xff] }
 0x154   : > { %1714 = vrot.lane.b32.xlu0 %v3693_v13, %s3367_s9 }
 0x155   : > { %1712 = vrot.lane.b32.xlu2 %v1631_v8, %s3367_s9  ;;  %v4952_v8 = vld [vmem:[#allocation11_spill] sm:$0xff] }
 0x156   : > { %1716 = vrot.lane.b32.xlu1 %v4192_v53, %s3367_s9  ;;  %v1502_v11 = vpop.permute.xlu0 %1501 }
 0x157   : > { %1590 = vst.msk [vmem:[#allocation3 + $0x40] sm:$0xff] %vm1581_vm5, %v1502_v11  ;;  %v1518_v3 = vpop.permute.xlu2 %1517 }
 0x158   : > { %v1504_v10 = vpop.permute.xlu1 %1503  ;;  %1598 = vst.msk [vmem:[#allocation3 + $0x80] sm:$0xff] %vm1581_vm5, %v1518_v3 }
 0x159   : > { %1591 = vst.msk [vmem:[#allocation3 + $0x48] sm:$0xff] %vm1581_vm5, %v1504_v10 }
 0x15c   : > { %1720 = vrot.lane.b32.xlu0 %v3701_v16, %s3367_s9 }
 0x15d   : > { %1718 = vrot.lane.b32.xlu2 %v4202_v54, %s3367_s9 }
 0x15e   : > { %1722 = vrot.lane.b32.xlu1 %v3699_v15, %s3367_s9  ;;  %v1508_v13 = vpop.permute.xlu0 %1507 }
 0x15f   : > { %1593 = vst.msk [vmem:[#allocation3 + $0x58] sm:$0xff] %vm1581_vm5, %v1508_v13  ;;  %v1524_v28 = vpop.permute.xlu2 %1523  ;;  %v4953_v13 = vld [vmem:[#allocation13_spill] sm:$0xff] }
 0x160   : > { %v1510_v32 = vpop.permute.xlu1 %1509  ;;  %1601 = vst.msk [vmem:[#allocation3 + $0x98] sm:$0xff] %vm1581_vm5, %v1524_v28  ;;  %v4954_v28 = vld [vmem:[#allocation14_spill] sm:$0xff] }
 0x161   : > { %1594 = vst.msk [vmem:[#allocation3 + $0x60] sm:$0xff] %vm1581_vm5, %v1510_v32 }
 0x164   : > { %1726 = vrot.lane.b32.xlu0 %v3713_v19, %s3367_s9 }
 0x165   : > { %1724 = vrot.lane.b32.xlu2 %v3703_v17, %s3367_s9 }
 0x166   : > { %1728 = vrot.lane.b32.xlu1 %v3711_v18, %s3367_s9  ;;  %v1514_v16 = vpop.permute.xlu0 %1513 }
 0x167   : > { %1596 = vst.msk [vmem:[#allocation3 + $0x70] sm:$0xff] %vm1581_vm5, %v1514_v16  ;;  %v1530_v15 = vpop.permute.xlu2 %1529 }
 0x168   : > { %v1516_v34 = vpop.permute.xlu1 %1515  ;;  %1604 = vst.msk [vmem:[#allocation3 + $0xb0] sm:$0xff] %vm1581_vm5, %v1530_v15 }
 0x169   : > { %1597 = vst.msk [vmem:[#allocation3 + $0x78] sm:$0xff] %vm1581_vm5, %v1516_v34  ;;  %v2001_v34 = vld [vmem:[#allocation2 + $0x30] sm:$0xff] }
 0x16c   : > { %1732 = vrot.lane.b32.xlu0 %v3729_v23, %s3367_s9 }
 0x16d   : > { %1730 = vrot.lane.b32.xlu2 %v3715_v20, %s3367_s9 }
 0x16e   : > { %1734 = vrot.lane.b32.xlu1 %v3727_v22, %s3367_s9  ;;  %v1520_v17 = vpop.permute.xlu0 %1519 }
 0x16f   : > { %1599 = vst.msk [vmem:[#allocation3 + $0x88] sm:$0xff] %vm1581_vm5, %v1520_v17  ;;  %v1536_v18 = vpop.permute.xlu2 %1535 }
 0x170   : > { %v1522_v19 = vpop.permute.xlu1 %1521  ;;  %1607 = vst.msk [vmem:[#allocation3 + $0xc8] sm:$0xff] %vm1581_vm5, %v1536_v18 }
 0x171   : > { %1600 = vst.msk [vmem:[#allocation3 + $0x90] sm:$0xff] %vm1581_vm5, %v1522_v19  ;;  %v2387_v19 = vld [vmem:[#allocation2 + $0x32] sm:$0xff] }
 0x174   : > { %1738 = vrot.lane.b32.xlu0 %v1644_v37, %s3367_s9  ;;  %v2002_v37 = vld [vmem:[#allocation2 + $0x38] sm:$0xff] }
 0x175   : > { %1736 = vrot.lane.b32.xlu2 %v3731_v24, %s3367_s9 }
 0x176   : > { %1740 = vrot.lane.b32.xlu1 %v1645_v39, %s3367_s9  ;;  %v1526_v20 = vpop.permute.xlu0 %1525 }
 0x177   : > { %1602 = vst.msk [vmem:[#allocation3 + $0xa0] sm:$0xff] %vm1581_vm5, %v1526_v20  ;;  %v1542_v22 = vpop.permute.xlu2 %1541  ;;  %v2388_v20 = vld [vmem:[#allocation2 + $0x3a] sm:$0xff] }
 0x178   : > { %v1528_v23 = vpop.permute.xlu1 %1527  ;;  %1610 = vst.msk [vmem:[#allocation3 + $0xe0] sm:$0xff] %vm1581_vm5, %v1542_v22  ;;  %v2003_v22 = vld [vmem:[#allocation2 + $0x48] sm:$0xff] }
 0x179   : > { %1603 = vst.msk [vmem:[#allocation3 + $0xa8] sm:$0xff] %vm1581_vm5, %v1528_v23 }
 0x17c   : > { %1873 = vrot.lane.b32.xlu0 %v3763_v35, %s3368_s10 }
 0x17d   : > { %1871 = vrot.lane.b32.xlu2 %v3748_v30, %s3368_s10 }
 0x17e   : > { %1875 = vrot.lane.b32.xlu1 %v3759_v33, %s3368_s10  ;;  %v1532_v24 = vpop.permute.xlu0 %1531 }
 0x17f   : > { %1605 = vst.msk [vmem:[#allocation3 + $0xb8] sm:$0xff] %vm1581_vm5, %v1532_v24  ;;  %v1548_v9 = vpop.permute.xlu2 %1547 }
 0x180   : > { %v1534_v14 = vpop.permute.xlu1 %1533  ;;  %1613 = vst.msk [vmem:[#allocation3 + $0xf8] sm:$0xff] %vm1581_vm5, %v1548_v9  ;;  %v2009_v9 = vld [vmem:[#allocation2 + $0x90] sm:$0xff] }
 0x181   : > { %1606 = vst.msk [vmem:[#allocation3 + $0xc0] sm:$0xff] %vm1581_vm5, %v1534_v14 }
 0x184   : > { %1879 = vrot.lane.b32.xlu0 %v3788_v42, %s3368_s10 }
 0x185   : > { %1877 = vrot.lane.b32.xlu2 %v3767_v36, %s3368_s10 }
 0x186   : > { %1881 = vrot.lane.b32.xlu1 %v3782_v40, %s3368_s10  ;;  %v1538_v30 = vpop.permute.xlu0 %1537 }
 0x187   : > { %1608 = vst.msk [vmem:[#allocation3 + $0xd0] sm:$0xff] %vm1581_vm5, %v1538_v30  ;;  %v1683_v33 = vpop.permute.xlu2 %1682 }
 0x188   : > { %v1540_v35 = vpop.permute.xlu1 %1539  ;;  %1777 = vst.msk [vmem:[#allocation3 + $0x10] sm:$0xff] %vm1774_vm6, %v1683_v33  ;;  %v2395_v33 = vld [vmem:[#allocation2 + $0x92] sm:$0xff] }
 0x189   : > { %1609 = vst.msk [vmem:[#allocation3 + $0xd8] sm:$0xff] %vm1581_vm5, %v1540_v35  ;;  %v2389_v35 = vld [vmem:[#allocation2 + $0x4a] sm:$0xff] }
 0x18c   : > { %1885 = vrot.lane.b32.xlu0 %v3813_v49, %s3368_s10 }
 0x18d   : > { %1883 = vrot.lane.b32.xlu2 %v3792_v43, %s3368_s10 }
 0x18e   : > { %1887 = vrot.lane.b32.xlu1 %v3807_v47, %s3368_s10  ;;  %v1544_v36 = vpop.permute.xlu0 %1543 }
 0x18f   : > { %1611 = vst.msk [vmem:[#allocation3 + $0xe8] sm:$0xff] %vm1581_vm5, %v1544_v36  ;;  %v1689_v40 = vpop.permute.xlu2 %1688  ;;  %v2004_v36 = vld [vmem:[#allocation2 + $0x50] sm:$0xff] }
 0x190   : > { %v1546_v42 = vpop.permute.xlu1 %1545  ;;  %1780 = vst.msk [vmem:[#allocation3 + $0x28] sm:$0xff] %vm1774_vm6, %v1689_v40 }
 0x191   : > { %1612 = vst.msk [vmem:[#allocation3 + $0xf0] sm:$0xff] %vm1581_vm5, %v1546_v42  ;;  %v2010_v42 = vld [vmem:[#allocation2 + $0x98] sm:$0xff] }
 0x194   : > { %1891 = vrot.lane.b32.xlu0 %v3836_v58, %s3368_s10 }
 0x195   : > { %1889 = vrot.lane.b32.xlu2 %v3817_v51, %s3368_s10 }
 0x196   : > { %1893 = vrot.lane.b32.xlu1 %v3832_v56, %s3368_s10  ;;  %v1679_v43 = vpop.permute.xlu0 %1678 }
 0x197   : > { %1775 = vst.msk [vmem:[#allocation3] sm:$0xff] %vm1774_vm6, %v1679_v43  ;;  %v1695_v47 = vpop.permute.xlu2 %1694 }
 0x198   : > { %v1681_v49 = vpop.permute.xlu1 %1680  ;;  %1783 = vst.msk [vmem:[#allocation3 + $0x40] sm:$0xff] %vm1774_vm6, %v1695_v47 }
 0x199   : > { %1776 = vst.msk [vmem:[#allocation3 + $0x8] sm:$0xff] %vm1774_vm6, %v1681_v49 }
 0x19c   : > { %1897 = vrot.lane.b32.xlu0 %v3863_v4, %s3368_s10  ;;  %v4945_v4 = vld [vmem:[#allocation4_spill] sm:$0xff] }
 0x19d   : > { %1895 = vrot.lane.b32.xlu2 %v3840_v0, %s3368_s10  ;;  %v4946_v0 = vld [vmem:[#allocation5_spill] sm:$0xff] }
 0x19e   : > { %1899 = vrot.lane.b32.xlu1 %v3859_v1, %s3368_s10  ;;  %v1685_v51 = vpop.permute.xlu0 %1684 }
 0x19f   : > { %1778 = vst.msk [vmem:[#allocation3 + $0x18] sm:$0xff] %vm1774_vm6, %v1685_v51  ;;  %v1701_v56 = vpop.permute.xlu2 %1700  ;;  %v2390_v51 = vld [vmem:[#allocation2 + $0x52] sm:$0xff] }
 0x1a0   : > { %v1687_v58 = vpop.permute.xlu1 %1686  ;;  %1786 = vst.msk [vmem:[#allocation3 + $0x58] sm:$0xff] %vm1774_vm6, %v1701_v56  ;;  %v2017_v56 = vld [vmem:[#allocation2 + $0xf0] sm:$0xff] }
 0x1a1   : > { %1779 = vst.msk [vmem:[#allocation3 + $0x20] sm:$0xff] %vm1774_vm6, %v1687_v58  ;;  %v2396_v58 = vld [vmem:[#allocation2 + $0x9a] sm:$0xff] }
 0x1a4   : > { %1903 = vrot.lane.b32.xlu0 %v4944_v38, %s3368_s10 }
 0x1a5   : > { %1901 = vrot.lane.b32.xlu2 %v4945_v4, %s3368_s10  ;;  %v2403_v4 = vld [vmem:[#allocation2 + $0xf2] sm:$0xff] }
 0x1a6   : > { %1905 = vrot.lane.b32.xlu1 %v4946_v0, %s3368_s10  ;;  %v1691_v52 = vpop.permute.xlu0 %1690  ;;  %v2210_v0 = vld [vmem:[#allocation2 + $0xf1] sm:$0xff] }
 0x1a7   : > { %1781 = vst.msk [vmem:[#allocation3 + $0x30] sm:$0xff] %vm1774_vm6, %v1691_v52  ;;  %v1707_v1 = vpop.permute.xlu2 %1706  ;;  %v2005_v52 = vld [vmem:[#allocation2 + $0x60] sm:$0xff] }
 0x1a8   : > { %v1693_v29 = vpop.permute.xlu1 %1692  ;;  %1789 = vst.msk [vmem:[#allocation3 + $0x70] sm:$0xff] %vm1774_vm6, %v1707_v1 }
 0x1a9   : > { %1782 = vst.msk [vmem:[#allocation3 + $0x38] sm:$0xff] %vm1774_vm6, %v1693_v29 }
 0x1ac   : > { %1909 = vrot.lane.b32.xlu0 %v4947_v6, %s3368_s10 }
 0x1ad   : > { %1907 = vrot.lane.b32.xlu2 %v4948_v60, %s3368_s10  ;;  %v2011_v60 = vld [vmem:[#allocation2 + $0xa8] sm:$0xff] }
 0x1ae   : > { %1911 = vrot.lane.b32.xlu1 %v4949_v45, %s3368_s10  ;;  %v1697_v59 = vpop.permute.xlu0 %1696  ;;  %v2204_v45 = vld [vmem:[#allocation2 + $0xa9] sm:$0xff] }
 0x1af   : > { %1784 = vst.msk [vmem:[#allocation3 + $0x48] sm:$0xff] %vm1774_vm6, %v1697_v59  ;;  %v1713_v55 = vpop.permute.xlu2 %1712 }
 0x1b0   : > { %v1699_v26 = vpop.permute.xlu1 %1698  ;;  %1792 = vst.msk [vmem:[#allocation3 + $0x88] sm:$0xff] %vm1774_vm6, %v1713_v55 }
 0x1b1   : > { %1785 = vst.msk [vmem:[#allocation3 + $0x50] sm:$0xff] %vm1774_vm6, %v1699_v26 }
 0x1b4   : > { %1915 = vrot.lane.b32.xlu0 %v4950_v31, %s3368_s10  ;;  %v2391_v31 = vld [vmem:[#allocation2 + $0x62] sm:$0xff] }
 0x1b5   : > { %1913 = vrot.lane.b32.xlu2 %v4951_v5, %s3368_s10  ;;  %v2018_v5 = vld [vmem:[#allocation2 + $0xf8] sm:$0xff] }
 0x1b6   : > { %1917 = vrot.lane.b32.xlu1 %v4952_v8, %s3368_s10  ;;  %v1703_v11 = vpop.permute.xlu0 %1702  ;;  %v2397_v8 = vld [vmem:[#allocation2 + $0xaa] sm:$0xff] }
 0x1b7   : > { %1787 = vst.msk [vmem:[#allocation3 + $0x60] sm:$0xff] %vm1774_vm6, %v1703_v11  ;;  %v1719_v3 = vpop.permute.xlu2 %1718 }
 0x1b8   : > { %v1705_v10 = vpop.permute.xlu1 %1704  ;;  %1795 = vst.msk [vmem:[#allocation3 + $0xa0] sm:$0xff] %vm1774_vm6, %v1719_v3 }
 0x1b9   : > { %1788 = vst.msk [vmem:[#allocation3 + $0x68] sm:$0xff] %vm1774_vm6, %v1705_v10  ;;  %v2404_v10 = vld [vmem:[#allocation2 + $0xfa] sm:$0xff] }
 0x1bc   : > { %1921 = vrot.lane.b32.xlu0 %v3969_v12, %s3368_s10 }
 0x1bd   : > { %1919 = vrot.lane.b32.xlu2 %v4953_v13, %s3368_s10  ;;  %v2006_v13 = vld [vmem:[#allocation2 + $0x68] sm:$0xff] }
 0x1be   : > { %1923 = vrot.lane.b32.xlu1 %v4954_v28, %s3368_s10  ;;  %v1709_v32 = vpop.permute.xlu0 %1708 }
 0x1bf   : > { %1790 = vst.msk [vmem:[#allocation3 + $0x78] sm:$0xff] %vm1774_vm6, %v1709_v32  ;;  %v1725_v16 = vpop.permute.xlu2 %1724  ;;  %v2620_v32 = vld [vmem:[%s4918_s5 + $0x40] sm:$0xff] }
 0x1c0   : > { %v1711_v15 = vpop.permute.xlu1 %1710  ;;  %1798 = vst.msk [vmem:[#allocation3 + $0xb8] sm:$0xff] %vm1774_vm6, %v1725_v16  ;;  %2729 = vmatpush.msra.mxu0 %v2620_v32  ;;  %3274 = vmatpush.msra.mxu1 %v2620_v32 }
 0x1c1   : > { %1791 = vst.msk [vmem:[#allocation3 + $0x80] sm:$0xff] %vm1774_vm6, %v1711_v15  ;;  %3275 = vmatpush.msra.mxu2 %v2620_v32  ;;  %3276 = vmatpush.msra.mxu3 %v2620_v32  ;;  %v2027_v32 = vld [vmem:[#allocation2 + $0x168] sm:$0xff] }
 0x1c4   : > { %1927 = vrot.lane.b32.xlu0 %v3990_v25, %s3368_s10 }
 0x1c5   : > { %1925 = vrot.lane.b32.xlu2 %v3973_v63, %s3368_s10 }
 0x1c6   : > { %2065 = vrot.lane.b32.xlu1 %v2001_v34, %s3369_s12  ;;  %v1715_v12 = vpop.permute.xlu0 %1714  ;;  %v2618_v34 = vld [vmem:[%s4918_s5 + $0x30] sm:$0xff] }
 0x1c7   : > { %1793 = vst.msk [vmem:[#allocation3 + $0x90] sm:$0xff] %vm1774_vm6, %v1715_v12  ;;  %v1731_v17 = vpop.permute.xlu2 %1730  ;;  %v2012_v12 = vld [vmem:[#allocation2 + $0xb0] sm:$0xff] }
 0x1c8   : > { %v1717_v18 = vpop.permute.xlu1 %1716  ;;  %1801 = vst.msk [vmem:[#allocation3 + $0xd0] sm:$0xff] %vm1774_vm6, %v1731_v17  ;;  %v2617_v17 = vld [vmem:[%s4918_s5 + $0x28] sm:$0xff] }
 0x1c9   : > { %1794 = vst.msk [vmem:[#allocation3 + $0x98] sm:$0xff] %vm1774_vm6, %v1717_v18 }
 0x1cc   : > { %2451 = vrot.lane.b32.xlu0 %v2387_v19, %s3370_s13  ;;  %v2616_v19 = vld [vmem:[%s4918_s5 + $0x20] sm:$0xff] }
 0x1cd   : > { %2258 = vrot.lane.b32.xlu2 %v4121_v21, %s3371_s14 }
 0x1ce   : > { %2067 = vrot.lane.b32.xlu1 %v2002_v37, %s3369_s12  ;;  %v1721_v25 = vpop.permute.xlu0 %1720 }
 0x1cf   : > { %1796 = vst.msk [vmem:[#allocation3 + $0xa8] sm:$0xff] %vm1774_vm6, %v1721_v25  ;;  %v1737_v63 = vpop.permute.xlu2 %1736 }
 0x1d0   : > { %v1723_v39 = vpop.permute.xlu1 %1722  ;;  %1804 = vst.msk [vmem:[#allocation3 + $0xe8] sm:$0xff] %vm1774_vm6, %v1737_v63  ;;  %v2019_v63 = vld [vmem:[#allocation2 + $0x108] sm:$0xff] }
 0x1d1   : > { %1797 = vst.msk [vmem:[#allocation3 + $0xb0] sm:$0xff] %vm1774_vm6, %v1723_v39  ;;  %v2614_v39 = vld [vmem:[%s4918_s5 + $0x10] sm:$0xff] }
 0x1d4   : > { %2453 = vrot.lane.b32.xlu0 %v2388_v20, %s3370_s13  ;;  %v2392_v20 = vld [vmem:[#allocation2 + $0x6a] sm:$0xff] }
 0x1d5   : > { %2260 = vrot.lane.b32.xlu2 %v4119_v27, %s3371_s14 }
 0x1d6   : > { %2069 = vrot.lane.b32.xlu1 %v2003_v22, %s3369_s12  ;;  %v1727_v21 = vpop.permute.xlu0 %1726  ;;  %v2613_v22 = vld [vmem:[%s4918_s5 + $0x8] sm:$0xff] }
 0x1d7   : > { %1799 = vst.msk [vmem:[#allocation3 + $0xc0] sm:$0xff] %vm1774_vm6, %v1727_v21  ;;  %v1872_v23 = vpop.permute.xlu2 %1871 }
 0x1d8   : > { %v1729_v24 = vpop.permute.xlu1 %1728  ;;  %1968 = vst.msk [vmem:[#allocation3] sm:$0xff] %vm1967_vm7, %v1872_v23  ;;  %v2612_v23 = vld [vmem:[%s4918_s5] sm:$0xff] }
 0x1d9   : > { %1800 = vst.msk [vmem:[#allocation3 + $0xc8] sm:$0xff] %vm1774_vm6, %v1729_v24 }
 0x1dc   : > { %2262 = vrot.lane.b32.xlu0 %v4123_v48, %s3371_s14 }
 0x1dd   : > { %2081 = vrot.lane.b32.xlu2 %v2009_v9, %s3369_s12 }
 0x1de   : > { %2274 = vrot.lane.b32.xlu1 %v4153_v46, %s3371_s14  ;;  %v1733_v27 = vpop.permute.xlu0 %1732 }
 0x1df   : > { %1802 = vst.msk [vmem:[#allocation3 + $0xd8] sm:$0xff] %vm1774_vm6, %v1733_v27  ;;  %v1878_v14 = vpop.permute.xlu2 %1877  ;;  %v2398_v27 = vld [vmem:[#allocation2 + $0xb2] sm:$0xff] }
 0x1e0   : > { %v1735_v30 = vpop.permute.xlu1 %1734  ;;  %1971 = vst.msk [vmem:[#allocation3 + $0x18] sm:$0xff] %vm1967_vm7, %v1878_v14  ;;  %v2218_v14 = vld [vmem:[#allocation2 + $0x151] sm:$0xff] }
 0x1e1   : > { %1803 = vst.msk [vmem:[#allocation3 + $0xe0] sm:$0xff] %vm1774_vm6, %v1735_v30 }
 0x1e4   : > { %2467 = vrot.lane.b32.xlu0 %v2395_v33, %s3370_s13 }
 0x1e5   : > { %2455 = vrot.lane.b32.xlu2 %v2389_v35, %s3370_s13 }
 0x1e6   : > { %2071 = vrot.lane.b32.xlu1 %v2004_v36, %s3369_s12  ;;  %v1739_v48 = vpop.permute.xlu0 %1738  ;;  %v2411_v36 = vld [vmem:[#allocation2 + $0x152] sm:$0xff] }
 0x1e7   : > { %1805 = vst.msk [vmem:[#allocation3 + $0xf0] sm:$0xff] %vm1774_vm6, %v1739_v48  ;;  %v1884_v46 = vpop.permute.xlu2 %1883  ;;  %v2405_v48 = vld [vmem:[#allocation2 + $0x10a] sm:$0xff] }
 0x1e8   : > { %v1741_v40 = vpop.permute.xlu1 %1740  ;;  %1974 = vst.msk [vmem:[#allocation3 + $0x30] sm:$0xff] %vm1967_vm7, %v1884_v46  ;;  %v2007_v46 = vld [vmem:[#allocation2 + $0x78] sm:$0xff] }
 0x1e9   : > { %1806 = vst.msk [vmem:[#allocation3 + $0xf8] sm:$0xff] %vm1774_vm6, %v1741_v40 }
 0x1ec   : > { %2264 = vrot.lane.b32.xlu0 %v4136_v62, %s3371_s14 }
 0x1ed   : > { %2083 = vrot.lane.b32.xlu2 %v2010_v42, %s3369_s12 }
 0x1ee   : > { %2276 = vrot.lane.b32.xlu1 %v4164_v7, %s3371_s14  ;;  %v1874_v43 = vpop.permute.xlu0 %1873 }
 0x1ef   : > { %1969 = vst.msk [vmem:[#allocation3 + $0x8] sm:$0xff] %vm1967_vm7, %v1874_v43  ;;  %v1890_v47 = vpop.permute.xlu2 %1889  ;;  %v2013_v43 = vld [vmem:[#allocation2 + $0xc0] sm:$0xff] }
 0x1f0   : > { %v1876_v49 = vpop.permute.xlu1 %1875  ;;  %1977 = vst.msk [vmem:[#allocation3 + $0x48] sm:$0xff] %vm1967_vm7, %v1890_v47 }
 0x1f1   : > { %1970 = vst.msk [vmem:[#allocation3 + $0x10] sm:$0xff] %vm1967_vm7, %v1876_v49 }
 0x1f4   : > { %2457 = vrot.lane.b32.xlu0 %v2390_v51, %s3370_s13 }
 0x1f5   : > { %2097 = vrot.lane.b32.xlu2 %v2017_v56, %s3369_s12  ;;  %v2026_v56 = vld [vmem:[#allocation2 + $0x158] sm:$0xff] }
 0x1f6   : > { %2469 = vrot.lane.b32.xlu1 %v2396_v58, %s3370_s13  ;;  %v1880_v62 = vpop.permute.xlu0 %1879  ;;  %v2020_v58 = vld [vmem:[#allocation2 + $0x110] sm:$0xff] }
 0x1f7   : > { %1972 = vst.msk [vmem:[#allocation3 + $0x20] sm:$0xff] %vm1967_vm7, %v1880_v62  ;;  %v1896_v7 = vpop.permute.xlu2 %1895  ;;  %v2393_v62 = vld [vmem:[#allocation2 + $0x7a] sm:$0xff] }
 0x1f8   : > { %v1882_v38 = vpop.permute.xlu1 %1881  ;;  %1980 = vst.msk [vmem:[#allocation3 + $0x60] sm:$0xff] %vm1967_vm7, %v1896_v7 }
 0x1f9   : > { %1973 = vst.msk [vmem:[#allocation3 + $0x28] sm:$0xff] %vm1967_vm7, %v1882_v38 }
 0x1fc   : > { %2483 = vrot.lane.b32.xlu0 %v2403_v4, %s3370_s13  ;;  %v2213_v4 = vld [vmem:[#allocation2 + $0x111] sm:$0xff] }
 0x1fd   : > { %2290 = vrot.lane.b32.xlu2 %v2210_v0, %s3371_s14  ;;  %v2399_v0 = vld [vmem:[#allocation2 + $0xc2] sm:$0xff] }
 0x1fe   : > { %2073 = vrot.lane.b32.xlu1 %v2005_v52, %s3369_s12  ;;  %v1886_v1 = vpop.permute.xlu0 %1885  ;;  %v2219_v52 = vld [vmem:[#allocation2 + $0x159] sm:$0xff] }
 0x1ff   : > { %1975 = vst.msk [vmem:[#allocation3 + $0x38] sm:$0xff] %vm1967_vm7, %v1886_v1  ;;  %v1902_v29 = vpop.permute.xlu2 %1901 }
 0x200   : > { %v1888_v6 = vpop.permute.xlu1 %1887  ;;  %1983 = vst.msk [vmem:[#allocation3 + $0x78] sm:$0xff] %vm1967_vm7, %v1902_v29 }
 0x201   : > { %1976 = vst.msk [vmem:[#allocation3 + $0x40] sm:$0xff] %vm1967_vm7, %v1888_v6 }
 0x204   : > { %2266 = vrot.lane.b32.xlu0 %v4134_v57, %s3371_s14 }
 0x205   : > { %2085 = vrot.lane.b32.xlu2 %v2011_v60, %s3369_s12 }
 0x206   : > { %2278 = vrot.lane.b32.xlu1 %v2204_v45, %s3371_s14  ;;  %v1892_v59 = vpop.permute.xlu0 %1891  ;;  %v2412_v45 = vld [vmem:[#allocation2 + $0x15a] sm:$0xff] }
 0x207   : > { %1978 = vst.msk [vmem:[#allocation3 + $0x50] sm:$0xff] %vm1967_vm7, %v1892_v59  ;;  %v1908_v55 = vpop.permute.xlu2 %1907  ;;  %v2406_v59 = vld [vmem:[#allocation2 + $0x112] sm:$0xff] }
 0x208   : > { %v1894_v26 = vpop.permute.xlu1 %1893  ;;  %1986 = vst.msk [vmem:[#allocation3 + $0x90] sm:$0xff] %vm1967_vm7, %v1908_v55  ;;  %v2008_v55 = vld [vmem:[#allocation2 + $0x80] sm:$0xff] }
 0x209   : > { %1979 = vst.msk [vmem:[#allocation3 + $0x58] sm:$0xff] %vm1967_vm7, %v1894_v26 }
 0x20c   : > { %2459 = vrot.lane.b32.xlu0 %v2391_v31, %s3370_s13 }
 0x20d   : > { %2099 = vrot.lane.b32.xlu2 %v2018_v5, %s3369_s12 }
 0x20e   : > { %2471 = vrot.lane.b32.xlu1 %v2397_v8, %s3370_s13  ;;  %v1898_v57 = vpop.permute.xlu0 %1897 }
 0x20f   : > { %1981 = vst.msk [vmem:[#allocation3 + $0x68] sm:$0xff] %vm1967_vm7, %v1898_v57  ;;  %v1914_v11 = vpop.permute.xlu2 %1913  ;;  %v2014_v57 = vld [vmem:[#allocation2 + $0xc8] sm:$0xff] }
 0x210   : > { %v1900_v3 = vpop.permute.xlu1 %1899  ;;  %1989 = vst.msk [vmem:[#allocation3 + $0xa8] sm:$0xff] %vm1967_vm7, %v1914_v11  ;;  %v2207_v11 = vld [vmem:[#allocation2 + $0xc9] sm:$0xff] }
 0x211   : > { %1982 = vst.msk [vmem:[#allocation3 + $0x70] sm:$0xff] %vm1967_vm7, %v1900_v3 }
 0x214   : > { %2485 = vrot.lane.b32.xlu0 %v2404_v10, %s3370_s13 }
 0x215   : > { %2292 = vrot.lane.b32.xlu2 %v4192_v53, %s3371_s14  ;;  %v2619_v53 = vld [vmem:[%s4918_s5 + $0x38] sm:$0xff] }
 0x216   : > { %2075 = vrot.lane.b32.xlu1 %v2006_v13, %s3369_s12  ;;  %v1904_v28 = vpop.permute.xlu0 %1903  ;;  %2730 = vmatpush.msra.mxu0 %v2619_v53 }
 0x217   : > { %1984 = vst.msk [vmem:[#allocation3 + $0x80] sm:$0xff] %vm1967_vm7, %v1904_v28  ;;  %v1920_v16 = vpop.permute.xlu2 %1919  ;;  %3277 = vmatpush.msra.mxu1 %v2619_v53  ;;  %3278 = vmatpush.msra.mxu2 %v2619_v53 }
 0x218   : > { %v1906_v15 = vpop.permute.xlu1 %1905  ;;  %1992 = vst.msk [vmem:[#allocation3 + $0xc0] sm:$0xff] %vm1967_vm7, %v1920_v16  ;;  %3279 = vmatpush.msra.mxu3 %v2619_v53  ;;  %2731 = vmatpush.msra.mxu0 %v2618_v34  ;;  %v2021_v16 = vld [vmem:[#allocation2 + $0x120] sm:$0xff] }
 0x219   : > { %1985 = vst.msk [vmem:[#allocation3 + $0x88] sm:$0xff] %vm1967_vm7, %v1906_v15  ;;  %3280 = vmatpush.msra.mxu1 %v2618_v34  ;;  %3281 = vmatpush.msra.mxu2 %v2618_v34  ;;  %v2394_v15 = vld [vmem:[#allocation2 + $0x82] sm:$0xff] }
 0x21a   : > { %2732 = vmatpush.msra.mxu0 %v2617_v17  ;;  %3282 = vmatpush.msra.mxu3 %v2618_v34 }
 0x21b   : > { %3283 = vmatpush.msra.mxu1 %v2617_v17  ;;  %3284 = vmatpush.msra.mxu2 %v2617_v17 }
 0x21c   : > { %2268 = vrot.lane.b32.xlu0 %v4138_v2, %s3371_s14  ;;  %2733 = vmatpush.msra.mxu0 %v2616_v19  ;;  %v2025_v2 = vld [vmem:[#allocation2 + $0x150] sm:$0xff] }
 0x21d   : > { %2087 = vrot.lane.b32.xlu2 %v2012_v12, %s3369_s12  ;;  %3286 = vmatpush.msra.mxu1 %v2616_v19  ;;  %v2214_v12 = vld [vmem:[#allocation2 + $0x121] sm:$0xff] }
 0x21e   : > { %2280 = vrot.lane.b32.xlu1 %v4166_v50, %s3371_s14  ;;  %v1910_v18 = vpop.permute.xlu0 %1909  ;;  %v2615_v50 = vld [vmem:[%s4918_s5 + $0x18] sm:$0xff]  ;;  %3285 = vmatpush.msra.mxu3 %v2617_v17  ;;  %v2400_v17 = vld [vmem:[#allocation2 + $0xca] sm:$0xff] }
 0x21f   : > { %1987 = vst.msk [vmem:[#allocation3 + $0x98] sm:$0xff] %vm1967_vm7, %v1910_v18  ;;  %v1926_v37 = vpop.permute.xlu2 %1925  ;;  %2734 = vmatpush.msra.mxu0 %v2615_v50  ;;  %3289 = vmatpush.msra.mxu1 %v2615_v50  ;;  %v2220_v18 = vld [vmem:[#allocation2 + $0x169] sm:$0xff] }
 0x220   : > { %v1912_v25 = vpop.permute.xlu1 %1911  ;;  %1995 = vst.msk [vmem:[#allocation3 + $0xd8] sm:$0xff] %vm1967_vm7, %v1926_v37  ;;  %3287 = vmatpush.msra.mxu2 %v2616_v19  ;;  %3288 = vmatpush.msra.mxu3 %v2616_v19 }
 0x221   : > { %1988 = vst.msk [vmem:[#allocation3 + $0xa0] sm:$0xff] %vm1967_vm7, %v1912_v25  ;;  %2735 = vmatpush.msra.mxu0 %v2614_v39  ;;  %3292 = vmatpush.msra.mxu1 %v2614_v39 }
 0x222   : > { %3290 = vmatpush.msra.mxu2 %v2615_v50  ;;  %3291 = vmatpush.msra.mxu3 %v2615_v50 }
 0x223   : > { %2736 = vmatpush.msra.mxu0 %v2613_v22  ;;  %3295 = vmatpush.msra.mxu1 %v2613_v22 }
 0x224   : > { %2113 = vrot.lane.b32.xlu0 %v2025_v2, %s3369_s12  ;;  %3293 = vmatpush.msra.mxu2 %v2614_v39 }
 0x225   : > { %2101 = vrot.lane.b32.xlu2 %v2019_v63, %s3369_s12  ;;  %2737 = vmatpush.msra.mxu0 %v2612_v23  ;;  %v2413_v63 = vld [vmem:[#allocation2 + $0x16a] sm:$0xff] }
 0x226   : > { %2461 = vrot.lane.b32.xlu1 %v2392_v20, %s3370_s13  ;;  %v1916_v21 = vpop.permute.xlu0 %1915  ;;  %3298 = vmatpush.msra.mxu1 %v2612_v23  ;;  %v2015_v20 = vld [vmem:[#allocation2 + $0xd8] sm:$0xff] }
 0x227   : > { %1990 = vst.msk [vmem:[#allocation3 + $0xb0] sm:$0xff] %vm1967_vm7, %v1916_v21  ;;  %v2259_v24 = vpop.permute.xlu2 %2258  ;;  %3296 = vmatpush.msra.mxu2 %v2613_v22  ;;  %3294 = vmatpush.msra.mxu3 %v2614_v39  ;;  %v2407_v39 = vld [vmem:[#allocation2 + $0x122] sm:$0xff] }
 0x228   : > { %v1918_v9 = vpop.permute.xlu1 %1917 }
 0x229   : > { %1991 = vst.msk [vmem:[#allocation3 + $0xb8] sm:$0xff] %vm1967_vm7, %v1918_v9  ;;  %3299 = vmatpush.msra.mxu2 %v2612_v23  ;;  %3297 = vmatpush.msra.mxu3 %v2613_v22  ;;  %v2022_v9 = vld [vmem:[#allocation2 + $0x128] sm:$0xff] }
 0x22b   : > { %3300 = vmatpush.msra.mxu3 %v2612_v23 }
 0x22c   : > { %2294 = vrot.lane.b32.xlu0 %v4202_v54, %s3371_s14 }
 0x22d   : > { %2473 = vrot.lane.b32.xlu2 %v2398_v27, %s3370_s13  ;;  %v2208_v27 = vld [vmem:[#allocation2 + $0xd9] sm:$0xff] }
 0x22e   : > { %2306 = vrot.lane.b32.xlu1 %v2218_v14, %s3371_s14  ;;  %v1922_v30 = vpop.permute.xlu0 %1921  ;;  %v2028_v14 = vld [vmem:[#allocation2 + $0x170] sm:$0xff] }
 0x22f   : > { %1993 = vst.msk [vmem:[#allocation3 + $0xc8] sm:$0xff] %vm1967_vm7, %v1922_v30  ;;  %v2261_v33 = vpop.permute.xlu2 %2260 }
 0x230   : > { %v1924_v35 = vpop.permute.xlu1 %1923 }
 0x231   : > { %1994 = vst.msk [vmem:[#allocation3 + $0xd0] sm:$0xff] %vm1967_vm7, %v1924_v35 }
 0x234   : > { %2499 = vrot.lane.b32.xlu0 %v2411_v36, %s3370_s13  ;;  %v2215_v36 = vld [vmem:[#allocation2 + $0x129] sm:$0xff] }
 0x235   : > { %2487 = vrot.lane.b32.xlu2 %v2405_v48, %s3370_s13  ;;  %v2401_v48 = vld [vmem:[#allocation2 + $0xda] sm:$0xff] }
 0x236   : > { %2077 = vrot.lane.b32.xlu1 %v2007_v46, %s3369_s12  ;;  %v1928_v54 = vpop.permute.xlu0 %1927  ;;  %v2221_v46 = vld [vmem:[#allocation2 + $0x171] sm:$0xff] }
 0x237   : > { %1996 = vst.msk [vmem:[#allocation3 + $0xe0] sm:$0xff] %vm1967_vm7, %v1928_v54  ;;  %v2082_v40 = vpop.permute.xlu2 %2081 }
 0x238   : > { %v2066_v42 = vpop.permute.xlu1 %2065  ;;  %2170 = vst.msk [vmem:[#allocation3 + $0x40] sm:$0xff] %vm2161_vm8, %v2082_v40 }
 0x239   : > { %2162 = vst.msk [vmem:[#allocation3] sm:$0xff] %vm2161_vm8, %v2066_v42 }
 0x23a   : > { %2355 = vst.msk [vmem:[#allocation3] sm:$0xff] %vm2354_vm9, %v2259_v24 }
 0x23c   : > { %2270 = vrot.lane.b32.xlu0 %v4151_v44, %s3371_s14 }
 0x23d   : > { %2089 = vrot.lane.b32.xlu2 %v2013_v43, %s3369_s12 }
 0x23e   : > { %2282 = vrot.lane.b32.xlu1 %v4177_v61, %s3371_s14  ;;  %v2452_v47 = vpop.permute.xlu0 %2451 }
 0x23f   : > { %2548 = vst.msk [vmem:[#allocation3] sm:$0xff] %vm2547_vm10, %v2452_v47  ;;  %v2456_v49 = vpop.permute.xlu2 %2455 }
 0x240   : > { %v2068_v51 = vpop.permute.xlu1 %2067 }
 0x241   : > { %2163 = vst.msk [vmem:[#allocation3 + $0x8] sm:$0xff] %vm2161_vm8, %v2068_v51  ;;  %v2408_v51 = vld [vmem:[#allocation2 + $0x12a] sm:$0xff] }
 0x242   : > { %2356 = vst.msk [vmem:[#allocation3 + $0x8] sm:$0xff] %vm2354_vm9, %v2261_v33 }
 0x244   : > { %2115 = vrot.lane.b32.xlu0 %v2026_v56, %s3369_s12  ;;  %v2016_v56 = vld [vmem:[#allocation2 + $0xe0] sm:$0xff] }
 0x245   : > { %2103 = vrot.lane.b32.xlu2 %v2020_v58, %s3369_s12  ;;  %v3232_v58 = vld [vmem:[%s478_s23 + $0x60] sm:$0xff] }
 0x246   : > { %2463 = vrot.lane.b32.xlu1 %v2393_v62, %s3370_s13  ;;  %v2454_v44 = vpop.permute.xlu0 %2453  ;;  %v2580_v61 = vld [vmem:[#allocation3] sm:$0xff]  ;;  %v3338_v62 = vld [vmem:[%s4916_s3] ss:$0 sm:$0xff] }
 0x247   : > { %2549 = vst.msk [vmem:[#allocation3 + $0x8] sm:$0xff] %vm2547_vm10, %v2454_v44  ;;  %3234 = vmatmul.msk.f32.vlgmr.msra.gmra.mxu0 %vm2625_vm11, %v2580_v61  ;;  %v2084_v7 = vpop.permute.xlu2 %2083  ;;  %v947_v44 = vmul.f32 %v3338_v62, %v3232_v58 }
 0x248   : > { %v2070_v38 = vpop.permute.xlu1 %2069  ;;  %2171 = vst.msk [vmem:[#allocation3 + $0x48] sm:$0xff] %vm2161_vm8, %v2084_v7 }
 0x249   : > { %2164 = vst.msk [vmem:[#allocation3 + $0x10] sm:$0xff] %vm2161_vm8, %v2070_v38 }
 0x24c   : > { %2296 = vrot.lane.b32.xlu0 %v2213_v4, %s3371_s14  ;;  %v3339_v4 = vld [vmem:[%s4917_s4] ss:$0 sm:$0xff] }
 0x24d   : > { %2475 = vrot.lane.b32.xlu2 %v2399_v0, %s3370_s13  ;;  %v949_v0 = vadd.f32 %v3339_v4, %v947_v44 }
 0x24e   : > { %2308 = vrot.lane.b32.xlu1 %v2219_v52, %s3371_s14  ;;  %v2263_v1 = vpop.permute.xlu0 %2262  ;;  %v2581_v29 = vld [vmem:[#allocation3 + $0x8] sm:$0xff] }
 0x24f   : > { %2357 = vst.msk [vmem:[#allocation3 + $0x10] sm:$0xff] %vm2354_vm9, %v2263_v1  ;;  %3235 = vmatmul.msk.f32.gmra.mxu0 %vm2625_vm11, %v2581_v29  ;;  %v2098_v6 = vpop.permute.xlu2 %2097  ;;  %v2023_v1 = vld [vmem:[#allocation2 + $0x138] sm:$0xff]  ;;  %v951_v29 = vmax.f32 %v949_v0, 0.0 }
 0x250   : > { %2550 = vst.msk [vmem:[#allocation3 + $0x10] sm:$0xff] %vm2547_vm10, %v2456_v49  ;;  %v2275_v60 = vpop.permute.xlu1 %2274  ;;  %v4520_v49 = vld [vmem:[#allocation2 + $0x172] sm:$0xff] }
 0x251   : > { %2363 = vst.msk [vmem:[#allocation3 + $0x40] sm:$0xff] %vm2354_vm9, %v2275_v60  ;;  %v2209_v60 = vld [vmem:[#allocation2 + $0xe1] sm:$0xff] }
 0x252   : > { %2178 = vst.msk [vmem:[#allocation3 + $0x80] sm:$0xff] %vm2161_vm8, %v2098_v6  ;;  %v3233_v6 = vld [vmem:[%s478_s23 + $0x68] sm:$0xff] }
 0x254   : > { %2501 = vrot.lane.b32.xlu0 %v2412_v45, %s3370_s13  ;;  %v948_v45 = vmul.f32 %v3338_v62, %v3233_v6 }
 0x255   : > { %2489 = vrot.lane.b32.xlu2 %v2406_v59, %s3370_s13  ;;  %v2029_v59 = vld [vmem:[#allocation2 + $0x180] sm:$0xff] }
 0x256   : > { %2079 = vrot.lane.b32.xlu1 %v2008_v55, %s3369_s12  ;;  %v2468_v26 = vpop.permute.xlu0 %2467  ;;  %v954_v55 = vrot.slane %v951_v29, 1 }
 0x257   : > { %2556 = vst.msk [vmem:[#allocation3 + $0x40] sm:$0xff] %vm2547_vm10, %v2468_v26  ;;  %v2582_v31 = vld [vmem:[#allocation3 + $0x10] sm:$0xff]  ;;  %v2291_v5 = vpop.permute.xlu2 %2290  ;;  %v957_v26 = vrot.slane %v951_v29, 7 }
 0x258   : > { %v2072_v8 = vpop.permute.xlu1 %2071  ;;  %3236 = vmatmul.msk.f32.gmra.mxu0 %vm2625_vm11, %v2582_v31  ;;  %2371 = vst.msk [vmem:[#allocation3 + $0x80] sm:$0xff] %vm2354_vm9, %v2291_v5  ;;  %v950_v31 = vadd.f32 %v3339_v4, %v948_v45 }
 0x259   : > { %2165 = vst.msk [vmem:[#allocation3 + $0x18] sm:$0xff] %vm2161_vm8, %v2072_v8  ;;  %v965_v5 = vsel %vm701_vm0, %v954_v55, %v957_v26 }
 0x25a   : > { %968 = vst.msk [vmem:[#allocation2 + $0x198] sm:$0xff] %vm863_vm1, %v965_v5 }
 0x25c   : > { %2272 = vrot.lane.b32.xlu0 %v4149_v41, %s3371_s14 }
 0x25d   : > { %2091 = vrot.lane.b32.xlu2 %v2014_v57, %s3369_s12  ;;  %v952_v57 = vmax.f32 %v950_v31, 0.0 }
 0x25e   : > { %2284 = vrot.lane.b32.xlu1 %v2207_v11, %s3371_s14  ;;  %v2265_v3 = vpop.permute.xlu0 %2264  ;;  %v2588_v10 = vld [vmem:[#allocation3 + $0x40] sm:$0xff] }
 0x25f   : > { %2358 = vst.msk [vmem:[#allocation3 + $0x18] sm:$0xff] %vm2354_vm9, %v2265_v3  ;;  %3242 = vmatmul.msk.f32.vlgmr.msra.gmra.mxu1 %vm2625_vm11, %v2588_v10  ;;  %v2086_v13 = vpop.permute.xlu2 %2085  ;;  %v958_v10 = vrot.slane %v952_v57, 7 }
 0x260   : > { %v2277_v28 = vpop.permute.xlu1 %2276  ;;  %2172 = vst.msk [vmem:[#allocation3 + $0x50] sm:$0xff] %vm2161_vm8, %v2086_v13  ;;  %v2216_v13 = vld [vmem:[#allocation2 + $0x139] sm:$0xff] }
 0x261   : > { %2364 = vst.msk [vmem:[#allocation3 + $0x48] sm:$0xff] %vm2354_vm9, %v2277_v28 }
 0x264   : > { %2117 = vrot.lane.b32.xlu0 %v2027_v32, %s3369_s12  ;;  %v2402_v32 = vld [vmem:[#allocation2 + $0xe2] sm:$0xff] }
 0x265   : > { %2105 = vrot.lane.b32.xlu2 %v2021_v16, %s3369_s12  ;;  %v959_v16 = vsel %vm701_vm0, %v957_v26, %v958_v10 }
 0x266   : > { %2465 = vrot.lane.b32.xlu1 %v2394_v15, %s3370_s13  ;;  %v2458_v41 = vpop.permute.xlu0 %2457  ;;  %v2222_v15 = vld [vmem:[#allocation2 + $0x181] sm:$0xff]  ;;  %969 = vst.msk [vmem:[#allocation2 + $0x1a0] sm:$0xff] %vm863_vm1, %v959_v16 }
 0x267   : > { %2551 = vst.msk [vmem:[#allocation3 + $0x18] sm:$0xff] %vm2547_vm10, %v2458_v41  ;;  %v2100_v53 = vpop.permute.xlu2 %2099 }
 0x268   : > { %v2470_v34 = vpop.permute.xlu1 %2469  ;;  %2179 = vst.msk [vmem:[#allocation3 + $0x88] sm:$0xff] %vm2161_vm8, %v2100_v53 }
 0x269   : > { %2557 = vst.msk [vmem:[#allocation3 + $0x48] sm:$0xff] %vm2547_vm10, %v2470_v34 }
 0x26c   : > { %2298 = vrot.lane.b32.xlu0 %v2214_v12, %s3371_s14 }
 0x26d   : > { %2477 = vrot.lane.b32.xlu2 %v2400_v17, %s3370_s13  ;;  %v2415_v17 = vld [vmem:[#allocation2 + $0x182] sm:$0xff] }
 0x26e   : > { %2310 = vrot.lane.b32.xlu1 %v2220_v18, %s3371_s14  ;;  %v2484_v19 = vpop.permute.xlu0 %2483  ;;  %v2583_v37 = vld [vmem:[#allocation3 + $0x18] sm:$0xff]  ;;  %v2409_v18 = vld [vmem:[#allocation2 + $0x13a] sm:$0xff] }
 0x26f   : > { %2564 = vst.msk [vmem:[#allocation3 + $0x80] sm:$0xff] %vm2547_vm10, %v2484_v19  ;;  %3237 = vmatmul.msk.f32.gmra.mxu0 %vm2625_vm11, %v2583_v37  ;;  %v2293_v25 = vpop.permute.xlu2 %2292  ;;  %v963_v19 = vrot.slane %v952_v57, 5 }
 0x270   : > { %v2074_v2 = vpop.permute.xlu1 %2073  ;;  %v2589_v50 = vld [vmem:[#allocation3 + $0x48] sm:$0xff]  ;;  %2372 = vst.msk [vmem:[#allocation3 + $0x88] sm:$0xff] %vm2354_vm9, %v2293_v25 }
 0x271   : > { %2166 = vst.msk [vmem:[#allocation3 + $0x20] sm:$0xff] %vm2161_vm8, %v2074_v2  ;;  %3243 = vmatmul.msk.f32.gmra.mxu1 %vm2625_vm11, %v2589_v50  ;;  %v966_v37 = vsel %vm701_vm0, %v958_v10, %v963_v19 }
 0x272   : > { %970 = vst.msk [vmem:[#allocation2 + $0x1a8] sm:$0x3] %vm866_vm2, %v966_v37 }
 0x274   : > { %2503 = vrot.lane.b32.xlu0 %v2413_v63, %s3370_s13 }
 0x275   : > { %2491 = vrot.lane.b32.xlu2 %v2407_v39, %s3370_s13  ;;  %v2030_v39 = vld [vmem:[#allocation2 + $0x188] sm:$0xff] }
 0x276   : > { %2093 = vrot.lane.b32.xlu1 %v2015_v20, %s3369_s12  ;;  %v2267_v22 = vpop.permute.xlu0 %2266  ;;  %v2596_v21 = vld [vmem:[#allocation3 + $0x80] sm:$0xff]  ;;  %v2024_v20 = vld [vmem:[#allocation2 + $0x140] sm:$0xff] }
 0x277   : > { %2359 = vst.msk [vmem:[#allocation3 + $0x20] sm:$0xff] %vm2354_vm9, %v2267_v22  ;;  %3250 = vmatmul.msk.f32.vlgmr.msra.gmra.mxu2 %vm2625_vm11, %v2596_v21  ;;  %v2088_v23 = vpop.permute.xlu2 %2087  ;;  %v2217_v22 = vld [vmem:[#allocation2 + $0x141] sm:$0xff] }
 0x278   : > { %v2279_v24 = vpop.permute.xlu1 %2278  ;;  %2173 = vst.msk [vmem:[#allocation3 + $0x58] sm:$0xff] %vm2161_vm8, %v2088_v23 }
 0x279   : > { %2365 = vst.msk [vmem:[#allocation3 + $0x50] sm:$0xff] %vm2354_vm9, %v2279_v24  ;;  %v2418_v4 = vld [vmem:[#allocation2 + $0x1a2] sm:$0xff] }
 0x27a   : > { %v2225_v0 = vld [vmem:[#allocation2 + $0x1a1] sm:$0xff] }
 0x27c   : > { %2107 = vrot.lane.b32.xlu0 %v2022_v9, %s3369_s12 }
 0x27d   : > { %2286 = vrot.lane.b32.xlu2 %v2208_v27, %s3371_s14  ;;  %v2410_v27 = vld [vmem:[#allocation2 + $0x142] sm:$0xff] }
 0x27e   : > { %2119 = vrot.lane.b32.xlu1 %v2028_v14, %s3369_s12  ;;  %v2460_v30 = vpop.permute.xlu0 %2459  ;;  %v2223_v14 = vld [vmem:[#allocation2 + $0x189] sm:$0xff] }
 0x27f   : > { %2552 = vst.msk [vmem:[#allocation3 + $0x20] sm:$0xff] %vm2547_vm10, %v2460_v30  ;;  %v2102_v33 = vpop.permute.xlu2 %2101  ;;  %v2416_v30 = vld [vmem:[#allocation2 + $0x18a] sm:$0xff] }
 0x280   : > { %v2472_v35 = vpop.permute.xlu1 %2471  ;;  %2180 = vst.msk [vmem:[#allocation3 + $0x90] sm:$0xff] %vm2161_vm8, %v2102_v33 }
 0x281   : > { %2558 = vst.msk [vmem:[#allocation3 + $0x50] sm:$0xff] %vm2547_vm10, %v2472_v35 }
 0x284   : > { %2300 = vrot.lane.b32.xlu0 %v2215_v36, %s3371_s14 }
 0x285   : > { %2479 = vrot.lane.b32.xlu2 %v2401_v48, %s3370_s13  ;;  %v2031_v48 = vld [vmem:[#allocation2 + $0x198] sm:$0xff] }
 0x286   : > { %2312 = vrot.lane.b32.xlu1 %v2221_v46, %s3371_s14  ;;  %v2486_v54 = vpop.permute.xlu0 %2485  ;;  %v2584_v40 = vld [vmem:[#allocation3 + $0x20] sm:$0xff] }
 0x287   : > { %2565 = vst.msk [vmem:[#allocation3 + $0x88] sm:$0xff] %vm2547_vm10, %v2486_v54  ;;  %3238 = vmatmul.msk.f32.gmra.mxu0 %vm2625_vm11, %v2584_v40  ;;  %v2474_v42 = vpop.permute.xlu2 %2473  ;;  %v2224_v54 = vld [vmem:[#allocation2 + $0x199] sm:$0xff] }
 0x288   : > { %v2076_v43 = vpop.permute.xlu1 %2075  ;;  %v2590_v47 = vld [vmem:[#allocation3 + $0x50] sm:$0xff] }
 0x289   : > { %2167 = vst.msk [vmem:[#allocation3 + $0x28] sm:$0xff] %vm2161_vm8, %v2076_v43  ;;  %3244 = vmatmul.msk.f32.gmra.mxu1 %vm2625_vm11, %v2590_v47 }
 0x28c   : > { %2505 = vrot.lane.b32.xlu0 %v4520_v49, %s3370_s13 }
 0x28d   : > { %2493 = vrot.lane.b32.xlu2 %v2408_v51, %s3370_s13  ;;  %v2417_v51 = vld [vmem:[#allocation2 + $0x19a] sm:$0xff] }
 0x28e   : > { %2095 = vrot.lane.b32.xlu1 %v2016_v56, %s3369_s12  ;;  %v2269_v61 = vpop.permute.xlu0 %2268  ;;  %v2597_v7 = vld [vmem:[#allocation3 + $0x88] sm:$0xff]  ;;  %v2032_v56 = vld [vmem:[#allocation2 + $0x1a0] sm:$0xff] }
 0x28f   : > { %2360 = vst.msk [vmem:[#allocation3 + $0x28] sm:$0xff] %vm2354_vm9, %v2269_v61  ;;  %3251 = vmatmul.msk.f32.gmra.mxu2 %vm2625_vm11, %v2597_v7  ;;  %v2488_v38 = vpop.permute.xlu2 %2487 }
 0x290   : > { %v2281_v52 = vpop.permute.xlu1 %2280 }
 0x291   : > { %2366 = vst.msk [vmem:[#allocation3 + $0x58] sm:$0xff] %vm2354_vm9, %v2281_v52 }
 0x292   : > { %2559 = vst.msk [vmem:[#allocation3 + $0x58] sm:$0xff] %vm2547_vm10, %v2474_v42 }
 0x294   : > { %2109 = vrot.lane.b32.xlu0 %v2023_v1, %s3369_s12 }
 0x295   : > { %2288 = vrot.lane.b32.xlu2 %v2209_v60, %s3371_s14 }
 0x296   : > { %v2114_v8 = vpop.permute.xlu0 %2113  ;;  %2121 = vrot.lane.b32.xlu1 %v2029_v59, %s3369_s12 }
 0x297   : > { %2186 = vst.msk [vmem:[#allocation3 + $0xc0] sm:$0xff] %vm2161_vm8, %v2114_v8  ;;  %v2090_v11 = vpop.permute.xlu2 %2089 }
 0x298   : > { %v2462_v3 = vpop.permute.xlu1 %2461  ;;  %2174 = vst.msk [vmem:[#allocation3 + $0x60] sm:$0xff] %vm2161_vm8, %v2090_v11 }
 0x299   : > { %2553 = vst.msk [vmem:[#allocation3 + $0x28] sm:$0xff] %vm2547_vm10, %v2462_v3  ;;  %v2591_v28 = vld [vmem:[#allocation3 + $0x58] sm:$0xff] }
 0x29a   : > { %3245 = vmatmul.msk.f32.gmra.mxu1 %vm2625_vm11, %v2591_v28 }
 0x29c   : > { %2302 = vrot.lane.b32.xlu0 %v2216_v13, %s3371_s14 }
 0x29d   : > { %2481 = vrot.lane.b32.xlu2 %v2402_v32, %s3370_s13 }
 0x29e   : > { %v2295_v41 = vpop.permute.xlu0 %2294  ;;  %2314 = vrot.lane.b32.xlu1 %v2222_v15, %s3371_s14 }
 0x29f   : > { %2373 = vst.msk [vmem:[#allocation3 + $0x90] sm:$0xff] %vm2354_vm9, %v2295_v41  ;;  %v2104_v53 = vpop.permute.xlu2 %2103 }
 0x2a0   : > { %2566 = vst.msk [vmem:[#allocation3 + $0x90] sm:$0xff] %vm2547_vm10, %v2488_v38  ;;  %v2307_v34 = vpop.permute.xlu1 %2306  ;;  %v2585_v12 = vld [vmem:[#allocation3 + $0x28] sm:$0xff] }
 0x2a1   : > { %2379 = vst.msk [vmem:[#allocation3 + $0xc0] sm:$0xff] %vm2354_vm9, %v2307_v34  ;;  %3239 = vmatmul.msk.f32.gmra.mxu0 %vm2625_vm11, %v2585_v12 }
 0x2a2   : > { %2181 = vst.msk [vmem:[#allocation3 + $0x98] sm:$0xff] %vm2161_vm8, %v2104_v53 }
 0x2a4   : > { %2507 = vrot.lane.b32.xlu0 %v2415_v17, %s3370_s13 }
 0x2a5   : > { %2495 = vrot.lane.b32.xlu2 %v2409_v18, %s3370_s13 }
 0x2a6   : > { %v2500_v25 = vpop.permute.xlu0 %2499  ;;  %1929 = vrot.lane.b32.xlu1 %v4520_v49, %s3368_s10  ;;  %v4592_v49 = vld [vmem:[%s4919_s6] ss:$0 sm:$0xff] }
 0x2a7   : > { %2572 = vst.msk [vmem:[#allocation3 + $0xc0] sm:$0xff] %vm2547_vm10, %v2500_v25  ;;  %v2598_v2 = vld [vmem:[#allocation3 + $0x90] sm:$0xff]  ;;  %v2476_v50 = vpop.permute.xlu2 %2475 }
 0x2a8   : > { %v2078_v63 = vpop.permute.xlu1 %2077  ;;  %3252 = vmatmul.msk.f32.gmra.mxu2 %vm2625_vm11, %v2598_v2 }
 0x2a9   : > { %2168 = vst.msk [vmem:[#allocation3 + $0x30] sm:$0xff] %vm2161_vm8, %v2078_v63 }
 0x2ac   : > { %2123 = vrot.lane.b32.xlu0 %v2030_v39, %s3369_s12 }
 0x2ad   : > { %2111 = vrot.lane.b32.xlu2 %v2024_v20, %s3369_s12 }
 0x2ae   : > { %v2271_v21 = vpop.permute.xlu0 %2270  ;;  %v2604_v23 = vld [vmem:[#allocation3 + $0xc0] sm:$0xff]  ;;  %2304 = vrot.lane.b32.xlu1 %v2217_v22, %s3371_s14 }
 0x2af   : > { %2361 = vst.msk [vmem:[#allocation3 + $0x30] sm:$0xff] %vm2354_vm9, %v2271_v21  ;;  %3258 = vmatmul.msk.f32.vlgmr.msra.gmra.mxu3 %vm2625_vm11, %v2604_v23  ;;  %v2490_v24 = vpop.permute.xlu2 %2489 }
 0x2b0   : > { %v2283_v9 = vpop.permute.xlu1 %2282 }
 0x2b1   : > { %2367 = vst.msk [vmem:[#allocation3 + $0x60] sm:$0xff] %vm2354_vm9, %v2283_v9 }
 0x2b2   : > { %2560 = vst.msk [vmem:[#allocation3 + $0x60] sm:$0xff] %vm2547_vm10, %v2476_v50 }
 0x2b4   : > { %2497 = vrot.lane.b32.xlu0 %v2410_v27, %s3370_s13 }
 0x2b5   : > { %2316 = vrot.lane.b32.xlu2 %v2223_v14, %s3371_s14 }
 0x2b6   : > { %v2116_v33 = vpop.permute.xlu0 %2115  ;;  %2509 = vrot.lane.b32.xlu1 %v2416_v30, %s3370_s13 }
 0x2b7   : > { %2187 = vst.msk [vmem:[#allocation3 + $0xc8] sm:$0xff] %vm2161_vm8, %v2116_v33  ;;  %v2092_v35 = vpop.permute.xlu2 %2091 }
 0x2b8   : > { %v2464_v36 = vpop.permute.xlu1 %2463  ;;  %2175 = vst.msk [vmem:[#allocation3 + $0x68] sm:$0xff] %vm2161_vm8, %v2092_v35 }
 0x2b9   : > { %2554 = vst.msk [vmem:[#allocation3 + $0x30] sm:$0xff] %vm2547_vm10, %v2464_v36  ;;  %v2592_v46 = vld [vmem:[#allocation3 + $0x60] sm:$0xff] }
 0x2ba   : > { %3246 = vmatmul.msk.f32.gmra.mxu1 %vm2625_vm11, %v2592_v46 }
 0x2bc   : > { %2125 = vrot.lane.b32.xlu0 %v2031_v48, %s3369_s12 }
 0x2bd   : > { %1931 = vrot.lane.b32.xlu2 %v2415_v17, %s3368_s10 }
 0x2be   : > { %v2297_v40 = vpop.permute.xlu0 %2296  ;;  %2318 = vrot.lane.b32.xlu1 %v2224_v54, %s3371_s14 }
 0x2bf   : > { %2374 = vst.msk [vmem:[#allocation3 + $0x98] sm:$0xff] %vm2354_vm9, %v2297_v40  ;;  %v2106_v42 = vpop.permute.xlu2 %2105 }
 0x2c0   : > { %2567 = vst.msk [vmem:[#allocation3 + $0x98] sm:$0xff] %vm2547_vm10, %v2490_v24  ;;  %v2309_v43 = vpop.permute.xlu1 %2308  ;;  %v2586_v47 = vld [vmem:[#allocation3 + $0x30] sm:$0xff] }
 0x2c1   : > { %2380 = vst.msk [vmem:[#allocation3 + $0xc8] sm:$0xff] %vm2354_vm9, %v2309_v43  ;;  %3240 = vmatmul.msk.f32.gmra.mxu0 %vm2625_vm11, %v2586_v47 }
 0x2c2   : > { %2182 = vst.msk [vmem:[#allocation3 + $0xa0] sm:$0xff] %vm2161_vm8, %v2106_v42 }
 0x2c4   : > { %1933 = vrot.lane.b32.xlu0 %v2416_v30, %s3368_s10  ;;  %v2739_v58 = vpop.f32.mrf.mxu0 }
 0x2c5   : > { %v2740_v62 = vadd.f32 %v4592_v49, %v2739_v58  ;;  %2511 = vrot.lane.b32.xlu2 %v2417_v51, %s3370_s13 }
 0x2c6   : > { %v2502_v44 = vpop.permute.xlu0 %2501  ;;  %2127 = vrot.lane.b32.xlu1 %v2032_v56, %s3369_s12 }
 0x2c7   : > { %3007 = vst.msk [vmem:[%s4599_s19] sm:$0xff] %vm863_vm1, %v2740_v62  ;;  %v2599_v61 = vld [vmem:[#allocation3 + $0x98] sm:$0xff]  ;;  %v2478_v7 = vpop.permute.xlu2 %2477  ;;  %v2904_v1 = vmul.f32 %v2740_v62, %v2740_v62  ;;  %v2835_v60 = vsel %vm863_vm1, %v2740_v62, 0.0 }
 0x2c8   : > { %2573 = vst.msk [vmem:[#allocation3 + $0xc8] sm:$0xff] %vm2547_vm10, %v2502_v44  ;;  %v2080_v38 = vpop.permute.xlu1 %2079  ;;  %3253 = vmatmul.msk.f32.gmra.mxu2 %vm2625_vm11, %v2599_v61 }
 0x2c9   : > { %2169 = vst.msk [vmem:[#allocation3 + $0x38] sm:$0xff] %vm2161_vm8, %v2080_v38  ;;  %v2936_v8 = vsel %vm863_vm1, %v2904_v1, 0.0 }
 0x2cc   : > { %2513 = vrot.lane.b32.xlu0 %v2418_v4, %s3370_s13  ;;  %v2742_v52 = vpop.f32.mrf.mxu0  ;;  %s500_s13 = scalar_lea.vmem %s4921_s8, %s3229_s11 }
 0x2cd   : > { %v2743_v29 = vadd.f32 %v4592_v49, %v2742_v52  ;;  %2320 = vrot.lane.b32.xlu2 %v2225_v0, %s3371_s14 }
 0x2ce   : > { %v2273_v6 = vpop.permute.xlu0 %2272 }
 0x2cf   : > { %v2836_v45 = vsel %vm863_vm1, %v2743_v29, 0.0  ;;  %v2905_v59 = vmul.f32 %v2743_v29, %v2743_v29  ;;  %3008 = vst.msk [vmem:[%s4599_s19 + $0x8] sm:$0xff] %vm863_vm1, %v2743_v29  ;;  %v2605_v55 = vld [vmem:[#allocation3 + $0xc8] sm:$0xff]  ;;  %v2492_v26 = vpop.permute.xlu2 %2491 }
 0x2d0   : > { %v2837_v31 = vadd.f32 %v2836_v45, %v2835_v60  ;;  %2362 = vst.msk [vmem:[#allocation3 + $0x38] sm:$0xff] %vm2354_vm9, %v2273_v6  ;;  %v2285_v5 = vpop.permute.xlu1 %2284  ;;  %3259 = vmatmul.msk.f32.gmra.mxu3 %vm2625_vm11, %v2605_v55 }
 0x2d1   : > { %v2937_v57 = vsel %vm863_vm1, %v2905_v59, 0.0  ;;  %2368 = vst.msk [vmem:[#allocation3 + $0x68] sm:$0xff] %vm2354_vm9, %v2285_v5 }
 0x2d2   : > { %v2938_v11 = vadd.f32 %v2937_v57, %v2936_v8  ;;  %2561 = vst.msk [vmem:[#allocation3 + $0x68] sm:$0xff] %vm2547_vm10, %v2478_v7 }
 0x2d5   : > { %v2745_v3 = vpop.f32.mrf.mxu0 }
 0x2d6   : > { %v2746_v10 = vadd.f32 %v4592_v49, %v2745_v3  ;;  %v2118_v13 = vpop.permute.xlu0 %2117 }
 0x2d7   : > { %2188 = vst.msk [vmem:[#allocation3 + $0xd0] sm:$0xff] %vm2161_vm8, %v2118_v13  ;;  %v2287_v28 = vpop.permute.xlu2 %2286 }
 0x2d8   : > { %v2838_v32 = vsel %vm863_vm1, %v2746_v10, 0.0  ;;  %v2906_v16 = vmul.f32 %v2746_v10, %v2746_v10  ;;  %3009 = vst.msk [vmem:[%s4599_s19 + $0x10] sm:$0xff] %vm863_vm1, %v2746_v10  ;;  %v2466_v15 = vpop.permute.xlu1 %2465 }
 0x2d9   : > { %v2839_v41 = vadd.f32 %v2838_v32, %v2837_v31  ;;  %2555 = vst.msk [vmem:[#allocation3 + $0x38] sm:$0xff] %vm2547_vm10, %v2466_v15  ;;  %v2593_v53 = vld [vmem:[#allocation3 + $0x68] sm:$0xff] }
 0x2da   : > { %v2939_v34 = vsel %vm863_vm1, %v2906_v16, 0.0  ;;  %3247 = vmatmul.msk.f32.gmra.mxu1 %vm2625_vm11, %v2593_v53 }
 0x2db   : > { %v2940_v12 = vadd.f32 %v2939_v34, %v2938_v11 }
 0x2dc   : > { %v2763_v17 = vpop.f32.mrf.mxu1 }
 0x2dd   : > { %v4632_v18 = vadd.f32 %v4592_v49, %v2763_v17 }
 0x2de   : > { %v2299_v19 = vpop.permute.xlu0 %2298 }
 0x2df   : > { %3015 = vst.msk [vmem:[%s4599_s19 + $0x40] sm:$0xff] %vm863_vm1, %v4632_v18  ;;  %v2480_v37 = vpop.permute.xlu2 %2479 }
 0x2e0   : > { %2375 = vst.msk [vmem:[#allocation3 + $0xa0] sm:$0xff] %vm2354_vm9, %v2299_v19  ;;  %v2311_v25 = vpop.permute.xlu1 %2310  ;;  %v2587_v2 = vld [vmem:[#allocation3 + $0x38] sm:$0xff] }
 0x2e1   : > { %2568 = vst.msk [vmem:[#allocation3 + $0xa0] sm:$0xff] %vm2547_vm10, %v2492_v26  ;;  %3241 = vmatmul.msk.f32.gmra.mxu0 %vm2625_vm11, %v2587_v2 }
 0x2e2   : > { %2381 = vst.msk [vmem:[#allocation3 + $0xd0] sm:$0xff] %vm2354_vm9, %v2311_v25 }
 0x2e6   : > { %v2504_v50 = vpop.permute.xlu0 %2503 }
 0x2e7   : > { %2574 = vst.msk [vmem:[#allocation3 + $0xd0] sm:$0xff] %vm2547_vm10, %v2504_v50  ;;  %v2494_v63 = vpop.permute.xlu2 %2493 }
 0x2e8   : > { %v2094_v39 = vpop.permute.xlu1 %2093  ;;  %v2600_v20 = vld [vmem:[#allocation3 + $0xa0] sm:$0xff] }
 0x2e9   : > { %2176 = vst.msk [vmem:[#allocation3 + $0x70] sm:$0xff] %vm2161_vm8, %v2094_v39  ;;  %3254 = vmatmul.msk.f32.gmra.mxu2 %vm2625_vm11, %v2600_v20 }
 0x2ea   : > { %2369 = vst.msk [vmem:[#allocation3 + $0x70] sm:$0xff] %vm2354_vm9, %v2287_v28 }
 0x2eb   : > { %2562 = vst.msk [vmem:[#allocation3 + $0x70] sm:$0xff] %vm2547_vm10, %v2480_v37 }
 0x2ec   : > { %v2748_v22 = vpop.f32.mrf.mxu0 }
 0x2ed   : > { %v2749_v21 = vadd.f32 %v4592_v49, %v2748_v22 }
 0x2ee   : > { %v2108_v23 = vpop.permute.xlu0 %2107  ;;  %v2606_v24 = vld [vmem:[#allocation3 + $0xd0] sm:$0xff]  ;;  %v2766_v9 = vpop.f32.mrf.mxu1 }
 0x2ef   : > { %v2840_v27 = vsel %vm863_vm1, %v2749_v21, 0.0  ;;  %v2907_v14 = vmul.f32 %v2749_v21, %v2749_v21  ;;  %3010 = vst.msk [vmem:[%s4599_s19 + $0x18] sm:$0xff] %vm863_vm1, %v2749_v21  ;;  %3260 = vmatmul.msk.f32.gmra.mxu3 %vm2625_vm11, %v2606_v24  ;;  %v4652_v30 = vadd.f32 %v4592_v49, %v2766_v9  ;;  %v2289_v33 = vpop.permute.xlu2 %2288 }
 0x2f0   : > { %v2841_v35 = vadd.f32 %v2840_v27, %v2839_v41  ;;  %2183 = vst.msk [vmem:[#allocation3 + $0xa8] sm:$0xff] %vm2161_vm8, %v2108_v23  ;;  %v2120_v36 = vpop.permute.xlu1 %2119 }
 0x2f1   : > { %v2941_v48 = vsel %vm863_vm1, %v2907_v14, 0.0  ;;  %2189 = vst.msk [vmem:[#allocation3 + $0xd8] sm:$0xff] %vm2161_vm8, %v2120_v36 }
 0x2f2   : > { %v2942_v46 = vadd.f32 %v2941_v48, %v2940_v12  ;;  %v2594_v54 = vld [vmem:[#allocation3 + $0x70] sm:$0xff]  ;;  %3016 = vst.msk [vmem:[%s4599_s19 + $0x48] sm:$0xff] %vm863_vm1, %v4652_v30 }
 0x2f3   : > { %3248 = vmatmul.msk.f32.gmra.mxu1 %vm2625_vm11, %v2594_v54 }
 0x2f6   : > { %v2301_v40 = vpop.permute.xlu0 %2300 }
 0x2f7   : > { %2376 = vst.msk [vmem:[#allocation3 + $0xa8] sm:$0xff] %vm2354_vm9, %v2301_v40  ;;  %v2482_v42 = vpop.permute.xlu2 %2481 }
 0x2f8   : > { %2569 = vst.msk [vmem:[#allocation3 + $0xa8] sm:$0xff] %vm2547_vm10, %v2494_v63  ;;  %v2313_v43 = vpop.permute.xlu1 %2312 }
 0x2f9   : > { %2382 = vst.msk [vmem:[#allocation3 + $0xd8] sm:$0xff] %vm2354_vm9, %v2313_v43 }
 0x2fa   : > { %v2787_v47 = vpop.f32.mrf.mxu2 }
 0x2fb   : > { %v4665_v51 = vadd.f32 %v4592_v49, %v2787_v47 }
 0x2fd   : > { %3023 = vst.msk [vmem:[%s4599_s19 + $0x80] sm:$0xff] %vm863_vm1, %v4665_v51 }
 0x2fe   : > { %v2506_v56 = vpop.permute.xlu0 %2505 }
 0x2ff   : > { %2575 = vst.msk [vmem:[#allocation3 + $0xd8] sm:$0xff] %vm2547_vm10, %v2506_v56  ;;  %v2601_v58 = vld [vmem:[#allocation3 + $0xa8] sm:$0xff]  ;;  %v2496_v62 = vpop.permute.xlu2 %2495 }
 0x300   : > { %v2096_v44 = vpop.permute.xlu1 %2095  ;;  %3255 = vmatmul.msk.f32.gmra.mxu2 %vm2625_vm11, %v2601_v58 }
 0x301   : > { %2177 = vst.msk [vmem:[#allocation3 + $0x78] sm:$0xff] %vm2161_vm8, %v2096_v44 }
 0x302   : > { %2370 = vst.msk [vmem:[#allocation3 + $0x78] sm:$0xff] %vm2354_vm9, %v2289_v33 }
 0x303   : > { %2563 = vst.msk [vmem:[#allocation3 + $0x78] sm:$0xff] %vm2547_vm10, %v2482_v42 }
 0x304   : > { %v2751_v61 = vpop.f32.mrf.mxu0 }
 0x305   : > { %v2752_v7 = vadd.f32 %v4592_v49, %v2751_v61 }
 0x306   : > { %v2110_v38 = vpop.permute.xlu0 %2109  ;;  %v2607_v4 = vld [vmem:[#allocation3 + $0xd8] sm:$0xff]  ;;  %v2769_v0 = vpop.f32.mrf.mxu1 }
 0x307   : > { %v2842_v52 = vsel %vm863_vm1, %v2752_v7, 0.0  ;;  %v2908_v1 = vmul.f32 %v2752_v7, %v2752_v7  ;;  %3011 = vst.msk [vmem:[%s4599_s19 + $0x20] sm:$0xff] %vm863_vm1, %v2752_v7  ;;  %3261 = vmatmul.msk.f32.gmra.mxu3 %vm2625_vm11, %v2607_v4  ;;  %v4681_v29 = vadd.f32 %v4592_v49, %v2769_v0  ;;  %v2112_v6 = vpop.permute.xlu2 %2111 }
 0x308   : > { %v2843_v60 = vadd.f32 %v2842_v52, %v2841_v35  ;;  %2184 = vst.msk [vmem:[#allocation3 + $0xb0] sm:$0xff] %vm2161_vm8, %v2110_v38  ;;  %v2122_v45 = vpop.permute.xlu1 %2121 }
 0x309   : > { %v2943_v59 = vsel %vm863_vm1, %v2908_v1, 0.0  ;;  %3017 = vst.msk [vmem:[%s4599_s19 + $0x50] sm:$0xff] %vm863_vm1, %v4681_v29 }
 0x30a   : > { %v2944_v55 = vadd.f32 %v2943_v59, %v2942_v46  ;;  %v2595_v26 = vld [vmem:[#allocation3 + $0x78] sm:$0xff]  ;;  %2190 = vst.msk [vmem:[#allocation3 + $0xe0] sm:$0xff] %vm2161_vm8, %v2122_v45  ;;  %v2912_v45 = vmul.f32 %v4632_v18, %v4632_v18 }
 0x30b   : > { %3249 = vmatmul.msk.f32.gmra.mxu1 %vm2625_vm11, %v2595_v26  ;;  %2185 = vst.msk [vmem:[#allocation3 + $0xb8] sm:$0xff] %vm2161_vm8, %v2112_v6 }
 0x30e   : > { %v2303_v31 = vpop.permute.xlu0 %2302 }
 0x30f   : > { %2377 = vst.msk [vmem:[#allocation3 + $0xb0] sm:$0xff] %vm2354_vm9, %v2303_v31  ;;  %v2317_v5 = vpop.permute.xlu2 %2316  ;;  %v2850_v31 = vsel %vm863_vm1, %v4632_v18, 0.0  ;;  %v2854_v18 = vsel %vm863_vm1, %v4681_v29, 0.0 }
 0x310   : > { %2570 = vst.msk [vmem:[#allocation3 + $0xb0] sm:$0xff] %vm2547_vm10, %v2496_v62  ;;  %v2315_v8 = vpop.permute.xlu1 %2314 }
 0x311   : > { %2383 = vst.msk [vmem:[#allocation3 + $0xe0] sm:$0xff] %vm2354_vm9, %v2315_v8 }
 0x312   : > { %v2790_v57 = vpop.f32.mrf.mxu2 }
 0x313   : > { %v4695_v11 = vadd.f32 %v4592_v49, %v2790_v57 }
 0x315   : > { %3024 = vst.msk [vmem:[%s4599_s19 + $0x88] sm:$0xff] %vm863_vm1, %v4695_v11 }
 0x316   : > { %v2508_v3 = vpop.permute.xlu0 %2507 }
 0x317   : > { %2576 = vst.msk [vmem:[#allocation3 + $0xe0] sm:$0xff] %vm2547_vm10, %v2508_v3  ;;  %v2602_v10 = vld [vmem:[#allocation3 + $0xb0] sm:$0xff]  ;;  %v2772_v13 = vpop.f32.mrf.mxu1  ;;  %v1932_v28 = vpop.permute.xlu2 %1931 }
 0x318   : > { %3256 = vmatmul.msk.f32.gmra.mxu2 %vm2625_vm11, %v2602_v10  ;;  %v1930_v32 = vpop.permute.xlu1 %1929  ;;  %v4703_v16 = vadd.f32 %v4592_v49, %v2772_v13  ;;  %1998 = vst.msk [vmem:[#allocation3 + $0xf0] sm:$0xff] %vm1967_vm7, %v1932_v28  ;;  %v2951_v10 = vsel %vm863_vm1, %v2912_v45, 0.0  ;;  %v2852_v13 = vsel %vm863_vm1, %v4652_v30, 0.0  ;;  %v2914_v28 = vmul.f32 %v4681_v29, %v4681_v29 }
 0x319   : > { %1997 = vst.msk [vmem:[#allocation3 + $0xe8] sm:$0xff] %vm1967_vm7, %v1930_v32  ;;  %v2921_v45 = vmul.f32 %v4695_v11, %v4695_v11 }
 0x31a   : > { %3018 = vst.msk [vmem:[%s4599_s19 + $0x58] sm:$0xff] %vm863_vm1, %v4703_v16 }
 0x31e   : > { %v2754_v15 = vpop.f32.mrf.mxu0  ;;  %v2124_v41 = vpop.permute.xlu0 %2123  ;;  %v2608_v53 = vld [vmem:[#allocation3 + $0xe0] sm:$0xff] }
 0x31f   : > { %v2755_v34 = vadd.f32 %v4592_v49, %v2754_v15  ;;  %2191 = vst.msk [vmem:[#allocation3 + $0xe8] sm:$0xff] %vm2161_vm8, %v2124_v41  ;;  %3262 = vmatmul.msk.f32.gmra.mxu3 %vm2625_vm11, %v2608_v53  ;;  %v2512_v22 = vpop.permute.xlu2 %2511  ;;  %v2915_v53 = vmul.f32 %v4703_v16, %v4703_v16 }
 0x320   : > { %v2305_v12 = vpop.permute.xlu1 %2304  ;;  %2384 = vst.msk [vmem:[#allocation3 + $0xe8] sm:$0xff] %vm2354_vm9, %v2317_v5  ;;  %v2913_v5 = vmul.f32 %v4652_v30, %v4652_v30  ;;  %v2856_v30 = vsel %vm863_vm1, %v4703_v16, 0.0 }
 0x321   : > { %v2844_v17 = vsel %vm863_vm1, %v2755_v34, 0.0  ;;  %v2909_v19 = vmul.f32 %v2755_v34, %v2755_v34  ;;  %3012 = vst.msk [vmem:[%s4599_s19 + $0x28] sm:$0xff] %vm863_vm1, %v2755_v34 }
 0x322   : > { %v2845_v37 = vadd.f32 %v2844_v17, %v2843_v60  ;;  %2378 = vst.msk [vmem:[#allocation3 + $0xb8] sm:$0xff] %vm2354_vm9, %v2305_v12  ;;  %v2953_v41 = vsel %vm863_vm1, %v2913_v5, 0.0  ;;  %v2955_v17 = vsel %vm863_vm1, %v2914_v28, 0.0  ;;  %v2868_v5 = vsel %vm863_vm1, %v4695_v11, 0.0 }
 0x323   : > { %v2945_v25 = vsel %vm863_vm1, %v2909_v19, 0.0 }
 0x324   : > { %v2946_v2 = vadd.f32 %v2945_v25, %v2944_v55 }
 0x326   : > { %v2498_v50 = vpop.permute.xlu0 %2497 }
 0x327   : > { %2571 = vst.msk [vmem:[#allocation3 + $0xb8] sm:$0xff] %vm2547_vm10, %v2498_v50  ;;  %v2321_v35 = vpop.permute.xlu2 %2320 }
 0x328   : > { %v2510_v63 = vpop.permute.xlu1 %2509 }
 0x329   : > { %2577 = vst.msk [vmem:[#allocation3 + $0xe8] sm:$0xff] %vm2547_vm10, %v2510_v63 }
 0x32b   : > { %v2793_v39 = vpop.f32.mrf.mxu2 }
 0x32c   : > { %v4722_v20 = vadd.f32 %v4592_v49, %v2793_v39 }
 0x32e   : > { %v2126_v21 = vpop.permute.xlu0 %2125  ;;  %v2603_v23 = vld [vmem:[#allocation3 + $0xb8] sm:$0xff]  ;;  %3025 = vst.msk [vmem:[%s4599_s19 + $0x90] sm:$0xff] %vm863_vm1, %v4722_v20 }
 0x32f   : > { %2192 = vst.msk [vmem:[#allocation3 + $0xf0] sm:$0xff] %vm2161_vm8, %v2126_v21  ;;  %3257 = vmatmul.msk.f32.gmra.mxu2 %vm2625_vm11, %v2603_v23 }
 0x330   : > { %v2319_v24 = vpop.permute.xlu1 %2318  ;;  %v2609_v9 = vld [vmem:[#allocation3 + $0xe8] sm:$0xff] }
 0x331   : > { %2385 = vst.msk [vmem:[#allocation3 + $0xf0] sm:$0xff] %vm2354_vm9, %v2319_v24  ;;  %3263 = vmatmul.msk.f32.gmra.mxu3 %vm2625_vm11, %v2609_v9 }
 0x332   : > { %v2811_v27 = vpop.f32.mrf.mxu3  ;;  %2578 = vst.msk [vmem:[#allocation3 + $0xf0] sm:$0xff] %vm2547_vm10, %v2512_v22 }
 0x333   : > { %v4733_v14 = vadd.f32 %v4592_v49, %v2811_v27 }
 0x335   : > { %3031 = vst.msk [vmem:[%s4599_s19 + $0xc0] sm:$0xff] %vm863_vm1, %v4733_v14 }
 0x336   : > { %v1934_v33 = vpop.permute.xlu0 %1933 }
 0x337   : > { %1999 = vst.msk [vmem:[#allocation3 + $0xf8] sm:$0xff] %vm1967_vm7, %v1934_v33  ;;  %v2775_v36 = vpop.f32.mrf.mxu1 }
 0x338   : > { %v2128_v48 = vpop.permute.xlu1 %2127  ;;  %v2776_v46 = vadd.f32 %v4592_v49, %v2775_v36 }
 0x339   : > { %2193 = vst.msk [vmem:[#allocation3 + $0xf8] sm:$0xff] %vm2161_vm8, %v2128_v48  ;;  %v2610_v54 = vld [vmem:[#allocation3 + $0xf0] sm:$0xff] }
 0x33a   : > { %2386 = vst.msk [vmem:[#allocation3 + $0xf8] sm:$0xff] %vm2354_vm9, %v2321_v35  ;;  %3264 = vmatmul.msk.f32.gmra.mxu3 %vm2625_vm11, %v2610_v54  ;;  %v2916_v19 = vmul.f32 %v2776_v46, %v2776_v46  ;;  %v2858_v50 = vsel %vm863_vm1, %v2776_v46, 0.0 }
 0x33b   : > { %3019 = vst.msk [vmem:[%s4599_s19 + $0x60] sm:$0xff] %vm863_vm1, %v2776_v46 }
 0x33c   : > { %v2959_v21 = vsel %vm863_vm1, %v2916_v19, 0.0 }
 0x33e   : > { %v2757_v40 = vpop.f32.mrf.mxu0  ;;  %v2514_v42 = vpop.permute.xlu0 %2513 }
 0x33f   : > { %v2758_v43 = vadd.f32 %v4592_v49, %v2757_v40  ;;  %2579 = vst.msk [vmem:[#allocation3 + $0xf8] sm:$0xff] %vm2547_vm10, %v2514_v42 }
 0x341   : > { %v2846_v47 = vsel %vm863_vm1, %v2758_v43, 0.0  ;;  %v2910_v56 = vmul.f32 %v2758_v43, %v2758_v43  ;;  %3013 = vst.msk [vmem:[%s4599_s19 + $0x30] sm:$0xff] %vm863_vm1, %v2758_v43 }
 0x342   : > { %v2847_v58 = vadd.f32 %v2846_v47, %v2845_v37 }
 0x343   : > { %v2947_v62 = vsel %vm863_vm1, %v2910_v56, 0.0 }
 0x344   : > { %v2948_v44 = vadd.f32 %v2947_v62, %v2946_v2  ;;  %v2957_v2 = vsel %vm863_vm1, %v2915_v53, 0.0 }
 0x346   : > { %v2611_v61 = vld [vmem:[#allocation3 + $0xf8] sm:$0xff] }
 0x347   : > { %3265 = vmatmul.msk.f32.gmra.mxu3 %vm2625_vm11, %v2611_v61  ;;  %v2920_v61 = vmul.f32 %v4665_v51, %v4665_v51 }
 0x34b   : > { %v2796_v7 = vpop.f32.mrf.mxu2 }
 0x34c   : > { %v4753_v38 = vadd.f32 %v4592_v49, %v2796_v7 }
 0x34e   : > { %3026 = vst.msk [vmem:[%s4599_s19 + $0x98] sm:$0xff] %vm863_vm1, %v4753_v38  ;;  %v2872_v11 = vsel %vm863_vm1, %v4753_v38, 0.0 }
 0x353   : > { %v2814_v4 = vpop.f32.mrf.mxu3 }
 0x354   : > { %v4759_v0 = vadd.f32 %v4592_v49, %v2814_v4 }
 0x356   : > { %3032 = vst.msk [vmem:[%s4599_s19 + $0xc8] sm:$0xff] %vm863_vm1, %v4759_v0 }
 0x357   : > { %v2778_v52 = vpop.f32.mrf.mxu1 }
 0x358   : > { %v2779_v1 = vadd.f32 %v4592_v49, %v2778_v52 }
 0x35a   : > { %3020 = vst.msk [vmem:[%s4599_s19 + $0x68] sm:$0xff] %vm863_vm1, %v2779_v1  ;;  %v2917_v29 = vmul.f32 %v2779_v1, %v2779_v1  ;;  %v2860_v23 = vsel %vm863_vm1, %v2779_v1, 0.0 }
 0x35c   : > { %v2961_v27 = vsel %vm863_vm1, %v2917_v29, 0.0 }
 0x35e   : > { %v2760_v6 = vpop.f32.mrf.mxu0 }
 0x35f   : > { %v2761_v60 = vadd.f32 %v4592_v49, %v2760_v6 }
 0x361   : > { %v2848_v59 = vsel %vm863_vm1, %v2761_v60, 0.0  ;;  %v2911_v55 = vmul.f32 %v2761_v60, %v2761_v60  ;;  %3014 = vst.msk [vmem:[%s4599_s19 + $0x38] sm:$0xff] %vm863_vm1, %v2761_v60  ;;  %v2866_v60 = vsel %vm863_vm1, %v4665_v51, 0.0 }
 0x362   : > { %v2849_v26 = vadd.f32 %v2848_v59, %v2847_v58 }
 0x363   : > { %v2949_v8 = vsel %vm863_vm1, %v2911_v55, 0.0 }
 0x364   : > { %v2851_v57 = vadd.f32 %v2850_v31, %v2849_v26  ;;  %v2950_v3 = vadd.f32 %v2949_v8, %v2948_v44  ;;  %v2967_v31 = vsel %vm863_vm1, %v2920_v61, 0.0  ;;  %v2922_v8 = vmul.f32 %v4722_v20, %v4722_v20 }
 0x365   : > { %v2884_v61 = vsel %vm863_vm1, %v4759_v0, 0.0 }
 0x366   : > { %v2853_v32 = vadd.f32 %v2852_v13, %v2851_v57  ;;  %v2952_v15 = vadd.f32 %v2951_v10, %v2950_v3  ;;  %v2969_v3 = vsel %vm863_vm1, %v2921_v45, 0.0  ;;  %v2870_v10 = vsel %vm863_vm1, %v4722_v20, 0.0 }
 0x367   : > { %v2923_v13 = vmul.f32 %v4753_v38, %v4753_v38 }
 0x368   : > { %v2954_v34 = vadd.f32 %v2953_v41, %v2952_v15  ;;  %v2855_v12 = vadd.f32 %v2854_v18, %v2853_v32  ;;  %v2971_v15 = vsel %vm863_vm1, %v2922_v8, 0.0 }
 0x36a   : > { %v2857_v37 = vadd.f32 %v2856_v30, %v2855_v12  ;;  %v2956_v25 = vadd.f32 %v2955_v17, %v2954_v34  ;;  %v2973_v34 = vsel %vm863_vm1, %v2923_v13, 0.0 }
 0x36c   : > { %v2859_v63 = vadd.f32 %v2858_v50, %v2857_v37  ;;  %v2958_v39 = vadd.f32 %v2957_v2, %v2956_v25  ;;  %v2799_v22 = vpop.f32.mrf.mxu2 }
 0x36d   : > { %v2800_v16 = vadd.f32 %v4592_v49, %v2799_v22 }
 0x36e   : > { %v2861_v24 = vadd.f32 %v2860_v23, %v2859_v63  ;;  %v2960_v9 = vadd.f32 %v2959_v21, %v2958_v39 }
 0x36f   : > { %3027 = vst.msk [vmem:[%s4599_s19 + $0xa0] sm:$0xff] %vm863_vm1, %v2800_v16  ;;  %v2924_v41 = vmul.f32 %v2800_v16, %v2800_v16  ;;  %v2874_v12 = vsel %vm863_vm1, %v2800_v16, 0.0 }
 0x370   : > { %v2962_v33 = vadd.f32 %v2961_v27, %v2960_v9  ;;  %v2781_v35 = vpop.f32.mrf.mxu1 }
 0x371   : > { %v2782_v36 = vadd.f32 %v4592_v49, %v2781_v35  ;;  %v2975_v30 = vsel %vm863_vm1, %v2924_v41, 0.0  ;;  %v2928_v35 = vmul.f32 %v4733_v14, %v4733_v14 }
 0x372   : > { %v2817_v48 = vpop.f32.mrf.mxu3 }
 0x373   : > { %3021 = vst.msk [vmem:[%s4599_s19 + $0x70] sm:$0xff] %vm863_vm1, %v2782_v36  ;;  %v4803_v46 = vadd.f32 %v4592_v49, %v2817_v48  ;;  %v2918_v42 = vmul.f32 %v2782_v36, %v2782_v36  ;;  %v2862_v43 = vsel %vm863_vm1, %v2782_v36, 0.0 }
 0x374   : > { %v2863_v62 = vadd.f32 %v2862_v43, %v2861_v24  ;;  %v2882_v43 = vsel %vm863_vm1, %v4733_v14, 0.0 }
 0x375   : > { %3033 = vst.msk [vmem:[%s4599_s19 + $0xd0] sm:$0xff] %vm863_vm1, %v4803_v46  ;;  %v2963_v56 = vsel %vm863_vm1, %v2918_v42, 0.0 }
 0x376   : > { %v2964_v1 = vadd.f32 %v2963_v56, %v2962_v33 }
 0x383   : > { %v2802_v54 = vpop.f32.mrf.mxu2 }
 0x384   : > { %v2803_v40 = vadd.f32 %v4592_v49, %v2802_v54 }
 0x386   : > { %3028 = vst.msk [vmem:[%s4599_s19 + $0xa8] sm:$0xff] %vm863_vm1, %v2803_v40  ;;  %v2925_v50 = vmul.f32 %v2803_v40, %v2803_v40  ;;  %v2876_v63 = vsel %vm863_vm1, %v2803_v40, 0.0 }
 0x388   : > { %v2784_v47 = vpop.f32.mrf.mxu1  ;;  %v2977_v23 = vsel %vm863_vm1, %v2925_v50, 0.0 }
 0x389   : > { %v2785_v58 = vadd.f32 %v4592_v49, %v2784_v47  ;;  %v2929_v47 = vmul.f32 %v4759_v0, %v4759_v0 }
 0x38a   : > { %v2820_v44 = vpop.f32.mrf.mxu3 }
 0x38b   : > { %v2864_v7 = vsel %vm863_vm1, %v2785_v58, 0.0  ;;  %v2919_v4 = vmul.f32 %v2785_v58, %v2785_v58  ;;  %3022 = vst.msk [vmem:[%s4599_s19 + $0x78] sm:$0xff] %vm863_vm1, %v2785_v58  ;;  %v4820_v52 = vadd.f32 %v4592_v49, %v2820_v44  ;;  %v2983_v44 = vsel %vm863_vm1, %v2928_v35, 0.0 }
 0x38c   : > { %v2865_v6 = vadd.f32 %v2864_v7, %v2863_v62  ;;  %v2930_v7 = vmul.f32 %v4803_v46, %v4803_v46 }
 0x38d   : > { %v2965_v59 = vsel %vm863_vm1, %v2919_v4, 0.0  ;;  %3034 = vst.msk [vmem:[%s4599_s19 + $0xd8] sm:$0xff] %vm863_vm1, %v4820_v52 }
 0x38e   : > { %v2867_v55 = vadd.f32 %v2866_v60, %v2865_v6  ;;  %v2966_v26 = vadd.f32 %v2965_v59, %v2964_v1  ;;  %v2985_v1 = vsel %vm863_vm1, %v2929_v47, 0.0  ;;  %v2886_v6 = vsel %vm863_vm1, %v4803_v46, 0.0 }
 0x38f   : > { %v2987_v59 = vsel %vm863_vm1, %v2930_v7, 0.0 }
 0x390   : > { %v2869_v57 = vadd.f32 %v2868_v5, %v2867_v55  ;;  %v2968_v51 = vadd.f32 %v2967_v31, %v2966_v26  ;;  %v2931_v55 = vmul.f32 %v4820_v52, %v4820_v52  ;;  %v2888_v5 = vsel %vm863_vm1, %v4820_v52, 0.0 }
 0x392   : > { %v2970_v28 = vadd.f32 %v2969_v3, %v2968_v51  ;;  %v2871_v32 = vadd.f32 %v2870_v10, %v2869_v57  ;;  %v2989_v57 = vsel %vm863_vm1, %v2931_v55, 0.0 }
 0x394   : > { %v2873_v18 = vadd.f32 %v2872_v11, %v2871_v32  ;;  %v2972_v53 = vadd.f32 %v2971_v15, %v2970_v28 }
 0x396   : > { %v2875_v20 = vadd.f32 %v2874_v12, %v2873_v18  ;;  %v2974_v17 = vadd.f32 %v2973_v34, %v2972_v53 }
 0x398   : > { %v2976_v19 = vadd.f32 %v2975_v30, %v2974_v17  ;;  %v2877_v22 = vadd.f32 %v2876_v63, %v2875_v20 }
 0x39a   : > { %v2978_v9 = vadd.f32 %v2977_v23, %v2976_v19 }
 0x39b   : > { %v2805_v37 = vpop.f32.mrf.mxu2 }
 0x39c   : > { %v2806_v25 = vadd.f32 %v4592_v49, %v2805_v37 }
 0x39e   : > { %3029 = vst.msk [vmem:[%s4599_s19 + $0xb0] sm:$0xff] %vm863_vm1, %v2806_v25  ;;  %v2926_v29 = vmul.f32 %v2806_v25, %v2806_v25  ;;  %v2878_v39 = vsel %vm863_vm1, %v2806_v25, 0.0 }
 0x39f   : > { %v2879_v27 = vadd.f32 %v2878_v39, %v2877_v22 }
 0x3a0   : > { %v2979_v16 = vsel %vm863_vm1, %v2926_v29, 0.0 }
 0x3a1   : > { %v2980_v40 = vadd.f32 %v2979_v16, %v2978_v9 }
 0x3a2   : > { %v2823_v2 = vpop.f32.mrf.mxu3 }
 0x3a3   : > { %v2824_v38 = vadd.f32 %v4592_v49, %v2823_v2 }
 0x3a5   : > { %3035 = vst.msk [vmem:[%s4599_s19 + $0xe0] sm:$0xff] %vm863_vm1, %v2824_v38  ;;  %v2932_v46 = vmul.f32 %v2824_v38, %v2824_v38  ;;  %v2890_v3 = vsel %vm863_vm1, %v2824_v38, 0.0 }
 0x3a7   : > { %v2991_v13 = vsel %vm863_vm1, %v2932_v46, 0.0 }
 0x3b2   : > { %v2808_v21 = vpop.f32.mrf.mxu2 }
 0x3b3   : > { %v2809_v24 = vadd.f32 %v4592_v49, %v2808_v21 }
 0x3b4   : > { %v2826_v33 = vpop.f32.mrf.mxu3 }
 0x3b5   : > { %v2880_v36 = vsel %vm863_vm1, %v2809_v24, 0.0  ;;  %v2927_v48 = vmul.f32 %v2809_v24, %v2809_v24  ;;  %3030 = vst.msk [vmem:[%s4599_s19 + $0xb8] sm:$0xff] %vm863_vm1, %v2809_v24  ;;  %v2827_v54 = vadd.f32 %v4592_v49, %v2826_v33 }
 0x3b6   : > { %v2881_v42 = vadd.f32 %v2880_v36, %v2879_v27 }
 0x3b7   : > { %v2981_v56 = vsel %vm863_vm1, %v2927_v48, 0.0  ;;  %3036 = vst.msk [vmem:[%s4599_s19 + $0xe8] sm:$0xff] %vm863_vm1, %v2827_v54  ;;  %v2933_v28 = vmul.f32 %v2827_v54, %v2827_v54  ;;  %v2892_v15 = vsel %vm863_vm1, %v2827_v54, 0.0 }
 0x3b8   : > { %v2883_v58 = vadd.f32 %v2882_v43, %v2881_v42  ;;  %v2982_v62 = vadd.f32 %v2981_v56, %v2980_v40 }
 0x3b9   : > { %v2993_v52 = vsel %vm863_vm1, %v2933_v28, 0.0 }
 0x3ba   : > { %v2885_v4 = vadd.f32 %v2884_v61, %v2883_v58  ;;  %v2984_v14 = vadd.f32 %v2983_v44, %v2982_v62 }
 0x3bc   : > { %v2986_v60 = vadd.f32 %v2985_v1, %v2984_v14  ;;  %v2887_v45 = vadd.f32 %v2886_v6, %v2885_v4 }
 0x3bd   : > { %v2829_v26 = vpop.f32.mrf.mxu3 }
 0x3be   : > { %v2988_v31 = vadd.f32 %v2987_v59, %v2986_v60  ;;  %v2830_v0 = vadd.f32 %v4592_v49, %v2829_v26  ;;  %v2889_v8 = vadd.f32 %v2888_v5, %v2887_v45 }
 0x3c0   : > { %3037 = vst.msk [vmem:[%s4599_s19 + $0xf0] sm:$0xff] %vm863_vm1, %v2830_v0  ;;  %v2990_v51 = vadd.f32 %v2989_v57, %v2988_v31  ;;  %v2891_v10 = vadd.f32 %v2890_v3, %v2889_v8  ;;  %v2934_v11 = vmul.f32 %v2830_v0, %v2830_v0  ;;  %v2894_v18 = vsel %vm863_vm1, %v2830_v0, 0.0 }
 0x3c2   : > { %v2992_v32 = vadd.f32 %v2991_v13, %v2990_v51  ;;  %v2893_v41 = vadd.f32 %v2892_v15, %v2891_v10  ;;  %v2995_v12 = vsel %vm863_vm1, %v2934_v11, 0.0 }
 0x3c4   : > { %v2994_v53 = vadd.f32 %v2993_v52, %v2992_v32  ;;  %v2895_v17 = vadd.f32 %v2894_v18, %v2893_v41 }
 0x3c6   : > { %v2996_v37 = vadd.f32 %v2995_v12, %v2994_v53 }
 0x3ca   : > { %v2832_v34 = vpop.f32.mrf.mxu3 }
 0x3cb   : > { %v2833_v20 = vadd.f32 %v4592_v49, %v2832_v34 }
 0x3cd   : > { %v2896_v30 = vsel %vm863_vm1, %v2833_v20, 0.0  ;;  %v2935_v19 = vmul.f32 %v2833_v20, %v2833_v20  ;;  %3038 = vst.msk [vmem:[%s4599_s19 + $0xf8] sm:$0xff] %vm863_vm1, %v2833_v20 }
 0x3ce   : > { %v2897_v25 = vadd.f32 %v2896_v30, %v2895_v17 }
 0x3cf   : > { %v2997_v2 = vsel %vm863_vm1, %v2935_v19, 0.0 }
 0x3d0   : > { %v2898_v38 = vrot.slane %v2897_v25, 4  ;;  %v2998_v50 = vadd.f32 %v2997_v2, %v2996_v37 }
 0x3d2   : > { %v2899_v29 = vadd.f32 %v2898_v38, %v2897_v25  ;;  %v2999_v63 = vrot.slane %v2998_v50, 4 }
 0x3d4   : > { %v2900_v39 = vrot.slane %v2899_v29, 2  ;;  %v3000_v22 = vadd.f32 %v2999_v63, %v2998_v50 }
 0x3d6   : > { %v2901_v21 = vadd.f32 %v2900_v39, %v2899_v29  ;;  %v3001_v23 = vrot.slane %v3000_v22, 2 }
 0x3d8   : > { %v2902_v49 = vrot.slane %v2901_v21, 1  ;;  %v3002_v16 = vadd.f32 %v3001_v23, %v3000_v22 }
 0x3da   : > { %v3003_v24 = vrot.slane %v3002_v16, 1  ;;  %v2903_v9 = vadd.f32 %v2902_v49, %v2901_v21 }
 0x3dc   : > { %v3004_v27 = vadd.f32 %v3003_v24, %v3002_v16 }
 0x3de   : > { %v3005_v33 = vsel %vm701_vm0, %v2903_v9, %v3004_v27 }
 0x3df   : > { %3006 = vst.msk [vmem:[%s500_s13] sm:$0x3] %vm866_vm2, %v3005_v33 }
 0x3e0 PF: > { %s19_s29 = sadd.s32 1, %s3362_s29   ;;  %s4955_s27 = smov %s3358_s28 }
 0x3e1   : > { %p16_p5 = scmp.ge.s32.totalorder %s19_s29, 4   ;;  %s4956_s28 = smov %s4958_s30 }
 0x3e3   :  { %18 = sbr.rel (!%p16_p5) target bundleno = 2 (0x2), region = 101 }

</bundles_post_ra>
